<compile_context>
chip_gen: v5e
topology: v5e:2x2
jax: 0.10.0
libtpu: 0.0.40
codegen_flags: <defaults>
</compile_context>

<pallas_src>
import functools

import jax
import jax.numpy as jnp
from jax.experimental import pallas as pl
from jax.experimental.pallas import tpu as pltpu


def _softmax_last(x):
    """Numerically stable softmax along the last (lane) axis, exact divide."""
    m = jnp.max(x, axis=-1, keepdims=True)
    e = jnp.exp(x - m)
    return e / jnp.sum(e, axis=-1, keepdims=True)


# ---------------------------------------------------------------------------
# Fused kernel: one batch *block* per grid step, everything VMEM-resident.
# ---------------------------------------------------------------------------
def _attention_head_kernel(
        s1_ref, s2_ref,
        wf1_ref, bf1_ref, wf2_ref, bf2_ref,              # mlp_f  (E, E) x2
        wg1a_ref, wg1b_ref, bg1_ref, wg2_ref, bg2_ref,   # mlp_g  (wg1 pre-split)
        wh1a_ref, wh1b_ref, bh1_ref, wh2_ref, bh2_ref,   # mlp_h  (wh1 pre-split)
        wfin_ref, bfin_ref,                              # final linear (E, C)
        o_ref,
        *, dot_dtype):
    s1 = s1_ref[...].astype(jnp.float32)                 # (Bt, L1, E)
    s2 = s2_ref[...].astype(jnp.float32)                 # (Bt, L2, E)
    Bt, L1, E = s1.shape
    L2 = s2.shape[1]

    def cast(x):
        return x if dot_dtype is None else x.astype(dot_dtype)

    def mm(x, w_ref):
        # 2-D matmul: operands optionally cast to bf16, f32 accumulation on MXU.
        return jnp.dot(cast(x), cast(w_ref[...]),
                       preferred_element_type=jnp.float32)

    def bmm(eq, a, b):
        # Batched matmul over the Bt block; f32 accumulation on the MXU.
        return jnp.einsum(eq, cast(a), cast(b),
                          preferred_element_type=jnp.float32)

    # ---- mlp_f (token-wise) as fat-M (Bt*L, E) @ (E, E) matmuls -------------
    def mlp_f(x):
        h = jnp.maximum(mm(x, wf1_ref) + bf1_ref[...], 0.0)
        return jnp.maximum(mm(h, wf2_ref) + bf2_ref[...], 0.0)

    f1 = mlp_f(s1.reshape(Bt * L1, E)).reshape(Bt, L1, E)
    f2 = mlp_f(s2.reshape(Bt * L2, E)).reshape(Bt, L2, E)

    # ---- attend --------------------------------------------------------------
    # score[b, i, j] = f1[b, i] . f2[b, j]
    score = bmm("ble,bme->blm", f1, f2)                  # (Bt, L1, L2)
    p1 = _softmax_last(score)
    a1 = bmm("blm,bme->ble", p1, s2)                     # (Bt, L1, E)

    # Transposed score recomputed with a second (cheap) MXU dot so that the
    # second softmax is also a lane-axis reduction and a2 is a standard dot —
    # no sublane-axis reductions, no transposed-LHS contraction.
    score_t = bmm("bme,ble->bml", f2, f1)                # (Bt, L2, L1)
    p2 = _softmax_last(score_t)
    a2 = bmm("bml,ble->bme", p2, s1)                     # (Bt, L2, E)

    # ---- mlp_g on [sent ; a] (no concat: W1 pre-split) + sum over length -----
    def mlp_g_sum(sent, a, L):
        xs = sent.reshape(Bt * L, E)
        xa = a.reshape(Bt * L, E)
        h = jnp.maximum(mm(xs, wg1a_ref) + mm(xa, wg1b_ref) + bg1_ref[...], 0.0)
        y = jnp.maximum(mm(h, wg2_ref) + bg2_ref[...], 0.0)
        return jnp.sum(y.reshape(Bt, L, E), axis=1)      # (Bt, E)

    g1 = mlp_g_sum(s1, a1, L1)
    g2 = mlp_g_sum(s2, a2, L2)

    # ---- mlp_h on [g1 ; g2] (W1 pre-split) + final linear ---------------------
    h = jnp.maximum(mm(g1, wh1a_ref) + mm(g2, wh1b_ref) + bh1_ref[...], 0.0)
    h = jnp.maximum(mm(h, wh2_ref) + bh2_ref[...], 0.0)
    o_ref[...] = (mm(h, wfin_ref) + bfin_ref[...]).astype(o_ref.dtype)


def _pick_block_b(B):
    # <= 64 batch rows: single block (block == full dim, (8,128) rule is moot).
    # Larger: 64-row blocks (multiple of 8 -> sublane-dense output stores).
    # TODO(synk): at realistic L/E, size Bt against VMEM instead:
    #   2 bufs * Bt*(L1+L2)*E*bytes + weight residents must fit the scoped
    #   limit (v7x has 64 MiB physical vs 128 MiB on v5e/v6e).
    return B if B <= 64 else 64


def attention_head_forward(params, sent1, sent2, *, block_b=None, dot_dtype=None,
                           single_buffer_weights=True, vmem_limit_bytes=None):
    B, L1, E = sent1.shape
    L2 = sent2.shape[1]

    wf1, bf1, wf2, bf2 = params["mlp_f"]
    wg1, bg1, wg2, bg2 = params["mlp_g"]
    wh1, bh1, wh2, bh2 = params["mlp_h"]
    wfin, bfin = params["final"]
    C = wfin.shape[1]

    # Pre-split the (2E, E) first-layer weights so the kernel never slices a ref.
    wg1a, wg1b = wg1[:E], wg1[E:]
    wh1a, wh1b = wh1[:E], wh1[E:]

    # Optionally store weight *matrices* in the dot dtype (halves their DMA
    # bytes); biases stay f32 (added post-matmul in f32).
    def wcast(w):
        return w if dot_dtype is None else w.astype(dot_dtype)

    weights = (wcast(wf1), bf1, wcast(wf2), bf2,
               wcast(wg1a), wcast(wg1b), bg1, wcast(wg2), bg2,
               wcast(wh1a), wcast(wh1b), bh1, wcast(wh2), bh2,
               wcast(wfin), bfin)

    Bt = block_b if block_b is not None else _pick_block_b(B)
    Bt = min(Bt, B)
    if Bt != B and Bt % 8 != 0:          # keep (Bt, C) output blocks legal/dense
        Bt = max(8, (Bt // 8) * 8)
    grid = (pl.cdiv(B, Bt),)

    def weight_spec(a, single_buffer):
        nd = a.ndim
        idx = lambda b, _nd=nd: (0,) * _nd
        if single_buffer:
            # Constant index_map -> double buffering only wastes VMEM.
            return pl.BlockSpec(a.shape, idx, pipeline_mode=pl.Buffered(1))
        return pl.BlockSpec(a.shape, idx)

    def build(single_buffer):
        in_specs = [pl.BlockSpec((Bt, L1, E), lambda b: (b, 0, 0)),
                    pl.BlockSpec((Bt, L2, E), lambda b: (b, 0, 0))]
        in_specs += [weight_spec(w, single_buffer) for w in weights]
        cp_kwargs = dict(dimension_semantics=("parallel",))
        if vmem_limit_bytes is not None:
            cp_kwargs["vmem_limit_bytes"] = vmem_limit_bytes
        return pl.pallas_call(
            functools.partial(_attention_head_kernel, dot_dtype=dot_dtype),
            grid=grid,
            in_specs=in_specs,
            out_specs=pl.BlockSpec((Bt, C), lambda b: (b, 0)),
            out_shape=jax.ShapeDtypeStruct((B, C), sent1.dtype),
            compiler_params=pltpu.CompilerParams(**cp_kwargs),
        )

    args = (sent1, sent2, *weights)
    if single_buffer_weights:
        try:
            return build(True)(*args)
        except Exception:
            # Installed jax may not accept single-buffered pipeline_mode on the
            # top-level pallas_call pipeline; fall back to default buffering.
            pass
    return build(False)(*args)


# ---------------------------------------------------------------------------
# Pure-JAX reference (full-precision f32 matmuls) for correctness checking.
# ---------------------------------------------------------------------------
def reference_forward(params, sent1, sent2):
    hp = jax.lax.Precision.HIGHEST

    def mlp(x, w1, b1, w2, b2):
        h = jnp.maximum(jnp.dot(x, w1, precision=hp) + b1, 0.0)
        return jnp.maximum(jnp.dot(h, w2, precision=hp) + b2, 0.0)

    B, L1, E = sent1.shape
    L2 = sent2.shape[1]
    f1 = mlp(sent1.reshape(-1, E), *params["mlp_f"]).reshape(B, L1, E)
    f2 = mlp(sent2.reshape(-1, E), *params["mlp_f"]).reshape(B, L2, E)
    score1 = jnp.einsum("ble,bme->blm", f1, f2, precision=hp)
    prob1 = jax.nn.softmax(score1, axis=-1)
    prob2 = jax.nn.softmax(jnp.swapaxes(score1, 1, 2), axis=-1)
    c1 = jnp.concatenate(
        [sent1, jnp.einsum("blm,bme->ble", prob1, sent2, precision=hp)], axis=2)
    c2 = jnp.concatenate(
        [sent2, jnp.einsum("bml,ble->bme", prob2, sent1, precision=hp)], axis=2)
    g1 = mlp(c1.reshape(-1, 2 * E), *params["mlp_g"]).reshape(B, L1, E).sum(1)
    g2 = mlp(c2.reshape(-1, 2 * E), *params["mlp_g"]).reshape(B, L2, E).sum(1)
    h = mlp(jnp.concatenate([g1, g2], axis=1), *params["mlp_h"])
    wf, bf = params["final"]
    return jnp.dot(h, wf, precision=hp) + bf


def init_params(key, embed_size, class_size):
    E, C = embed_size, class_size
    ks = jax.random.split(key, 7)

    def lin(k, din, dout):
        kw, kb = jax.random.split(k)
        w = jax.random.normal(kw, (din, dout), jnp.float32) * (1.0 / jnp.sqrt(din))
        b = jax.random.normal(kb, (1, dout), jnp.float32) * 0.01
        return w, b

    return {
        "mlp_f": (*lin(ks[0], E, E), *lin(ks[1], E, E)),
        "mlp_g": (*lin(ks[2], 2 * E, E), *lin(ks[3], E, E)),
        "mlp_h": (*lin(ks[4], 2 * E, E), *lin(ks[5], E, E)),
        "final": lin(ks[6], E, C),
    }


if __name__ == "__main__":
    B, L1, L2, E, C = 16, 8, 16, 32, 5

    key = jax.random.PRNGKey(0)
    kp, k1, k2 = jax.random.split(key, 3)
    params = init_params(kp, E, C)
    sent1 = jax.random.normal(k1, (B, L1, E), jnp.float32)
    sent2 = jax.random.normal(k2, (B, L2, E), jnp.float32)

    ref = jax.block_until_ready(reference_forward(params, sent1, sent2))

    # f32 path (exact-divide softmax), batch-blocked: Bt=8 -> grid=(2,).
    out = jax.block_until_ready(
        attention_head_forward(params, sent1, sent2, block_b=8))
    assert out.shape == (B, C), out.shape
    assert jnp.allclose(out, ref, atol=5e-3, rtol=5e-3), (out, ref)

    # bf16-at-dot-boundaries path (v6e/v7x MXU fast path): loose sanity check —
    # only MXU operands are bf16, all elementwise math / accumulation stays f32.
    out_bf16 = jax.block_until_ready(
        attention_head_forward(params, sent1, sent2, block_b=8,
                               dot_dtype=jnp.bfloat16))
    assert out_bf16.shape == (B, C), out_bf16.shape
    assert bool(jnp.all(jnp.isfinite(out_bf16)))
    assert jnp.allclose(out_bf16, ref, atol=1.0, rtol=0.1), (out_bf16, ref)

    print("KERNEL_OK")
</pallas_src>

<mosaic_0001>
module attributes {stable_mosaic.version = 11 : i64} {
  func.func @_attention_head_kernel(%arg0: i32, %arg1: memref<8x8x32xf32, #tpu.memory_space<vmem>>, %arg2: memref<8x16x32xf32, #tpu.memory_space<vmem>>, %arg3: memref<32x32xf32, #tpu.memory_space<vmem>>, %arg4: memref<1x32xf32, #tpu.memory_space<vmem>>, %arg5: memref<32x32xf32, #tpu.memory_space<vmem>>, %arg6: memref<1x32xf32, #tpu.memory_space<vmem>>, %arg7: memref<32x32xf32, #tpu.memory_space<vmem>>, %arg8: memref<32x32xf32, #tpu.memory_space<vmem>>, %arg9: memref<1x32xf32, #tpu.memory_space<vmem>>, %arg10: memref<32x32xf32, #tpu.memory_space<vmem>>, %arg11: memref<1x32xf32, #tpu.memory_space<vmem>>, %arg12: memref<32x32xf32, #tpu.memory_space<vmem>>, %arg13: memref<32x32xf32, #tpu.memory_space<vmem>>, %arg14: memref<1x32xf32, #tpu.memory_space<vmem>>, %arg15: memref<32x32xf32, #tpu.memory_space<vmem>>, %arg16: memref<1x32xf32, #tpu.memory_space<vmem>>, %arg17: memref<32x5xf32, #tpu.memory_space<vmem>>, %arg18: memref<1x5xf32, #tpu.memory_space<vmem>>, %arg19: memref<8x5xf32, #tpu.memory_space<vmem>>) attributes {dimension_semantics = [#tpu.dimension_semantics<parallel>], iteration_bounds = array<i64: 2>, scalar_prefetch = 0 : i64, scratch_operands = 0 : i64, tpu.core_type = #tpu.core_type<tc>, window_params = [{transform_indices = @transform_0, window_bounds = array<i64: 8, 8, 32>}, {transform_indices = @transform_1, window_bounds = array<i64: 8, 16, 32>}, {pipeline_mode = #tpu.pipeline_mode<synchronous>, transform_indices = @transform_2, window_bounds = array<i64: 32, 32>}, {pipeline_mode = #tpu.pipeline_mode<synchronous>, transform_indices = @transform_3, window_bounds = array<i64: 1, 32>}, {pipeline_mode = #tpu.pipeline_mode<synchronous>, transform_indices = @transform_4, window_bounds = array<i64: 32, 32>}, {pipeline_mode = #tpu.pipeline_mode<synchronous>, transform_indices = @transform_5, window_bounds = array<i64: 1, 32>}, {pipeline_mode = #tpu.pipeline_mode<synchronous>, transform_indices = @transform_6, window_bounds = array<i64: 32, 32>}, {pipeline_mode = #tpu.pipeline_mode<synchronous>, transform_indices = @transform_7, window_bounds = array<i64: 32, 32>}, {pipeline_mode = #tpu.pipeline_mode<synchronous>, transform_indices = @transform_8, window_bounds = array<i64: 1, 32>}, {pipeline_mode = #tpu.pipeline_mode<synchronous>, transform_indices = @transform_9, window_bounds = array<i64: 32, 32>}, {pipeline_mode = #tpu.pipeline_mode<synchronous>, transform_indices = @transform_10, window_bounds = array<i64: 1, 32>}, {pipeline_mode = #tpu.pipeline_mode<synchronous>, transform_indices = @transform_11, window_bounds = array<i64: 32, 32>}, {pipeline_mode = #tpu.pipeline_mode<synchronous>, transform_indices = @transform_12, window_bounds = array<i64: 32, 32>}, {pipeline_mode = #tpu.pipeline_mode<synchronous>, transform_indices = @transform_13, window_bounds = array<i64: 1, 32>}, {pipeline_mode = #tpu.pipeline_mode<synchronous>, transform_indices = @transform_14, window_bounds = array<i64: 32, 32>}, {pipeline_mode = #tpu.pipeline_mode<synchronous>, transform_indices = @transform_15, window_bounds = array<i64: 1, 32>}, {pipeline_mode = #tpu.pipeline_mode<synchronous>, transform_indices = @transform_16, window_bounds = array<i64: 32, 5>}, {pipeline_mode = #tpu.pipeline_mode<synchronous>, transform_indices = @transform_17, window_bounds = array<i64: 1, 5>}, {transform_indices = @transform_18, window_bounds = array<i64: 8, 5>}]} {
    %c0 = arith.constant 0 : index
    %c0_0 = arith.constant 0 : index
    %c0_1 = arith.constant 0 : index
    %0 = vector.load %arg1[%c0, %c0_0, %c0_1] : memref<8x8x32xf32, #tpu.memory_space<vmem>>, vector<8x8x32xf32>
    %c0_2 = arith.constant 0 : index
    %c0_3 = arith.constant 0 : index
    %c0_4 = arith.constant 0 : index
    %1 = vector.load %arg2[%c0_2, %c0_3, %c0_4] : memref<8x16x32xf32, #tpu.memory_space<vmem>>, vector<8x16x32xf32>
    %2 = vector.shape_cast %0 : vector<8x8x32xf32> to vector<64x32xf32>
    %c0_5 = arith.constant 0 : index
    %c0_6 = arith.constant 0 : index
    %3 = vector.load %arg3[%c0_5, %c0_6] : memref<32x32xf32, #tpu.memory_space<vmem>>, vector<32x32xf32>
    %cst = arith.constant dense<0.000000e+00> : vector<64x32xf32>
    %4 = tpu.matmul %2, %3, %cst {dimension_numbers = #tpu.dot_dimension_numbers<[1], [0], [0], [1], [0, 0, 1, 1], [], []>} : vector<64x32xf32>, vector<32x32xf32>, vector<64x32xf32> -> vector<64x32xf32>
    %c0_7 = arith.constant 0 : index
    %c0_8 = arith.constant 0 : index
    %5 = vector.load %arg4[%c0_7, %c0_8] : memref<1x32xf32, #tpu.memory_space<vmem>>, vector<1x32xf32>
    %6 = vector.broadcast %5 : vector<1x32xf32> to vector<64x32xf32>
    %7 = arith.addf %4, %6 : vector<64x32xf32>
    %cst_9 = arith.constant 0.000000e+00 : f32
    %8 = vector.broadcast %cst_9 : f32 to vector<64x32xf32>
    %9 = arith.maximumf %7, %8 : vector<64x32xf32>
    %c0_10 = arith.constant 0 : index
    %c0_11 = arith.constant 0 : index
    %10 = vector.load %arg5[%c0_10, %c0_11] : memref<32x32xf32, #tpu.memory_space<vmem>>, vector<32x32xf32>
    %cst_12 = arith.constant dense<0.000000e+00> : vector<64x32xf32>
    %11 = tpu.matmul %9, %10, %cst_12 {dimension_numbers = #tpu.dot_dimension_numbers<[1], [0], [0], [1], [0, 0, 1, 1], [], []>} : vector<64x32xf32>, vector<32x32xf32>, vector<64x32xf32> -> vector<64x32xf32>
    %c0_13 = arith.constant 0 : index
    %c0_14 = arith.constant 0 : index
    %12 = vector.load %arg6[%c0_13, %c0_14] : memref<1x32xf32, #tpu.memory_space<vmem>>, vector<1x32xf32>
    %13 = vector.broadcast %12 : vector<1x32xf32> to vector<64x32xf32>
    %14 = arith.addf %11, %13 : vector<64x32xf32>
    %cst_15 = arith.constant 0.000000e+00 : f32
    %15 = vector.broadcast %cst_15 : f32 to vector<64x32xf32>
    %16 = arith.maximumf %14, %15 : vector<64x32xf32>
    %17 = vector.shape_cast %16 : vector<64x32xf32> to vector<8x8x32xf32>
    %18 = vector.shape_cast %1 : vector<8x16x32xf32> to vector<128x32xf32>
    %c0_16 = arith.constant 0 : index
    %c0_17 = arith.constant 0 : index
    %19 = vector.load %arg3[%c0_16, %c0_17] : memref<32x32xf32, #tpu.memory_space<vmem>>, vector<32x32xf32>
    %cst_18 = arith.constant dense<0.000000e+00> : vector<128x32xf32>
    %20 = tpu.matmul %18, %19, %cst_18 {dimension_numbers = #tpu.dot_dimension_numbers<[1], [0], [0], [1], [0, 0, 1, 1], [], []>} : vector<128x32xf32>, vector<32x32xf32>, vector<128x32xf32> -> vector<128x32xf32>
    %c0_19 = arith.constant 0 : index
    %c0_20 = arith.constant 0 : index
    %21 = vector.load %arg4[%c0_19, %c0_20] : memref<1x32xf32, #tpu.memory_space<vmem>>, vector<1x32xf32>
    %22 = vector.broadcast %21 : vector<1x32xf32> to vector<128x32xf32>
    %23 = arith.addf %20, %22 : vector<128x32xf32>
    %cst_21 = arith.constant 0.000000e+00 : f32
    %24 = vector.broadcast %cst_21 : f32 to vector<128x32xf32>
    %25 = arith.maximumf %23, %24 : vector<128x32xf32>
    %c0_22 = arith.constant 0 : index
    %c0_23 = arith.constant 0 : index
    %26 = vector.load %arg5[%c0_22, %c0_23] : memref<32x32xf32, #tpu.memory_space<vmem>>, vector<32x32xf32>
    %cst_24 = arith.constant dense<0.000000e+00> : vector<128x32xf32>
    %27 = tpu.matmul %25, %26, %cst_24 {dimension_numbers = #tpu.dot_dimension_numbers<[1], [0], [0], [1], [0, 0, 1, 1], [], []>} : vector<128x32xf32>, vector<32x32xf32>, vector<128x32xf32> -> vector<128x32xf32>
    %c0_25 = arith.constant 0 : index
    %c0_26 = arith.constant 0 : index
    %28 = vector.load %arg6[%c0_25, %c0_26] : memref<1x32xf32, #tpu.memory_space<vmem>>, vector<1x32xf32>
    %29 = vector.broadcast %28 : vector<1x32xf32> to vector<128x32xf32>
    %30 = arith.addf %27, %29 : vector<128x32xf32>
    %cst_27 = arith.constant 0.000000e+00 : f32
    %31 = vector.broadcast %cst_27 : f32 to vector<128x32xf32>
    %32 = arith.maximumf %30, %31 : vector<128x32xf32>
    %33 = vector.shape_cast %32 : vector<128x32xf32> to vector<8x16x32xf32>
    "tpu.trace_start"() <{level = 10 : i32, message = "ble,bme->blm"}> : () -> ()
    %cst_28 = arith.constant dense<0.000000e+00> : vector<8x8x16xf32>
    %34 = tpu.matmul %17, %33, %cst_28 {dimension_numbers = #tpu.dot_dimension_numbers<[2], [2], [1], [1], [0, 0, 0, 1, 1, 1], [0], [0]>} : vector<8x8x32xf32>, vector<8x16x32xf32>, vector<8x8x16xf32> -> vector<8x8x16xf32>
    "tpu.trace_stop"() : () -> ()
    %cst_29 = arith.constant dense<0xFF800000> : vector<8x8xf32>
    %35 = vector.multi_reduction <maximumf>, %34, %cst_29 [2] : vector<8x8x16xf32> to vector<8x8xf32>
    %36 = vector.shape_cast %35 : vector<8x8xf32> to vector<8x8x1xf32>
    %37 = vector.broadcast %36 : vector<8x8x1xf32> to vector<8x8x16xf32>
    %38 = arith.subf %34, %37 : vector<8x8x16xf32>
    %39 = math.exp %38 : vector<8x8x16xf32>
    %cst_30 = arith.constant dense<0.000000e+00> : vector<8x8xf32>
    %40 = vector.multi_reduction <add>, %39, %cst_30 [2] : vector<8x8x16xf32> to vector<8x8xf32>
    %41 = vector.shape_cast %40 : vector<8x8xf32> to vector<8x8x1xf32>
    %42 = vector.broadcast %41 : vector<8x8x1xf32> to vector<8x8x16xf32>
    %43 = arith.divf %39, %42 : vector<8x8x16xf32>
    "tpu.trace_start"() <{level = 10 : i32, message = "blm,bme->ble"}> : () -> ()
    %cst_31 = arith.constant dense<0.000000e+00> : vector<8x8x32xf32>
    %44 = tpu.matmul %43, %1, %cst_31 {dimension_numbers = #tpu.dot_dimension_numbers<[2], [1], [1], [2], [0, 0, 0, 1, 1, 2], [0], [0]>} : vector<8x8x16xf32>, vector<8x16x32xf32>, vector<8x8x32xf32> -> vector<8x8x32xf32>
    "tpu.trace_stop"() : () -> ()
    "tpu.trace_start"() <{level = 10 : i32, message = "bme,ble->bml"}> : () -> ()
    %cst_32 = arith.constant dense<0.000000e+00> : vector<8x16x8xf32>
    %45 = tpu.matmul %33, %17, %cst_32 {dimension_numbers = #tpu.dot_dimension_numbers<[2], [2], [1], [1], [0, 0, 0, 1, 1, 1], [0], [0]>} : vector<8x16x32xf32>, vector<8x8x32xf32>, vector<8x16x8xf32> -> vector<8x16x8xf32>
    "tpu.trace_stop"() : () -> ()
    %cst_33 = arith.constant dense<0xFF800000> : vector<8x16xf32>
    %46 = vector.multi_reduction <maximumf>, %45, %cst_33 [2] : vector<8x16x8xf32> to vector<8x16xf32>
    %47 = vector.shape_cast %46 : vector<8x16xf32> to vector<8x16x1xf32>
    %48 = vector.broadcast %47 : vector<8x16x1xf32> to vector<8x16x8xf32>
    %49 = arith.subf %45, %48 : vector<8x16x8xf32>
    %50 = math.exp %49 : vector<8x16x8xf32>
    %cst_34 = arith.constant dense<0.000000e+00> : vector<8x16xf32>
    %51 = vector.multi_reduction <add>, %50, %cst_34 [2] : vector<8x16x8xf32> to vector<8x16xf32>
    %52 = vector.shape_cast %51 : vector<8x16xf32> to vector<8x16x1xf32>
    %53 = vector.broadcast %52 : vector<8x16x1xf32> to vector<8x16x8xf32>
    %54 = arith.divf %50, %53 : vector<8x16x8xf32>
    "tpu.trace_start"() <{level = 10 : i32, message = "bml,ble->bme"}> : () -> ()
    %cst_35 = arith.constant dense<0.000000e+00> : vector<8x16x32xf32>
    %55 = tpu.matmul %54, %0, %cst_35 {dimension_numbers = #tpu.dot_dimension_numbers<[2], [1], [1], [2], [0, 0, 0, 1, 1, 2], [0], [0]>} : vector<8x16x8xf32>, vector<8x8x32xf32>, vector<8x16x32xf32> -> vector<8x16x32xf32>
    "tpu.trace_stop"() : () -> ()
    %56 = vector.shape_cast %0 : vector<8x8x32xf32> to vector<64x32xf32>
    %57 = vector.shape_cast %44 : vector<8x8x32xf32> to vector<64x32xf32>
    %c0_36 = arith.constant 0 : index
    %c0_37 = arith.constant 0 : index
    %58 = vector.load %arg7[%c0_36, %c0_37] : memref<32x32xf32, #tpu.memory_space<vmem>>, vector<32x32xf32>
    %cst_38 = arith.constant dense<0.000000e+00> : vector<64x32xf32>
    %59 = tpu.matmul %56, %58, %cst_38 {dimension_numbers = #tpu.dot_dimension_numbers<[1], [0], [0], [1], [0, 0, 1, 1], [], []>} : vector<64x32xf32>, vector<32x32xf32>, vector<64x32xf32> -> vector<64x32xf32>
    %c0_39 = arith.constant 0 : index
    %c0_40 = arith.constant 0 : index
    %60 = vector.load %arg8[%c0_39, %c0_40] : memref<32x32xf32, #tpu.memory_space<vmem>>, vector<32x32xf32>
    %cst_41 = arith.constant dense<0.000000e+00> : vector<64x32xf32>
    %61 = tpu.matmul %57, %60, %cst_41 {dimension_numbers = #tpu.dot_dimension_numbers<[1], [0], [0], [1], [0, 0, 1, 1], [], []>} : vector<64x32xf32>, vector<32x32xf32>, vector<64x32xf32> -> vector<64x32xf32>
    %62 = arith.addf %59, %61 : vector<64x32xf32>
    %c0_42 = arith.constant 0 : index
    %c0_43 = arith.constant 0 : index
    %63 = vector.load %arg9[%c0_42, %c0_43] : memref<1x32xf32, #tpu.memory_space<vmem>>, vector<1x32xf32>
    %64 = vector.broadcast %63 : vector<1x32xf32> to vector<64x32xf32>
    %65 = arith.addf %62, %64 : vector<64x32xf32>
    %cst_44 = arith.constant 0.000000e+00 : f32
    %66 = vector.broadcast %cst_44 : f32 to vector<64x32xf32>
    %67 = arith.maximumf %65, %66 : vector<64x32xf32>
    %c0_45 = arith.constant 0 : index
    %c0_46 = arith.constant 0 : index
    %68 = vector.load %arg10[%c0_45, %c0_46] : memref<32x32xf32, #tpu.memory_space<vmem>>, vector<32x32xf32>
    %cst_47 = arith.constant dense<0.000000e+00> : vector<64x32xf32>
    %69 = tpu.matmul %67, %68, %cst_47 {dimension_numbers = #tpu.dot_dimension_numbers<[1], [0], [0], [1], [0, 0, 1, 1], [], []>} : vector<64x32xf32>, vector<32x32xf32>, vector<64x32xf32> -> vector<64x32xf32>
    %c0_48 = arith.constant 0 : index
    %c0_49 = arith.constant 0 : index
    %70 = vector.load %arg11[%c0_48, %c0_49] : memref<1x32xf32, #tpu.memory_space<vmem>>, vector<1x32xf32>
    %71 = vector.broadcast %70 : vector<1x32xf32> to vector<64x32xf32>
    %72 = arith.addf %69, %71 : vector<64x32xf32>
    %cst_50 = arith.constant 0.000000e+00 : f32
    %73 = vector.broadcast %cst_50 : f32 to vector<64x32xf32>
    %74 = arith.maximumf %72, %73 : vector<64x32xf32>
    %75 = vector.shape_cast %74 : vector<64x32xf32> to vector<8x8x32xf32>
    %cst_51 = arith.constant dense<0.000000e+00> : vector<8x32xf32>
    %76 = vector.multi_reduction <add>, %75, %cst_51 [1] : vector<8x8x32xf32> to vector<8x32xf32>
    %77 = vector.shape_cast %1 : vector<8x16x32xf32> to vector<128x32xf32>
    %78 = vector.shape_cast %55 : vector<8x16x32xf32> to vector<128x32xf32>
    %c0_52 = arith.constant 0 : index
    %c0_53 = arith.constant 0 : index
    %79 = vector.load %arg7[%c0_52, %c0_53] : memref<32x32xf32, #tpu.memory_space<vmem>>, vector<32x32xf32>
    %cst_54 = arith.constant dense<0.000000e+00> : vector<128x32xf32>
    %80 = tpu.matmul %77, %79, %cst_54 {dimension_numbers = #tpu.dot_dimension_numbers<[1], [0], [0], [1], [0, 0, 1, 1], [], []>} : vector<128x32xf32>, vector<32x32xf32>, vector<128x32xf32> -> vector<128x32xf32>
    %c0_55 = arith.constant 0 : index
    %c0_56 = arith.constant 0 : index
    %81 = vector.load %arg8[%c0_55, %c0_56] : memref<32x32xf32, #tpu.memory_space<vmem>>, vector<32x32xf32>
    %cst_57 = arith.constant dense<0.000000e+00> : vector<128x32xf32>
    %82 = tpu.matmul %78, %81, %cst_57 {dimension_numbers = #tpu.dot_dimension_numbers<[1], [0], [0], [1], [0, 0, 1, 1], [], []>} : vector<128x32xf32>, vector<32x32xf32>, vector<128x32xf32> -> vector<128x32xf32>
    %83 = arith.addf %80, %82 : vector<128x32xf32>
    %c0_58 = arith.constant 0 : index
    %c0_59 = arith.constant 0 : index
    %84 = vector.load %arg9[%c0_58, %c0_59] : memref<1x32xf32, #tpu.memory_space<vmem>>, vector<1x32xf32>
    %85 = vector.broadcast %84 : vector<1x32xf32> to vector<128x32xf32>
    %86 = arith.addf %83, %85 : vector<128x32xf32>
    %cst_60 = arith.constant 0.000000e+00 : f32
    %87 = vector.broadcast %cst_60 : f32 to vector<128x32xf32>
    %88 = arith.maximumf %86, %87 : vector<128x32xf32>
    %c0_61 = arith.constant 0 : index
    %c0_62 = arith.constant 0 : index
    %89 = vector.load %arg10[%c0_61, %c0_62] : memref<32x32xf32, #tpu.memory_space<vmem>>, vector<32x32xf32>
    %cst_63 = arith.constant dense<0.000000e+00> : vector<128x32xf32>
    %90 = tpu.matmul %88, %89, %cst_63 {dimension_numbers = #tpu.dot_dimension_numbers<[1], [0], [0], [1], [0, 0, 1, 1], [], []>} : vector<128x32xf32>, vector<32x32xf32>, vector<128x32xf32> -> vector<128x32xf32>
    %c0_64 = arith.constant 0 : index
    %c0_65 = arith.constant 0 : index
    %91 = vector.load %arg11[%c0_64, %c0_65] : memref<1x32xf32, #tpu.memory_space<vmem>>, vector<1x32xf32>
    %92 = vector.broadcast %91 : vector<1x32xf32> to vector<128x32xf32>
    %93 = arith.addf %90, %92 : vector<128x32xf32>
    %cst_66 = arith.constant 0.000000e+00 : f32
    %94 = vector.broadcast %cst_66 : f32 to vector<128x32xf32>
    %95 = arith.maximumf %93, %94 : vector<128x32xf32>
    %96 = vector.shape_cast %95 : vector<128x32xf32> to vector<8x16x32xf32>
    %cst_67 = arith.constant dense<0.000000e+00> : vector<8x32xf32>
    %97 = vector.multi_reduction <add>, %96, %cst_67 [1] : vector<8x16x32xf32> to vector<8x32xf32>
    %c0_68 = arith.constant 0 : index
    %c0_69 = arith.constant 0 : index
    %98 = vector.load %arg12[%c0_68, %c0_69] : memref<32x32xf32, #tpu.memory_space<vmem>>, vector<32x32xf32>
    %cst_70 = arith.constant dense<0.000000e+00> : vector<8x32xf32>
    %99 = tpu.matmul %76, %98, %cst_70 {dimension_numbers = #tpu.dot_dimension_numbers<[1], [0], [0], [1], [0, 0, 1, 1], [], []>} : vector<8x32xf32>, vector<32x32xf32>, vector<8x32xf32> -> vector<8x32xf32>
    %c0_71 = arith.constant 0 : index
    %c0_72 = arith.constant 0 : index
    %100 = vector.load %arg13[%c0_71, %c0_72] : memref<32x32xf32, #tpu.memory_space<vmem>>, vector<32x32xf32>
    %cst_73 = arith.constant dense<0.000000e+00> : vector<8x32xf32>
    %101 = tpu.matmul %97, %100, %cst_73 {dimension_numbers = #tpu.dot_dimension_numbers<[1], [0], [0], [1], [0, 0, 1, 1], [], []>} : vector<8x32xf32>, vector<32x32xf32>, vector<8x32xf32> -> vector<8x32xf32>
    %102 = arith.addf %99, %101 : vector<8x32xf32>
    %c0_74 = arith.constant 0 : index
    %c0_75 = arith.constant 0 : index
    %103 = vector.load %arg14[%c0_74, %c0_75] : memref<1x32xf32, #tpu.memory_space<vmem>>, vector<1x32xf32>
    %104 = vector.broadcast %103 : vector<1x32xf32> to vector<8x32xf32>
    %105 = arith.addf %102, %104 : vector<8x32xf32>
    %cst_76 = arith.constant 0.000000e+00 : f32
    %106 = vector.broadcast %cst_76 : f32 to vector<8x32xf32>
    %107 = arith.maximumf %105, %106 : vector<8x32xf32>
    %c0_77 = arith.constant 0 : index
    %c0_78 = arith.constant 0 : index
    %108 = vector.load %arg15[%c0_77, %c0_78] : memref<32x32xf32, #tpu.memory_space<vmem>>, vector<32x32xf32>
    %cst_79 = arith.constant dense<0.000000e+00> : vector<8x32xf32>
    %109 = tpu.matmul %107, %108, %cst_79 {dimension_numbers = #tpu.dot_dimension_numbers<[1], [0], [0], [1], [0, 0, 1, 1], [], []>} : vector<8x32xf32>, vector<32x32xf32>, vector<8x32xf32> -> vector<8x32xf32>
    %c0_80 = arith.constant 0 : index
    %c0_81 = arith.constant 0 : index
    %110 = vector.load %arg16[%c0_80, %c0_81] : memref<1x32xf32, #tpu.memory_space<vmem>>, vector<1x32xf32>
    %111 = vector.broadcast %110 : vector<1x32xf32> to vector<8x32xf32>
    %112 = arith.addf %109, %111 : vector<8x32xf32>
    %cst_82 = arith.constant 0.000000e+00 : f32
    %113 = vector.broadcast %cst_82 : f32 to vector<8x32xf32>
    %114 = arith.maximumf %112, %113 : vector<8x32xf32>
    %c0_83 = arith.constant 0 : index
    %c0_84 = arith.constant 0 : index
    %115 = vector.load %arg17[%c0_83, %c0_84] : memref<32x5xf32, #tpu.memory_space<vmem>>, vector<32x5xf32>
    %cst_85 = arith.constant dense<0.000000e+00> : vector<8x5xf32>
    %116 = tpu.matmul %114, %115, %cst_85 {dimension_numbers = #tpu.dot_dimension_numbers<[1], [0], [0], [1], [0, 0, 1, 1], [], []>} : vector<8x32xf32>, vector<32x5xf32>, vector<8x5xf32> -> vector<8x5xf32>
    %c0_86 = arith.constant 0 : index
    %c0_87 = arith.constant 0 : index
    %117 = vector.load %arg18[%c0_86, %c0_87] : memref<1x5xf32, #tpu.memory_space<vmem>>, vector<1x5xf32>
    %118 = vector.broadcast %117 : vector<1x5xf32> to vector<8x5xf32>
    %119 = arith.addf %116, %118 : vector<8x5xf32>
    %c0_88 = arith.constant 0 : index
    %c0_89 = arith.constant 0 : index
    %120 = vector.load %arg19[%c0_88, %c0_89] : memref<8x5xf32, #tpu.memory_space<vmem>>, vector<8x5xf32>
    tpu.vector_store %arg19[%c0_88, %c0_89], %119 {strides = array<i32>} : memref<8x5xf32, #tpu.memory_space<vmem>>, vector<8x5xf32>,
    return
  }
  func.func @transform_0(%arg0: i32) -> (i32, i32, i32) {
    %c0_i32 = arith.constant 0 : i32
    %c0_i32_0 = arith.constant 0 : i32
    %c0_i32_1 = arith.constant 0 : i32
    return %arg0, %c0_i32, %c0_i32_0 : i32, i32, i32
  }
  func.func @transform_1(%arg0: i32) -> (i32, i32, i32) {
    %c0_i32 = arith.constant 0 : i32
    %c0_i32_0 = arith.constant 0 : i32
    %c0_i32_1 = arith.constant 0 : i32
    return %arg0, %c0_i32, %c0_i32_0 : i32, i32, i32
  }
  func.func @transform_2(%arg0: i32) -> (i32, i32) {
    %c0_i32 = arith.constant 0 : i32
    %c0_i32_0 = arith.constant 0 : i32
    %c0_i32_1 = arith.constant 0 : i32
    return %c0_i32, %c0_i32_0 : i32, i32
  }
  func.func @transform_3(%arg0: i32) -> (i32, i32) {
    %c0_i32 = arith.constant 0 : i32
    %c0_i32_0 = arith.constant 0 : i32
    %c0_i32_1 = arith.constant 0 : i32
    return %c0_i32, %c0_i32_0 : i32, i32
  }
  func.func @transform_4(%arg0: i32) -> (i32, i32) {
    %c0_i32 = arith.constant 0 : i32
    %c0_i32_0 = arith.constant 0 : i32
    %c0_i32_1 = arith.constant 0 : i32
    return %c0_i32, %c0_i32_0 : i32, i32
  }
  func.func @transform_5(%arg0: i32) -> (i32, i32) {
    %c0_i32 = arith.constant 0 : i32
    %c0_i32_0 = arith.constant 0 : i32
    %c0_i32_1 = arith.constant 0 : i32
    return %c0_i32, %c0_i32_0 : i32, i32
  }
  func.func @transform_6(%arg0: i32) -> (i32, i32) {
    %c0_i32 = arith.constant 0 : i32
    %c0_i32_0 = arith.constant 0 : i32
    %c0_i32_1 = arith.constant 0 : i32
    return %c0_i32, %c0_i32_0 : i32, i32
  }
  func.func @transform_7(%arg0: i32) -> (i32, i32) {
    %c0_i32 = arith.constant 0 : i32
    %c0_i32_0 = arith.constant 0 : i32
    %c0_i32_1 = arith.constant 0 : i32
    return %c0_i32, %c0_i32_0 : i32, i32
  }
  func.func @transform_8(%arg0: i32) -> (i32, i32) {
    %c0_i32 = arith.constant 0 : i32
    %c0_i32_0 = arith.constant 0 : i32
    %c0_i32_1 = arith.constant 0 : i32
    return %c0_i32, %c0_i32_0 : i32, i32
  }
  func.func @transform_9(%arg0: i32) -> (i32, i32) {
    %c0_i32 = arith.constant 0 : i32
    %c0_i32_0 = arith.constant 0 : i32
    %c0_i32_1 = arith.constant 0 : i32
    return %c0_i32, %c0_i32_0 : i32, i32
  }
  func.func @transform_10(%arg0: i32) -> (i32, i32) {
    %c0_i32 = arith.constant 0 : i32
    %c0_i32_0 = arith.constant 0 : i32
    %c0_i32_1 = arith.constant 0 : i32
    return %c0_i32, %c0_i32_0 : i32, i32
  }
  func.func @transform_11(%arg0: i32) -> (i32, i32) {
    %c0_i32 = arith.constant 0 : i32
    %c0_i32_0 = arith.constant 0 : i32
    %c0_i32_1 = arith.constant 0 : i32
    return %c0_i32, %c0_i32_0 : i32, i32
  }
  func.func @transform_12(%arg0: i32) -> (i32, i32) {
    %c0_i32 = arith.constant 0 : i32
    %c0_i32_0 = arith.constant 0 : i32
    %c0_i32_1 = arith.constant 0 : i32
    return %c0_i32, %c0_i32_0 : i32, i32
  }
  func.func @transform_13(%arg0: i32) -> (i32, i32) {
    %c0_i32 = arith.constant 0 : i32
    %c0_i32_0 = arith.constant 0 : i32
    %c0_i32_1 = arith.constant 0 : i32
    return %c0_i32, %c0_i32_0 : i32, i32
  }
  func.func @transform_14(%arg0: i32) -> (i32, i32) {
    %c0_i32 = arith.constant 0 : i32
    %c0_i32_0 = arith.constant 0 : i32
    %c0_i32_1 = arith.constant 0 : i32
    return %c0_i32, %c0_i32_0 : i32, i32
  }
  func.func @transform_15(%arg0: i32) -> (i32, i32) {
    %c0_i32 = arith.constant 0 : i32
    %c0_i32_0 = arith.constant 0 : i32
    %c0_i32_1 = arith.constant 0 : i32
    return %c0_i32, %c0_i32_0 : i32, i32
  }
  func.func @transform_16(%arg0: i32) -> (i32, i32) {
    %c0_i32 = arith.constant 0 : i32
    %c0_i32_0 = arith.constant 0 : i32
    %c0_i32_1 = arith.constant 0 : i32
    return %c0_i32, %c0_i32_0 : i32, i32
  }
  func.func @transform_17(%arg0: i32) -> (i32, i32) {
    %c0_i32 = arith.constant 0 : i32
    %c0_i32_0 = arith.constant 0 : i32
    %c0_i32_1 = arith.constant 0 : i32
    return %c0_i32, %c0_i32_0 : i32, i32
  }
  func.func @transform_18(%arg0: i32) -> (i32, i32) {
    %c0_i32 = arith.constant 0 : i32
    %c0_i32_0 = arith.constant 0 : i32
    return %arg0, %c0_i32 : i32, i32
  }
}

module attributes {stable_mosaic.version = 11 : i64} {
  func.func @_attention_head_kernel(%arg0: i32, %arg1: memref<8x8x32xf32, #tpu.memory_space<vmem>>, %arg2: memref<8x16x32xf32, #tpu.memory_space<vmem>>, %arg3: memref<32x32xf32, #tpu.memory_space<vmem>>, %arg4: memref<1x32xf32, #tpu.memory_space<vmem>>, %arg5: memref<32x32xf32, #tpu.memory_space<vmem>>, %arg6: memref<1x32xf32, #tpu.memory_space<vmem>>, %arg7: memref<32x32xf32, #tpu.memory_space<vmem>>, %arg8: memref<32x32xf32, #tpu.memory_space<vmem>>, %arg9: memref<1x32xf32, #tpu.memory_space<vmem>>, %arg10: memref<32x32xf32, #tpu.memory_space<vmem>>, %arg11: memref<1x32xf32, #tpu.memory_space<vmem>>, %arg12: memref<32x32xf32, #tpu.memory_space<vmem>>, %arg13: memref<32x32xf32, #tpu.memory_space<vmem>>, %arg14: memref<1x32xf32, #tpu.memory_space<vmem>>, %arg15: memref<32x32xf32, #tpu.memory_space<vmem>>, %arg16: memref<1x32xf32, #tpu.memory_space<vmem>>, %arg17: memref<32x5xf32, #tpu.memory_space<vmem>>, %arg18: memref<1x5xf32, #tpu.memory_space<vmem>>, %arg19: memref<8x5xf32, #tpu.memory_space<vmem>>) attributes {dimension_semantics = [#tpu.dimension_semantics<parallel>], iteration_bounds = array<i64: 2>, scalar_prefetch = 0 : i64, scratch_operands = 0 : i64, tpu.core_type = #tpu.core_type<tc>, window_params = [{transform_indices = @transform_0, window_bounds = array<i64: 8, 8, 32>}, {transform_indices = @transform_1, window_bounds = array<i64: 8, 16, 32>}, {pipeline_mode = #tpu.pipeline_mode<synchronous>, transform_indices = @transform_2, window_bounds = array<i64: 32, 32>}, {pipeline_mode = #tpu.pipeline_mode<synchronous>, transform_indices = @transform_3, window_bounds = array<i64: 1, 32>}, {pipeline_mode = #tpu.pipeline_mode<synchronous>, transform_indices = @transform_4, window_bounds = array<i64: 32, 32>}, {pipeline_mode = #tpu.pipeline_mode<synchronous>, transform_indices = @transform_5, window_bounds = array<i64: 1, 32>}, {pipeline_mode = #tpu.pipeline_mode<synchronous>, transform_indices = @transform_6, window_bounds = array<i64: 32, 32>}, {pipeline_mode = #tpu.pipeline_mode<synchronous>, transform_indices = @transform_7, window_bounds = array<i64: 32, 32>}, {pipeline_mode = #tpu.pipeline_mode<synchronous>, transform_indices = @transform_8, window_bounds = array<i64: 1, 32>}, {pipeline_mode = #tpu.pipeline_mode<synchronous>, transform_indices = @transform_9, window_bounds = array<i64: 32, 32>}, {pipeline_mode = #tpu.pipeline_mode<synchronous>, transform_indices = @transform_10, window_bounds = array<i64: 1, 32>}, {pipeline_mode = #tpu.pipeline_mode<synchronous>, transform_indices = @transform_11, window_bounds = array<i64: 32, 32>}, {pipeline_mode = #tpu.pipeline_mode<synchronous>, transform_indices = @transform_12, window_bounds = array<i64: 32, 32>}, {pipeline_mode = #tpu.pipeline_mode<synchronous>, transform_indices = @transform_13, window_bounds = array<i64: 1, 32>}, {pipeline_mode = #tpu.pipeline_mode<synchronous>, transform_indices = @transform_14, window_bounds = array<i64: 32, 32>}, {pipeline_mode = #tpu.pipeline_mode<synchronous>, transform_indices = @transform_15, window_bounds = array<i64: 1, 32>}, {pipeline_mode = #tpu.pipeline_mode<synchronous>, transform_indices = @transform_16, window_bounds = array<i64: 32, 5>}, {pipeline_mode = #tpu.pipeline_mode<synchronous>, transform_indices = @transform_17, window_bounds = array<i64: 1, 5>}, {transform_indices = @transform_18, window_bounds = array<i64: 8, 5>}]} {
    %c0 = arith.constant 0 : index
    %c0_0 = arith.constant 0 : index
    %c0_1 = arith.constant 0 : index
    %0 = vector.load %arg1[%c0, %c0_0, %c0_1] : memref<8x8x32xf32, #tpu.memory_space<vmem>>, vector<8x8x32xf32>
    %c0_2 = arith.constant 0 : index
    %c0_3 = arith.constant 0 : index
    %c0_4 = arith.constant 0 : index
    %1 = vector.load %arg2[%c0_2, %c0_3, %c0_4] : memref<8x16x32xf32, #tpu.memory_space<vmem>>, vector<8x16x32xf32>
    %2 = vector.shape_cast %0 : vector<8x8x32xf32> to vector<64x32xf32>
    %c0_5 = arith.constant 0 : index
    %c0_6 = arith.constant 0 : index
    %3 = vector.load %arg3[%c0_5, %c0_6] : memref<32x32xf32, #tpu.memory_space<vmem>>, vector<32x32xf32>
    %cst = arith.constant dense<0.000000e+00> : vector<64x32xf32>
    %4 = tpu.matmul %2, %3, %cst {dimension_numbers = #tpu.dot_dimension_numbers<[1], [0], [0], [1], [0, 0, 1, 1], [], []>} : vector<64x32xf32>, vector<32x32xf32>, vector<64x32xf32> -> vector<64x32xf32>
    %c0_7 = arith.constant 0 : index
    %c0_8 = arith.constant 0 : index
    %5 = vector.load %arg4[%c0_7, %c0_8] : memref<1x32xf32, #tpu.memory_space<vmem>>, vector<1x32xf32>
    %6 = vector.broadcast %5 : vector<1x32xf32> to vector<64x32xf32>
    %7 = arith.addf %4, %6 : vector<64x32xf32>
    %cst_9 = arith.constant 0.000000e+00 : f32
    %8 = vector.broadcast %cst_9 : f32 to vector<64x32xf32>
    %9 = arith.maximumf %7, %8 : vector<64x32xf32>
    %c0_10 = arith.constant 0 : index
    %c0_11 = arith.constant 0 : index
    %10 = vector.load %arg5[%c0_10, %c0_11] : memref<32x32xf32, #tpu.memory_space<vmem>>, vector<32x32xf32>
    %cst_12 = arith.constant dense<0.000000e+00> : vector<64x32xf32>
    %11 = tpu.matmul %9, %10, %cst_12 {dimension_numbers = #tpu.dot_dimension_numbers<[1], [0], [0], [1], [0, 0, 1, 1], [], []>} : vector<64x32xf32>, vector<32x32xf32>, vector<64x32xf32> -> vector<64x32xf32>
    %c0_13 = arith.constant 0 : index
    %c0_14 = arith.constant 0 : index
    %12 = vector.load %arg6[%c0_13, %c0_14] : memref<1x32xf32, #tpu.memory_space<vmem>>, vector<1x32xf32>
    %13 = vector.broadcast %12 : vector<1x32xf32> to vector<64x32xf32>
    %14 = arith.addf %11, %13 : vector<64x32xf32>
    %cst_15 = arith.constant 0.000000e+00 : f32
    %15 = vector.broadcast %cst_15 : f32 to vector<64x32xf32>
    %16 = arith.maximumf %14, %15 : vector<64x32xf32>
    %17 = vector.shape_cast %16 : vector<64x32xf32> to vector<8x8x32xf32>
    %18 = vector.shape_cast %1 : vector<8x16x32xf32> to vector<128x32xf32>
    %c0_16 = arith.constant 0 : index
    %c0_17 = arith.constant 0 : index
    %19 = vector.load %arg3[%c0_16, %c0_17] : memref<32x32xf32, #tpu.memory_space<vmem>>, vector<32x32xf32>
    %cst_18 = arith.constant dense<0.000000e+00> : vector<128x32xf32>
    %20 = tpu.matmul %18, %19, %cst_18 {dimension_numbers = #tpu.dot_dimension_numbers<[1], [0], [0], [1], [0, 0, 1, 1], [], []>} : vector<128x32xf32>, vector<32x32xf32>, vector<128x32xf32> -> vector<128x32xf32>
    %c0_19 = arith.constant 0 : index
    %c0_20 = arith.constant 0 : index
    %21 = vector.load %arg4[%c0_19, %c0_20] : memref<1x32xf32, #tpu.memory_space<vmem>>, vector<1x32xf32>
    %22 = vector.broadcast %21 : vector<1x32xf32> to vector<128x32xf32>
    %23 = arith.addf %20, %22 : vector<128x32xf32>
    %cst_21 = arith.constant 0.000000e+00 : f32
    %24 = vector.broadcast %cst_21 : f32 to vector<128x32xf32>
    %25 = arith.maximumf %23, %24 : vector<128x32xf32>
    %c0_22 = arith.constant 0 : index
    %c0_23 = arith.constant 0 : index
    %26 = vector.load %arg5[%c0_22, %c0_23] : memref<32x32xf32, #tpu.memory_space<vmem>>, vector<32x32xf32>
    %cst_24 = arith.constant dense<0.000000e+00> : vector<128x32xf32>
    %27 = tpu.matmul %25, %26, %cst_24 {dimension_numbers = #tpu.dot_dimension_numbers<[1], [0], [0], [1], [0, 0, 1, 1], [], []>} : vector<128x32xf32>, vector<32x32xf32>, vector<128x32xf32> -> vector<128x32xf32>
    %c0_25 = arith.constant 0 : index
    %c0_26 = arith.constant 0 : index
    %28 = vector.load %arg6[%c0_25, %c0_26] : memref<1x32xf32, #tpu.memory_space<vmem>>, vector<1x32xf32>
    %29 = vector.broadcast %28 : vector<1x32xf32> to vector<128x32xf32>
    %30 = arith.addf %27, %29 : vector<128x32xf32>
    %cst_27 = arith.constant 0.000000e+00 : f32
    %31 = vector.broadcast %cst_27 : f32 to vector<128x32xf32>
    %32 = arith.maximumf %30, %31 : vector<128x32xf32>
    %33 = vector.shape_cast %32 : vector<128x32xf32> to vector<8x16x32xf32>
    "tpu.trace_start"() <{level = 10 : i32, message = "ble,bme->blm"}> : () -> ()
    %cst_28 = arith.constant dense<0.000000e+00> : vector<8x8x16xf32>
    %34 = tpu.matmul %17, %33, %cst_28 {dimension_numbers = #tpu.dot_dimension_numbers<[2], [2], [1], [1], [0, 0, 0, 1, 1, 1], [0], [0]>} : vector<8x8x32xf32>, vector<8x16x32xf32>, vector<8x8x16xf32> -> vector<8x8x16xf32>
    "tpu.trace_stop"() : () -> ()
    %cst_29 = arith.constant dense<0xFF800000> : vector<8x8xf32>
    %35 = vector.multi_reduction <maximumf>, %34, %cst_29 [2] : vector<8x8x16xf32> to vector<8x8xf32>
    %36 = vector.shape_cast %35 : vector<8x8xf32> to vector<8x8x1xf32>
    %37 = vector.broadcast %36 : vector<8x8x1xf32> to vector<8x8x16xf32>
    %38 = arith.subf %34, %37 : vector<8x8x16xf32>
    %39 = math.exp %38 : vector<8x8x16xf32>
    %cst_30 = arith.constant dense<0.000000e+00> : vector<8x8xf32>
    %40 = vector.multi_reduction <add>, %39, %cst_30 [2] : vector<8x8x16xf32> to vector<8x8xf32>
    %41 = vector.shape_cast %40 : vector<8x8xf32> to vector<8x8x1xf32>
    %42 = vector.broadcast %41 : vector<8x8x1xf32> to vector<8x8x16xf32>
    %43 = arith.divf %39, %42 : vector<8x8x16xf32>
    "tpu.trace_start"() <{level = 10 : i32, message = "blm,bme->ble"}> : () -> ()
    %cst_31 = arith.constant dense<0.000000e+00> : vector<8x8x32xf32>
    %44 = tpu.matmul %43, %1, %cst_31 {dimension_numbers = #tpu.dot_dimension_numbers<[2], [1], [1], [2], [0, 0, 0, 1, 1, 2], [0], [0]>} : vector<8x8x16xf32>, vector<8x16x32xf32>, vector<8x8x32xf32> -> vector<8x8x32xf32>
    "tpu.trace_stop"() : () -> ()
    "tpu.trace_start"() <{level = 10 : i32, message = "bme,ble->bml"}> : () -> ()
    %cst_32 = arith.constant dense<0.000000e+00> : vector<8x16x8xf32>
    %45 = tpu.matmul %33, %17, %cst_32 {dimension_numbers = #tpu.dot_dimension_numbers<[2], [2], [1], [1], [0, 0, 0, 1, 1, 1], [0], [0]>} : vector<8x16x32xf32>, vector<8x8x32xf32>, vector<8x16x8xf32> -> vector<8x16x8xf32>
    "tpu.trace_stop"() : () -> ()
    %cst_33 = arith.constant dense<0xFF800000> : vector<8x16xf32>
    %46 = vector.multi_reduction <maximumf>, %45, %cst_33 [2] : vector<8x16x8xf32> to vector<8x16xf32>
    %47 = vector.shape_cast %46 : vector<8x16xf32> to vector<8x16x1xf32>
    %48 = vector.broadcast %47 : vector<8x16x1xf32> to vector<8x16x8xf32>
    %49 = arith.subf %45, %48 : vector<8x16x8xf32>
    %50 = math.exp %49 : vector<8x16x8xf32>
    %cst_34 = arith.constant dense<0.000000e+00> : vector<8x16xf32>
    %51 = vector.multi_reduction <add>, %50, %cst_34 [2] : vector<8x16x8xf32> to vector<8x16xf32>
    %52 = vector.shape_cast %51 : vector<8x16xf32> to vector<8x16x1xf32>
    %53 = vector.broadcast %52 : vector<8x16x1xf32> to vector<8x16x8xf32>
    %54 = arith.divf %50, %53 : vector<8x16x8xf32>
    "tpu.trace_start"() <{level = 10 : i32, message = "bml,ble->bme"}> : () -> ()
    %cst_35 = arith.constant dense<0.000000e+00> : vector<8x16x32xf32>
    %55 = tpu.matmul %54, %0, %cst_35 {dimension_numbers = #tpu.dot_dimension_numbers<[2], [1], [1], [2], [0, 0, 0, 1, 1, 2], [0], [0]>} : vector<8x16x8xf32>, vector<8x8x32xf32>, vector<8x16x32xf32> -> vector<8x16x32xf32>
    "tpu.trace_stop"() : () -> ()
    %56 = vector.shape_cast %0 : vector<8x8x32xf32> to vector<64x32xf32>
    %57 = vector.shape_cast %44 : vector<8x8x32xf32> to vector<64x32xf32>
    %c0_36 = arith.constant 0 : index
    %c0_37 = arith.constant 0 : index
    %58 = vector.load %arg7[%c0_36, %c0_37] : memref<32x32xf32, #tpu.memory_space<vmem>>, vector<32x32xf32>
    %cst_38 = arith.constant dense<0.000000e+00> : vector<64x32xf32>
    %59 = tpu.matmul %56, %58, %cst_38 {dimension_numbers = #tpu.dot_dimension_numbers<[1], [0], [0], [1], [0, 0, 1, 1], [], []>} : vector<64x32xf32>, vector<32x32xf32>, vector<64x32xf32> -> vector<64x32xf32>
    %c0_39 = arith.constant 0 : index
    %c0_40 = arith.constant 0 : index
    %60 = vector.load %arg8[%c0_39, %c0_40] : memref<32x32xf32, #tpu.memory_space<vmem>>, vector<32x32xf32>
    %cst_41 = arith.constant dense<0.000000e+00> : vector<64x32xf32>
    %61 = tpu.matmul %57, %60, %cst_41 {dimension_numbers = #tpu.dot_dimension_numbers<[1], [0], [0], [1], [0, 0, 1, 1], [], []>} : vector<64x32xf32>, vector<32x32xf32>, vector<64x32xf32> -> vector<64x32xf32>
    %62 = arith.addf %59, %61 : vector<64x32xf32>
    %c0_42 = arith.constant 0 : index
    %c0_43 = arith.constant 0 : index
    %63 = vector.load %arg9[%c0_42, %c0_43] : memref<1x32xf32, #tpu.memory_space<vmem>>, vector<1x32xf32>
    %64 = vector.broadcast %63 : vector<1x32xf32> to vector<64x32xf32>
    %65 = arith.addf %62, %64 : vector<64x32xf32>
    %cst_44 = arith.constant 0.000000e+00 : f32
    %66 = vector.broadcast %cst_44 : f32 to vector<64x32xf32>
    %67 = arith.maximumf %65, %66 : vector<64x32xf32>
    %c0_45 = arith.constant 0 : index
    %c0_46 = arith.constant 0 : index
    %68 = vector.load %arg10[%c0_45, %c0_46] : memref<32x32xf32, #tpu.memory_space<vmem>>, vector<32x32xf32>
    %cst_47 = arith.constant dense<0.000000e+00> : vector<64x32xf32>
    %69 = tpu.matmul %67, %68, %cst_47 {dimension_numbers = #tpu.dot_dimension_numbers<[1], [0], [0], [1], [0, 0, 1, 1], [], []>} : vector<64x32xf32>, vector<32x32xf32>, vector<64x32xf32> -> vector<64x32xf32>
    %c0_48 = arith.constant 0 : index
    %c0_49 = arith.constant 0 : index
    %70 = vector.load %arg11[%c0_48, %c0_49] : memref<1x32xf32, #tpu.memory_space<vmem>>, vector<1x32xf32>
    %71 = vector.broadcast %70 : vector<1x32xf32> to vector<64x32xf32>
    %72 = arith.addf %69, %71 : vector<64x32xf32>
    %cst_50 = arith.constant 0.000000e+00 : f32
    %73 = vector.broadcast %cst_50 : f32 to vector<64x32xf32>
    %74 = arith.maximumf %72, %73 : vector<64x32xf32>
    %75 = vector.shape_cast %74 : vector<64x32xf32> to vector<8x8x32xf32>
    %cst_51 = arith.constant dense<0.000000e+00> : vector<8x32xf32>
    %76 = vector.multi_reduction <add>, %75, %cst_51 [1] : vector<8x8x32xf32> to vector<8x32xf32>
    %77 = vector.shape_cast %1 : vector<8x16x32xf32> to vector<128x32xf32>
    %78 = vector.shape_cast %55 : vector<8x16x32xf32> to vector<128x32xf32>
    %c0_52 = arith.constant 0 : index
    %c0_53 = arith.constant 0 : index
    %79 = vector.load %arg7[%c0_52, %c0_53] : memref<32x32xf32, #tpu.memory_space<vmem>>, vector<32x32xf32>
    %cst_54 = arith.constant dense<0.000000e+00> : vector<128x32xf32>
    %80 = tpu.matmul %77, %79, %cst_54 {dimension_numbers = #tpu.dot_dimension_numbers<[1], [0], [0], [1], [0, 0, 1, 1], [], []>} : vector<128x32xf32>, vector<32x32xf32>, vector<128x32xf32> -> vector<128x32xf32>
    %c0_55 = arith.constant 0 : index
    %c0_56 = arith.constant 0 : index
    %81 = vector.load %arg8[%c0_55, %c0_56] : memref<32x32xf32, #tpu.memory_space<vmem>>, vector<32x32xf32>
    %cst_57 = arith.constant dense<0.000000e+00> : vector<128x32xf32>
    %82 = tpu.matmul %78, %81, %cst_57 {dimension_numbers = #tpu.dot_dimension_numbers<[1], [0], [0], [1], [0, 0, 1, 1], [], []>} : vector<128x32xf32>, vector<32x32xf32>, vector<128x32xf32> -> vector<128x32xf32>
    %83 = arith.addf %80, %82 : vector<128x32xf32>
    %c0_58 = arith.constant 0 : index
    %c0_59 = arith.constant 0 : index
    %84 = vector.load %arg9[%c0_58, %c0_59] : memref<1x32xf32, #tpu.memory_space<vmem>>, vector<1x32xf32>
    %85 = vector.broadcast %84 : vector<1x32xf32> to vector<128x32xf32>
    %86 = arith.addf %83, %85 : vector<128x32xf32>
    %cst_60 = arith.constant 0.000000e+00 : f32
    %87 = vector.broadcast %cst_60 : f32 to vector<128x32xf32>
    %88 = arith.maximumf %86, %87 : vector<128x32xf32>
    %c0_61 = arith.constant 0 : index
    %c0_62 = arith.constant 0 : index
    %89 = vector.load %arg10[%c0_61, %c0_62] : memref<32x32xf32, #tpu.memory_space<vmem>>, vector<32x32xf32>
    %cst_63 = arith.constant dense<0.000000e+00> : vector<128x32xf32>
    %90 = tpu.matmul %88, %89, %cst_63 {dimension_numbers = #tpu.dot_dimension_numbers<[1], [0], [0], [1], [0, 0, 1, 1], [], []>} : vector<128x32xf32>, vector<32x32xf32>, vector<128x32xf32> -> vector<128x32xf32>
    %c0_64 = arith.constant 0 : index
    %c0_65 = arith.constant 0 : index
    %91 = vector.load %arg11[%c0_64, %c0_65] : memref<1x32xf32, #tpu.memory_space<vmem>>, vector<1x32xf32>
    %92 = vector.broadcast %91 : vector<1x32xf32> to vector<128x32xf32>
    %93 = arith.addf %90, %92 : vector<128x32xf32>
    %cst_66 = arith.constant 0.000000e+00 : f32
    %94 = vector.broadcast %cst_66 : f32 to vector<128x32xf32>
    %95 = arith.maximumf %93, %94 : vector<128x32xf32>
    %96 = vector.shape_cast %95 : vector<128x32xf32> to vector<8x16x32xf32>
    %cst_67 = arith.constant dense<0.000000e+00> : vector<8x32xf32>
    %97 = vector.multi_reduction <add>, %96, %cst_67 [1] : vector<8x16x32xf32> to vector<8x32xf32>
    %c0_68 = arith.constant 0 : index
    %c0_69 = arith.constant 0 : index
    %98 = vector.load %arg12[%c0_68, %c0_69] : memref<32x32xf32, #tpu.memory_space<vmem>>, vector<32x32xf32>
    %cst_70 = arith.constant dense<0.000000e+00> : vector<8x32xf32>
    %99 = tpu.matmul %76, %98, %cst_70 {dimension_numbers = #tpu.dot_dimension_numbers<[1], [0], [0], [1], [0, 0, 1, 1], [], []>} : vector<8x32xf32>, vector<32x32xf32>, vector<8x32xf32> -> vector<8x32xf32>
    %c0_71 = arith.constant 0 : index
    %c0_72 = arith.constant 0 : index
    %100 = vector.load %arg13[%c0_71, %c0_72] : memref<32x32xf32, #tpu.memory_space<vmem>>, vector<32x32xf32>
    %cst_73 = arith.constant dense<0.000000e+00> : vector<8x32xf32>
    %101 = tpu.matmul %97, %100, %cst_73 {dimension_numbers = #tpu.dot_dimension_numbers<[1], [0], [0], [1], [0, 0, 1, 1], [], []>} : vector<8x32xf32>, vector<32x32xf32>, vector<8x32xf32> -> vector<8x32xf32>
    %102 = arith.addf %99, %101 : vector<8x32xf32>
    %c0_74 = arith.constant 0 : index
    %c0_75 = arith.constant 0 : index
    %103 = vector.load %arg14[%c0_74, %c0_75] : memref<1x32xf32, #tpu.memory_space<vmem>>, vector<1x32xf32>
    %104 = vector.broadcast %103 : vector<1x32xf32> to vector<8x32xf32>
    %105 = arith.addf %102, %104 : vector<8x32xf32>
    %cst_76 = arith.constant 0.000000e+00 : f32
    %106 = vector.broadcast %cst_76 : f32 to vector<8x32xf32>
    %107 = arith.maximumf %105, %106 : vector<8x32xf32>
    %c0_77 = arith.constant 0 : index
    %c0_78 = arith.constant 0 : index
    %108 = vector.load %arg15[%c0_77, %c0_78] : memref<32x32xf32, #tpu.memory_space<vmem>>, vector<32x32xf32>
    %cst_79 = arith.constant dense<0.000000e+00> : vector<8x32xf32>
    %109 = tpu.matmul %107, %108, %cst_79 {dimension_numbers = #tpu.dot_dimension_numbers<[1], [0], [0], [1], [0, 0, 1, 1], [], []>} : vector<8x32xf32>, vector<32x32xf32>, vector<8x32xf32> -> vector<8x32xf32>
    %c0_80 = arith.constant 0 : index
    %c0_81 = arith.constant 0 : index
    %110 = vector.load %arg16[%c0_80, %c0_81] : memref<1x32xf32, #tpu.memory_space<vmem>>, vector<1x32xf32>
    %111 = vector.broadcast %110 : vector<1x32xf32> to vector<8x32xf32>
    %112 = arith.addf %109, %111 : vector<8x32xf32>
    %cst_82 = arith.constant 0.000000e+00 : f32
    %113 = vector.broadcast %cst_82 : f32 to vector<8x32xf32>
    %114 = arith.maximumf %112, %113 : vector<8x32xf32>
    %c0_83 = arith.constant 0 : index
    %c0_84 = arith.constant 0 : index
    %115 = vector.load %arg17[%c0_83, %c0_84] : memref<32x5xf32, #tpu.memory_space<vmem>>, vector<32x5xf32>
    %cst_85 = arith.constant dense<0.000000e+00> : vector<8x5xf32>
    %116 = tpu.matmul %114, %115, %cst_85 {dimension_numbers = #tpu.dot_dimension_numbers<[1], [0], [0], [1], [0, 0, 1, 1], [], []>} : vector<8x32xf32>, vector<32x5xf32>, vector<8x5xf32> -> vector<8x5xf32>
    %c0_86 = arith.constant 0 : index
    %c0_87 = arith.constant 0 : index
    %117 = vector.load %arg18[%c0_86, %c0_87] : memref<1x5xf32, #tpu.memory_space<vmem>>, vector<1x5xf32>
    %118 = vector.broadcast %117 : vector<1x5xf32> to vector<8x5xf32>
    %119 = arith.addf %116, %118 : vector<8x5xf32>
    %c0_88 = arith.constant 0 : index
    %c0_89 = arith.constant 0 : index
    %120 = vector.load %arg19[%c0_88, %c0_89] : memref<8x5xf32, #tpu.memory_space<vmem>>, vector<8x5xf32>
    tpu.vector_store %arg19[%c0_88, %c0_89], %119 {strides = array<i32>} : memref<8x5xf32, #tpu.memory_space<vmem>>, vector<8x5xf32>,
    return
  }
  func.func @transform_0(%arg0: i32) -> (i32, i32, i32) {
    %c0_i32 = arith.constant 0 : i32
    %c0_i32_0 = arith.constant 0 : i32
    %c0_i32_1 = arith.constant 0 : i32
    return %arg0, %c0_i32, %c0_i32_0 : i32, i32, i32
  }
  func.func @transform_1(%arg0: i32) -> (i32, i32, i32) {
    %c0_i32 = arith.constant 0 : i32
    %c0_i32_0 = arith.constant 0 : i32
    %c0_i32_1 = arith.constant 0 : i32
    return %arg0, %c0_i32, %c0_i32_0 : i32, i32, i32
  }
  func.func @transform_2(%arg0: i32) -> (i32, i32) {
    %c0_i32 = arith.constant 0 : i32
    %c0_i32_0 = arith.constant 0 : i32
    %c0_i32_1 = arith.constant 0 : i32
    return %c0_i32, %c0_i32_0 : i32, i32
  }
  func.func @transform_3(%arg0: i32) -> (i32, i32) {
    %c0_i32 = arith.constant 0 : i32
    %c0_i32_0 = arith.constant 0 : i32
    %c0_i32_1 = arith.constant 0 : i32
    return %c0_i32, %c0_i32_0 : i32, i32
  }
  func.func @transform_4(%arg0: i32) -> (i32, i32) {
    %c0_i32 = arith.constant 0 : i32
    %c0_i32_0 = arith.constant 0 : i32
    %c0_i32_1 = arith.constant 0 : i32
    return %c0_i32, %c0_i32_0 : i32, i32
  }
  func.func @transform_5(%arg0: i32) -> (i32, i32) {
    %c0_i32 = arith.constant 0 : i32
    %c0_i32_0 = arith.constant 0 : i32
    %c0_i32_1 = arith.constant 0 : i32
    return %c0_i32, %c0_i32_0 : i32, i32
  }
  func.func @transform_6(%arg0: i32) -> (i32, i32) {
    %c0_i32 = arith.constant 0 : i32
    %c0_i32_0 = arith.constant 0 : i32
    %c0_i32_1 = arith.constant 0 : i32
    return %c0_i32, %c0_i32_0 : i32, i32
  }
  func.func @transform_7(%arg0: i32) -> (i32, i32) {
    %c0_i32 = arith.constant 0 : i32
    %c0_i32_0 = arith.constant 0 : i32
    %c0_i32_1 = arith.constant 0 : i32
    return %c0_i32, %c0_i32_0 : i32, i32
  }
  func.func @transform_8(%arg0: i32) -> (i32, i32) {
    %c0_i32 = arith.constant 0 : i32
    %c0_i32_0 = arith.constant 0 : i32
    %c0_i32_1 = arith.constant 0 : i32
    return %c0_i32, %c0_i32_0 : i32, i32
  }
  func.func @transform_9(%arg0: i32) -> (i32, i32) {
    %c0_i32 = arith.constant 0 : i32
    %c0_i32_0 = arith.constant 0 : i32
    %c0_i32_1 = arith.constant 0 : i32
    return %c0_i32, %c0_i32_0 : i32, i32
  }
  func.func @transform_10(%arg0: i32) -> (i32, i32) {
    %c0_i32 = arith.constant 0 : i32
    %c0_i32_0 = arith.constant 0 : i32
    %c0_i32_1 = arith.constant 0 : i32
    return %c0_i32, %c0_i32_0 : i32, i32
  }
  func.func @transform_11(%arg0: i32) -> (i32, i32) {
    %c0_i32 = arith.constant 0 : i32
    %c0_i32_0 = arith.constant 0 : i32
    %c0_i32_1 = arith.constant 0 : i32
    return %c0_i32, %c0_i32_0 : i32, i32
  }
  func.func @transform_12(%arg0: i32) -> (i32, i32) {
    %c0_i32 = arith.constant 0 : i32
    %c0_i32_0 = arith.constant 0 : i32
    %c0_i32_1 = arith.constant 0 : i32
    return %c0_i32, %c0_i32_0 : i32, i32
  }
  func.func @transform_13(%arg0: i32) -> (i32, i32) {
    %c0_i32 = arith.constant 0 : i32
    %c0_i32_0 = arith.constant 0 : i32
    %c0_i32_1 = arith.constant 0 : i32
    return %c0_i32, %c0_i32_0 : i32, i32
  }
  func.func @transform_14(%arg0: i32) -> (i32, i32) {
    %c0_i32 = arith.constant 0 : i32
    %c0_i32_0 = arith.constant 0 : i32
    %c0_i32_1 = arith.constant 0 : i32
    return %c0_i32, %c0_i32_0 : i32, i32
  }
  func.func @transform_15(%arg0: i32) -> (i32, i32) {
    %c0_i32 = arith.constant 0 : i32
    %c0_i32_0 = arith.constant 0 : i32
    %c0_i32_1 = arith.constant 0 : i32
    return %c0_i32, %c0_i32_0 : i32, i32
  }
  func.func @transform_16(%arg0: i32) -> (i32, i32) {
    %c0_i32 = arith.constant 0 : i32
    %c0_i32_0 = arith.constant 0 : i32
    %c0_i32_1 = arith.constant 0 : i32
    return %c0_i32, %c0_i32_0 : i32, i32
  }
  func.func @transform_17(%arg0: i32) -> (i32, i32) {
    %c0_i32 = arith.constant 0 : i32
    %c0_i32_0 = arith.constant 0 : i32
    %c0_i32_1 = arith.constant 0 : i32
    return %c0_i32, %c0_i32_0 : i32, i32
  }
  func.func @transform_18(%arg0: i32) -> (i32, i32) {
    %c0_i32 = arith.constant 0 : i32
    %c0_i32_0 = arith.constant 0 : i32
    return %arg0, %c0_i32 : i32, i32
  }
}

</mosaic_0001>

<bundles_post_ra>
// kernel: tpu_custom_call.1
= control target key start
LH: loop header
LB: loop body
LE: loop exit
PB: predicated region body
PF: predicated region fallthrough
CT: control target
= control target key end

     0   :  { %s5691_s0 = inlined_call_operand.hbm [shape: f32[16,8,32], index: 0, kind: input, shape index: {}]   ;;  %s5692_s1 = inlined_call_operand.hbm [shape: f32[16,16,32], index: 1, kind: input, shape index: {}]   ;;  %s5693_s2 = inlined_call_operand.vmem [shape: f32[32,32], index: 2, kind: input, shape index: {}]   ;;  %s5694_s3 = inlined_call_operand.vmem [shape: f32[1,32], index: 3, kind: input, shape index: {}]   ;;  %s5695_s4 = inlined_call_operand.hbm [shape: f32[32,32], index: 4, kind: input, shape index: {}]   ;;  %s5696_s5 = inlined_call_operand.vmem [shape: f32[1,32], index: 5, kind: input, shape index: {}]   ;;  %s5697_s6 = inlined_call_operand.hbm [shape: f32[32,32], index: 6, kind: input, shape index: {}]   ;;  %s5698_s7 = inlined_call_operand.hbm [shape: f32[32,32], index: 7, kind: input, shape index: {}]   ;;  %s5699_s8 = inlined_call_operand.vmem [shape: f32[1,32], index: 8, kind: input, shape index: {}]   ;;  %s5700_s9 = inlined_call_operand.hbm [shape: f32[32,32], index: 9, kind: input, shape index: {}]   ;;  %s5701_s10 = inlined_call_operand.vmem [shape: f32[1,32], index: 10, kind: input, shape index: {}]   ;;  %s5702_s11 = inlined_call_operand.hbm [shape: f32[32,32], index: 11, kind: input, shape index: {}]   ;;  %s5703_s12 = inlined_call_operand.hbm [shape: f32[32,32], index: 12, kind: input, shape index: {}]   ;;  %s5704_s13 = inlined_call_operand.vmem [shape: f32[1,32], index: 13, kind: input, shape index: {}]   ;;  %s5705_s14 = inlined_call_operand.hbm [shape: f32[32,32], index: 14, kind: input, shape index: {}]   ;;  %s5706_s15 = inlined_call_operand.vmem [shape: f32[1,32], index: 15, kind: input, shape index: {}]   ;;  %s5707_s16 = inlined_call_operand.vmem [shape: f32[32,5], index: 16, kind: input, shape index: {}]   ;;  %s5708_s17 = inlined_call_operand.vmem [shape: f32[1,5], index: 17, kind: input, shape index: {}]   ;;  %s5709_s18 = inlined_call_operand.vmem [shape: f32[16,5], index: 18, kind: output, shape index: {}]  }
   0x1   :  { %5720 = sst [smem:[#allocation25_spill]] %s5691_s0 }
   0x2   :  { %5721 = sst [smem:[#allocation26_spill]] %s5692_s1 }
   0x3   :  { %5722 = sst [smem:[#allocation27_spill]] %s5693_s2 }
   0x4   :  { %5723 = sst [smem:[#allocation28_spill]] %s5695_s4 }
   0x5   :  { %5724 = sst [smem:[#allocation29_spill]] %s5697_s6 }
   0x6   :  { %5725 = sst [smem:[#allocation30_spill]] %s5698_s7 }
   0x7   :  { %5726 = sst [smem:[#allocation31_spill]] %s5700_s9 }
   0x8   :  { %5727 = sst [smem:[#allocation32_spill]] %s5702_s11 }
   0x9   :  { %5728 = sst [smem:[#allocation33_spill]] %s5703_s12 }
   0xa   :  { %5729 = sst [smem:[#allocation34_spill]] %s5705_s14 }
   0xb   :  { %5730 = sst [smem:[#allocation35_spill]] %s5706_s15 }
   0xc   :  { %5731 = sst [smem:[#allocation36_spill]] %s5708_s17 }
   0xd   :  { %5732 = sst [smem:[#allocation37_spill]] %s5709_s18 }
   0xe   :  { %23 = vsyncpa [#allocation3], 0 }
   0xf   :  { %25 = vsyncpa [#allocation3 + $0x1], 0 }
  0x10   :  { %26 = vsyncpa [#allocation5], 0 }
  0x11   :  { %28 = vsyncpa [#allocation5 + $0x1], 0 }
  0x12   :  { %29 = vsyncpa [#allocation8], 0 }
  0x13   :  { %30 = vsyncpa [#allocation11], 0 }
  0x14   :  { %31 = vsyncpa [#allocation14], 0  ;;  %s4522_s27 = smov 0   ;;  %s4524_s28 = smov 0  }
  0x15   :  { %s4526_s29 = smov 0   ;;  %s4528_s30 = smov 0  }
  0x16 LB: > { %5733 = sst [smem:[#allocation22_spill]] %s4412_s29  ;;  %s4546_s20 = sadd.s32 4294967295, %s4416_s30   ;;  %s4416_s30 = sphi %s4528_s30, %s5759_s30   ;;  %s4412_s29 = sphi %s4526_s29, %s5761_s29   ;;  %s4408_s28 = sphi %s4524_s28, %s5763_s28   ;;  %s4404_s27 = sphi %s4522_s27, %s5762_s27  }
  0x17   : > { %s5734_s4 = sld [smem:[#allocation28_spill]]  ;;  %p3608_p0 = scmp.ge.s32.totalorder %s4416_s30, 1 }
  0x18   : > { %p58_p1 = scmp.eq.s32.totalorder %s4546_s20, 0  ;;  %p456_p2 = scmp.lt.s32.totalorder %s4416_s30, 3 }
  0x19   : > { %s4418_s22 = smov [#allocation6]   ;;  %s5736_s6 = sld [smem:[#allocation29_spill]] }
  0x1a   : > { %p4551_p3 = pnand %p3608_p0, %p456_p2  ;;  %s475_s2 = sshll.u32 %s4418_s22, 4  ;;  %s476_s2 = int_to_ptr.vmem [resolvable:$true] %s475_s2 }
  0x1b   : > { %s5738_s9 = sld [smem:[#allocation31_spill]]  ;;  %s5713_s17 = smov 128  }
  0x1c   : > { %p3880_p4 = pneg %p4551_p3  ;;  %s5715_s15 = smov 8  }
  0x1d   : > { %s473_s1 = sshll.u32 %s5734_s4, 4  ;;  %s4419_s4 = smov [#allocation7]   ;;  %s474_s1 = int_to_ptr.hbm [resolvable:$true] %s473_s1 }
  0x1e   : > { %p4562_p5 = pnand %p3880_p4, %p58_p1  ;;  %s492_s18 = sshll.u32 %s4419_s4, 4  ;;  %s493_s18 = int_to_ptr.vmem [resolvable:$true] %s492_s18 }
  0x1f   : > { %s490_s25 = sshll.u32 %s5736_s6, 4  ;;  %s5739_s12 = sld [smem:[#allocation33_spill]]  ;;  %s491_s25 = int_to_ptr.hbm [resolvable:$true] %s490_s25 }
  0x20   : > { %3883 = dma.hbm_to_vmem [thread:$0]  (!%p4562_p5), %s474_s1, 512, %s476_s2, [#allocation5], %s5713_s17, %s5713_s17, %s5715_s15  }
  0x21   : > { %s521_s22 = sshll.u32 %s5738_s9, 4  ;;  %s4422_s4 = smov [#allocation10]   ;;  %s522_s22 = int_to_ptr.hbm [resolvable:$true] %s521_s22 }
  0x22   : > { %3886 = dma.hbm_to_vmem [thread:$0]  (!%p4562_p5), %s491_s25, 512, %s493_s18, [#allocation8], %s5713_s17, %s5713_s17, %s5715_s15  }
  0x23   : > { %s523_s19 = sshll.u32 %s4422_s4, 4  ;;  %s4423_s1 = smov [#allocation13]   ;;  %s524_s19 = int_to_ptr.vmem [resolvable:$true] %s523_s19 }
  0x24   : > { %3892 = dma.hbm_to_vmem [thread:$0]  (!%p4562_p5), %s522_s22, 512, %s524_s19, [#allocation11], %s5713_s17, %s5713_s17, %s5715_s15  }
  0x25   : > { %s552_s0 = sshll.u32 %s5739_s12, 4  ;;  %s554_s2 = sshll.u32 %s4423_s1, 4  ;;  %s553_s0 = int_to_ptr.hbm [resolvable:$true] %s552_s0  ;;  %s555_s2 = int_to_ptr.vmem [resolvable:$true] %s554_s2 }
  0x26   : > { %s5740_s7 = sld [smem:[#allocation30_spill]]  ;;  %s4424_s22 = smov [#allocation9]  }
  0x27   : > { %3898 = dma.hbm_to_vmem [thread:$0]  (!%p4562_p5), %s553_s0, 512, %s555_s2, [#allocation14], %s5713_s17, %s5713_s17, %s5715_s15  }
  0x28   : > { %s5741_s11 = sld [smem:[#allocation32_spill]]  ;;  %s506_s4 = sshll.u32 %s4424_s22, 4  ;;  %s507_s4 = int_to_ptr.vmem [resolvable:$true] %s506_s4 }
  0x29   : > { %s4425_s6 = smov [#allocation12]   ;;  %s5742_s14 = sld [smem:[#allocation34_spill]] }
  0x2a   : > { %s540_s9 = sshll.u32 %s4425_s6, 4  ;;  %s4426_s2 = smov [#allocation15]   ;;  %s541_s9 = int_to_ptr.vmem [resolvable:$true] %s540_s9 }
  0x2b   : > { %s4617_s25 = sadd.s32 1, %s4416_s30   ;;  %s44_s22 = sadd.s32 1, %s4412_s29 }
  0x2c   : > { %s504_s18 = sshll.u32 %s5740_s7, 4  ;;  %5743 = sst [smem:[#allocation23_spill]] %s4617_s25  ;;  %s505_s18 = int_to_ptr.hbm [resolvable:$true] %s504_s18 }
  0x2d   : > { %3889 = dma.hbm_to_vmem [thread:$0]  (!%p4562_p5), %s505_s18, 512, %s507_s4, [#allocation8], %s5713_s17, %s5713_s17, %s5715_s15  }
  0x2e   : > { %s538_s24 = sshll.u32 %s5741_s11, 4  ;;  %s571_s18 = sshll.u32 %s4426_s2, 4  ;;  %s539_s24 = int_to_ptr.hbm [resolvable:$true] %s538_s24  ;;  %s572_s18 = int_to_ptr.vmem [resolvable:$true] %s571_s18 }
  0x2f   : > { %s569_s1 = sshll.u32 %s5742_s14, 4  ;;  %s41_s23 = ssub.s32 %s4416_s30, %s4617_s25  ;;  %s570_s1 = int_to_ptr.hbm [resolvable:$true] %s569_s1 }
  0x30   : > { %3895 = dma.hbm_to_vmem [thread:$0]  (!%p4562_p5), %s539_s24, 512, %s541_s9, [#allocation11], %s5713_s17, %s5713_s17, %s5715_s15  }
  0x31   : > { %3901 = dma.hbm_to_vmem [thread:$0]  (!%p4562_p5), %s570_s1, 512, %s572_s18, [#allocation14], %s5713_s17, %s5713_s17, %s5715_s15  }
  0x32   : > { %p42_p6 = scmp.eq.s32.totalorder %s41_s23, 0  ;;  %p51_p7 = scmp.ne.s32.totalorder %s4412_s29, %s4408_s28 }
  0x33   : > { %p52_p8 = scmp.eq.s32.totalorder %s4416_s30, 0  ;;  %p57_p9 = scmp.ne.s32.totalorder %s4408_s28, %s4404_s27 }
  0x34   : > { %s4628_s24 = scalar_select %p42_p6, %s4412_s29, %s44_s22  }
  0x35   : > { %p53_p10 = por %p52_p8, %p51_p7  ;;  %p4632_p11 = por %p58_p1, %p57_p9 }
  0x36   : > { %5744 = sst [smem:[#allocation24_spill]] %s4628_s24  ;;  %p3916_p12 = scmp.lt.s32.totalorder %s4416_s30, 2 }
  0x37   : > { %s4638_s4 = sand.u32 1, %s4412_s29   ;;  %s3833_s9 = sshll.u32 %s4416_s30, 6 }
  0x38   : > { %s3617_s6 = sshll.u32 %s4638_s4, 6  ;;  %s5746_s1 = sld [smem:[#allocation25_spill]] }
  0x39   : > { %s598_s2 = scalar_lea.vmem [#allocation2], %s3617_s6  ;;  %p4645_p13 = pnand %p3916_p12, %p53_p10 }
  0x3a   : > { %s606_s18 = sshll.u32 %s598_s2, 4  ;;  %s616_s17 = sand.u32 1, %s4416_s30   ;;  %s607_s18 = int_to_ptr.vmem [resolvable:$true] %s606_s18 }
  0x3b   : > { %s3620_s15 = sshll.u32 %s4638_s4, 7  ;;  %s595_s7 = scalar_lea.sflag [#allocation3], %s4638_s4 }
  0x3c   : > { %p4306_p2 = pneg %p4645_p13 }
  0x3e   : > { %s603_s27 = scalar_lea.hbm %s5746_s1, %s3833_s9  ;;  %s4309_s0 = scalar_lea.hbm %s5746_s1, 128 }
  0x3f   : > { %s604_s23 = sshll.u32 %s603_s27, 4  ;;  %s605_s23 = int_to_ptr.hbm [resolvable:$true] %s604_s23 }
  0x40   : > { %s4302_s11 = sshra.s32 %s605_s23, 4  ;;  %s4303_s11 = int_to_ptr.hbm [resolvable:$true] %s4302_s11 }
  0x41   : > { %s4304_s12 = scalar_lea.hbm %s4303_s11, 64  ;;  %p4310_p6 = scmp.lt.s32.totalorder %s4303_s11, %s5746_s1 }
  0x42   : > { %p4305_p0 = scmp.ne.s32.totalorder %s4303_s11, %s4304_s12  ;;  %p4311_p7 = scmp.lt.s32.totalorder %s4309_s0, %s4304_s12 }
  0x44   : > { %p4307_p4 = pnand %p4306_p2, %p4305_p0  ;;  %p4312_p8 = por %p4311_p7, %p4310_p6 }
  0x46   : > { %p4308_p5 = pneg %p4307_p4 }
  0x48   : > { %p4313_p9 = pnand %p4312_p8, %p4308_p5 }
  0x4a   : > { %4316 = shalt.err (!%p4313_p9)
}
  0x4b   : > { %s5748_s4 = smov 8   ;;  %s5749_s2 = smov 128  }
  0x4c   : > { %3905 = dma.hbm_to_vmem [thread:$0]  (!%p4645_p13), %s605_s23, 1024, %s607_s18, %s595_s7, %s5749_s2, %s5749_s2, %s5748_s4  }
  0x4d   : > { %s3835_s14 = sshll.u32 %s4416_s30, 7  ;;  %s5750_s9 = sld [smem:[#allocation26_spill]] }
  0x4e   : > { %s620_s25 = scalar_lea.vmem [#allocation4], %s3620_s15  ;;  %s617_s12 = scalar_lea.sflag [#allocation5], %s616_s17 }
  0x4f   : > { %s629_s19 = sshll.u32 %s620_s25, 4  ;;  %s630_s19 = int_to_ptr.vmem [resolvable:$true] %s629_s19 }
  0x53   : > { %s626_s29 = scalar_lea.hbm %s5750_s9, %s3835_s14  ;;  %s4339_s18 = scalar_lea.hbm %s5750_s9, 256 }
  0x54   : > { %s627_s11 = sshll.u32 %s626_s29, 4  ;;  %s628_s11 = int_to_ptr.hbm [resolvable:$true] %s627_s11 }
  0x55   : > { %s4332_s0 = sshra.s32 %s628_s11, 4  ;;  %s4333_s0 = int_to_ptr.hbm [resolvable:$true] %s4332_s0 }
  0x56   : > { %s4334_s27 = scalar_lea.hbm %s4333_s0, 128  ;;  %p4340_p4 = scmp.lt.s32.totalorder %s4333_s0, %s5750_s9 }
  0x57   : > { %p4335_p10 = scmp.ne.s32.totalorder %s4333_s0, %s4334_s27  ;;  %p4341_p5 = scmp.lt.s32.totalorder %s4339_s18, %s4334_s27 }
  0x59   : > { %p4337_p12 = pnand %p4335_p10, %p4306_p2  ;;  %p4342_p6 = por %p4341_p5, %p4340_p4 }
  0x5b   : > { %p4338_p0 = pneg %p4337_p12 }
  0x5d   : > { %p4343_p7 = pnand %p4342_p6, %p4338_p0 }
  0x5f   : > { %4346 = shalt.err (!%p4343_p7)
}
  0x60   : > { %3908 = dma.hbm_to_vmem [thread:$0]  (!%p4645_p13), %s628_s11, 2048, %s630_s19, %s617_s12, %s5749_s2, %s5749_s2, %s5748_s4  }
  0x61   : > { %641 = sbr.rel (%p4551_p3) target bundleno = 2374 (0x946), region = 92  ;;  %s643_s15 = sand.u32 (!%p4551_p3), 1, %s4408_s28  }
  0x62   : > { %s3625_s17 = sshll.u32 (!%p4551_p3), %s643_s15, 6  ;;  %s644_s29 = scalar_lea.sflag (!%p4551_p3), [#allocation3], %s643_s15 }
  0x63   : > { %s4689_s25 = scalar_lea.vmem (!%p4551_p3), [#allocation2], %s3625_s17 }
  0x66   : > { %4379 = dma.done.wait (%p4632_p11), %s644_s29, 1024  }
  0x67   : > { %4381 = vsyncadd (%p4632_p11), %s644_s29, 4294966272  ;;  %s653_s23 = sand.u32 1, %s4546_s20   ;;  %s3626_s22 = sshll.u32 %s643_s15, 7 }
  0x68   : > { %s654_s4 = scalar_lea.sflag [#allocation5], %s653_s23  ;;  %s4696_s2 = scalar_lea.vmem [#allocation4], %s3626_s22 }
  0x69   : > { %4383 = dma.done.wait (%p4632_p11), %s654_s4, 2048  }
  0x6a   : > { %4385 = vsyncadd (%p4632_p11), %s654_s4, 4294965248 }
  0x6b   : > { %4387 = dma.done.wait (%p58_p1), [#allocation5], 512  }
  0x6c   : > { %4389 = vsyncadd (%p58_p1), [#allocation5], 4294966784 }
  0x6d   : > { %4391 = dma.done.wait (%p58_p1), [#allocation8], 1024  }
  0x6e   : > { %4393 = vsyncadd (%p58_p1), [#allocation8], 4294966272 }
  0x6f   : > { %4395 = dma.done.wait (%p58_p1), [#allocation11], 1024  }
  0x70   : > { %4397 = vsyncadd (%p58_p1), [#allocation11], 4294966272 }
  0x71   : > { %4399 = dma.done.wait (%p58_p1), [#allocation14], 1024  }
  0x72   : > { %4401 = vsyncadd (%p58_p1), [#allocation14], 4294966272  ;;  %s5751_s6 = sld [smem:[#allocation27_spill]]  ;;  %v756_v4 = vld [vmem:[%s4689_s25] sm:$0xff]  ;;  %vm788_vm0 = vcmask 261120   ;;  %v757_v5 = vld [vmem:[%s4689_s25 + $0x8] sm:$0xff] }
  0x73   : > { %v4735_v6 = vld [vmem:[%s4689_s25 + $0x10] sm:$0xff]  ;;  %v4740_v7 = vld [vmem:[%s4689_s25 + $0x18] sm:$0xff]  ;;  %v760_v8 = vld [vmem:[%s4689_s25 + $0x20] sm:$0xff]  ;;  %vm1433_vm1 = vcmask 130048   ;;  %s5756_s30 = sld [smem:[#allocation35_spill]]  ;;  %p752_p1 = scmp.lt.s32.totalorder %s4546_s20, 1 }
  0x74   : > { %v761_v9 = vld [vmem:[%s4689_s25 + $0x28] sm:$0xff]  ;;  %v4749_v10 = vld [vmem:[%s4689_s25 + $0x30] sm:$0xff]  ;;  %v4754_v11 = vld [vmem:[%s4689_s25 + $0x38] sm:$0xff]  ;;  %s5757_s15 = sld [smem:[#allocation36_spill]] }
  0x75   : > { %v4759_v12 = vld [vmem:[%s4696_s2] sm:$0xff]  ;;  %v4764_v13 = vld [vmem:[%s4696_s2 + $0x8] sm:$0xff]  ;;  %v4769_v14 = vld [vmem:[%s4696_s2 + $0x10] sm:$0xff]  ;;  %s5765_s20 = smov (!%p752_p1, %s4546_s20), 1 }
  0x76   : > { %v4774_v15 = vld [vmem:[%s4696_s2 + $0x18] sm:$0xff]  ;;  %v4779_v16 = vld [vmem:[%s4696_s2 + $0x20] sm:$0xff]  ;;  %v864_v18 = vld [vmem:[#allocation6 + $0x10] sm:$0xff]  ;;  %s3634_s18 = sshll.u32 %s5765_s20, 3 }
  0x77   : > { %v865_v17 = vld [vmem:[#allocation6 + $0x18] sm:$0xff]  ;;  %v4784_v19 = vld [vmem:[%s4696_s2 + $0x28] sm:$0xff]  ;;  %v862_v21 = vld [vmem:[#allocation6] sm:$0xff] }
  0x78   : > { %v783_v0 = vld [vmem:[%s5751_s6 + $0x18] sm:$0xff]  ;;  %v782_v1 = vld [vmem:[%s5751_s6 + $0x10] sm:$0xff]  ;;  %v781_v2 = vld [vmem:[%s5751_s6 + $0x8] sm:$0xff]  ;;  %3840 = vmatpush.msra.mxu1 %v865_v17  ;;  %3841 = vmatpush.msra.mxu3 %v865_v17 }
  0x79   : > { %825 = vmatpush.msra.mxu0 %v783_v0  ;;  %3836 = vmatpush.msra.mxu2 %v783_v0  ;;  %v780_v3 = vld [vmem:[%s5751_s6] sm:$0xff]  ;;  %v863_v20 = vld [vmem:[#allocation6 + $0x8] sm:$0xff]  ;;  %v4789_v22 = vld [vmem:[%s4696_s2 + $0x30] sm:$0xff] }
  0x7a   : > { %3842 = vmatpush.msra.mxu1 %v864_v18  ;;  %3843 = vmatpush.msra.mxu3 %v864_v18  ;;  %v4794_v23 = vld [vmem:[%s4696_s2 + $0x38] sm:$0xff]  ;;  %v4799_v24 = vld [vmem:[%s4696_s2 + $0x40] sm:$0xff]  ;;  %v4809_v27 = vld [vmem:[%s4696_s2 + $0x48] sm:$0xff] }
  0x7b   : > { %826 = vmatpush.msra.mxu0 %v782_v1  ;;  %3837 = vmatpush.msra.mxu2 %v782_v1  ;;  %v4806_v25 = vld [vmem:[%s5694_s3] ss:$0 sm:$0xff]  ;;  %v4817_v32 = vld [vmem:[%s4696_s2 + $0x50] sm:$0xff]  ;;  %v4824_v36 = vld [vmem:[%s4696_s2 + $0x58] sm:$0xff] }
  0x7c   : > { %3844 = vmatpush.msra.mxu1 %v863_v20  ;;  %3845 = vmatpush.msra.mxu3 %v863_v20  ;;  %v4831_v40 = vld [vmem:[%s4696_s2 + $0x60] sm:$0xff]  ;;  %v4838_v44 = vld [vmem:[%s4696_s2 + $0x68] sm:$0xff]  ;;  %v4845_v48 = vld [vmem:[%s4696_s2 + $0x70] sm:$0xff] }
  0x7d   : > { %827 = vmatpush.msra.mxu0 %v781_v2  ;;  %3838 = vmatpush.msra.mxu2 %v781_v2  ;;  %v4852_v52 = vld [vmem:[%s4696_s2 + $0x78] sm:$0xff] }
  0x7e   : > { %3846 = vmatpush.msra.mxu1 %v862_v21  ;;  %3847 = vmatpush.msra.mxu3 %v862_v21 }
  0x7f   : > { %828 = vmatpush.msra.mxu0 %v780_v3  ;;  %3839 = vmatpush.msra.mxu2 %v780_v3 }
  0x80   : > { %3635 = vmatmul.msk.f32.vlgmr.msra.gmra.mxu0 %vm788_vm0, %v756_v4  ;;  %3636 = vmatmul.msk.f32.vlgmr.msra.gmra.mxu2 %vm788_vm0, %v757_v5 }
  0x81   : > { %1003 = vmatpush.msrb.mxu2 %v783_v0  ;;  %906 = vmatpush.msrb.mxu0 %v865_v17 }
  0x82   : > { %1132 = vmatpush.msrb.mxu3 %v865_v17 }
  0x83   : > { %1004 = vmatpush.msrb.mxu2 %v782_v1  ;;  %907 = vmatpush.msrb.mxu0 %v864_v18 }
  0x84   : > { %1133 = vmatpush.msrb.mxu3 %v864_v18 }
  0x85   : > { %1005 = vmatpush.msrb.mxu2 %v781_v2  ;;  %908 = vmatpush.msrb.mxu0 %v863_v20 }
  0x86   : > { %1134 = vmatpush.msrb.mxu3 %v863_v20 }
  0x87   : > { %1006 = vmatpush.msrb.mxu2 %v780_v3  ;;  %909 = vmatpush.msrb.mxu0 %v862_v21 }
  0x88   : > { %3637 = vmatmul.msk.f32.gmra.mxu2 %vm788_vm0, %v4735_v6  ;;  %1135 = vmatpush.msrb.mxu3 %v862_v21 }
  0x90   : > { %3638 = vmatmul.msk.f32.gmra.mxu2 %vm788_vm0, %v4740_v7 }
  0x98   : > { %3639 = vmatmul.msk.f32.gmra.mxu2 %vm788_vm0, %v760_v8 }
  0xa0   : > { %3640 = vmatmul.msk.f32.gmra.mxu2 %vm788_vm0, %v761_v9 }
  0xa8   : > { %3641 = vmatmul.msk.f32.gmra.mxu2 %vm788_vm0, %v4749_v10 }
  0xb0   : > { %3642 = vmatmul.msk.f32.gmra.mxu2 %vm788_vm0, %v4754_v11 }
  0xb8   : > { %3651 = vmatmul.msk.f32.vlgmr.msrb.gmra.mxu2 %vm788_vm0, %v4759_v12 }
  0xc0   : > { %3652 = vmatmul.msk.f32.gmra.mxu2 %vm788_vm0, %v4764_v13 }
  0xc8   : > { %3653 = vmatmul.msk.f32.gmra.mxu2 %vm788_vm0, %v4769_v14 }
  0xd0   : > { %3654 = vmatmul.msk.f32.gmra.mxu2 %vm788_vm0, %v4774_v15 }
  0xd8   : > { %3655 = vmatmul.msk.f32.gmra.mxu2 %vm788_vm0, %v4779_v16 }
  0xe0   : > { %3656 = vmatmul.msk.f32.gmra.mxu2 %vm788_vm0, %v4784_v19 }
  0xe8   : > { %3657 = vmatmul.msk.f32.gmra.mxu2 %vm788_vm0, %v4789_v22 }
  0xf0   : > { %3658 = vmatmul.msk.f32.gmra.mxu2 %vm788_vm0, %v4794_v23 }
  0xf8   : > { %3659 = vmatmul.msk.f32.gmra.mxu2 %vm788_vm0, %v4799_v24 }
  0xfd   : > { %v830_v26 = vpop.f32.mrf.mxu0 }
  0xfe   : > { %v831_v28 = vadd.f32 %v4806_v25, %v830_v26 }
 0x100   : > { %v854_v29 = vmax.f32 %v831_v28, 0.0  ;;  %3660 = vmatmul.msk.f32.gmra.mxu2 %vm788_vm0, %v4809_v27 }
 0x102   : > { %3643 = vmatmul.msk.f32.vlgmr.msrb.gmra.mxu0 %vm788_vm0, %v854_v29 }
 0x103   : > { %v833_v30 = vpop.f32.mrf.mxu2 }
 0x104   : > { %v834_v31 = vadd.f32 %v4806_v25, %v833_v30 }
 0x106   : > { %v855_v33 = vmax.f32 %v834_v31, 0.0 }
 0x108   : > { %3661 = vmatmul.msk.f32.gmra.mxu2 %vm788_vm0, %v4817_v32 }
 0x10a   : > { %3644 = vmatmul.msk.f32.gmra.mxu0 %vm788_vm0, %v855_v33 }
 0x10b   : > { %v836_v34 = vpop.f32.mrf.mxu2 }
 0x10c   : > { %v837_v35 = vadd.f32 %v4806_v25, %v836_v34 }
 0x10e   : > { %v856_v37 = vmax.f32 %v837_v35, 0.0 }
 0x110   : > { %3645 = vmatmul.msk.f32.vlgmr.msra.gmra.mxu1 %vm788_vm0, %v856_v37  ;;  %3662 = vmatmul.msk.f32.gmra.mxu2 %vm788_vm0, %v4824_v36 }
 0x113   : > { %v839_v38 = vpop.f32.mrf.mxu2 }
 0x114   : > { %v840_v39 = vadd.f32 %v4806_v25, %v839_v38 }
 0x116   : > { %v857_v41 = vmax.f32 %v840_v39, 0.0 }
 0x118   : > { %3646 = vmatmul.msk.f32.gmra.mxu1 %vm788_vm0, %v857_v41  ;;  %3663 = vmatmul.msk.f32.gmra.mxu2 %vm788_vm0, %v4831_v40 }
 0x11b   : > { %v842_v42 = vpop.f32.mrf.mxu2 }
 0x11c   : > { %v843_v43 = vadd.f32 %v4806_v25, %v842_v42  ;;  %v4882_v42 = vld [vmem:[%s5696_s5] ss:$0 sm:$0xff] }
 0x11e   : > { %v858_v45 = vmax.f32 %v843_v43, 0.0 }
 0x120   : > { %3647 = vmatmul.msk.f32.gmra.mxu1 %vm788_vm0, %v858_v45  ;;  %3664 = vmatmul.msk.f32.gmra.mxu2 %vm788_vm0, %v4838_v44 }
 0x123   : > { %v845_v46 = vpop.f32.mrf.mxu2 }
 0x124   : > { %v846_v47 = vadd.f32 %v4806_v25, %v845_v46 }
 0x126   : > { %v859_v49 = vmax.f32 %v846_v47, 0.0 }
 0x128   : > { %3648 = vmatmul.msk.f32.vlgmr.msra.gmra.mxu3 %vm788_vm0, %v859_v49  ;;  %3665 = vmatmul.msk.f32.gmra.mxu2 %vm788_vm0, %v4845_v48 }
 0x12b   : > { %v848_v50 = vpop.f32.mrf.mxu2 }
 0x12c   : > { %v849_v51 = vadd.f32 %v4806_v25, %v848_v50 }
 0x12e   : > { %v860_v53 = vmax.f32 %v849_v51, 0.0 }
 0x130   : > { %3649 = vmatmul.msk.f32.gmra.mxu3 %vm788_vm0, %v860_v53  ;;  %3666 = vmatmul.msk.f32.gmra.mxu2 %vm788_vm0, %v4852_v52 }
 0x133   : > { %v851_v54 = vpop.f32.mrf.mxu2 }
 0x134   : > { %v852_v55 = vadd.f32 %v4806_v25, %v851_v54 }
 0x136   : > { %v861_v56 = vmax.f32 %v852_v55, 0.0 }
 0x138   : > { %3650 = vmatmul.msk.f32.gmra.mxu3 %vm788_vm0, %v861_v56 }
 0x13b   : > { %v1008_v57 = vpop.f32.mrf.mxu2 }
 0x13c   : > { %v1009_v58 = vadd.f32 %v4806_v25, %v1008_v57 }
 0x13e   : > { %v1056_v59 = vmax.f32 %v1009_v58, 0.0 }
 0x140   : > { %3667 = vmatmul.msk.f32.vlgmr.msrb.gmra.mxu3 %vm788_vm0, %v1056_v59 }
 0x143   : > { %v1011_v60 = vpop.f32.mrf.mxu2 }
 0x144   : > { %v1012_v61 = vadd.f32 %v4806_v25, %v1011_v60 }
 0x146   : > { %v1057_v62 = vmax.f32 %v1012_v61, 0.0 }
 0x148   : > { %3668 = vmatmul.msk.f32.gmra.mxu3 %vm788_vm0, %v1057_v62 }
 0x14b   : > { %v1014_v63 = vpop.f32.mrf.mxu2 }
 0x14c   : > { %v1015_v0 = vadd.f32 %v4806_v25, %v1014_v63 }
 0x14e   : > { %v1058_v1 = vmax.f32 %v1015_v0, 0.0 }
 0x150   : > { %3669 = vmatmul.msk.f32.gmra.mxu3 %vm788_vm0, %v1058_v1 }
 0x153   : > { %v1017_v2 = vpop.f32.mrf.mxu2 }
 0x154   : > { %v1018_v3 = vadd.f32 %v4806_v25, %v1017_v2 }
 0x156   : > { %v1059_v4 = vmax.f32 %v1018_v3, 0.0 }
 0x158   : > { %3670 = vmatmul.msk.f32.gmra.mxu3 %vm788_vm0, %v1059_v4 }
 0x15b   : > { %v1020_v5 = vpop.f32.mrf.mxu2 }
 0x15c   : > { %v1021_v8 = vadd.f32 %v4806_v25, %v1020_v5 }
 0x15e   : > { %v1060_v9 = vmax.f32 %v1021_v8, 0.0 }
 0x160   : > { %3671 = vmatmul.msk.f32.gmra.mxu3 %vm788_vm0, %v1060_v9 }
 0x163   : > { %v1023_v17 = vpop.f32.mrf.mxu2 }
 0x164   : > { %v1024_v18 = vadd.f32 %v4806_v25, %v1023_v17 }
 0x166   : > { %v1061_v20 = vmax.f32 %v1024_v18, 0.0 }
 0x168   : > { %3672 = vmatmul.msk.f32.gmra.mxu3 %vm788_vm0, %v1061_v20 }
 0x16b   : > { %v1026_v21 = vpop.f32.mrf.mxu2 }
 0x16c   : > { %v1027_v26 = vadd.f32 %v4806_v25, %v1026_v21 }
 0x16e   : > { %v1062_v28 = vmax.f32 %v1027_v26, 0.0 }
 0x170   : > { %3673 = vmatmul.msk.f32.gmra.mxu3 %vm788_vm0, %v1062_v28 }
 0x173   : > { %v1029_v29 = vpop.f32.mrf.mxu2 }
 0x174   : > { %v1030_v30 = vadd.f32 %v4806_v25, %v1029_v29 }
 0x176   : > { %v1063_v31 = vmax.f32 %v1030_v30, 0.0 }
 0x178   : > { %3674 = vmatmul.msk.f32.gmra.mxu3 %vm788_vm0, %v1063_v31 }
 0x17b   : > { %v1032_v33 = vpop.f32.mrf.mxu2 }
 0x17c   : > { %v1033_v34 = vadd.f32 %v4806_v25, %v1032_v33 }
 0x17e   : > { %v1064_v35 = vmax.f32 %v1033_v34, 0.0 }
 0x17f   : > { %v911_v29 = vpop.f32.mrf.mxu0 }
 0x180   : > { %3675 = vmatmul.msk.f32.gmra.mxu3 %vm788_vm0, %v1064_v35  ;;  %v4934_v33 = vadd.f32 %v4882_v42, %v911_v29 }
 0x182   : > { %v935_v35 = vmax.f32 %v4934_v33, 0.0 }
 0x183   : > { %v1035_v37 = vpop.f32.mrf.mxu2 }
 0x184   : > { %v1036_v38 = vadd.f32 %v4806_v25, %v1035_v37 }
 0x186   : > { %v1065_v39 = vmax.f32 %v1036_v38, 0.0 }
 0x188   : > { %3676 = vmatmul.msk.f32.gmra.mxu3 %vm788_vm0, %v1065_v39 }
 0x18b   : > { %v1038_v41 = vpop.f32.mrf.mxu2 }
 0x18c   : > { %v1039_v43 = vadd.f32 %v4806_v25, %v1038_v41  ;;  %v914_v41 = vpop.f32.mrf.mxu0 }
 0x18d   : > { %v917_v45 = vpop.f32.mrf.mxu1 }
 0x18e   : > { %v1066_v46 = vmax.f32 %v1039_v43, 0.0  ;;  %v4886_v47 = vadd.f32 %v4882_v42, %v917_v45 }
 0x190   : > { %v937_v49 = vmax.f32 %v4886_v47, 0.0  ;;  %3677 = vmatmul.msk.f32.gmra.mxu3 %vm788_vm0, %v1066_v46  ;;  %v4958_v46 = vadd.f32 %v4882_v42, %v914_v41 }
 0x192   : > { %3721 = vmatpush.xpose.msk.msra.mxu2 %vm788_vm0, %v937_v49 }
 0x193   : > { %v1041_v50 = vpop.f32.mrf.mxu2 }
 0x194   : > { %v1042_v51 = vadd.f32 %v4806_v25, %v1041_v50 }
 0x195   : > { %v920_v53 = vpop.f32.mrf.mxu1 }
 0x196   : > { %v1067_v54 = vmax.f32 %v1042_v51, 0.0  ;;  %v4895_v55 = vadd.f32 %v4882_v42, %v920_v53 }
 0x198   : > { %v938_v56 = vmax.f32 %v4895_v55, 0.0  ;;  %3678 = vmatmul.msk.f32.gmra.mxu3 %vm788_vm0, %v1067_v54  ;;  %v936_v54 = vmax.f32 %v4958_v46, 0.0 }
 0x19a   : > { %3724 = vmatpush.xpose.msk.msra.mxu3 %vm788_vm0, %v938_v56 }
 0x19b   : > { %v1044_v57 = vpop.f32.mrf.mxu2 }
 0x19c   : > { %v1045_v58 = vadd.f32 %v4806_v25, %v1044_v57 }
 0x19e   : > { %v1068_v59 = vmax.f32 %v1045_v58, 0.0 }
 0x1a0   : > { %3679 = vmatmul.msk.f32.gmra.mxu3 %vm788_vm0, %v1068_v59 }
 0x1a3   : > { %v1047_v60 = vpop.f32.mrf.mxu2 }
 0x1a4   : > { %v1048_v61 = vadd.f32 %v4806_v25, %v1047_v60 }
 0x1a6   : > { %v1069_v62 = vmax.f32 %v1048_v61, 0.0 }
 0x1a8   : > { %3680 = vmatmul.msk.f32.gmra.mxu3 %vm788_vm0, %v1069_v62 }
 0x1ab   : > { %v4906_v63 = vpop.f32.mrf.mxu3  ;;  %v1050_v0 = vpop.f32.mrf.mxu2 }
 0x1ac   : > { %v1051_v1 = vadd.f32 %v4806_v25, %v1050_v0 }
 0x1ae   : > { %v1070_v2 = vmax.f32 %v1051_v1, 0.0 }
 0x1b0   : > { %3681 = vmatmul.msk.f32.gmra.mxu3 %vm788_vm0, %v1070_v2 }
 0x1b3   : > { %v929_v3 = vpop.f32.mrf.mxu3  ;;  %v1053_v4 = vpop.f32.mrf.mxu2 }
 0x1b4   : > { %v4911_v5 = vadd.f32 %v4882_v42, %v929_v3  ;;  %v1054_v8 = vadd.f32 %v4806_v25, %v1053_v4 }
 0x1b6   : > { %v941_v9 = vmax.f32 %v4911_v5, 0.0  ;;  %v1071_v17 = vmax.f32 %v1054_v8, 0.0 }
 0x1b8   : > { %3682 = vmatmul.msk.f32.gmra.mxu3 %vm788_vm0, %v1071_v17  ;;  %3733 = vmatpush.xpose.msk.msrb.mxu2 %vm788_vm0, %v941_v9 }
 0x1bb   : > { %v932_v18 = vpop.f32.mrf.mxu3 }
 0x1bc   : > { %v4920_v20 = vadd.f32 %v4882_v42, %v932_v18 }
 0x1be   : > { %v942_v21 = vmax.f32 %v4920_v20, 0.0 }
 0x1c0   : > { %3736 = vmatpush.xpose.msk.msrb.mxu3 %vm788_vm0, %v942_v21 }
 0x1c3   : > { %v1137_v25 = vpop.f32.mrf.mxu3 }
 0x1c4   : > { %v4930_v30 = vadd.f32 %v4882_v42, %v1137_v25 }
 0x1c6   : > { %v1185_v34 = vmax.f32 %v4930_v30, 0.0  ;;  %v5152_v30 = vld [vmem:[%s4689_s25 + $0x8] sm:$0xff] }
 0x1cb   : > { %v1140_v26 = vpop.f32.mrf.mxu3 }
 0x1cc   : > { %v4927_v28 = vadd.f32 %v4882_v42, %v1140_v26 }
 0x1ce   : > { %v1186_v31 = vmax.f32 %v4927_v28, 0.0  ;;  %v5169_v28 = vld [vmem:[%s4689_s25 + $0x28] sm:$0xff] }
 0x1d0   : > { %3683 = vmatpush.xpose.msk.msra.mxu0 %vm788_vm0, %v1186_v31 }
 0x1d3   : > { %v1143_v37 = vpop.f32.mrf.mxu3 }
 0x1d4   : > { %3684 = vmatpush.xpose.msk.msra.mxu0 %vm788_vm0, %v1185_v34  ;;  %v4951_v43 = vadd.f32 %v4882_v42, %v1143_v37 }
 0x1d6   : > { %v1187_v50 = vmax.f32 %v4951_v43, 0.0 }
 0x1d7   : > { %3685 = vmatmul.msk.f32.vlgmr.msra.gmra.mxu0 %vm788_vm0, %v935_v35 }
 0x1db   : > { %v1146_v38 = vpop.f32.mrf.mxu3 }
 0x1dc   : > { %v4948_v39 = vadd.f32 %v4882_v42, %v1146_v38  ;;  %v5021_v38 = vadd.f32 %v4882_v42, %v4906_v63 }
 0x1de   : > { %v1188_v45 = vmax.f32 %v4948_v39, 0.0 }
 0x1e0   : > { %3686 = vmatpush.xpose.msk.msrb.mxu1 %vm788_vm0, %v1188_v45 }
 0x1e3   : > { %v1149_v51 = vpop.f32.mrf.mxu3 }
 0x1e4   : > { %v1150_v53 = vadd.f32 %v4882_v42, %v1149_v51  ;;  %3687 = vmatpush.xpose.msk.msrb.mxu1 %vm788_vm0, %v1187_v50 }
 0x1e6   : > { %v1189_v57 = vmax.f32 %v1150_v53, 0.0 }
 0x1e7   : > { %3688 = vmatmul.msk.f32.vlgmr.msrb.gmra.mxu1 %vm788_vm0, %v936_v54 }
 0x1e8   : > { %3722 = vmatmul.msk.f32.vlgmr.msra.gmra.mxu2 %vm788_vm0, %v1189_v57 }
 0x1e9   : > { %2458 = vmatpush.msra.mxu2 %v4735_v6 }
 0x1eb   : > { %v1152_v58 = vpop.f32.mrf.mxu3 }
 0x1ec   : > { %v1153_v59 = vadd.f32 %v4882_v42, %v1152_v58 }
 0x1ee   : > { %v1190_v60 = vmax.f32 %v1153_v59, 0.0 }
 0x1f0   : > { %3689 = vmatpush.xpose.msk.msrb.mxu0 %vm788_vm0, %v1190_v60  ;;  %3723 = vmatmul.msk.f32.gmra.mxu2 %vm788_vm0, %v1190_v60 }
 0x1f3   : > { %v1155_v61 = vpop.f32.mrf.mxu3 }
 0x1f4   : > { %v1156_v62 = vadd.f32 %v4882_v42, %v1155_v61  ;;  %3690 = vmatpush.xpose.msk.msrb.mxu0 %vm788_vm0, %v1189_v57  ;;  %v940_v57 = vmax.f32 %v5021_v38, 0.0 }
 0x1f6   : > { %v1191_v0 = vmax.f32 %v1156_v62, 0.0 }
 0x1f7   : > { %3691 = vmatmul.msk.f32.vlgmr.msrb.gmra.mxu0 %vm788_vm0, %v937_v49 }
 0x1f8   : > { %3725 = vmatmul.msk.f32.vlgmr.msra.gmra.mxu3 %vm788_vm0, %v1191_v0 }
 0x1f9   : > { %2487 = vmatpush.msra.mxu3 %v4740_v7  ;;  %v923_v7 = vpop.f32.mrf.mxu1 }
 0x1fa   : > { %v4999_v17 = vadd.f32 %v4882_v42, %v923_v7 }
 0x1fb   : > { %v1158_v6 = vpop.f32.mrf.mxu3 }
 0x1fc   : > { %v1159_v1 = vadd.f32 %v4882_v42, %v1158_v6  ;;  %v939_v18 = vmax.f32 %v4999_v17, 0.0 }
 0x1fe   : > { %v1192_v2 = vmax.f32 %v1159_v1, 0.0 }
 0x200   : > { %3692 = vmatpush.xpose.msk.msra.mxu1 %vm788_vm0, %v1192_v2  ;;  %3726 = vmatmul.msk.f32.gmra.mxu3 %vm788_vm0, %v1192_v2 }
 0x203   : > { %v1161_v3 = vpop.f32.mrf.mxu3 }
 0x204   : > { %3693 = vmatpush.xpose.msk.msra.mxu1 %vm788_vm0, %v1191_v0  ;;  %v4992_v4 = vadd.f32 %v4882_v42, %v1161_v3 }
 0x206   : > { %v1193_v55 = vmax.f32 %v4992_v4, 0.0 }
 0x207   : > { %3694 = vmatmul.msk.f32.vlgmr.msra.gmra.mxu1 %vm788_vm0, %v938_v56 }
 0x20b   : > { %v1164_v47 = vpop.f32.mrf.mxu3 }
 0x20c   : > { %v4989_v49 = vadd.f32 %v4882_v42, %v1164_v47 }
 0x20e   : > { %v1194_v8 = vmax.f32 %v4989_v49, 0.0 }
 0x210   : > { %3695 = vmatpush.xpose.msk.msra.mxu0 %vm788_vm0, %v1194_v8 }
 0x213   : > { %v1167_v56 = vpop.f32.mrf.mxu3 }
 0x214   : > { %3696 = vmatpush.xpose.msk.msra.mxu0 %vm788_vm0, %v1193_v55  ;;  %v5013_v29 = vadd.f32 %v4882_v42, %v1167_v56 }
 0x216   : > { %v1195_v41 = vmax.f32 %v5013_v29, 0.0 }
 0x217   : > { %3697 = vmatmul.msk.f32.vlgmr.msra.gmra.mxu0 %vm788_vm0, %v939_v18 }
 0x21b   : > { %v1170_v25 = vpop.f32.mrf.mxu3 }
 0x21c   : > { %v5010_v26 = vadd.f32 %v4882_v42, %v1170_v25 }
 0x21e   : > { %v1196_v37 = vmax.f32 %v5010_v26, 0.0 }
 0x220   : > { %3698 = vmatpush.xpose.msk.msrb.mxu1 %vm788_vm0, %v1196_v37 }
 0x223   : > { %v1173_v51 = vpop.f32.mrf.mxu3 }
 0x224   : > { %v1174_v53 = vadd.f32 %v4882_v42, %v1173_v51  ;;  %3699 = vmatpush.xpose.msk.msrb.mxu1 %vm788_vm0, %v1195_v41 }
 0x226   : > { %v1197_v58 = vmax.f32 %v1174_v53, 0.0 }
 0x227   : > { %3700 = vmatmul.msk.f32.vlgmr.msrb.gmra.mxu1 %vm788_vm0, %v940_v57 }
 0x228   : > { %3734 = vmatmul.msk.f32.vlgmr.msrb.gmra.mxu2 %vm788_vm0, %v1197_v58 }
 0x229   : > { %2574 = vmatpush.msrb.mxu2 %v4749_v10 }
 0x22b   : > { %v1176_v63 = vpop.f32.mrf.mxu3 }
 0x22c   : > { %v1177_v59 = vadd.f32 %v4882_v42, %v1176_v63 }
 0x22e   : > { %v1198_v60 = vmax.f32 %v1177_v59, 0.0 }
 0x230   : > { %3701 = vmatpush.xpose.msk.msrb.mxu0 %vm788_vm0, %v1198_v60  ;;  %3735 = vmatmul.msk.f32.gmra.mxu2 %vm788_vm0, %v1198_v60 }
 0x233   : > { %v1179_v61 = vpop.f32.mrf.mxu3 }
 0x234   : > { %v1180_v62 = vadd.f32 %v4882_v42, %v1179_v61  ;;  %3702 = vmatpush.xpose.msk.msrb.mxu0 %vm788_vm0, %v1197_v58 }
 0x236   : > { %v1199_v0 = vmax.f32 %v1180_v62, 0.0 }
 0x237   : > { %3703 = vmatmul.msk.f32.vlgmr.msrb.gmra.mxu0 %vm788_vm0, %v941_v9 }
 0x238   : > { %1643 = vmatpush.msra.mxu0 %v4764_v13  ;;  %3737 = vmatmul.msk.f32.vlgmr.msrb.gmra.mxu3 %vm788_vm0, %v1199_v0 }
 0x239   : > { %2603 = vmatpush.msrb.mxu3 %v4754_v11 }
 0x23a   : > { %1644 = vmatpush.msra.mxu0 %v4759_v12 }
 0x23b   : > { %v1182_v10 = vpop.f32.mrf.mxu3 }
 0x23c   : > { %1689 = vmatpush.msrb.mxu0 %v4784_v19  ;;  %v1183_v6 = vadd.f32 %v4882_v42, %v1182_v10 }
 0x23e   : > { %1690 = vmatpush.msrb.mxu0 %v4779_v16  ;;  %v1200_v1 = vmax.f32 %v1183_v6, 0.0 }
 0x240   : > { %3704 = vmatpush.xpose.msk.msra.mxu1 %vm788_vm0, %v1200_v1  ;;  %3738 = vmatmul.msk.f32.gmra.mxu3 %vm788_vm0, %v1200_v1 }
 0x244   : > { %3705 = vmatpush.xpose.msk.msra.mxu1 %vm788_vm0, %v1199_v0 }
 0x247   : > { %3706 = vmatmul.msk.f32.vlgmr.msra.gmra.mxu1 %vm788_vm0, %v942_v21 }
 0x248   : > { %1666 = vmatpush.msrb.mxu1 %v4774_v15 }
 0x24a   : > { %1667 = vmatpush.msrb.mxu1 %v4769_v14 }
 0x24c   : > { %1712 = vmatpush.msra.mxu1 %v4794_v23 }
 0x24e   : > { %1713 = vmatpush.msra.mxu1 %v4789_v22 }
 0x254   : > { %v1227_v11 = vpop.f32.mrf.mxu0 }
 0x255   : > { %v1434_v12 = vsel %vm1433_vm1, %v1227_v11, -inf }
 0x256   : > { %1435 = vmax.xlane.f32.xlu0 %v1434_v12 }
 0x264   : > { %v1256_v13 = vpop.f32.mrf.mxu1 }
 0x265   : > { %v1437_v16 = vsel %vm1433_vm1, %v1256_v13, -inf }
 0x266   : > { %1438 = vmax.xlane.f32.xlu1 %v1437_v16 }
 0x26b   : > { %v1873_v38 = vpop.f32.mrf.mxu2 }
 0x274   : > { %v1285_v15 = vpop.f32.mrf.mxu0 }
 0x275   : > { %v1440_v19 = vsel %vm1433_vm1, %v1285_v15, -inf }
 0x276   : > { %1441 = vmax.xlane.f32.xlu0 %v1440_v19 }
 0x284   : > { %v1314_v42 = vpop.f32.mrf.mxu1 }
 0x285   : > { %v1443_v14 = vsel %vm1433_vm1, %v1314_v42, -inf }
 0x286   : > { %1444 = vmax.xlane.f32.xlu2 %v1443_v14 }
 0x294   : > { %v1343_v23 = vpop.f32.mrf.mxu0 }
 0x295   : > { %v1446_v22 = vsel %vm1433_vm1, %v1343_v23, -inf }
 0x296   : > { %1447 = vmax.xlane.f32.xlu1 %v1446_v22 }
 0x2a4   : > { %v1372_v5 = vpop.f32.mrf.mxu1 }
 0x2a5   : > { %v1449_v9 = vsel %vm1433_vm1, %v1372_v5, -inf }
 0x2a6   : > { %1450 = vmax.xlane.f32.xlu0 %v1449_v9 }
 0x2b4   : > { %v1401_v20 = vpop.f32.mrf.mxu0 }
 0x2b5   : > { %v1452_v21 = vsel %vm1433_vm1, %v1401_v20, -inf }
 0x2b6   : > { %1453 = vmax.xlane.f32.xlu2 %v1452_v21 }
 0x2c4   : > { %v1430_v2 = vpop.f32.mrf.mxu1 }
 0x2c5   : > { %v1455_v3 = vsel %vm1433_vm1, %v1430_v2, -inf }
 0x2c6   : > { %1456 = vmax.xlane.f32.xlu1 %v1455_v3 }
 0x2c9   : > { %v1436_v47 = vpop.xlane.xlu0 %1435 }
 0x2ca   : > { %v1458_v7 = vsub.f32 %v1227_v11, %v1436_v47 }
 0x2cc   : > { %v1466_v56 = vmul.f32 1.442695, %v1458_v7 }
 0x2ce   : > { %3972 = vpow2.f32 %v1466_v56 }
 0x2d4   : > { %v5067_v25 = vpop.eup %3972 }
 0x2d5   : > { %v1482_v51 = vsel %vm1433_vm1, %v5067_v25, 0.0 }
 0x2d6   : > { %1483 = vadd.xlane.f32.xlu2 %v1482_v51 }
 0x2d9   : > { %v1439_v53 = vpop.xlane.xlu1 %1438 }
 0x2da   : > { %v1459_v58 = vsub.f32 %v1256_v13, %v1439_v53 }
 0x2dc   : > { %v1468_v63 = vmul.f32 1.442695, %v1459_v58 }
 0x2de   : > { %3974 = vpow2.f32 %v1468_v63 }
 0x2e4   : > { %v5071_v59 = vpop.eup %3974 }
 0x2e5   : > { %v1485_v60 = vsel %vm1433_vm1, %v5071_v59, 0.0 }
 0x2e6   : > { %1486 = vadd.xlane.f32.xlu1 %v1485_v60 }
 0x2e9   : > { %v1442_v61 = vpop.xlane.xlu0 %1441 }
 0x2ea   : > { %v1460_v62 = vsub.f32 %v1285_v15, %v1442_v61 }
 0x2ec   : > { %v1470_v0 = vmul.f32 1.442695, %v1460_v62 }
 0x2ee   : > { %3976 = vpow2.f32 %v1470_v0 }
 0x2f4   : > { %v5075_v10 = vpop.eup %3976 }
 0x2f5   : > { %v1488_v6 = vsel %vm1433_vm1, %v5075_v10, 0.0 }
 0x2f6   : > { %1489 = vadd.xlane.f32.xlu0 %v1488_v6 }
 0x2f9   : > { %v1445_v1 = vpop.xlane.xlu2 %1444 }
 0x2fa   : > { %v1461_v11 = vsub.f32 %v1314_v42, %v1445_v1 }
 0x2fc   : > { %v1472_v12 = vmul.f32 1.442695, %v1461_v11 }
 0x2fe   : > { %3978 = vpow2.f32 %v1472_v12 }
 0x304   : > { %v5079_v13 = vpop.eup %3978 }
 0x305   : > { %v1491_v16 = vsel %vm1433_vm1, %v5079_v13, 0.0 }
 0x306   : > { %1492 = vadd.xlane.f32.xlu0 %v1491_v16 }
 0x309   : > { %v1448_v19 = vpop.xlane.xlu1 %1447 }
 0x30a   : > { %v1462_v15 = vsub.f32 %v1343_v23, %v1448_v19 }
 0x30c   : > { %v1474_v14 = vmul.f32 1.442695, %v1462_v15 }
 0x30e   : > { %3980 = vpow2.f32 %v1474_v14 }
 0x314   : > { %v5083_v22 = vpop.eup %3980 }
 0x315   : > { %v1494_v9 = vsel %vm1433_vm1, %v5083_v22, 0.0 }
 0x316   : > { %1495 = vadd.xlane.f32.xlu2 %v1494_v9 }
 0x319   : > { %v1451_v21 = vpop.xlane.xlu0 %1450 }
 0x31a   : > { %v1463_v42 = vsub.f32 %v1372_v5, %v1451_v21 }
 0x31c   : > { %v1476_v3 = vmul.f32 1.442695, %v1463_v42 }
 0x31e   : > { %3982 = vpow2.f32 %v1476_v3 }
 0x324   : > { %v5087_v47 = vpop.eup %3982 }
 0x325   : > { %v1497_v7 = vsel %vm1433_vm1, %v5087_v47, 0.0 }
 0x326   : > { %1498 = vadd.xlane.f32.xlu2 %v1497_v7 }
 0x329   : > { %v1454_v56 = vpop.xlane.xlu2 %1453 }
 0x32a   : > { %v1464_v23 = vsub.f32 %v1401_v20, %v1454_v56 }
 0x32c   : > { %v1478_v51 = vmul.f32 1.442695, %v1464_v23 }
 0x32e   : > { %3984 = vpow2.f32 %v1478_v51 }
 0x334   : > { %v5091_v53 = vpop.eup %3984 }
 0x335   : > { %v1500_v58 = vsel %vm1433_vm1, %v5091_v53, 0.0 }
 0x336   : > { %1501 = vadd.xlane.f32.xlu1 %v1500_v58 }
 0x339   : > { %v1457_v63 = vpop.xlane.xlu1 %1456 }
 0x33a   : > { %v1465_v5 = vsub.f32 %v1430_v2, %v1457_v63 }
 0x33c   : > { %v1480_v60 = vmul.f32 1.442695, %v1465_v5 }
 0x33e   : > { %3986 = vpow2.f32 %v1480_v60 }
 0x344   : > { %v5095_v61 = vpop.eup %3986 }
 0x345   : > { %v1503_v62 = vsel %vm1433_vm1, %v5095_v61, 0.0 }
 0x346   : > { %1504 = vadd.xlane.f32.xlu0 %v1503_v62 }
 0x349   : > { %v1484_v0 = vpop.xlane.xlu2 %1483 }
 0x34a   : > { %3988 = vrcp.f32 %v1484_v0  ;;  %v1517_v11 = vand.u32 2147483648, %v1484_v0  ;;  %v1515_v16 = vand.u32 2147483647, %v1484_v0  ;;  %vm1511_vm3 = vweird.f32 %v1484_v0 }
 0x34c   : > { %v1518_v2 = vor.u32 1.1754944e-38, %v1517_v11  ;;  %vm1516_vm5 = vcmp.eq.f32.partialorder %v1515_v16, 8.507059e+37 }
 0x350   : > { %v3989_v20 = vpop.eup %3988 }
 0x351   : > { %v1507_v6 = vmul.f32 %v3989_v20, %v1484_v0  ;;  %vm1512_vm2 = vweird.f32 %v3989_v20 }
 0x352   : > { %vm1513_vm4 = vmor %vm1511_vm3, %vm1512_vm2 }
 0x353   : > { %v1508_v1 = vsub.f32 1.0, %v1507_v6 }
 0x355   : > { %v1509_v12 = vmul.f32 %v3989_v20, %v1508_v1 }
 0x357   : > { %v1510_v19 = vadd.f32 %v3989_v20, %v1509_v12 }
 0x359   : > { %v1514_v15 = vsel %vm1513_vm4, %v3989_v20, %v1510_v19  ;;  %v1487_v14 = vpop.xlane.xlu1 %1486 }
 0x35a   : > { %v1519_v9 = vsel %vm1516_vm5, %v1518_v2, %v1514_v15  ;;  %3990 = vrcp.f32 %v1487_v14  ;;  %v1532_v56 = vand.u32 2147483648, %v1487_v14  ;;  %v1530_v51 = vand.u32 2147483647, %v1487_v14 }
 0x35b   : > { %v1520_v21 = vmul.f32 %v5067_v25, %v1519_v9  ;;  %vm1526_vm7 = vweird.f32 %v1487_v14 }
 0x35c   : > { %v1533_v63 = vor.u32 1.1754944e-38, %v1532_v56  ;;  %vm1531_vm9 = vcmp.eq.f32.partialorder %v1530_v51, 8.507059e+37 }
 0x35d   : > { %3707 = vmatmul.msk.f32.vlgmr.msra.gmra.mxu0 %vm1433_vm1, %v1520_v21 }
 0x35e   : > { %1735 = vmatpush.msra.mxu0 %v4809_v27 }
 0x360   : > { %v3991_v42 = vpop.eup %3990  ;;  %1736 = vmatpush.msra.mxu0 %v4799_v24 }
 0x361   : > { %v1522_v3 = vmul.f32 %v3991_v42, %v1487_v14  ;;  %vm1527_vm6 = vweird.f32 %v3991_v42 }
 0x362   : > { %vm1528_vm8 = vmor %vm1526_vm7, %vm1527_vm6 }
 0x363   : > { %v1523_v7 = vsub.f32 1.0, %v1522_v3 }
 0x365   : > { %v1524_v23 = vmul.f32 %v3991_v42, %v1523_v7 }
 0x367   : > { %v1525_v58 = vadd.f32 %v3991_v42, %v1524_v23 }
 0x369   : > { %v1529_v5 = vsel %vm1528_vm8, %v3991_v42, %v1525_v58  ;;  %v1490_v25 = vpop.xlane.xlu0 %1489 }
 0x36a   : > { %v1534_v60 = vsel %vm1531_vm9, %v1533_v63, %v1529_v5  ;;  %3992 = vrcp.f32 %v1490_v25  ;;  %v1547_v20 = vand.u32 2147483648, %v1490_v25  ;;  %v1545_v1 = vand.u32 2147483647, %v1490_v25 }
 0x36b   : > { %v1535_v27 = vmul.f32 %v5071_v59, %v1534_v60  ;;  %vm1541_vm11 = vweird.f32 %v1490_v25 }
 0x36c   : > { %v1548_v12 = vor.u32 1.1754944e-38, %v1547_v20  ;;  %vm1546_vm13 = vcmp.eq.f32.partialorder %v1545_v1, 8.507059e+37 }
 0x36d   : > { %3708 = vmatmul.msk.f32.vlgmr.msrb.gmra.mxu1 %vm1433_vm1, %v1535_v27 }
 0x36e   : > { %1758 = vmatpush.msrb.mxu1 %v4824_v36 }
 0x370   : > { %v3993_v24 = vpop.eup %3992  ;;  %1759 = vmatpush.msrb.mxu1 %v4817_v32 }
 0x371   : > { %v1537_v62 = vmul.f32 %v3993_v24, %v1490_v25  ;;  %vm1542_vm10 = vweird.f32 %v3993_v24 }
 0x372   : > { %vm1543_vm12 = vmor %vm1541_vm11, %vm1542_vm10 }
 0x373   : > { %v1538_v0 = vsub.f32 1.0, %v1537_v62 }
 0x375   : > { %v1539_v6 = vmul.f32 %v3993_v24, %v1538_v0 }
 0x377   : > { %v1540_v11 = vadd.f32 %v3993_v24, %v1539_v6 }
 0x379   : > { %v1544_v16 = vsel %vm1543_vm12, %v3993_v24, %v1540_v11  ;;  %v1493_v59 = vpop.xlane.xlu0 %1492 }
 0x37a   : > { %v1549_v19 = vsel %vm1546_vm13, %v1548_v12, %v1544_v16  ;;  %3994 = vrcp.f32 %v1493_v59  ;;  %v1562_v14 = vand.u32 2147483648, %v1493_v59  ;;  %v1560_v21 = vand.u32 2147483647, %v1493_v59 }
 0x37b   : > { %v1550_v36 = vmul.f32 %v5075_v10, %v1549_v19  ;;  %vm1556_vm15 = vweird.f32 %v1493_v59 }
 0x37c   : > { %v1563_v3 = vor.u32 1.1754944e-38, %v1562_v14  ;;  %vm1561_vm3 = vcmp.eq.f32.partialorder %v1560_v21, 8.507059e+37 }
 0x37d   : > { %3709 = vmatmul.msk.f32.vlgmr.msrb.gmra.mxu0 %vm1433_vm1, %v1550_v36 }
 0x37e   : > { %1781 = vmatpush.msrb.mxu0 %v4838_v44 }
 0x380   : > { %v3995_v32 = vpop.eup %3994  ;;  %1782 = vmatpush.msrb.mxu0 %v4831_v40 }
 0x381   : > { %v1552_v2 = vmul.f32 %v3995_v32, %v1493_v59  ;;  %vm1557_vm14 = vweird.f32 %v3995_v32 }
 0x382   : > { %vm1558_vm2 = vmor %vm1556_vm15, %vm1557_vm14 }
 0x383   : > { %v1553_v15 = vsub.f32 1.0, %v1552_v2 }
 0x385   : > { %v1554_v9 = vmul.f32 %v3995_v32, %v1553_v15 }
 0x387   : > { %v1555_v42 = vadd.f32 %v3995_v32, %v1554_v9 }
 0x389   : > { %v1559_v7 = vsel %vm1558_vm2, %v3995_v32, %v1555_v42  ;;  %v1496_v10 = vpop.xlane.xlu2 %1495 }
 0x38a   : > { %v1564_v56 = vsel %vm1561_vm3, %v1563_v3, %v1559_v7  ;;  %3996 = vrcp.f32 %v1496_v10  ;;  %v1577_v58 = vand.u32 2147483648, %v1496_v10  ;;  %v1575_v5 = vand.u32 2147483647, %v1496_v10 }
 0x38b   : > { %v1565_v44 = vmul.f32 %v5079_v13, %v1564_v56  ;;  %vm1571_vm5 = vweird.f32 %v1496_v10 }
 0x38c   : > { %v1578_v60 = vor.u32 1.1754944e-38, %v1577_v58  ;;  %vm1576_vm7 = vcmp.eq.f32.partialorder %v1575_v5, 8.507059e+37  ;;  %v1876_v5 = vpop.f32.mrf.mxu2 }
 0x38d   : > { %3710 = vmatmul.msk.f32.vlgmr.msra.gmra.mxu1 %vm1433_vm1, %v1565_v44 }
 0x38e   : > { %1804 = vmatpush.msra.mxu1 %v4852_v52 }
 0x390   : > { %v3997_v40 = vpop.eup %3996  ;;  %1805 = vmatpush.msra.mxu1 %v4845_v48 }
 0x391   : > { %v1567_v23 = vmul.f32 %v3997_v40, %v1496_v10  ;;  %vm1572_vm4 = vweird.f32 %v3997_v40 }
 0x392   : > { %vm1573_vm6 = vmor %vm1571_vm5, %vm1572_vm4 }
 0x393   : > { %v1568_v51 = vsub.f32 1.0, %v1567_v23 }
 0x395   : > { %v1569_v63 = vmul.f32 %v3997_v40, %v1568_v51 }
 0x397   : > { %v1570_v25 = vadd.f32 %v3997_v40, %v1569_v63 }
 0x399   : > { %v1574_v27 = vsel %vm1573_vm6, %v3997_v40, %v1570_v25  ;;  %v1499_v13 = vpop.xlane.xlu2 %1498  ;;  %v5134_v40 = vld [vmem:[%s4689_s25] sm:$0xff] }
 0x39a   : > { %v1579_v24 = vsel %vm1576_vm7, %v1578_v60, %v1574_v27  ;;  %3998 = vrcp.f32 %v1499_v13  ;;  %v1592_v20 = vand.u32 2147483648, %v1499_v13  ;;  %v1590_v1 = vand.u32 2147483647, %v1499_v13 }
 0x39b   : > { %v1580_v52 = vmul.f32 %v5083_v22, %v1579_v24  ;;  %vm1586_vm9 = vweird.f32 %v1499_v13 }
 0x39c   : > { %v1593_v12 = vor.u32 1.1754944e-38, %v1592_v20  ;;  %vm1591_vm11 = vcmp.eq.f32.partialorder %v1590_v1, 8.507059e+37 }
 0x39d   : > { %3711 = vmatmul.msk.f32.vlgmr.msra.gmra.mxu0 %vm1433_vm1, %v1580_v52 }
 0x39e   : > { %3715 = vmatpush.xpose.msk.msra.mxu0 %vm788_vm0, %v935_v35 }
 0x3a0   : > { %v3999_v48 = vpop.eup %3998 }
 0x3a1   : > { %v1582_v62 = vmul.f32 %v3999_v48, %v1499_v13  ;;  %vm1587_vm8 = vweird.f32 %v3999_v48 }
 0x3a2   : > { %vm1588_vm10 = vmor %vm1586_vm9, %vm1587_vm8 }
 0x3a3   : > { %v1583_v0 = vsub.f32 1.0, %v1582_v62 }
 0x3a5   : > { %v1584_v6 = vmul.f32 %v3999_v48, %v1583_v0 }
 0x3a7   : > { %v1585_v11 = vadd.f32 %v3999_v48, %v1584_v6 }
 0x3a9   : > { %v1589_v16 = vsel %vm1588_vm10, %v3999_v48, %v1585_v11  ;;  %v1502_v22 = vpop.xlane.xlu1 %1501 }
 0x3aa   : > { %v1594_v59 = vsel %vm1591_vm11, %v1593_v12, %v1589_v16  ;;  %4000 = vrcp.f32 %v1502_v22  ;;  %v1607_v32 = vand.u32 2147483648, %v1502_v22  ;;  %v1605_v15 = vand.u32 2147483647, %v1502_v22 }
 0x3ab   : > { %v1595_v33 = vmul.f32 %v5087_v47, %v1594_v59  ;;  %vm1601_vm13 = vweird.f32 %v1502_v22 }
 0x3ac   : > { %v1608_v9 = vor.u32 1.1754944e-38, %v1607_v32  ;;  %vm1606_vm15 = vcmp.eq.f32.partialorder %v1605_v15, 8.507059e+37 }
 0x3ad   : > { %3712 = vmatmul.msk.f32.vlgmr.msrb.gmra.mxu1 %vm1433_vm1, %v1595_v33 }
 0x3ae   : > { %3718 = vmatpush.xpose.msk.msrb.mxu1 %vm788_vm0, %v936_v54 }
 0x3b0   : > { %v4001_v35 = vpop.eup %4000 }
 0x3b1   : > { %v1597_v19 = vmul.f32 %v4001_v35, %v1502_v22  ;;  %vm1602_vm12 = vweird.f32 %v4001_v35 }
 0x3b2   : > { %vm1603_vm14 = vmor %vm1601_vm13, %vm1602_vm12 }
 0x3b3   : > { %v1598_v36 = vsub.f32 1.0, %v1597_v19 }
 0x3b5   : > { %v1599_v2 = vmul.f32 %v4001_v35, %v1598_v36 }
 0x3b7   : > { %v1600_v14 = vadd.f32 %v4001_v35, %v1599_v2 }
 0x3b9   : > { %v1604_v21 = vsel %vm1603_vm14, %v4001_v35, %v1600_v14  ;;  %v1505_v47 = vpop.xlane.xlu0 %1504 }
 0x3ba   : > { %v1609_v42 = vsel %vm1606_vm15, %v1608_v9, %v1604_v21  ;;  %4002 = vrcp.f32 %v1505_v47  ;;  %v1622_v10 = vand.u32 2147483648, %v1505_v47  ;;  %v1620_v44 = vand.u32 2147483647, %v1505_v47 }
 0x3bb   : > { %v1610_v46 = vmul.f32 %v5091_v53, %v1609_v42  ;;  %vm1616_vm3 = vweird.f32 %v1505_v47 }
 0x3bc   : > { %vm1621_vm5 = vcmp.eq.f32.partialorder %v1620_v44, 8.507059e+37 }
 0x3bd   : > { %3713 = vmatmul.msk.f32.vlgmr.msrb.gmra.mxu0 %vm1433_vm1, %v1610_v46 }
 0x3be   : > { %3727 = vmatpush.xpose.msk.msrb.mxu0 %vm788_vm0, %v939_v18  ;;  %v1623_v18 = vor.u32 1.1754944e-38, %v1622_v10 }
 0x3c0   : > { %v4003_v54 = vpop.eup %4002 }
 0x3c1   : > { %v1612_v3 = vmul.f32 %v4003_v54, %v1505_v47  ;;  %vm1617_vm2 = vweird.f32 %v4003_v54 }
 0x3c2   : > { %vm1618_vm4 = vmor %vm1616_vm3, %vm1617_vm2 }
 0x3c3   : > { %v1613_v7 = vsub.f32 1.0, %v1612_v3 }
 0x3c5   : > { %v1614_v56 = vmul.f32 %v4003_v54, %v1613_v7  ;;  %3716 = vmatmul.msk.f32.vlgmr.msra.gmra.mxu0 %vm788_vm0, %v1185_v34  ;;  %v5156_v34 = vld [vmem:[%s4689_s25 + $0x20] sm:$0xff] }
 0x3c6   : > { %2400 = vmatpush.msra.mxu0 %v5134_v40 }
 0x3c7   : > { %v1615_v17 = vadd.f32 %v4003_v54, %v1614_v56 }
 0x3c9   : > { %v1619_v53 = vsel %vm1618_vm4, %v4003_v54, %v1615_v17  ;;  %v5231_v17 = vpop.f32.mrf.mxu2 }
 0x3ca   : > { %v1624_v23 = vsel %vm1621_vm5, %v1623_v18, %v1619_v53 }
 0x3cb   : > { %v1625_v51 = vmul.f32 %v5095_v61, %v1624_v23 }
 0x3cd   : > { %3714 = vmatmul.msk.f32.vlgmr.msra.gmra.mxu1 %vm1433_vm1, %v1625_v51  ;;  %3717 = vmatmul.msk.f32.gmra.mxu0 %vm788_vm0, %v1186_v31  ;;  %vm1994_vm1 = vcmask 64512  }
 0x3ce   : > { %3730 = vmatpush.xpose.msk.msra.mxu1 %vm788_vm0, %v940_v57  ;;  %v2007_v61 = vsel %vm1994_vm1, %v1873_v38, -inf  ;;  %v2010_v13 = vsel %vm1994_vm1, %v1876_v5, -inf }
 0x3d5   : > { %3719 = vmatmul.msk.f32.vlgmr.msrb.gmra.mxu1 %vm788_vm0, %v1187_v50  ;;  %3728 = vmatmul.msk.f32.vlgmr.msrb.gmra.mxu0 %vm788_vm0, %v1193_v55 }
 0x3d6   : > { %2429 = vmatpush.msrb.mxu1 %v5152_v30  ;;  %2516 = vmatpush.msrb.mxu0 %v5156_v34 }
 0x3da   : > { %v5175_v31 = vpop.f32.mrf.mxu0 }
 0x3dd   : > { %3720 = vmatmul.msk.f32.gmra.mxu1 %vm788_vm0, %v1188_v45  ;;  %3729 = vmatmul.msk.f32.gmra.mxu0 %vm788_vm0, %v1194_v8 }
 0x3e5   : > { %3731 = vmatmul.msk.f32.vlgmr.msra.gmra.mxu1 %vm788_vm0, %v1195_v41  ;;  %v5193_v41 = vpop.f32.mrf.mxu3 }
 0x3e6   : > { %2545 = vmatpush.msra.mxu1 %v5169_v28  ;;  %v2013_v0 = vsel %vm1994_vm1, %v5193_v41, -inf }
 0x3ea   : > { %v5179_v43 = vpop.f32.mrf.mxu1 }
 0x3ed   : > { %3732 = vmatmul.msk.f32.gmra.mxu1 %vm788_vm0, %v1196_v37  ;;  %v5199_v25 = vpop.f32.mrf.mxu3 }
 0x3ee   : > { %v2016_v27 = vsel %vm1994_vm1, %v5199_v25, -inf }
 0x3fa   : > { %v5177_v39 = vpop.f32.mrf.mxu0 }
 0x40a   : > { %v5183_v50 = vpop.f32.mrf.mxu1 }
 0x41a   : > { %v5181_v45 = vpop.f32.mrf.mxu0 }
 0x42a   : > { %v5187_v4 = vpop.f32.mrf.mxu1 }
 0x43a   : > { %v5185_v49 = vpop.f32.mrf.mxu0 }
 0x442   : > { %v1827_v8 = vpop.f32.mrf.mxu0 }
 0x443   : > { %v1995_v55 = vsel %vm1994_vm1, %v1827_v8, -inf }
 0x444   : > { %1996 = vmax.xlane.f32.xlu1 %v1995_v55 }
 0x44a   : > { %v5190_v26 = vpop.f32.mrf.mxu1  ;;  %v1830_v29 = vpop.f32.mrf.mxu0 }
 0x44b   : > { %v1998_v37 = vsel %vm1994_vm1, %v1830_v29, -inf }
 0x44c   : > { %1999 = vmax.xlane.f32.xlu2 %v1998_v37 }
 0x452   : > { %v1850_v57 = vpop.f32.mrf.mxu1  ;;  %v5197_v63 = vpop.f32.mrf.mxu0 }
 0x453   : > { %v2001_v58 = vsel %vm1994_vm1, %v1850_v57, -inf  ;;  %v2019_v62 = vsel %vm1994_vm1, %v5197_v63, -inf }
 0x454   : > { %2008 = vmax.xlane.f32.xlu2 %v2007_v61  ;;  %2002 = vmax.xlane.f32.xlu0 %v2001_v58 }
 0x45a   : > { %v1853_v60 = vpop.f32.mrf.mxu1  ;;  %v5205_v52 = vpop.f32.mrf.mxu0 }
 0x45b   : > { %v2004_v24 = vsel %vm1994_vm1, %v1853_v60, -inf  ;;  %v2022_v48 = vsel %vm1994_vm1, %v5205_v52, -inf }
 0x45c   : > { %2017 = vmax.xlane.f32.xlu2 %v2016_v27  ;;  %2011 = vmax.xlane.f32.xlu0 %v2010_v13  ;;  %v2031_v13 = vsel %vm1994_vm1, %v5231_v17, -inf }
 0x45d   : > { %2005 = vmax.xlane.f32.xlu1 %v2004_v24 }
 0x462   : > { %v5221_v9 = vpop.f32.mrf.mxu1 }
 0x464   : > { %2023 = vmax.xlane.f32.xlu2 %v2022_v48  ;;  %2020 = vmax.xlane.f32.xlu0 %v2019_v62 }
 0x465   : > { %2014 = vmax.xlane.f32.xlu1 %v2013_v0 }
 0x46a   : > { %v5233_v23 = vpop.f32.mrf.mxu1 }
 0x4b7   : > { %v1997_v20 = vpop.xlane.xlu1 %1996 }
 0x4b8   : > { %v2043_v6 = vsub.f32 %v1827_v8, %v1997_v20 }
 0x4ba   : > { %v2059_v1 = vmul.f32 1.442695, %v2043_v6 }
 0x4bc   : > { %4004 = vpow2.f32 %v2059_v1 }
 0x4bf   : > { %v2000_v11 = vpop.xlane.xlu2 %1999 }
 0x4c0   : > { %v2044_v12 = vsub.f32 %v1830_v29, %v2000_v11  ;;  %v2025_v29 = vsel %vm1994_vm1, %v5221_v9, -inf }
 0x4c2   : > { %v5213_v16 = vpop.eup %4004  ;;  %v2061_v22 = vmul.f32 1.442695, %v2044_v12 }
 0x4c3   : > { %v2091_v59 = vsel %vm1994_vm1, %v5213_v16, 0.0 }
 0x4c4   : > { %4006 = vpow2.f32 %v2061_v22  ;;  %2092 = vadd.xlane.f32.xlu1 %v2091_v59 }
 0x4c7   : > { %v2003_v33 = vpop.xlane.xlu0 %2002  ;;  %v2009_v35 = vpop.xlane.xlu2 %2008 }
 0x4c8   : > { %v2045_v19 = vsub.f32 %v1850_v57, %v2003_v33  ;;  %v2047_v36 = vsub.f32 %v1873_v38, %v2009_v35  ;;  %v2028_v38 = vsel %vm1994_vm1, %v5233_v23, -inf }
 0x4ca   : > { %v5217_v32 = vpop.eup %4006  ;;  %v2063_v2 = vmul.f32 1.442695, %v2045_v19  ;;  %v2067_v15 = vmul.f32 1.442695, %v2047_v36 }
 0x4cb   : > { %v2094_v14 = vsel %vm1994_vm1, %v5217_v32, 0.0 }
 0x4cc   : > { %4008 = vpow2.f32 %v2063_v2  ;;  %2095 = vadd.xlane.f32.xlu0 %v2094_v14 }
 0x4cd   : > { %4010 = vpow2.f32 %v2067_v15 }
 0x4cf   : > { %v2012_v21 = vpop.xlane.xlu0 %2011  ;;  %v2018_v44 = vpop.xlane.xlu2 %2017 }
 0x4d0   : > { %v2006_v47 = vpop.xlane.xlu1 %2005  ;;  %v2048_v3 = vsub.f32 %v1876_v5, %v2012_v21  ;;  %v2050_v51 = vsub.f32 %v5199_v25, %v2018_v44 }
 0x4d1   : > { %v2046_v42 = vsub.f32 %v1853_v60, %v2006_v47  ;;  %v5247_v60 = vpop.f32.mrf.mxu2 }
 0x4d2   : > { %v5223_v46 = vpop.eup %4008  ;;  %v2069_v18 = vmul.f32 1.442695, %v2048_v3  ;;  %v2073_v57 = vmul.f32 1.442695, %v2050_v51  ;;  %v2034_v48 = vsel %vm1994_vm1, %v5247_v60, -inf }
 0x4d3   : > { %v5225_v54 = vpop.eup %4010  ;;  %v2065_v7 = vmul.f32 1.442695, %v2046_v42  ;;  %v2097_v10 = vsel %vm1994_vm1, %v5223_v46, 0.0 }
 0x4d4   : > { %2098 = vadd.xlane.f32.xlu1 %v2097_v10  ;;  %v2103_v56 = vsel %vm1994_vm1, %v5225_v54, 0.0 }
 0x4d5   : > { %4012 = vpow2.f32 %v2065_v7  ;;  %2104 = vadd.xlane.f32.xlu0 %v2103_v56 }
 0x4d6   : > { %4014 = vpow2.f32 %v2069_v18 }
 0x4d7   : > { %v2024_v58 = vpop.xlane.xlu2 %2023  ;;  %v2021_v5 = vpop.xlane.xlu0 %2020  ;;  %4016 = vpow2.f32 %v2073_v57 }
 0x4d8   : > { %v2015_v53 = vpop.xlane.xlu1 %2014  ;;  %v2051_v27 = vsub.f32 %v5197_v63, %v2021_v5  ;;  %v5261_v63 = vpop.f32.mrf.mxu3 }
 0x4d9   : > { %v2049_v55 = vsub.f32 %v5193_v41, %v2015_v53  ;;  %v2052_v41 = vsub.f32 %v5205_v52, %v2024_v58  ;;  %v2037_v11 = vsel %vm1994_vm1, %v5261_v63, -inf }
 0x4da   : > { %v2075_v0 = vmul.f32 1.442695, %v2051_v27 }
 0x4db   : > { %v5236_v8 = vpop.eup %4012  ;;  %v2071_v61 = vmul.f32 1.442695, %v2049_v55  ;;  %v2077_v62 = vmul.f32 1.442695, %v2052_v41 }
 0x4dc   : > { %v2100_v37 = vsel %vm1994_vm1, %v5236_v8, 0.0  ;;  %2026 = vmax.xlane.f32.xlu1 %v2025_v29  ;;  %v5245_v25 = vpop.eup %4014 }
 0x4dd   : > { %2101 = vadd.xlane.f32.xlu2 %v2100_v37  ;;  %2029 = vmax.xlane.f32.xlu0 %v2028_v38  ;;  %4018 = vpow2.f32 %v2071_v61  ;;  %v2106_v24 = vsel %vm1994_vm1, %v5245_v25, 0.0  ;;  %v5257_v20 = vpop.eup %4016 }
 0x4de   : > { %4020 = vpow2.f32 %v2077_v62  ;;  %v2112_v6 = vsel %vm1994_vm1, %v5257_v20, 0.0 }
 0x4df   : > { %4022 = vpow2.f32 %v2075_v0 }
 0x4e0   : > { %v5277_v35 = vpop.f32.mrf.mxu3 }
 0x4e1   : > { %v2040_v19 = vsel %vm1994_vm1, %v5277_v35, -inf }
 0x4e3   : > { %v5259_v52 = vpop.eup %4018 }
 0x4e4   : > { %2032 = vmax.xlane.f32.xlu1 %v2031_v13  ;;  %v2109_v1 = vsel %vm1994_vm1, %v5259_v52, 0.0  ;;  %v5269_v12 = vpop.eup %4020 }
 0x4e5   : > { %2107 = vadd.xlane.f32.xlu2 %v2106_v24  ;;  %2035 = vmax.xlane.f32.xlu0 %v2034_v48  ;;  %v5271_v22 = vpop.eup %4022  ;;  %v2118_v59 = vsel %vm1994_vm1, %v5269_v12, 0.0 }
 0x4e6   : > { %v2115_v33 = vsel %vm1994_vm1, %v5271_v22, 0.0 }
 0x4ec   : > { %2113 = vadd.xlane.f32.xlu1 %v2112_v6 }
 0x4ed   : > { %2110 = vadd.xlane.f32.xlu2 %v2109_v1  ;;  %2038 = vmax.xlane.f32.xlu0 %v2037_v11 }
 0x4f4   : > { %2119 = vadd.xlane.f32.xlu1 %v2118_v59 }
 0x4f5   : > { %2116 = vadd.xlane.f32.xlu2 %v2115_v33 }
 0x4fd   : > { %2041 = vmax.xlane.f32.xlu2 %v2040_v19 }
 0x537   : > { %v2093_v36 = vpop.xlane.xlu1 %2092 }
 0x538   : > { %4024 = vrcp.f32 %v2093_v36  ;;  %v2150_v47 = vand.u32 2147483648, %v2093_v36  ;;  %v2148_v3 = vand.u32 2147483647, %v2093_v36  ;;  %vm2144_vm7 = vweird.f32 %v2093_v36 }
 0x53a   : > { %v2151_v56 = vor.u32 1.1754944e-38, %v2150_v47  ;;  %vm2149_vm9 = vcmp.eq.f32.partialorder %v2148_v3, 8.507059e+37 }
 0x53e   : > { %v4025_v2 = vpop.eup %4024 }
 0x53f   : > { %v2140_v15 = vmul.f32 %v4025_v2, %v2093_v36  ;;  %v2096_v14 = vpop.xlane.xlu0 %2095  ;;  %vm2145_vm6 = vweird.f32 %v4025_v2 }
 0x540   : > { %4026 = vrcp.f32 %v2096_v14  ;;  %vm2146_vm8 = vmor %vm2144_vm7, %vm2145_vm6  ;;  %v2165_v37 = vand.u32 2147483648, %v2096_v14  ;;  %v2163_v61 = vand.u32 2147483647, %v2096_v14  ;;  %vm2159_vm11 = vweird.f32 %v2096_v14 }
 0x541   : > { %v2141_v21 = vsub.f32 1.0, %v2140_v15 }
 0x542   : > { %v2166_v41 = vor.u32 1.1754944e-38, %v2165_v37  ;;  %vm2164_vm13 = vcmp.eq.f32.partialorder %v2163_v61, 8.507059e+37 }
 0x543   : > { %v2142_v42 = vmul.f32 %v4025_v2, %v2141_v21 }
 0x545   : > { %v2143_v7 = vadd.f32 %v4025_v2, %v2142_v42 }
 0x546   : > { %v4027_v10 = vpop.eup %4026 }
 0x547   : > { %v2147_v44 = vsel %vm2146_vm8, %v4025_v2, %v2143_v7  ;;  %v2155_v18 = vmul.f32 %v4027_v10, %v2096_v14  ;;  %v2099_v53 = vpop.xlane.xlu1 %2098  ;;  %vm2160_vm10 = vweird.f32 %v4027_v10 }
 0x548   : > { %v2152_v51 = vsel %vm2149_vm9, %v2151_v56, %v2147_v44  ;;  %4028 = vrcp.f32 %v2099_v53  ;;  %v2105_v55 = vpop.xlane.xlu0 %2104  ;;  %vm2161_vm12 = vmor %vm2159_vm11, %vm2160_vm10  ;;  %v2178_v62 = vand.u32 2147483647, %v2099_v53  ;;  %v2180_v33 = vand.u32 2147483648, %v2099_v53 }
 0x549   : > { %v2156_v29 = vsub.f32 1.0, %v2155_v18  ;;  %4030 = vrcp.f32 %v2105_v55  ;;  %v2153_v38 = vmul.f32 %v5213_v16, %v2152_v51  ;;  %v2208_v2 = vand.u32 2147483647, %v2105_v55 }
 0x54a   : > { %v2210_v47 = vand.u32 2147483648, %v2105_v55  ;;  %vm2174_vm2 = vweird.f32 %v2099_v53  ;;  %vm2204_vm4 = vweird.f32 %v2105_v55  ;;  %vm2179_vm5 = vcmp.eq.f32.partialorder %v2178_v62, 8.507059e+37 }
 0x54b   : > { %v2157_v57 = vmul.f32 %v4027_v10, %v2156_v29  ;;  %3739 = vmatmul.msk.f32.vlgmr.msra.gmra.mxu0 %vm1994_vm1, %v2153_v38  ;;  %vm2209_vm7 = vcmp.eq.f32.partialorder %v2208_v2, 8.507059e+37 }
 0x54d   : > { %v2158_v58 = vadd.f32 %v4027_v10, %v2157_v57 }
 0x54e   : > { %v4029_v5 = vpop.eup %4028 }
 0x54f   : > { %v4031_v27 = vpop.eup %4030  ;;  %v2170_v13 = vmul.f32 %v4029_v5, %v2099_v53  ;;  %v2027_v24 = vpop.xlane.xlu1 %2026  ;;  %v2162_v48 = vsel %vm2161_vm12, %v4027_v10, %v2158_v58  ;;  %vm2175_vm14 = vweird.f32 %v4029_v5 }
 0x550   : > { %v2200_v0 = vmul.f32 %v4031_v27, %v2105_v55  ;;  %v2053_v6 = vsub.f32 %v5221_v9, %v2027_v24  ;;  %v2030_v16 = vpop.xlane.xlu0 %2029  ;;  %v5284_v1 = vpop.xlane.xlu2 %2101  ;;  %v2167_v11 = vsel %vm2164_vm13, %v2166_v41, %v2162_v48  ;;  %vm2205_vm15 = vweird.f32 %v4031_v27  ;;  %vm2176_vm3 = vmor %vm2174_vm2, %vm2175_vm14 }
 0x551   : > { %v2171_v59 = vsub.f32 1.0, %v2170_v13  ;;  %v2054_v19 = vsub.f32 %v5233_v23, %v2030_v16  ;;  %4032 = vrcp.f32 %v5284_v1  ;;  %v2168_v14 = vmul.f32 %v5217_v32, %v2167_v11  ;;  %vm2206_vm6 = vmor %vm2204_vm4, %vm2205_vm15 }
 0x552   : > { %v2201_v36 = vsub.f32 1.0, %v2200_v0  ;;  %v2079_v15 = vmul.f32 1.442695, %v2053_v6  ;;  %v2181_v23 = vor.u32 1.1754944e-38, %v2180_v33  ;;  %v2211_v32 = vor.u32 1.1754944e-38, %v2210_v47 }
 0x553   : > { %v2172_v21 = vmul.f32 %v4029_v5, %v2171_v59  ;;  %v2081_v42 = vmul.f32 1.442695, %v2054_v19  ;;  %3740 = vmatmul.msk.f32.gmra.mxu0 %vm1994_vm1, %v2168_v14  ;;  %v2193_v6 = vand.u32 2147483647, %v5284_v1  ;;  %vm2189_vm9 = vweird.f32 %v5284_v1 }
 0x554   : > { %v2202_v9 = vmul.f32 %v4031_v27, %v2201_v36  ;;  %4034 = vpow2.f32 %v2079_v15 }
 0x555   : > { %v2173_v3 = vadd.f32 %v4029_v5, %v2172_v21  ;;  %4036 = vpow2.f32 %v2081_v42  ;;  %vm2194_vm11 = vcmp.eq.f32.partialorder %v2193_v6, 8.507059e+37 }
 0x556   : > { %v2203_v7 = vadd.f32 %v4031_v27, %v2202_v9 }
 0x557   : > { %v4033_v10 = vpop.eup %4032  ;;  %v2177_v56 = vsel %vm2176_vm3, %v4029_v5, %v2173_v3  ;;  %v2033_v44 = vpop.xlane.xlu1 %2032  ;;  %v5324_v3 = vld [vmem:[#allocation9 + $0x18] sm:$0xff] }
 0x558   : > { %v2182_v18 = vsel %vm2179_vm5, %v2181_v23, %v2177_v56  ;;  %v2207_v51 = vsel %vm2206_vm6, %v4031_v27, %v2203_v7  ;;  %v2185_v29 = vmul.f32 %v4033_v10, %v5284_v1  ;;  %v2055_v37 = vsub.f32 %v5231_v17, %v2033_v44  ;;  %v2036_v38 = vpop.xlane.xlu0 %2035  ;;  %v5292_v53 = vpop.xlane.xlu2 %2107  ;;  %2655 = vmatpush.msra.mxu0 %v5324_v3  ;;  %v5337_v44 = vld [vmem:[#allocation9 + $0x8] sm:$0xff] }
 0x559   : > { %v2212_v57 = vsel %vm2209_vm7, %v2211_v32, %v2207_v51  ;;  %v2056_v61 = vsub.f32 %v5247_v60, %v2036_v38  ;;  %4038 = vrcp.f32 %v5292_v53  ;;  %v2183_v24 = vmul.f32 %v5223_v46, %v2182_v18  ;;  %v5350_v38 = vld [vmem:[#allocation9] sm:$0xff] }
 0x55a   : > { %v5296_v55 = vpop.eup %4034  ;;  %v2213_v58 = vmul.f32 %v5225_v54, %v2212_v57  ;;  %v2186_v5 = vsub.f32 1.0, %v2185_v29  ;;  %v2083_v41 = vmul.f32 1.442695, %v2055_v37  ;;  %v2195_v54 = vand.u32 2147483648, %v5284_v1  ;;  %v5326_v1 = vld [vmem:[#allocation9 + $0x10] sm:$0xff] }
 0x55b   : > { %v5299_v13 = vpop.eup %4036  ;;  %v2085_v27 = vmul.f32 1.442695, %v2056_v61  ;;  %v2121_v17 = vsel %vm1994_vm1, %v5296_v55, 0.0  ;;  %3741 = vmatmul.msk.f32.vlgmr.msrb.gmra.mxu1 %vm1994_vm1, %v2183_v24  ;;  %vm2190_vm8 = vweird.f32 %v4033_v10  ;;  %v2225_v42 = vand.u32 2147483648, %v5292_v53  ;;  %2656 = vmatpush.msra.mxu0 %v5326_v1 }
 0x55c   : > { %v2187_v48 = vmul.f32 %v4033_v10, %v2186_v5  ;;  %4040 = vpow2.f32 %v2083_v41  ;;  %3743 = vmatmul.msk.f32.vlgmr.msra.gmra.mxu2 %vm1994_vm1, %v2213_v58  ;;  %2122 = vadd.xlane.f32.xlu0 %v2121_v17  ;;  %v2124_v60 = vsel %vm1994_vm1, %v5299_v13, 0.0  ;;  %v2196_v36 = vor.u32 1.1754944e-38, %v2195_v54  ;;  %vm2191_vm10 = vmor %vm2189_vm9, %vm2190_vm8 }
 0x55d   : > { %4042 = vpow2.f32 %v2085_v27  ;;  %2125 = vadd.xlane.f32.xlu1 %v2124_v60  ;;  %v2223_v32 = vand.u32 2147483647, %v5292_v53  ;;  %vm2219_vm13 = vweird.f32 %v5292_v53  ;;  %v2226_v57 = vor.u32 1.1754944e-38, %v2225_v42  ;;  %2657 = vmatpush.msra.mxu0 %v5337_v44 }
 0x55e   : > { %v2188_v46 = vadd.f32 %v4033_v10, %v2187_v48 }
 0x55f   : > { %v4039_v62 = vpop.eup %4038  ;;  %v5309_v0 = vpop.xlane.xlu1 %2113  ;;  %vm2224_vm15 = vcmp.eq.f32.partialorder %v2223_v32, 8.507059e+37  ;;  %2658 = vmatpush.msra.mxu0 %v5350_v38 }
 0x560   : > { %v2215_v16 = vmul.f32 %v4039_v62, %v5292_v53  ;;  %v2039_v11 = vpop.xlane.xlu0 %2038  ;;  %4044 = vrcp.f32 %v5309_v0  ;;  %v5314_v59 = vpop.xlane.xlu2 %2110  ;;  %v2192_v21 = vsel %vm2191_vm10, %v4033_v10, %v2188_v46  ;;  %vm2220_vm12 = vweird.f32 %v4039_v62 }
 0x561   : > { %v2057_v33 = vsub.f32 %v5261_v63, %v2039_v11  ;;  %4046 = vrcp.f32 %v5314_v59  ;;  %v2197_v9 = vsel %vm2194_vm11, %v2196_v36, %v2192_v21  ;;  %vm2221_vm14 = vmor %vm2219_vm13, %vm2220_vm12  ;;  %v2238_v41 = vand.u32 2147483647, %v5314_v59 }
 0x562   : > { %v5319_v19 = vpop.eup %4040  ;;  %v2216_v2 = vsub.f32 1.0, %v2215_v16  ;;  %v2198_v63 = vmul.f32 %v5236_v8, %v2197_v9  ;;  %v2240_v27 = vand.u32 2147483648, %v5314_v59  ;;  %vm2234_vm3 = vweird.f32 %v5314_v59 }
 0x563   : > { %v5321_v15 = vpop.eup %4042  ;;  %v2087_v14 = vmul.f32 1.442695, %v2057_v33  ;;  %v2127_v23 = vsel %vm1994_vm1, %v5319_v19, 0.0  ;;  %vm2239_vm5 = vcmp.eq.f32.partialorder %v2238_v41, 8.507059e+37  ;;  %vm2249_vm7 = vweird.f32 %v5309_v0 }
 0x564   : > { %v2217_v47 = vmul.f32 %v4039_v62, %v2216_v2  ;;  %v2130_v7 = vsel %vm1994_vm1, %v5321_v15, 0.0  ;;  %2128 = vadd.xlane.f32.xlu2 %v2127_v23  ;;  %3742 = vmatmul.msk.f32.gmra.mxu1 %vm1994_vm1, %v2198_v63  ;;  %v2241_v16 = vor.u32 1.1754944e-38, %v2240_v27  ;;  %v2253_v42 = vand.u32 2147483647, %v5309_v0  ;;  %v4073_v23 = vld [vmem:[%s4696_s2 + $0x8] sm:$0xff] }
 0x565   : > { %4048 = vpow2.f32 %v2087_v14  ;;  %2131 = vadd.xlane.f32.xlu0 %v2130_v7 }
 0x566   : > { %v5334_v10 = vpop.eup %4044  ;;  %v2218_v56 = vadd.f32 %v4039_v62, %v2217_v47  ;;  %vm2254_vm10 = vcmp.eq.f32.partialorder %v2253_v42, 8.507059e+37 }
 0x567   : > { %v4047_v18 = vpop.eup %4046  ;;  %v2245_v8 = vmul.f32 %v5334_v10, %v5309_v0  ;;  %v5342_v51 = vpop.xlane.xlu1 %2119  ;;  %vm2250_vm6 = vweird.f32 %v5334_v10 }
 0x568   : > { %v2230_v29 = vmul.f32 %v4047_v18, %v5314_v59  ;;  %4050 = vrcp.f32 %v5342_v51  ;;  %v5348_v37 = vpop.xlane.xlu2 %2116  ;;  %v2222_v5 = vsel %vm2221_vm14, %v4039_v62, %v2218_v56  ;;  %vm2235_vm2 = vweird.f32 %v4047_v18  ;;  %vm5378_vm8 = vmor %vm2249_vm7, %vm2250_vm6 }
 0x569   : > { %v2246_v61 = vsub.f32 1.0, %v2245_v8  ;;  %4052 = vrcp.f32 %v5348_v37  ;;  %v2227_v24 = vsel %vm2224_vm15, %v2226_v57, %v2222_v5  ;;  %vm2236_vm4 = vmor %vm2234_vm3, %vm2235_vm2  ;;  %v2255_v59 = vand.u32 2147483648, %v5309_v0 }
 0x56a   : > { %v2231_v58 = vsub.f32 1.0, %v2230_v29  ;;  %v2228_v60 = vmul.f32 %v5245_v25, %v2227_v24  ;;  %v2268_v7 = vand.u32 2147483647, %v5348_v37  ;;  %v2270_v56 = vand.u32 2147483648, %v5348_v37 }
 0x56b   : > { %v5355_v53 = vpop.eup %4048  ;;  %v2247_v17 = vmul.f32 %v5334_v10, %v2246_v61  ;;  %vm2264_vm11 = vweird.f32 %v5348_v37  ;;  %vm2279_vm15 = vweird.f32 %v5342_v51  ;;  %v2283_v41 = vand.u32 2147483647, %v5342_v51 }
 0x56c   : > { %v2232_v48 = vmul.f32 %v4047_v18, %v2231_v58  ;;  %v2133_v54 = vsel %vm1994_vm1, %v5355_v53, 0.0  ;;  %3744 = vmatmul.msk.f32.gmra.mxu2 %vm1994_vm1, %v2228_v60  ;;  %v2271_v29 = vor.u32 1.1754944e-38, %v2270_v56  ;;  %vm2269_vm13 = vcmp.eq.f32.partialorder %v2268_v7, 8.507059e+37  ;;  %v4072_v60 = vld [vmem:[%s4696_s2] sm:$0xff] }
 0x56d   : > { %2134 = vadd.xlane.f32.xlu1 %v2133_v54  ;;  %v2248_v25 = vadd.f32 %v5334_v10, %v2247_v17  ;;  %vm2284_vm3 = vcmp.eq.f32.partialorder %v2283_v41, 8.507059e+37 }
 0x56e   : > { %v5364_v46 = vpop.eup %4050  ;;  %v2233_v62 = vadd.f32 %v4047_v18, %v2232_v48 }
 0x56f   : > { %v4053_v6 = vpop.eup %4052  ;;  %v2275_v11 = vmul.f32 %v5364_v46, %v5342_v51  ;;  %vm2280_vm14 = vweird.f32 %v5364_v46 }
 0x570   : > { %v2237_v33 = vsel %vm2236_vm4, %v4047_v18, %v2233_v62  ;;  %v2260_v36 = vmul.f32 %v4053_v6, %v5348_v37  ;;  %v2042_v2 = vpop.xlane.xlu2 %2041  ;;  %vm2265_vm9 = vweird.f32 %v4053_v6  ;;  %vm2281_vm2 = vmor %vm2279_vm15, %vm2280_vm14 }
 0x571   : > { %v2242_v14 = vsel %vm2239_vm5, %v2241_v16, %v2237_v33  ;;  %v2276_v21 = vsub.f32 1.0, %v2275_v11  ;;  %v2058_v47 = vsub.f32 %v5277_v35, %v2042_v2  ;;  %v2252_v35 = vsel %vm5378_vm8, %v5334_v10, %v2248_v25  ;;  %vm2266_vm12 = vmor %vm2264_vm11, %vm2265_vm9 }
 0x572   : > { %v2261_v9 = vsub.f32 1.0, %v2260_v36  ;;  %v2243_v63 = vmul.f32 %v5259_v52, %v2242_v14  ;;  %v2256_v52 = vor.u32 1.1754944e-38, %v2255_v59  ;;  %v2285_v10 = vand.u32 2147483648, %v5342_v51  ;;  %v2611_v51 = vld [vmem:[#allocation7] sm:$0xff] }
 0x573   : > { %v2089_v32 = vmul.f32 1.442695, %v2058_v47  ;;  %v2277_v18 = vmul.f32 %v5364_v46, %v2276_v21 }
 0x574   : > { %v2262_v8 = vmul.f32 %v4053_v6, %v2261_v9  ;;  %3745 = vmatmul.msk.f32.vlgmr.msra.gmra.mxu3 %vm1994_vm1, %v2243_v63  ;;  %v2257_v57 = vsel %vm2254_vm10, %v2256_v52, %v2252_v35  ;;  %v2286_v24 = vor.u32 1.1754944e-38, %v2285_v10 }
 0x575   : > { %4054 = vpow2.f32 %v2089_v32  ;;  %2942 = vmatpush.msra.mxu3 %v5324_v3  ;;  %v2278_v58 = vadd.f32 %v5364_v46, %v2277_v18  ;;  %v2258_v3 = vmul.f32 %v5257_v20, %v2257_v57 }
 0x576   : > { %v2263_v0 = vadd.f32 %v4053_v6, %v2262_v8 }
 0x577   : > { %2943 = vmatpush.msra.mxu3 %v5326_v1  ;;  %v2282_v27 = vsel %vm2281_vm2, %v5364_v46, %v2278_v58 }
 0x578   : > { %v2267_v61 = vsel %vm2266_vm12, %v4053_v6, %v2263_v0  ;;  %v2287_v20 = vsel %vm2284_vm3, %v2286_v24, %v2282_v27 }
 0x579   : > { %v2272_v5 = vsel %vm2269_vm13, %v2271_v29, %v2267_v61  ;;  %2944 = vmatpush.msra.mxu3 %v5337_v44 }
 0x57a   : > { %v2273_v37 = vmul.f32 %v5271_v22, %v2272_v5  ;;  %v2288_v22 = vmul.f32 %v5269_v12, %v2287_v20 }
 0x57b   : > { %v5400_v1 = vpop.eup %4054  ;;  %2945 = vmatpush.msra.mxu3 %v5350_v38 }
 0x57c   : > { %3746 = vmatmul.msk.f32.gmra.mxu3 %vm1994_vm1, %v2258_v3  ;;  %3747 = vmatmul.msk.f32.vlgmr.msrb.gmra.mxu0 %vm1994_vm1, %v2273_v37  ;;  %v2136_v44 = vsel %vm1994_vm1, %v5400_v1, 0.0  ;;  %v4074_v3 = vld [vmem:[%s4696_s2 + $0x10] sm:$0xff] }
 0x57d   : > { %2137 = vadd.xlane.f32.xlu2 %v2136_v44 }
 0x584   : > { %3748 = vmatmul.msk.f32.gmra.mxu0 %vm1994_vm1, %v2288_v22 }
 0x58c   : > { %3755 = vmatmul.msk.f32.vlgmr.msra.gmra.mxu0 %vm788_vm0, %v5175_v31  ;;  %v2614_v31 = vld [vmem:[#allocation7 + $0x18] sm:$0xff] }
 0x58d   : > { %3007 = vmatpush.msrb.mxu0 %v2614_v31  ;;  %2696 = vmatpush.msrb.mxu1 %v2614_v31 }
 0x594   : > { %3756 = vmatmul.msk.f32.gmra.mxu0 %vm788_vm0, %v5179_v43 }
 0x59c   : > { %3757 = vmatmul.msk.f32.gmra.mxu0 %vm788_vm0, %v5177_v39 }
 0x5a4   : > { %3758 = vmatmul.msk.f32.gmra.mxu0 %vm788_vm0, %v5183_v50  ;;  %v2613_v50 = vld [vmem:[#allocation7 + $0x10] sm:$0xff] }
 0x5a5   : > { %3008 = vmatpush.msrb.mxu0 %v2613_v50  ;;  %2697 = vmatpush.msrb.mxu1 %v2613_v50 }
 0x5ac   : > { %3759 = vmatmul.msk.f32.gmra.mxu0 %vm788_vm0, %v5181_v45  ;;  %v2612_v45 = vld [vmem:[#allocation7 + $0x8] sm:$0xff] }
 0x5ad   : > { %2698 = vmatpush.msrb.mxu1 %v2612_v45  ;;  %3009 = vmatpush.msrb.mxu0 %v2612_v45 }
 0x5af   : > { %2699 = vmatpush.msrb.mxu1 %v2611_v51  ;;  %3010 = vmatpush.msrb.mxu0 %v2611_v51 }
 0x5b4   : > { %3760 = vmatmul.msk.f32.gmra.mxu0 %vm788_vm0, %v5187_v4 }
 0x5bc   : > { %3761 = vmatmul.msk.f32.gmra.mxu0 %vm788_vm0, %v5185_v49 }
 0x5c4   : > { %3762 = vmatmul.msk.f32.gmra.mxu0 %vm788_vm0, %v5190_v26 }
 0x5cc   : > { %3795 = vmatmul.msk.f32.vlgmr.msrb.gmra.mxu0 %vm788_vm0, %v4072_v60 }
 0x5cf   : > { %v2123_v43 = vpop.xlane.xlu0 %2122 }
 0x5d0   : > { %4056 = vrcp.f32 %v2123_v43  ;;  %v2126_v39 = vpop.xlane.xlu1 %2125  ;;  %v2300_v54 = vand.u32 2147483648, %v2123_v43  ;;  %v2298_v6 = vand.u32 2147483647, %v2123_v43  ;;  %vm2294_vm5 = vweird.f32 %v2123_v43 }
 0x5d1   : > { %4058 = vrcp.f32 %v2126_v39  ;;  %v2315_v14 = vand.u32 2147483648, %v2126_v39  ;;  %vm2309_vm9 = vweird.f32 %v2126_v39  ;;  %v2313_v63 = vand.u32 2147483647, %v2126_v39 }
 0x5d2   : > { %v2301_v25 = vor.u32 1.1754944e-38, %v2300_v54  ;;  %vm2299_vm7 = vcmp.eq.f32.partialorder %v2298_v6, 8.507059e+37 }
 0x5d3   : > { %v2316_v18 = vor.u32 1.1754944e-38, %v2315_v14  ;;  %vm2314_vm11 = vcmp.eq.f32.partialorder %v2313_v63, 8.507059e+37  ;;  %v4080_v14 = vld [vmem:[%s4689_s25 + $0x18] sm:$0xff] }
 0x5d4   : > { %3796 = vmatmul.msk.f32.gmra.mxu0 %vm788_vm0, %v4073_v23  ;;  %v4083_v23 = vld [vmem:[%s4696_s2 + $0x48] sm:$0xff] }
 0x5d6   : > { %v4057_v12 = vpop.eup %4056 }
 0x5d7   : > { %v4059_v4 = vpop.eup %4058  ;;  %v2290_v49 = vmul.f32 %v4057_v12, %v2123_v43  ;;  %v2129_v48 = vpop.xlane.xlu2 %2128  ;;  %vm2295_vm4 = vweird.f32 %v4057_v12 }
 0x5d8   : > { %v2305_v38 = vmul.f32 %v4059_v4, %v2126_v39  ;;  %v5426_v17 = vpop.xlane.xlu0 %2131  ;;  %vm2296_vm6 = vmor %vm2294_vm5, %vm2295_vm4  ;;  %vm2310_vm8 = vweird.f32 %v4059_v4  ;;  %v2328_v35 = vand.u32 2147483647, %v2129_v48  ;;  %v2330_v52 = vand.u32 2147483648, %v2129_v48 }
 0x5d9   : > { %v2291_v26 = vsub.f32 1.0, %v2290_v49  ;;  %4060 = vrcp.f32 %v5426_v17  ;;  %vm2311_vm10 = vmor %vm2309_vm9, %vm2310_vm8  ;;  %vm2324_vm13 = vweird.f32 %v2129_v48  ;;  %v2345_v44 = vand.u32 2147483648, %v5426_v17 }
 0x5da   : > { %v2306_v46 = vsub.f32 1.0, %v2305_v38  ;;  %4062 = vrcp.f32 %v2129_v48  ;;  %v2331_v58 = vor.u32 1.1754944e-38, %v2330_v52  ;;  %vm2329_vm2 = vcmp.eq.f32.partialorder %v2328_v35, 8.507059e+37  ;;  %v4075_v38 = vld [vmem:[%s4696_s2 + $0x18] sm:$0xff] }
 0x5db   : > { %v2292_v62 = vmul.f32 %v4057_v12, %v2291_v26  ;;  %vm2339_vm3 = vweird.f32 %v5426_v17  ;;  %v2343_v20 = vand.u32 2147483647, %v5426_v17  ;;  %v2346_v45 = vor.u32 1.1754944e-38, %v2345_v44  ;;  %v2746_v44 = vld [vmem:[#allocation10 + $0x8] sm:$0xff] }
 0x5dc   : > { %v2307_v16 = vmul.f32 %v4059_v4, %v2306_v46  ;;  %3797 = vmatmul.msk.f32.gmra.mxu0 %vm788_vm0, %v4074_v3  ;;  %v4076_v46 = vld [vmem:[%s4696_s2 + $0x20] sm:$0xff]  ;;  %v4090_v3 = vld [vmem:[%s4696_s2 + $0x70] sm:$0xff] }
 0x5dd   : > { %v2293_v11 = vadd.f32 %v4057_v12, %v2292_v62 }
 0x5de   : > { %v2308_v36 = vadd.f32 %v4059_v4, %v2307_v16 }
 0x5df   : > { %v2297_v33 = vsel %vm2296_vm6, %v4057_v12, %v2293_v11  ;;  %v5431_v2 = vpop.eup %4060 }
 0x5e0   : > { %v2302_v59 = vsel %vm2299_vm7, %v2301_v25, %v2297_v33  ;;  %v4063_v21 = vpop.eup %4062  ;;  %v2335_v47 = vmul.f32 %v5431_v2, %v5426_v17  ;;  %v2135_v42 = vpop.xlane.xlu1 %2134  ;;  %v2312_v32 = vsel %vm2311_vm10, %v4059_v4, %v2308_v36  ;;  %vm2340_vm15 = vweird.f32 %v5431_v2  ;;  %v4077_v33 = vld [vmem:[%s4696_s2 + $0x28] sm:$0xff] }
 0x5e1   : > { %v2303_v9 = vmul.f32 %v5296_v55, %v2302_v59  ;;  %v2320_v7 = vmul.f32 %v4063_v21, %v2129_v48  ;;  %4064 = vrcp.f32 %v2135_v42  ;;  %vm2325_vm12 = vweird.f32 %v4063_v21  ;;  %vm5450_vm4 = vmor %vm2339_vm3, %vm2340_vm15  ;;  %v4079_v59 = vld [vmem:[%s4696_s2 + $0x30] sm:$0xff] }
 0x5e2   : > { %v2336_v56 = vsub.f32 1.0, %v2335_v47  ;;  %v2317_v29 = vsel %vm2314_vm11, %v2316_v18, %v2312_v32  ;;  %vm2326_vm14 = vmor %vm2324_vm13, %vm2325_vm12  ;;  %v2360_v22 = vand.u32 2147483648, %v2135_v42  ;;  %v2358_v39 = vand.u32 2147483647, %v2135_v42  ;;  %v4081_v47 = vld [vmem:[%s4696_s2 + $0x38] sm:$0xff]  ;;  %v4085_v32 = vld [vmem:[%s4696_s2 + $0x50] sm:$0xff]  ;;  %v2460_v18 = vpop.f32.mrf.mxu2 }
 0x5e3   : > { %3749 = vmatmul.msk.f32.vlgmr.msra.gmra.mxu1 %vm1994_vm1, %v2303_v9  ;;  %v2321_v8 = vsub.f32 1.0, %v2320_v7  ;;  %v2318_v5 = vmul.f32 %v5299_v13, %v2317_v29  ;;  %vm2354_vm6 = vweird.f32 %v2135_v42  ;;  %vm2344_vm7 = vcmp.eq.f32.partialorder %v2343_v20, 8.507059e+37  ;;  %v4082_v9 = vld [vmem:[%s4696_s2 + $0x40] sm:$0xff]  ;;  %v4084_v7 = vld [vmem:[%s4689_s25 + $0x30] sm:$0xff] }
 0x5e4   : > { %v2337_v0 = vmul.f32 %v5431_v2, %v2336_v56  ;;  %vm2359_vm9 = vcmp.eq.f32.partialorder %v2358_v39, 8.507059e+37  ;;  %3798 = vmatmul.msk.f32.gmra.mxu0 %vm788_vm0, %v4075_v38  ;;  %v4088_v29 = vld [vmem:[%s4696_s2 + $0x60] sm:$0xff]  ;;  %vm3313_vm15 = vcmask 1043459   ;;  %vm3317_vm3 = vcmask 1045509  }
 0x5e5   : > { %v2322_v55 = vmul.f32 %v4063_v21, %v2321_v8  ;;  %v4087_v8 = vld [vmem:[%s4696_s2 + $0x58] sm:$0xff] }
 0x5e6   : > { %v2338_v37 = vadd.f32 %v5431_v2, %v2337_v0  ;;  %v2748_v0 = vld [vmem:[#allocation10 + $0x18] sm:$0xff] }
 0x5e7   : > { %v4065_v57 = vpop.eup %4064  ;;  %v2323_v61 = vadd.f32 %v4063_v21, %v2322_v55  ;;  %3152 = vmatpush.msra.mxu1 %v2748_v0  ;;  %2789 = vmatpush.msra.mxu2 %v2748_v0 }
 0x5e8   : > { %v2350_v10 = vmul.f32 %v4065_v57, %v2135_v42  ;;  %vm2355_vm5 = vweird.f32 %v4065_v57  ;;  %v2342_v50 = vsel %vm5450_vm4, %v5431_v2, %v2338_v37  ;;  %v2402_v2 = vpop.f32.mrf.mxu0  ;;  %v2431_v42 = vpop.f32.mrf.mxu1  ;;  %vm3319_vm4 = vcmask 1046534  }
 0x5e9   : > { %v2327_v41 = vsel %vm2326_vm14, %v4063_v21, %v2323_v61  ;;  %vm2356_vm8 = vmor %vm2354_vm6, %vm2355_vm5  ;;  %v2347_v51 = vsel %vm2344_vm7, %v2346_v45, %v2342_v50  ;;  %v4089_v61 = vld [vmem:[%s4696_s2 + $0x68] sm:$0xff]  ;;  %vm3311_vm14 = vcmask 1042434   ;;  %vm3321_vm5 = vcmask 1047559  }
 0x5ea   : > { %v2332_v27 = vsel %vm2329_vm2, %v2331_v58, %v2327_v41  ;;  %v2351_v24 = vsub.f32 1.0, %v2350_v10  ;;  %v2348_v48 = vmul.f32 %v5321_v15, %v2347_v51  ;;  %v4091_v41 = vld [vmem:[%s4696_s2 + $0x78] sm:$0xff]  ;;  %vm3315_vm2 = vcmask 1044484  }
 0x5eb   : > { %3750 = vmatmul.msk.f32.gmra.mxu1 %vm1994_vm1, %v2318_v5  ;;  %v2333_v13 = vmul.f32 %v5319_v19, %v2332_v27  ;;  %v2361_v19 = vor.u32 1.1754944e-38, %v2360_v22  ;;  %v2747_v5 = vld [vmem:[#allocation10 + $0x10] sm:$0xff]  ;;  %v2745_v27 = vld [vmem:[#allocation10] sm:$0xff]  ;;  %vm3451_vm6 = vcmask 39936  }
 0x5ec   : > { %v2352_v43 = vmul.f32 %v4065_v57, %v2351_v24  ;;  %3799 = vmatmul.msk.f32.gmra.mxu0 %vm788_vm0, %v4076_v46  ;;  %3153 = vmatpush.msra.mxu1 %v2747_v5 }
 0x5ed   : > { %3751 = vmatmul.msk.f32.vlgmr.msrb.gmra.mxu2 %vm1994_vm1, %v2333_v13 }
 0x5ee   : > { %v2353_v12 = vadd.f32 %v4065_v57, %v2352_v43  ;;  %2790 = vmatpush.msra.mxu2 %v2747_v5  ;;  %3154 = vmatpush.msra.mxu1 %v2746_v44  ;;  %v5523_v43 = vld [vmem:[%s5699_s8] ss:$0 sm:$0xff] }
 0x5ef   : > { %v2463_v35 = vpop.f32.mrf.mxu2 }
 0x5f0   : > { %v2138_v4 = vpop.xlane.xlu2 %2137  ;;  %v2357_v49 = vsel %vm2356_vm8, %v4065_v57, %v2353_v12  ;;  %v2405_v21 = vpop.f32.mrf.mxu0  ;;  %2791 = vmatpush.msra.mxu2 %v2746_v44  ;;  %3155 = vmatpush.msra.mxu1 %v2745_v27 }
 0x5f1   : > { %4066 = vrcp.f32 %v2138_v4  ;;  %v2362_v26 = vsel %vm2359_vm9, %v2361_v19, %v2357_v49  ;;  %v2375_v6 = vand.u32 2147483648, %v2138_v4  ;;  %vm2369_vm11 = vweird.f32 %v2138_v4 }
 0x5f2   : > { %v2363_v17 = vmul.f32 %v5355_v53, %v2362_v26  ;;  %2792 = vmatpush.msra.mxu2 %v2745_v27 }
 0x5f3   : > { %3763 = vmatmul.msk.f32.vlgmr.msrb.gmra.mxu1 %vm788_vm0, %v5134_v40  ;;  %v2373_v40 = vand.u32 2147483647, %v2138_v4  ;;  %v2376_v16 = vor.u32 1.1754944e-38, %v2375_v6 }
 0x5f4   : > { %3753 = vmatmul.msk.f32.vlgmr.msrb.gmra.mxu3 %vm1994_vm1, %v2363_v17  ;;  %3800 = vmatmul.msk.f32.gmra.mxu0 %vm788_vm0, %v4077_v33 }
 0x5f5   : > { %3752 = vmatmul.msk.f32.gmra.mxu2 %vm1994_vm1, %v2348_v48  ;;  %vm2374_vm13 = vcmp.eq.f32.partialorder %v2373_v40, 8.507059e+37 }
 0x5f7   : > { %v4067_v60 = vpop.eup %4066  ;;  %v2489_v55 = vpop.f32.mrf.mxu3 }
 0x5f8   : > { %v2365_v54 = vmul.f32 %v4067_v60, %v2138_v4  ;;  %vm2370_vm10 = vweird.f32 %v4067_v60 }
 0x5f9   : > { %vm2371_vm12 = vmor %vm2369_vm11, %vm2370_vm10 }
 0x5fa   : > { %v2366_v62 = vsub.f32 1.0, %v2365_v54 }
 0x5fb   : > { %3764 = vmatmul.msk.f32.gmra.mxu1 %vm788_vm0, %v5152_v30  ;;  %v4078_v30 = vld [vmem:[%s4689_s25 + $0x10] sm:$0xff] }
 0x5fc   : > { %v2367_v53 = vmul.f32 %v4067_v60, %v2366_v62  ;;  %3801 = vmatmul.msk.f32.gmra.mxu0 %vm788_vm0, %v4079_v59 }
 0x5fe   : > { %v2368_v15 = vadd.f32 %v4067_v60, %v2367_v53 }
 0x5ff   : > { %v2492_v58 = vpop.f32.mrf.mxu3 }
 0x600   : > { %v2372_v11 = vsel %vm2371_vm12, %v4067_v60, %v2368_v15 }
 0x601   : > { %v2377_v25 = vsel %vm2374_vm13, %v2376_v16, %v2372_v11 }
 0x602   : > { %v2378_v36 = vmul.f32 %v5400_v1, %v2377_v25  ;;  %v2518_v1 = vpop.f32.mrf.mxu0 }
 0x603   : > { %3765 = vmatmul.msk.f32.gmra.mxu1 %vm788_vm0, %v4078_v30 }
 0x604   : > { %3754 = vmatmul.msk.f32.gmra.mxu3 %vm1994_vm1, %v2378_v36  ;;  %3802 = vmatmul.msk.f32.gmra.mxu0 %vm788_vm0, %v4081_v47  ;;  %vm3309_vm1 = vcmask 1041409  }
 0x60a   : > { %v2521_v63 = vpop.f32.mrf.mxu0 }
 0x60b   : > { %3766 = vmatmul.msk.f32.gmra.mxu1 %vm788_vm0, %v4080_v14 }
 0x60c   : > { %3779 = vmatmul.msk.f32.vlgmr.msra.gmra.mxu3 %vm788_vm0, %v2402_v2  ;;  %3803 = vmatmul.msk.f32.gmra.mxu0 %vm788_vm0, %v4082_v9 }
 0x612   : > { %v2660_v56 = vpop.f32.mrf.mxu0 }
 0x613   : > { %3767 = vmatmul.msk.f32.gmra.mxu1 %vm788_vm0, %v5156_v34  ;;  %v2434_v34 = vpop.f32.mrf.mxu1 }
 0x614   : > { %3780 = vmatmul.msk.f32.gmra.mxu3 %vm788_vm0, %v2405_v21  ;;  %3804 = vmatmul.msk.f32.gmra.mxu0 %vm788_vm0, %v4083_v23 }
 0x61a   : > { %v2663_v52 = vpop.f32.mrf.mxu0 }
 0x61b   : > { %3768 = vmatmul.msk.f32.gmra.mxu1 %vm788_vm0, %v5169_v28  ;;  %v4086_v28 = vld [vmem:[%s4689_s25 + $0x38] sm:$0xff]  ;;  %s5758_s25 = sld [smem:[#allocation37_spill]] }
 0x61c   : > { %3781 = vmatmul.msk.f32.gmra.mxu3 %vm788_vm0, %v2431_v42  ;;  %3805 = vmatmul.msk.f32.gmra.mxu0 %vm788_vm0, %v4085_v32 }
 0x621   : > { %s755_s23 = scalar_lea.vmem %s5758_s25, %s3634_s18 }
 0x622   : > { %v2666_v57 = vpop.f32.mrf.mxu0 }
 0x623   : > { %3769 = vmatmul.msk.f32.gmra.mxu1 %vm788_vm0, %v4084_v7 }
 0x624   : > { %3782 = vmatmul.msk.f32.gmra.mxu3 %vm788_vm0, %v2434_v34  ;;  %3806 = vmatmul.msk.f32.gmra.mxu0 %vm788_vm0, %v4087_v8 }
 0x62a   : > { %v2669_v10 = vpop.f32.mrf.mxu0 }
 0x62b   : > { %3770 = vmatmul.msk.f32.gmra.mxu1 %vm788_vm0, %v4086_v28 }
 0x62c   : > { %3783 = vmatmul.msk.f32.gmra.mxu3 %vm788_vm0, %v2460_v18  ;;  %3807 = vmatmul.msk.f32.gmra.mxu0 %vm788_vm0, %v4088_v29 }
 0x632   : > { %v2672_v37 = vpop.f32.mrf.mxu0 }
 0x634   : > { %3784 = vmatmul.msk.f32.gmra.mxu3 %vm788_vm0, %v2463_v35  ;;  %3808 = vmatmul.msk.f32.gmra.mxu0 %vm788_vm0, %v4089_v61 }
 0x63a   : > { %v2675_v24 = vpop.f32.mrf.mxu0 }
 0x63c   : > { %3785 = vmatmul.msk.f32.gmra.mxu3 %vm788_vm0, %v2489_v55  ;;  %3809 = vmatmul.msk.f32.gmra.mxu0 %vm788_vm0, %v4090_v3 }
 0x642   : > { %v2678_v13 = vpop.f32.mrf.mxu0 }
 0x644   : > { %3786 = vmatmul.msk.f32.gmra.mxu3 %vm788_vm0, %v2492_v58  ;;  %3810 = vmatmul.msk.f32.gmra.mxu0 %vm788_vm0, %v4091_v41 }
 0x64a   : > { %v5518_v31 = vpop.f32.mrf.mxu0 }
 0x64c   : > { %3787 = vmatmul.msk.f32.gmra.mxu3 %vm788_vm0, %v2518_v1 }
 0x652   : > { %v3012_v4 = vpop.f32.mrf.mxu0 }
 0x654   : > { %3788 = vmatmul.msk.f32.gmra.mxu3 %vm788_vm0, %v2521_v63 }
 0x65a   : > { %v3015_v46 = vpop.f32.mrf.mxu0 }
 0x660   : > { %v2547_v20 = vpop.f32.mrf.mxu1 }
 0x661   : > { %3789 = vmatmul.msk.f32.gmra.mxu3 %vm788_vm0, %v2547_v20 }
 0x662   : > { %v3018_v11 = vpop.f32.mrf.mxu0 }
 0x668   : > { %v2550_v22 = vpop.f32.mrf.mxu1 }
 0x669   : > { %3790 = vmatmul.msk.f32.gmra.mxu3 %vm788_vm0, %v2550_v22 }
 0x66a   : > { %v3021_v1 = vpop.f32.mrf.mxu0 }
 0x670   : > { %v2701_v39 = vpop.f32.mrf.mxu1  ;;  %v2576_v50 = vpop.f32.mrf.mxu2 }
 0x671   : > { %v2702_v45 = vadd.f32 %v2701_v39, %v2660_v56  ;;  %3791 = vmatmul.msk.f32.gmra.mxu3 %vm788_vm0, %v2576_v50 }
 0x672   : > { %v3024_v28 = vpop.f32.mrf.mxu0 }
 0x673   : > { %v2729_v12 = vadd.f32 %v5523_v43, %v2702_v45 }
 0x675   : > { %v2737_v19 = vmax.f32 %v2729_v12, 0.0 }
 0x677   : > { %3771 = vmatmul.msk.f32.vlgmr.msra.gmra.mxu2 %vm788_vm0, %v2737_v19  ;;  %v2605_v48 = vpop.f32.mrf.mxu3 }
 0x678   : > { %v2704_v49 = vpop.f32.mrf.mxu1  ;;  %v2579_v51 = vpop.f32.mrf.mxu2 }
 0x679   : > { %v2705_v38 = vadd.f32 %v2704_v49, %v2663_v52  ;;  %3792 = vmatmul.msk.f32.gmra.mxu3 %vm788_vm0, %v2579_v51 }
 0x67a   : > { %v3027_v3 = vpop.f32.mrf.mxu0 }
 0x67b   : > { %v2730_v26 = vadd.f32 %v5523_v43, %v2705_v38 }
 0x67d   : > { %v2738_v17 = vmax.f32 %v2730_v26, 0.0 }
 0x67f   : > { %3772 = vmatmul.msk.f32.gmra.mxu2 %vm788_vm0, %v2738_v17 }
 0x680   : > { %v2707_v60 = vpop.f32.mrf.mxu1 }
 0x681   : > { %v2708_v54 = vadd.f32 %v2707_v60, %v2666_v57  ;;  %3793 = vmatmul.msk.f32.gmra.mxu3 %vm788_vm0, %v2605_v48 }
 0x682   : > { %v3030_v22 = vpop.f32.mrf.mxu0 }
 0x683   : > { %v2731_v62 = vadd.f32 %v5523_v43, %v2708_v54 }
 0x685   : > { %v2739_v6 = vmax.f32 %v2731_v62, 0.0 }
 0x687   : > { %v2608_v53 = vpop.f32.mrf.mxu3  ;;  %3773 = vmatmul.msk.f32.gmra.mxu2 %vm788_vm0, %v2739_v6 }
 0x688   : > { %v2710_v40 = vpop.f32.mrf.mxu1 }
 0x689   : > { %v2711_v15 = vadd.f32 %v2710_v40, %v2669_v10  ;;  %3794 = vmatmul.msk.f32.gmra.mxu3 %vm788_vm0, %v2608_v53 }
 0x68a   : > { %v3033_v19 = vpop.f32.mrf.mxu0 }
 0x68b   : > { %v2732_v16 = vadd.f32 %v5523_v43, %v2711_v15 }
 0x68d   : > { %v2740_v25 = vmax.f32 %v2732_v16, 0.0 }
 0x68f   : > { %v2947_v33 = vpop.f32.mrf.mxu3  ;;  %3774 = vmatmul.msk.f32.gmra.mxu2 %vm788_vm0, %v2740_v25 }
 0x690   : > { %v3013_v36 = vadd.f32 %v3012_v4, %v2947_v33  ;;  %v2713_v2 = vpop.f32.mrf.mxu1 }
 0x691   : > { %v2714_v30 = vadd.f32 %v2713_v2, %v2672_v37 }
 0x692   : > { %v3060_v59 = vadd.f32 %v5523_v43, %v3013_v36  ;;  %v3036_v17 = vpop.f32.mrf.mxu0 }
 0x693   : > { %v2733_v14 = vadd.f32 %v5523_v43, %v2714_v30 }
 0x694   : > { %v3076_v21 = vmax.f32 %v3060_v59, 0.0 }
 0x695   : > { %v2741_v47 = vmax.f32 %v2733_v14, 0.0 }
 0x696   : > { %3811 = vmatmul.msk.f32.vlgmr.msra.gmra.mxu1 %vm788_vm0, %v3076_v21 }
 0x697   : > { %v2950_v42 = vpop.f32.mrf.mxu3  ;;  %3775 = vmatmul.msk.f32.gmra.mxu2 %vm788_vm0, %v2741_v47 }
 0x698   : > { %v3016_v9 = vadd.f32 %v3015_v46, %v2950_v42  ;;  %v2716_v63 = vpop.f32.mrf.mxu1 }
 0x699   : > { %v2717_v23 = vadd.f32 %v2716_v63, %v2675_v24 }
 0x69a   : > { %v3061_v34 = vadd.f32 %v5523_v43, %v3016_v9  ;;  %v3039_v6 = vpop.f32.mrf.mxu0 }
 0x69b   : > { %v2734_v7 = vadd.f32 %v5523_v43, %v2717_v23 }
 0x69c   : > { %v3077_v56 = vmax.f32 %v3061_v34, 0.0 }
 0x69d   : > { %v2742_v32 = vmax.f32 %v2734_v7, 0.0 }
 0x69e   : > { %3812 = vmatmul.msk.f32.gmra.mxu1 %vm788_vm0, %v3077_v56 }
 0x69f   : > { %v2953_v18 = vpop.f32.mrf.mxu3  ;;  %3776 = vmatmul.msk.f32.gmra.mxu2 %vm788_vm0, %v2742_v32 }
 0x6a0   : > { %v3019_v8 = vadd.f32 %v3018_v11, %v2953_v18  ;;  %v2719_v35 = vpop.f32.mrf.mxu1 }
 0x6a1   : > { %v2720_v52 = vadd.f32 %v2719_v35, %v2678_v13 }
 0x6a2   : > { %v3062_v0 = vadd.f32 %v5523_v43, %v3019_v8  ;;  %v3042_v11 = vpop.f32.mrf.mxu0 }
 0x6a3   : > { %v2735_v55 = vadd.f32 %v5523_v43, %v2720_v52 }
 0x6a4   : > { %v3078_v29 = vmax.f32 %v3062_v0, 0.0 }
 0x6a5   : > { %v2743_v57 = vmax.f32 %v2735_v55, 0.0 }
 0x6a6   : > { %3813 = vmatmul.msk.f32.gmra.mxu1 %vm788_vm0, %v3078_v29 }
 0x6a7   : > { %v2956_v61 = vpop.f32.mrf.mxu3  ;;  %3777 = vmatmul.msk.f32.gmra.mxu2 %vm788_vm0, %v2743_v57 }
 0x6a8   : > { %v3022_v58 = vadd.f32 %v3021_v1, %v2956_v61  ;;  %v2722_v10 = vpop.f32.mrf.mxu1 }
 0x6a9   : > { %v2723_v5 = vadd.f32 %v2722_v10, %v5518_v31 }
 0x6aa   : > { %v3063_v37 = vadd.f32 %v5523_v43, %v3022_v58  ;;  %v3045_v36 = vpop.f32.mrf.mxu0 }
 0x6ab   : > { %v2736_v41 = vadd.f32 %v5523_v43, %v2723_v5 }
 0x6ac   : > { %v3079_v44 = vmax.f32 %v3063_v37, 0.0  ;;  %v5581_v37 = vld [vmem:[%s5701_s10] ss:$0 sm:$0xff] }
 0x6ad   : > { %v2744_v27 = vmax.f32 %v2736_v41, 0.0 }
 0x6ae   : > { %3814 = vmatmul.msk.f32.gmra.mxu1 %vm788_vm0, %v3079_v44 }
 0x6af   : > { %v2959_v24 = vpop.f32.mrf.mxu3  ;;  %3778 = vmatmul.msk.f32.gmra.mxu2 %vm788_vm0, %v2744_v27 }
 0x6b0   : > { %v3025_v20 = vadd.f32 %v3024_v28, %v2959_v24 }
 0x6b2   : > { %v3064_v13 = vadd.f32 %v5523_v43, %v3025_v20  ;;  %v3048_v1 = vpop.f32.mrf.mxu0 }
 0x6b4   : > { %v3080_v39 = vmax.f32 %v3064_v13, 0.0 }
 0x6b6   : > { %3815 = vmatmul.msk.f32.gmra.mxu1 %vm788_vm0, %v3080_v39 }
 0x6b7   : > { %v2962_v31 = vpop.f32.mrf.mxu3 }
 0x6b8   : > { %v3028_v50 = vadd.f32 %v3027_v3, %v2962_v31 }
 0x6ba   : > { %v3065_v45 = vadd.f32 %v5523_v43, %v3028_v50  ;;  %v3051_v34 = vpop.f32.mrf.mxu0 }
 0x6bc   : > { %v3081_v12 = vmax.f32 %v3065_v45, 0.0 }
 0x6be   : > { %3816 = vmatmul.msk.f32.gmra.mxu1 %vm788_vm0, %v3081_v12 }
 0x6bf   : > { %v2965_v4 = vpop.f32.mrf.mxu3 }
 0x6c0   : > { %v3031_v49 = vadd.f32 %v3030_v22, %v2965_v4 }
 0x6c2   : > { %v3066_v51 = vadd.f32 %v5523_v43, %v3031_v49  ;;  %v3054_v8 = vpop.f32.mrf.mxu0 }
 0x6c4   : > { %v3082_v38 = vmax.f32 %v3066_v51, 0.0 }
 0x6c6   : > { %3817 = vmatmul.msk.f32.gmra.mxu1 %vm788_vm0, %v3082_v38 }
 0x6c7   : > { %v2968_v26 = vpop.f32.mrf.mxu3 }
 0x6c8   : > { %v3034_v48 = vadd.f32 %v3033_v19, %v2968_v26 }
 0x6ca   : > { %v3067_v60 = vadd.f32 %v5523_v43, %v3034_v48  ;;  %v3057_v57 = vpop.f32.mrf.mxu0 }
 0x6cc   : > { %v3083_v54 = vmax.f32 %v3067_v60, 0.0 }
 0x6ce   : > { %3818 = vmatmul.msk.f32.gmra.mxu1 %vm788_vm0, %v3083_v54 }
 0x6cf   : > { %v2971_v46 = vpop.f32.mrf.mxu3 }
 0x6d0   : > { %v3037_v62 = vadd.f32 %v3036_v17, %v2971_v46 }
 0x6d2   : > { %v3068_v53 = vadd.f32 %v5523_v43, %v3037_v62 }
 0x6d4   : > { %v3084_v40 = vmax.f32 %v3068_v53, 0.0 }
 0x6d6   : > { %3819 = vmatmul.msk.f32.gmra.mxu1 %vm788_vm0, %v3084_v40 }
 0x6d7   : > { %v2974_v15 = vpop.f32.mrf.mxu3 }
 0x6d8   : > { %v3040_v16 = vadd.f32 %v3039_v6, %v2974_v15 }
 0x6da   : > { %v3069_v25 = vadd.f32 %v5523_v43, %v3040_v16 }
 0x6dc   : > { %v3085_v33 = vmax.f32 %v3069_v25, 0.0 }
 0x6de   : > { %3820 = vmatmul.msk.f32.gmra.mxu1 %vm788_vm0, %v3085_v33 }
 0x6e4   : > { %v2977_v2 = vpop.f32.mrf.mxu3 }
 0x6e5   : > { %v3043_v30 = vadd.f32 %v3042_v11, %v2977_v2 }
 0x6e7   : > { %v3070_v59 = vadd.f32 %v5523_v43, %v3043_v30 }
 0x6e9   : > { %v3086_v14 = vmax.f32 %v3070_v59, 0.0 }
 0x6eb   : > { %3821 = vmatmul.msk.f32.gmra.mxu1 %vm788_vm0, %v3086_v14 }
 0x6ec   : > { %v2980_v21 = vpop.f32.mrf.mxu3 }
 0x6ed   : > { %v3046_v47 = vadd.f32 %v3045_v36, %v2980_v21 }
 0x6ef   : > { %v3071_v42 = vadd.f32 %v5523_v43, %v3046_v47 }
 0x6f1   : > { %v3087_v9 = vmax.f32 %v3071_v42, 0.0 }
 0x6f3   : > { %3822 = vmatmul.msk.f32.gmra.mxu1 %vm788_vm0, %v3087_v9 }
 0x6f4   : > { %v2983_v63 = vpop.f32.mrf.mxu3 }
 0x6f5   : > { %v3049_v23 = vadd.f32 %v3048_v1, %v2983_v63 }
 0x6f7   : > { %v3072_v7 = vadd.f32 %v5523_v43, %v3049_v23 }
 0x6f9   : > { %v3088_v56 = vmax.f32 %v3072_v7, 0.0 }
 0x6fa   : > { %v2794_v21 = vpop.f32.mrf.mxu2 }
 0x6fb   : > { %3823 = vmatmul.msk.f32.gmra.mxu1 %vm788_vm0, %v3088_v56 }
 0x6fc   : > { %v2986_v32 = vpop.f32.mrf.mxu3 }
 0x6fd   : > { %v3052_v18 = vadd.f32 %v3051_v34, %v2986_v32 }
 0x6ff   : > { %v3073_v28 = vadd.f32 %v5523_v43, %v3052_v18 }
 0x701   : > { %v3089_v35 = vmax.f32 %v3073_v28, 0.0 }
 0x702   : > { %v2797_v7 = vpop.f32.mrf.mxu2 }
 0x703   : > { %3824 = vmatmul.msk.f32.gmra.mxu1 %vm788_vm0, %v3089_v35 }
 0x704   : > { %v2989_v52 = vpop.f32.mrf.mxu3 }
 0x705   : > { %v3055_v0 = vadd.f32 %v3054_v8, %v2989_v52 }
 0x707   : > { %v3074_v55 = vadd.f32 %v5523_v43, %v3055_v0  ;;  %v3300_v0 = vld [vmem:[#allocation13 + $0x18] sm:$0xff] }
 0x708   : > { %3337 = vmatpush.msrb.mxu2 %v3300_v0 }
 0x709   : > { %v3090_v29 = vmax.f32 %v3074_v55, 0.0 }
 0x70b   : > { %3825 = vmatmul.msk.f32.gmra.mxu1 %vm788_vm0, %v3090_v29 }
 0x70c   : > { %v2992_v61 = vpop.f32.mrf.mxu3 }
 0x70d   : > { %v3058_v58 = vadd.f32 %v3057_v57, %v2992_v61 }
 0x70f   : > { %v3075_v10 = vadd.f32 %v5523_v43, %v3058_v58  ;;  %v2800_v58 = vpop.f32.mrf.mxu2 }
 0x711   : > { %v3091_v5 = vmax.f32 %v3075_v10, 0.0 }
 0x713   : > { %v3157_v3 = vpop.f32.mrf.mxu1  ;;  %3826 = vmatmul.msk.f32.gmra.mxu1 %vm788_vm0, %v3091_v5 }
 0x714   : > { %v3158_v41 = vadd.f32 %v5581_v37, %v3157_v3 }
 0x716   : > { %v3205_v27 = vmax.f32 %v3158_v41, 0.0 }
 0x718   : > { %v3221_v13 = vsel %vm788_vm0, %v3205_v27, 0.0 }
 0x71b   : > { %v3160_v44 = vpop.f32.mrf.mxu1 }
 0x71c   : > { %v3161_v24 = vadd.f32 %v5581_v37, %v3160_v44 }
 0x71e   : > { %v3206_v20 = vmax.f32 %v3161_v24, 0.0  ;;  %v2803_v24 = vpop.f32.mrf.mxu2 }
 0x720   : > { %v3222_v43 = vsel %vm788_vm0, %v3206_v20, 0.0 }
 0x721   : > { %v3223_v22 = vadd.f32 %v3222_v43, %v3221_v13  ;;  %v3299_v43 = vld [vmem:[#allocation13 + $0x10] sm:$0xff] }
 0x722   : > { %3338 = vmatpush.msrb.mxu2 %v3299_v43 }
 0x723   : > { %v3163_v39 = vpop.f32.mrf.mxu1  ;;  %v3224_v50 = vrot.slane %v3223_v22, 4 }
 0x724   : > { %v3164_v31 = vadd.f32 %v5581_v37, %v3163_v39 }
 0x725   : > { %v3225_v4 = vadd.f32 %v3224_v50, %v3223_v22 }
 0x726   : > { %v3207_v12 = vmax.f32 %v3164_v31, 0.0  ;;  %v2806_v39 = vpop.f32.mrf.mxu2 }
 0x727   : > { %v3226_v26 = vrot.slane %v3225_v4, 2 }
 0x728   : > { %v3230_v51 = vsel %vm788_vm0, %v3207_v12, 0.0 }
 0x729   : > { %v3227_v54 = vadd.f32 %v3226_v26, %v3225_v4 }
 0x72b   : > { %v3166_v45 = vpop.f32.mrf.mxu1  ;;  %v3228_v53 = vrot.slane %v3227_v54, 1 }
 0x72c   : > { %v3167_v19 = vadd.f32 %v5581_v37, %v3166_v45  ;;  %v3298_v45 = vld [vmem:[#allocation13 + $0x8] sm:$0xff] }
 0x72d   : > { %v3229_v33 = vadd.f32 %v3228_v53, %v3227_v54  ;;  %3339 = vmatpush.msrb.mxu2 %v3298_v45 }
 0x72e   : > { %v3208_v49 = vmax.f32 %v3167_v19, 0.0  ;;  %v2809_v50 = vpop.f32.mrf.mxu2 }
 0x730   : > { %v3231_v38 = vsel %vm788_vm0, %v3208_v49, 0.0 }
 0x731   : > { %v3232_v17 = vadd.f32 %v3231_v38, %v3230_v51 }
 0x733   : > { %v3233_v48 = vrot.slane %v3232_v17, 4  ;;  %v3169_v60 = vpop.f32.mrf.mxu1 }
 0x734   : > { %v3170_v6 = vadd.f32 %v5581_v37, %v3169_v60  ;;  %v2798_v60 = vadd.f32 %v5581_v37, %v2797_v7  ;;  %v2810_v7 = vadd.f32 %v5581_v37, %v2809_v50 }
 0x735   : > { %v3234_v46 = vadd.f32 %v3233_v48, %v3232_v17 }
 0x736   : > { %v3209_v11 = vmax.f32 %v3170_v6, 0.0  ;;  %v2812_v49 = vpop.f32.mrf.mxu2 }
 0x737   : > { %v3235_v62 = vrot.slane %v3234_v46, 2 }
 0x738   : > { %v3239_v59 = vsel %vm788_vm0, %v3209_v11, 0.0 }
 0x739   : > { %v3236_v40 = vadd.f32 %v3235_v62, %v3234_v46 }
 0x73b   : > { %v3237_v15 = vrot.slane %v3236_v40, 1  ;;  %v3172_v16 = vpop.f32.mrf.mxu1 }
 0x73c   : > { %v3173_v25 = vadd.f32 %v5581_v37, %v3172_v16  ;;  %v2795_v16 = vadd.f32 %v5581_v37, %v2794_v21  ;;  %v3295_v21 = vld [vmem:[#allocation12 + $0x10] sm:$0xff] }
 0x73d   : > { %v3238_v36 = vadd.f32 %v3237_v15, %v3236_v40  ;;  %v3297_v15 = vld [vmem:[#allocation13] sm:$0xff] }
 0x73e   : > { %v3210_v2 = vmax.f32 %v3173_v25, 0.0  ;;  %3340 = vmatpush.msrb.mxu2 %v3297_v15 }
 0x73f   : > { %v3310_v30 = vsel %vm3309_vm1, %v3238_v36, %v3229_v33  ;;  %v2819_v33 = vmax.f32 %v2798_v60, 0.0  ;;  %v2801_v36 = vadd.f32 %v5581_v37, %v2800_v58 }
 0x740   : > { %v3240_v14 = vsel %vm788_vm0, %v3210_v2, 0.0  ;;  %v2804_v2 = vadd.f32 %v5581_v37, %v2803_v24 }
 0x741   : > { %v3241_v47 = vadd.f32 %v3240_v14, %v3239_v59  ;;  %v2807_v59 = vadd.f32 %v5581_v37, %v2806_v39 }
 0x743   : > { %v3242_v1 = vrot.slane %v3241_v47, 4  ;;  %v3175_v42 = vpop.f32.mrf.mxu1  ;;  %v2822_v0 = vmax.f32 %v2807_v59, 0.0 }
 0x744   : > { %v3176_v23 = vadd.f32 %v5581_v37, %v3175_v42  ;;  %v3296_v42 = vld [vmem:[#allocation12 + $0x18] sm:$0xff] }
 0x745   : > { %v3243_v9 = vadd.f32 %v3242_v1, %v3241_v47  ;;  %3374 = vmatpush.msra.mxu2 %v3296_v42  ;;  %v2854_v24 = vsel %vm788_vm0, %v2822_v0, 0.0 }
 0x746   : > { %v3211_v18 = vmax.f32 %v3176_v23, 0.0 }
 0x747   : > { %v3244_v63 = vrot.slane %v3243_v9, 2  ;;  %3375 = vmatpush.msra.mxu2 %v3295_v21 }
 0x748   : > { %v3248_v55 = vsel %vm788_vm0, %v3211_v18, 0.0  ;;  %v2820_v18 = vmax.f32 %v2801_v36, 0.0 }
 0x749   : > { %v3245_v34 = vadd.f32 %v3244_v63, %v3243_v9  ;;  %v2815_v9 = vpop.f32.mrf.mxu2 }
 0x74b   : > { %v3246_v56 = vrot.slane %v3245_v34, 1  ;;  %v3178_v32 = vpop.f32.mrf.mxu1 }
 0x74c   : > { %v3179_v28 = vadd.f32 %v5581_v37, %v3178_v32  ;;  %v3294_v32 = vld [vmem:[#allocation12 + $0x8] sm:$0xff] }
 0x74d   : > { %v3247_v8 = vadd.f32 %v3246_v56, %v3245_v34  ;;  %v2818_v34 = vmax.f32 %v2795_v16, 0.0  ;;  %3376 = vmatpush.msra.mxu2 %v3294_v32 }
 0x74e   : > { %v3212_v35 = vmax.f32 %v3179_v28, 0.0  ;;  %v2821_v28 = vmax.f32 %v2804_v2, 0.0 }
 0x74f   : > { %v3312_v52 = vsel %vm3311_vm14, %v3247_v8, %v3310_v30  ;;  %v2813_v8 = vadd.f32 %v5581_v37, %v2812_v49  ;;  %v2826_v58 = vsel %vm788_vm0, %v2818_v34, 0.0  ;;  %v2855_v49 = vrot.slane %v2854_v24, 4 }
 0x750   : > { %v3249_v29 = vsel %vm788_vm0, %v3212_v35, 0.0  ;;  %v2827_v39 = vrot.slane %v2826_v58, 4 }
 0x751   : > { %v3250_v57 = vadd.f32 %v3249_v29, %v3248_v55  ;;  %v2816_v55 = vadd.f32 %v5581_v37, %v2815_v9 }
 0x753   : > { %v3251_v61 = vrot.slane %v3250_v57, 4  ;;  %v3181_v5 = vpop.f32.mrf.mxu1 }
 0x754   : > { %v3182_v51 = vadd.f32 %v5581_v37, %v3181_v5 }
 0x755   : > { %v3252_v10 = vadd.f32 %v3251_v61, %v3250_v57  ;;  %v3293_v57 = vld [vmem:[#allocation12] sm:$0xff] }
 0x756   : > { %v3213_v54 = vmax.f32 %v3182_v51, 0.0  ;;  %3377 = vmatpush.msra.mxu2 %v3293_v57 }
 0x757   : > { %v3253_v3 = vrot.slane %v3252_v10, 2 }
 0x758   : > { %v3257_v30 = vsel %vm788_vm0, %v3213_v54, 0.0  ;;  %v2828_v54 = vadd.f32 %v2827_v39, %v2826_v58 }
 0x759   : > { %v3254_v41 = vadd.f32 %v3253_v3, %v3252_v10  ;;  %v2823_v10 = vmax.f32 %v2810_v7, 0.0 }
 0x75b   : > { %v3255_v44 = vrot.slane %v3254_v41, 1  ;;  %v3184_v13 = vpop.f32.mrf.mxu1  ;;  %v2861_v45 = vsel %vm788_vm0, %v2823_v10, 0.0 }
 0x75c   : > { %v3185_v19 = vadd.f32 %v5581_v37, %v3184_v13  ;;  %v2825_v13 = vmax.f32 %v2816_v55, 0.0 }
 0x75d   : > { %v3256_v27 = vadd.f32 %v3255_v44, %v3254_v41  ;;  %v2840_v41 = vsel %vm788_vm0, %v2820_v18, 0.0  ;;  %v2847_v44 = vsel %vm788_vm0, %v2821_v28, 0.0 }
 0x75e   : > { %v3214_v26 = vmax.f32 %v3185_v19, 0.0  ;;  %v2841_v50 = vrot.slane %v2840_v41, 4 }
 0x75f   : > { %v5602_v20 = vsel %vm3313_vm15, %v3256_v27, %v3312_v52  ;;  %v2833_v52 = vsel %vm788_vm0, %v2819_v33, 0.0  ;;  %v2824_v27 = vmax.f32 %v2813_v8, 0.0  ;;  %v2856_v33 = vadd.f32 %v2855_v49, %v2854_v24 }
 0x760   : > { %v3258_v53 = vsel %vm788_vm0, %v3214_v26, 0.0  ;;  %v2834_v3 = vrot.slane %v2833_v52, 4  ;;  %v2875_v26 = vsel %vm788_vm0, %v2825_v13, 0.0 }
 0x761   : > { %v3259_v14 = vadd.f32 %v3258_v53, %v3257_v30  ;;  %v2868_v51 = vsel %vm788_vm0, %v2824_v27, 0.0  ;;  %v2857_v7 = vrot.slane %v2856_v33, 2 }
 0x762   : > { %v2835_v19 = vadd.f32 %v2834_v3, %v2833_v52  ;;  %v2869_v53 = vrot.slane %v2868_v51, 4 }
 0x763   : > { %v3260_v29 = vrot.slane %v3259_v14, 4  ;;  %v2858_v58 = vadd.f32 %v2857_v7, %v2856_v33  ;;  %v3391_v33 = vld [vmem:[#allocation15 + $0x18] sm:$0xff] }
 0x764   : > { %v2836_v16 = vrot.slane %v2835_v19, 2  ;;  %v2870_v42 = vadd.f32 %v2869_v53, %v2868_v51 }
 0x765   : > { %v3261_v43 = vadd.f32 %v3260_v29, %v3259_v14 }
 0x766   : > { %v2837_v34 = vadd.f32 %v2836_v16, %v2835_v19  ;;  %v2871_v52 = vrot.slane %v2870_v42, 2 }
 0x768   : > { %v3187_v22 = vpop.f32.mrf.mxu1  ;;  %v2872_v24 = vadd.f32 %v2871_v52, %v2870_v42 }
 0x769   : > { %v3188_v38 = vadd.f32 %v5581_v37, %v3187_v22 }
 0x76a   : > { %v2873_v51 = vrot.slane %v2872_v24, 1 }
 0x76b   : > { %v3215_v62 = vmax.f32 %v3188_v38, 0.0 }
 0x76d   : > { %v3266_v47 = vsel %vm788_vm0, %v3215_v62, 0.0 }
 0x770   : > { %v3190_v31 = vpop.f32.mrf.mxu1 }
 0x771   : > { %v3191_v4 = vadd.f32 %v5581_v37, %v3190_v31 }
 0x773   : > { %v3216_v48 = vmax.f32 %v3191_v4, 0.0  ;;  %v2848_v4 = vrot.slane %v2847_v44, 4 }
 0x775   : > { %v3267_v11 = vsel %vm788_vm0, %v3216_v48, 0.0 }
 0x776   : > { %v3268_v63 = vadd.f32 %v3267_v11, %v3266_v47  ;;  %v2849_v11 = vadd.f32 %v2848_v4, %v2847_v44 }
 0x778   : > { %v3193_v12 = vpop.f32.mrf.mxu1  ;;  %v3269_v61 = vrot.slane %v3268_v63, 4  ;;  %v2850_v9 = vrot.slane %v2849_v11, 2 }
 0x779   : > { %v3194_v17 = vadd.f32 %v5581_v37, %v3193_v12 }
 0x77a   : > { %v3270_v31 = vadd.f32 %v3269_v61, %v3268_v63  ;;  %v2851_v55 = vadd.f32 %v2850_v9, %v2849_v11  ;;  %v2838_v61 = vrot.slane %v2837_v34, 1  ;;  %v3422_v9 = vld [vmem:[%s5707_s16 + $0x10] sm:$0xff] }
 0x77b   : > { %v3217_v40 = vmax.f32 %v3194_v17, 0.0  ;;  %v3262_v17 = vrot.slane %v3261_v43, 2 }
 0x77c   : > { %v3271_v62 = vrot.slane %v3270_v31, 2 }
 0x77d   : > { %v3275_v23 = vsel %vm788_vm0, %v3217_v40, 0.0  ;;  %v3263_v36 = vadd.f32 %v3262_v17, %v3261_v43  ;;  %v2852_v43 = vrot.slane %v2851_v55, 1 }
 0x77e   : > { %v3272_v14 = vadd.f32 %v3271_v62, %v3270_v31  ;;  %v2839_v31 = vadd.f32 %v2838_v61, %v2837_v34  ;;  %v3970_v34 = vld [vmem:[%s5756_s30] ss:$0 sm:$0xff] }
 0x77f   : > { %v2853_v17 = vadd.f32 %v2852_v43, %v2851_v55 }
 0x780   : > { %v3196_v46 = vpop.f32.mrf.mxu1  ;;  %v3273_v18 = vrot.slane %v3272_v14, 1 }
 0x781   : > { %v3197_v6 = vadd.f32 %v5581_v37, %v3196_v46  ;;  %v2862_v46 = vrot.slane %v2861_v45, 4 }
 0x782   : > { %v3274_v3 = vadd.f32 %v3273_v18, %v3272_v14  ;;  %v3971_v18 = vld [vmem:[%s5757_s15] ss:$0 sm:$0xff] }
 0x783   : > { %v3218_v25 = vmax.f32 %v3197_v6, 0.0  ;;  %v2842_v6 = vadd.f32 %v2841_v50, %v2840_v41  ;;  %v2863_v59 = vadd.f32 %v2862_v46, %v2861_v45  ;;  %v2859_v50 = vrot.slane %v2858_v58, 1 }
 0x785   : > { %v3276_v1 = vsel %vm788_vm0, %v3218_v25, 0.0  ;;  %v2876_v25 = vrot.slane %v2875_v26, 4  ;;  %v2864_v32 = vrot.slane %v2863_v59, 2 }
 0x786   : > { %v3277_v56 = vadd.f32 %v3276_v1, %v3275_v23  ;;  %v2843_v1 = vrot.slane %v2842_v6, 2 }
 0x787   : > { %v2877_v63 = vadd.f32 %v2876_v25, %v2875_v26 }
 0x788   : > { %v3199_v35 = vpop.f32.mrf.mxu1  ;;  %v3278_v5 = vrot.slane %v3277_v56, 4 }
 0x789   : > { %v3200_v22 = vadd.f32 %v5581_v37, %v3199_v35  ;;  %v2844_v35 = vadd.f32 %v2843_v1, %v2842_v6  ;;  %v2878_v29 = vrot.slane %v2877_v63, 2  ;;  %v2874_v6 = vadd.f32 %v2873_v51, %v2872_v24 }
 0x78a   : > { %v3279_v12 = vadd.f32 %v3278_v5, %v3277_v56  ;;  %v3264_v56 = vrot.slane %v3263_v36, 1  ;;  %v2865_v5 = vadd.f32 %v2864_v32, %v2863_v59  ;;  %v3423_v59 = vld [vmem:[%s5707_s16 + $0x18] sm:$0xff] }
 0x78b   : > { %v3219_v48 = vmax.f32 %v3200_v22, 0.0  ;;  %v2845_v27 = vrot.slane %v2844_v35, 1  ;;  %v2879_v22 = vadd.f32 %v2878_v29, %v2877_v63  ;;  %v3421_v63 = vld [vmem:[%s5707_s16 + $0x8] sm:$0xff] }
 0x78c   : > { %v3280_v40 = vrot.slane %v3279_v12, 2  ;;  %v3265_v10 = vadd.f32 %v3264_v56, %v3263_v36  ;;  %v3390_v36 = vld [vmem:[#allocation15 + $0x10] sm:$0xff] }
 0x78d   : > { %v3284_v2 = vsel %vm788_vm0, %v3219_v48, 0.0  ;;  %v2846_v49 = vadd.f32 %v2845_v27, %v2844_v35  ;;  %v2880_v48 = vrot.slane %v2879_v22, 1 }
 0x78e   : > { %v3281_v21 = vadd.f32 %v3280_v40, %v3279_v12  ;;  %v3316_v45 = vsel %vm3315_vm2, %v3265_v10, %v5602_v20  ;;  %v2866_v12 = vrot.slane %v2865_v5, 1 }
 0x78f   : > { %v3318_v4 = vsel %vm3317_vm3, %v3274_v3, %v3316_v45  ;;  %v2881_v40 = vadd.f32 %v2880_v48, %v2879_v22 }
 0x790   : > { %v3202_v38 = vpop.f32.mrf.mxu1  ;;  %v3282_v0 = vrot.slane %v3281_v21, 1  ;;  %v2867_v46 = vadd.f32 %v2866_v12, %v2865_v5 }
 0x791   : > { %v3203_v60 = vadd.f32 %v5581_v37, %v3202_v38  ;;  %v2829_v37 = vrot.slane %v2828_v54, 2 }
 0x792   : > { %v3283_v13 = vadd.f32 %v3282_v0, %v3281_v21 }
 0x793   : > { %v3220_v15 = vmax.f32 %v3203_v60, 0.0  ;;  %v2830_v8 = vadd.f32 %v2829_v37, %v2828_v54  ;;  %v2860_v54 = vadd.f32 %v2859_v50, %v2858_v58 }
 0x794   : > { %v3320_v38 = vsel %vm3319_vm4, %v3283_v13, %v3318_v4 }
 0x795   : > { %v3285_v30 = vsel %vm788_vm0, %v3220_v15, 0.0  ;;  %v2831_v44 = vrot.slane %v2830_v8, 1 }
 0x796   : > { %v3286_v47 = vadd.f32 %v3285_v30, %v3284_v2  ;;  %v3389_v2 = vld [vmem:[#allocation15 + $0x8] sm:$0xff]  ;;  %v3388_v30 = vld [vmem:[#allocation15] sm:$0xff] }
 0x797   : > { %v2832_v26 = vadd.f32 %v2831_v44, %v2830_v8 }
 0x798   : > { %v3287_v23 = vrot.slane %v3286_v47, 4 }
 0x799   : > { %v3353_v20 = vsel %vm3309_vm1, %v2839_v31, %v2832_v26 }
 0x79a   : > { %v3288_v28 = vadd.f32 %v3287_v23, %v3286_v47  ;;  %v3354_v62 = vsel %vm3311_vm14, %v2846_v49, %v3353_v20  ;;  %v3969_v47 = vld [vmem:[%s5704_s13] ss:$0 sm:$0xff] }
 0x79b   : > { %v3355_v53 = vsel %vm3313_vm15, %v2853_v17, %v3354_v62  ;;  %v3420_v23 = vld [vmem:[%s5707_s16] sm:$0xff] }
 0x79c   : > { %v3289_v57 = vrot.slane %v3288_v28, 2  ;;  %v3356_v15 = vsel %vm3315_vm2, %v2860_v54, %v3355_v53 }
 0x79d   : > { %v3357_v16 = vsel %vm3317_vm3, %v2867_v46, %v3356_v15 }
 0x79e   : > { %v3290_v41 = vadd.f32 %v3289_v57, %v3288_v28  ;;  %v3358_v11 = vsel %vm3319_vm4, %v2874_v6, %v3357_v16 }
 0x79f   : > { %v3359_v25 = vsel %vm3321_vm5, %v2881_v40, %v3358_v11 }
 0x7a0   : > { %v3291_v39 = vrot.slane %v3290_v41, 1 }
 0x7a2   : > { %v3292_v19 = vadd.f32 %v3291_v39, %v3290_v41 }
 0x7a4   : > { %v3322_v60 = vsel %vm3321_vm5, %v3292_v19, %v3320_v38 }
 0x7a5   : > { %3827 = vmatmul.msk.f32.vlgmr.msrb.gmra.mxu2 %vm788_vm0, %v3322_v60 }
 0x7a6   : > { %3411 = vmatpush.msrb.mxu2 %v3391_v33 }
 0x7a8   : > { %3412 = vmatpush.msrb.mxu2 %v3390_v36 }
 0x7aa   : > { %3413 = vmatpush.msrb.mxu2 %v3389_v2 }
 0x7ac   : > { %3414 = vmatpush.msrb.mxu2 %v3388_v30 }
 0x7ad   : > { %3828 = vmatmul.msk.f32.vlgmr.msra.gmra.mxu2 %vm788_vm0, %v3359_v25 }
 0x7ae   : > { %3443 = vmatpush.msra.mxu2 %v3423_v59 }
 0x7b0   : > { %3444 = vmatpush.msra.mxu2 %v3422_v9 }
 0x7b2   : > { %3445 = vmatpush.msra.mxu2 %v3421_v63 }
 0x7b4   : > { %3446 = vmatpush.msra.mxu2 %v3420_v23 }
 0x828   : > { %v3342_v14 = vpop.f32.mrf.mxu2 }
 0x830   : > { %v3379_v37 = vpop.f32.mrf.mxu2 }
 0x831   : > { %v3380_v1 = vadd.f32 %v3379_v37, %v3342_v14 }
 0x833   : > { %v3386_v42 = vadd.f32 %v3969_v47, %v3380_v1 }
 0x835   : > { %v3387_v21 = vmax.f32 %v3386_v42, 0.0 }
 0x837   : > { %3829 = vmatmul.msk.f32.vlgmr.msrb.gmra.mxu2 %vm788_vm0, %v3387_v21 }
 0x8ba   : > { %v3416_v7 = vpop.f32.mrf.mxu2 }
 0x8bb   : > { %v3417_v56 = vadd.f32 %v3970_v34, %v3416_v7 }
 0x8bd   : > { %v3419_v32 = vmax.f32 %v3417_v56, 0.0 }
 0x8bf   : > { %3830 = vmatmul.msk.f32.vlgmr.msra.gmra.mxu2 %vm788_vm0, %v3419_v32 }
 0x942   : > { %v3448_v28 = vpop.f32.mrf.mxu2 }
 0x943   : > { %v3449_v8 = vadd.f32 %v3971_v18, %v3448_v28 }
 0x945   : > { %3452 = vst.msk [vmem:[%s755_s23] sm:$0xff] %vm3451_vm6, %v3449_v8 }
 0x946 PF: > { %s5759_s30 = sld [smem:[#allocation23_spill]]  ;;  %s5762_s27 = smov %s4408_s28 }
 0x947   : > { %s5760_s22 = sld [smem:[#allocation22_spill]] }
 0x948   : > { %s5761_s29 = sld [smem:[#allocation24_spill]] }
 0x94c   : > { %p34_p3 = scmp.ge.s32.totalorder %s5759_s30, 4  }
 0x94d   : > { %s5763_s28 = smov %s5760_s22 }
 0x94e   :  { %36 = sbr.rel (!%p34_p3) target bundleno = 22 (0x16), region = 173 }
 0x953   :  { %3472 = vsyncpa [#allocation3], 1 }
 0x954   :  { %3474 = vsyncpa [#allocation3 + $0x1], 1 }
 0x955   :  { %3475 = vsyncpa [#allocation5], 1 }
 0x956   :  { %3477 = vsyncpa [#allocation5 + $0x1], 1 }
 0x957   :  { %3478 = vsyncpa [#allocation8], 1 }
 0x958   :  { %3479 = vsyncpa [#allocation11], 1 }
 0x959   :  { %3480 = vsyncpa [#allocation14], 1 }

// kernel: tpu_custom_call.1
= control target key start
LH: loop header
LB: loop body
LE: loop exit
PB: predicated region body
PF: predicated region fallthrough
CT: control target
= control target key end

     0   :  { %s5691_s0 = inlined_call_operand.hbm [shape: f32[16,8,32], index: 0, kind: input, shape index: {}]   ;;  %s5692_s1 = inlined_call_operand.hbm [shape: f32[16,16,32], index: 1, kind: input, shape index: {}]   ;;  %s5693_s2 = inlined_call_operand.vmem [shape: f32[32,32], index: 2, kind: input, shape index: {}]   ;;  %s5694_s3 = inlined_call_operand.vmem [shape: f32[1,32], index: 3, kind: input, shape index: {}]   ;;  %s5695_s4 = inlined_call_operand.hbm [shape: f32[32,32], index: 4, kind: input, shape index: {}]   ;;  %s5696_s5 = inlined_call_operand.vmem [shape: f32[1,32], index: 5, kind: input, shape index: {}]   ;;  %s5697_s6 = inlined_call_operand.hbm [shape: f32[32,32], index: 6, kind: input, shape index: {}]   ;;  %s5698_s7 = inlined_call_operand.hbm [shape: f32[32,32], index: 7, kind: input, shape index: {}]   ;;  %s5699_s8 = inlined_call_operand.vmem [shape: f32[1,32], index: 8, kind: input, shape index: {}]   ;;  %s5700_s9 = inlined_call_operand.hbm [shape: f32[32,32], index: 9, kind: input, shape index: {}]   ;;  %s5701_s10 = inlined_call_operand.vmem [shape: f32[1,32], index: 10, kind: input, shape index: {}]   ;;  %s5702_s11 = inlined_call_operand.hbm [shape: f32[32,32], index: 11, kind: input, shape index: {}]   ;;  %s5703_s12 = inlined_call_operand.hbm [shape: f32[32,32], index: 12, kind: input, shape index: {}]   ;;  %s5704_s13 = inlined_call_operand.vmem [shape: f32[1,32], index: 13, kind: input, shape index: {}]   ;;  %s5705_s14 = inlined_call_operand.hbm [shape: f32[32,32], index: 14, kind: input, shape index: {}]   ;;  %s5706_s15 = inlined_call_operand.vmem [shape: f32[1,32], index: 15, kind: input, shape index: {}]   ;;  %s5707_s16 = inlined_call_operand.vmem [shape: f32[32,5], index: 16, kind: input, shape index: {}]   ;;  %s5708_s17 = inlined_call_operand.vmem [shape: f32[1,5], index: 17, kind: input, shape index: {}]   ;;  %s5709_s18 = inlined_call_operand.vmem [shape: f32[16,5], index: 18, kind: output, shape index: {}]  }
   0x1   :  { %5720 = sst [smem:[#allocation25_spill]] %s5691_s0 }
   0x2   :  { %5721 = sst [smem:[#allocation26_spill]] %s5692_s1 }
   0x3   :  { %5722 = sst [smem:[#allocation27_spill]] %s5693_s2 }
   0x4   :  { %5723 = sst [smem:[#allocation28_spill]] %s5695_s4 }
   0x5   :  { %5724 = sst [smem:[#allocation29_spill]] %s5697_s6 }
   0x6   :  { %5725 = sst [smem:[#allocation30_spill]] %s5698_s7 }
   0x7   :  { %5726 = sst [smem:[#allocation31_spill]] %s5700_s9 }
   0x8   :  { %5727 = sst [smem:[#allocation32_spill]] %s5702_s11 }
   0x9   :  { %5728 = sst [smem:[#allocation33_spill]] %s5703_s12 }
   0xa   :  { %5729 = sst [smem:[#allocation34_spill]] %s5705_s14 }
   0xb   :  { %5730 = sst [smem:[#allocation35_spill]] %s5706_s15 }
   0xc   :  { %5731 = sst [smem:[#allocation36_spill]] %s5708_s17 }
   0xd   :  { %5732 = sst [smem:[#allocation37_spill]] %s5709_s18 }
   0xe   :  { %23 = vsyncpa [#allocation3], 0 }
   0xf   :  { %25 = vsyncpa [#allocation3 + $0x1], 0 }
  0x10   :  { %26 = vsyncpa [#allocation5], 0 }
  0x11   :  { %28 = vsyncpa [#allocation5 + $0x1], 0 }
  0x12   :  { %29 = vsyncpa [#allocation8], 0 }
  0x13   :  { %30 = vsyncpa [#allocation11], 0 }
  0x14   :  { %31 = vsyncpa [#allocation14], 0  ;;  %s4522_s27 = smov 0   ;;  %s4524_s28 = smov 0  }
  0x15   :  { %s4526_s29 = smov 0   ;;  %s4528_s30 = smov 0  }
  0x16 LB: > { %5733 = sst [smem:[#allocation22_spill]] %s4412_s29  ;;  %s4546_s20 = sadd.s32 4294967295, %s4416_s30   ;;  %s4416_s30 = sphi %s4528_s30, %s5759_s30   ;;  %s4412_s29 = sphi %s4526_s29, %s5761_s29   ;;  %s4408_s28 = sphi %s4524_s28, %s5763_s28   ;;  %s4404_s27 = sphi %s4522_s27, %s5762_s27  }
  0x17   : > { %s5734_s4 = sld [smem:[#allocation28_spill]]  ;;  %p3608_p0 = scmp.ge.s32.totalorder %s4416_s30, 1 }
  0x18   : > { %p58_p1 = scmp.eq.s32.totalorder %s4546_s20, 0  ;;  %p456_p2 = scmp.lt.s32.totalorder %s4416_s30, 3 }
  0x19   : > { %s4418_s22 = smov [#allocation6]   ;;  %s5736_s6 = sld [smem:[#allocation29_spill]] }
  0x1a   : > { %p4551_p3 = pnand %p3608_p0, %p456_p2  ;;  %s475_s2 = sshll.u32 %s4418_s22, 4  ;;  %s476_s2 = int_to_ptr.vmem [resolvable:$true] %s475_s2 }
  0x1b   : > { %s5738_s9 = sld [smem:[#allocation31_spill]]  ;;  %s5713_s17 = smov 128  }
  0x1c   : > { %p3880_p4 = pneg %p4551_p3  ;;  %s5715_s15 = smov 8  }
  0x1d   : > { %s473_s1 = sshll.u32 %s5734_s4, 4  ;;  %s4419_s4 = smov [#allocation7]   ;;  %s474_s1 = int_to_ptr.hbm [resolvable:$true] %s473_s1 }
  0x1e   : > { %p4562_p5 = pnand %p3880_p4, %p58_p1  ;;  %s492_s18 = sshll.u32 %s4419_s4, 4  ;;  %s493_s18 = int_to_ptr.vmem [resolvable:$true] %s492_s18 }
  0x1f   : > { %s490_s25 = sshll.u32 %s5736_s6, 4  ;;  %s5739_s12 = sld [smem:[#allocation33_spill]]  ;;  %s491_s25 = int_to_ptr.hbm [resolvable:$true] %s490_s25 }
  0x20   : > { %3883 = dma.hbm_to_vmem [thread:$0]  (!%p4562_p5), %s474_s1, 512, %s476_s2, [#allocation5], %s5713_s17, %s5713_s17, %s5715_s15  }
  0x21   : > { %s521_s22 = sshll.u32 %s5738_s9, 4  ;;  %s4422_s4 = smov [#allocation10]   ;;  %s522_s22 = int_to_ptr.hbm [resolvable:$true] %s521_s22 }
  0x22   : > { %3886 = dma.hbm_to_vmem [thread:$0]  (!%p4562_p5), %s491_s25, 512, %s493_s18, [#allocation8], %s5713_s17, %s5713_s17, %s5715_s15  }
  0x23   : > { %s523_s19 = sshll.u32 %s4422_s4, 4  ;;  %s4423_s1 = smov [#allocation13]   ;;  %s524_s19 = int_to_ptr.vmem [resolvable:$true] %s523_s19 }
  0x24   : > { %3892 = dma.hbm_to_vmem [thread:$0]  (!%p4562_p5), %s522_s22, 512, %s524_s19, [#allocation11], %s5713_s17, %s5713_s17, %s5715_s15  }
  0x25   : > { %s552_s0 = sshll.u32 %s5739_s12, 4  ;;  %s554_s2 = sshll.u32 %s4423_s1, 4  ;;  %s553_s0 = int_to_ptr.hbm [resolvable:$true] %s552_s0  ;;  %s555_s2 = int_to_ptr.vmem [resolvable:$true] %s554_s2 }
  0x26   : > { %s5740_s7 = sld [smem:[#allocation30_spill]]  ;;  %s4424_s22 = smov [#allocation9]  }
  0x27   : > { %3898 = dma.hbm_to_vmem [thread:$0]  (!%p4562_p5), %s553_s0, 512, %s555_s2, [#allocation14], %s5713_s17, %s5713_s17, %s5715_s15  }
  0x28   : > { %s5741_s11 = sld [smem:[#allocation32_spill]]  ;;  %s506_s4 = sshll.u32 %s4424_s22, 4  ;;  %s507_s4 = int_to_ptr.vmem [resolvable:$true] %s506_s4 }
  0x29   : > { %s4425_s6 = smov [#allocation12]   ;;  %s5742_s14 = sld [smem:[#allocation34_spill]] }
  0x2a   : > { %s540_s9 = sshll.u32 %s4425_s6, 4  ;;  %s4426_s2 = smov [#allocation15]   ;;  %s541_s9 = int_to_ptr.vmem [resolvable:$true] %s540_s9 }
  0x2b   : > { %s4617_s25 = sadd.s32 1, %s4416_s30   ;;  %s44_s22 = sadd.s32 1, %s4412_s29 }
  0x2c   : > { %s504_s18 = sshll.u32 %s5740_s7, 4  ;;  %5743 = sst [smem:[#allocation23_spill]] %s4617_s25  ;;  %s505_s18 = int_to_ptr.hbm [resolvable:$true] %s504_s18 }
  0x2d   : > { %3889 = dma.hbm_to_vmem [thread:$0]  (!%p4562_p5), %s505_s18, 512, %s507_s4, [#allocation8], %s5713_s17, %s5713_s17, %s5715_s15  }
  0x2e   : > { %s538_s24 = sshll.u32 %s5741_s11, 4  ;;  %s571_s18 = sshll.u32 %s4426_s2, 4  ;;  %s539_s24 = int_to_ptr.hbm [resolvable:$true] %s538_s24  ;;  %s572_s18 = int_to_ptr.vmem [resolvable:$true] %s571_s18 }
  0x2f   : > { %s569_s1 = sshll.u32 %s5742_s14, 4  ;;  %s41_s23 = ssub.s32 %s4416_s30, %s4617_s25  ;;  %s570_s1 = int_to_ptr.hbm [resolvable:$true] %s569_s1 }
  0x30   : > { %3895 = dma.hbm_to_vmem [thread:$0]  (!%p4562_p5), %s539_s24, 512, %s541_s9, [#allocation11], %s5713_s17, %s5713_s17, %s5715_s15  }
  0x31   : > { %3901 = dma.hbm_to_vmem [thread:$0]  (!%p4562_p5), %s570_s1, 512, %s572_s18, [#allocation14], %s5713_s17, %s5713_s17, %s5715_s15  }
  0x32   : > { %p42_p6 = scmp.eq.s32.totalorder %s41_s23, 0  ;;  %p51_p7 = scmp.ne.s32.totalorder %s4412_s29, %s4408_s28 }
  0x33   : > { %p52_p8 = scmp.eq.s32.totalorder %s4416_s30, 0  ;;  %p57_p9 = scmp.ne.s32.totalorder %s4408_s28, %s4404_s27 }
  0x34   : > { %s4628_s24 = scalar_select %p42_p6, %s4412_s29, %s44_s22  }
  0x35   : > { %p53_p10 = por %p52_p8, %p51_p7  ;;  %p4632_p11 = por %p58_p1, %p57_p9 }
  0x36   : > { %5744 = sst [smem:[#allocation24_spill]] %s4628_s24  ;;  %p3916_p12 = scmp.lt.s32.totalorder %s4416_s30, 2 }
  0x37   : > { %s4638_s4 = sand.u32 1, %s4412_s29   ;;  %s3833_s9 = sshll.u32 %s4416_s30, 6 }
  0x38   : > { %s3617_s6 = sshll.u32 %s4638_s4, 6  ;;  %s5746_s1 = sld [smem:[#allocation25_spill]] }
  0x39   : > { %s598_s2 = scalar_lea.vmem [#allocation2], %s3617_s6  ;;  %p4645_p13 = pnand %p3916_p12, %p53_p10 }
  0x3a   : > { %s606_s18 = sshll.u32 %s598_s2, 4  ;;  %s616_s17 = sand.u32 1, %s4416_s30   ;;  %s607_s18 = int_to_ptr.vmem [resolvable:$true] %s606_s18 }
  0x3b   : > { %s3620_s15 = sshll.u32 %s4638_s4, 7  ;;  %s595_s7 = scalar_lea.sflag [#allocation3], %s4638_s4 }
  0x3c   : > { %p4306_p2 = pneg %p4645_p13 }
  0x3e   : > { %s603_s27 = scalar_lea.hbm %s5746_s1, %s3833_s9  ;;  %s4309_s0 = scalar_lea.hbm %s5746_s1, 128 }
  0x3f   : > { %s604_s23 = sshll.u32 %s603_s27, 4  ;;  %s605_s23 = int_to_ptr.hbm [resolvable:$true] %s604_s23 }
  0x40   : > { %s4302_s11 = sshra.s32 %s605_s23, 4  ;;  %s4303_s11 = int_to_ptr.hbm [resolvable:$true] %s4302_s11 }
  0x41   : > { %s4304_s12 = scalar_lea.hbm %s4303_s11, 64  ;;  %p4310_p6 = scmp.lt.s32.totalorder %s4303_s11, %s5746_s1 }
  0x42   : > { %p4305_p0 = scmp.ne.s32.totalorder %s4303_s11, %s4304_s12  ;;  %p4311_p7 = scmp.lt.s32.totalorder %s4309_s0, %s4304_s12 }
  0x44   : > { %p4307_p4 = pnand %p4306_p2, %p4305_p0  ;;  %p4312_p8 = por %p4311_p7, %p4310_p6 }
  0x46   : > { %p4308_p5 = pneg %p4307_p4 }
  0x48   : > { %p4313_p9 = pnand %p4312_p8, %p4308_p5 }
  0x4a   : > { %4316 = shalt.err (!%p4313_p9)
}
  0x4b   : > { %s5748_s4 = smov 8   ;;  %s5749_s2 = smov 128  }
  0x4c   : > { %3905 = dma.hbm_to_vmem [thread:$0]  (!%p4645_p13), %s605_s23, 1024, %s607_s18, %s595_s7, %s5749_s2, %s5749_s2, %s5748_s4  }
  0x4d   : > { %s3835_s14 = sshll.u32 %s4416_s30, 7  ;;  %s5750_s9 = sld [smem:[#allocation26_spill]] }
  0x4e   : > { %s620_s25 = scalar_lea.vmem [#allocation4], %s3620_s15  ;;  %s617_s12 = scalar_lea.sflag [#allocation5], %s616_s17 }
  0x4f   : > { %s629_s19 = sshll.u32 %s620_s25, 4  ;;  %s630_s19 = int_to_ptr.vmem [resolvable:$true] %s629_s19 }
  0x53   : > { %s626_s29 = scalar_lea.hbm %s5750_s9, %s3835_s14  ;;  %s4339_s18 = scalar_lea.hbm %s5750_s9, 256 }
  0x54   : > { %s627_s11 = sshll.u32 %s626_s29, 4  ;;  %s628_s11 = int_to_ptr.hbm [resolvable:$true] %s627_s11 }
  0x55   : > { %s4332_s0 = sshra.s32 %s628_s11, 4  ;;  %s4333_s0 = int_to_ptr.hbm [resolvable:$true] %s4332_s0 }
  0x56   : > { %s4334_s27 = scalar_lea.hbm %s4333_s0, 128  ;;  %p4340_p4 = scmp.lt.s32.totalorder %s4333_s0, %s5750_s9 }
  0x57   : > { %p4335_p10 = scmp.ne.s32.totalorder %s4333_s0, %s4334_s27  ;;  %p4341_p5 = scmp.lt.s32.totalorder %s4339_s18, %s4334_s27 }
  0x59   : > { %p4337_p12 = pnand %p4335_p10, %p4306_p2  ;;  %p4342_p6 = por %p4341_p5, %p4340_p4 }
  0x5b   : > { %p4338_p0 = pneg %p4337_p12 }
  0x5d   : > { %p4343_p7 = pnand %p4342_p6, %p4338_p0 }
  0x5f   : > { %4346 = shalt.err (!%p4343_p7)
}
  0x60   : > { %3908 = dma.hbm_to_vmem [thread:$0]  (!%p4645_p13), %s628_s11, 2048, %s630_s19, %s617_s12, %s5749_s2, %s5749_s2, %s5748_s4  }
  0x61   : > { %641 = sbr.rel (%p4551_p3) target bundleno = 2374 (0x946), region = 92  ;;  %s643_s15 = sand.u32 (!%p4551_p3), 1, %s4408_s28  }
  0x62   : > { %s3625_s17 = sshll.u32 (!%p4551_p3), %s643_s15, 6  ;;  %s644_s29 = scalar_lea.sflag (!%p4551_p3), [#allocation3], %s643_s15 }
  0x63   : > { %s4689_s25 = scalar_lea.vmem (!%p4551_p3), [#allocation2], %s3625_s17 }
  0x66   : > { %4379 = dma.done.wait (%p4632_p11), %s644_s29, 1024  }
  0x67   : > { %4381 = vsyncadd (%p4632_p11), %s644_s29, 4294966272  ;;  %s653_s23 = sand.u32 1, %s4546_s20   ;;  %s3626_s22 = sshll.u32 %s643_s15, 7 }
  0x68   : > { %s654_s4 = scalar_lea.sflag [#allocation5], %s653_s23  ;;  %s4696_s2 = scalar_lea.vmem [#allocation4], %s3626_s22 }
  0x69   : > { %4383 = dma.done.wait (%p4632_p11), %s654_s4, 2048  }
  0x6a   : > { %4385 = vsyncadd (%p4632_p11), %s654_s4, 4294965248 }
  0x6b   : > { %4387 = dma.done.wait (%p58_p1), [#allocation5], 512  }
  0x6c   : > { %4389 = vsyncadd (%p58_p1), [#allocation5], 4294966784 }
  0x6d   : > { %4391 = dma.done.wait (%p58_p1), [#allocation8], 1024  }
  0x6e   : > { %4393 = vsyncadd (%p58_p1), [#allocation8], 4294966272 }
  0x6f   : > { %4395 = dma.done.wait (%p58_p1), [#allocation11], 1024  }
  0x70   : > { %4397 = vsyncadd (%p58_p1), [#allocation11], 4294966272 }
  0x71   : > { %4399 = dma.done.wait (%p58_p1), [#allocation14], 1024  }
  0x72   : > { %4401 = vsyncadd (%p58_p1), [#allocation14], 4294966272  ;;  %s5751_s6 = sld [smem:[#allocation27_spill]]  ;;  %v756_v4 = vld [vmem:[%s4689_s25] sm:$0xff]  ;;  %vm788_vm0 = vcmask 261120   ;;  %v757_v5 = vld [vmem:[%s4689_s25 + $0x8] sm:$0xff] }
  0x73   : > { %v4735_v6 = vld [vmem:[%s4689_s25 + $0x10] sm:$0xff]  ;;  %v4740_v7 = vld [vmem:[%s4689_s25 + $0x18] sm:$0xff]  ;;  %v760_v8 = vld [vmem:[%s4689_s25 + $0x20] sm:$0xff]  ;;  %vm1433_vm1 = vcmask 130048   ;;  %s5756_s30 = sld [smem:[#allocation35_spill]]  ;;  %p752_p1 = scmp.lt.s32.totalorder %s4546_s20, 1 }
  0x74   : > { %v761_v9 = vld [vmem:[%s4689_s25 + $0x28] sm:$0xff]  ;;  %v4749_v10 = vld [vmem:[%s4689_s25 + $0x30] sm:$0xff]  ;;  %v4754_v11 = vld [vmem:[%s4689_s25 + $0x38] sm:$0xff]  ;;  %s5757_s15 = sld [smem:[#allocation36_spill]] }
  0x75   : > { %v4759_v12 = vld [vmem:[%s4696_s2] sm:$0xff]  ;;  %v4764_v13 = vld [vmem:[%s4696_s2 + $0x8] sm:$0xff]  ;;  %v4769_v14 = vld [vmem:[%s4696_s2 + $0x10] sm:$0xff]  ;;  %s5765_s20 = smov (!%p752_p1, %s4546_s20), 1 }
  0x76   : > { %v4774_v15 = vld [vmem:[%s4696_s2 + $0x18] sm:$0xff]  ;;  %v4779_v16 = vld [vmem:[%s4696_s2 + $0x20] sm:$0xff]  ;;  %v864_v18 = vld [vmem:[#allocation6 + $0x10] sm:$0xff]  ;;  %s3634_s18 = sshll.u32 %s5765_s20, 3 }
  0x77   : > { %v865_v17 = vld [vmem:[#allocation6 + $0x18] sm:$0xff]  ;;  %v4784_v19 = vld [vmem:[%s4696_s2 + $0x28] sm:$0xff]  ;;  %v862_v21 = vld [vmem:[#allocation6] sm:$0xff] }
  0x78   : > { %v783_v0 = vld [vmem:[%s5751_s6 + $0x18] sm:$0xff]  ;;  %v782_v1 = vld [vmem:[%s5751_s6 + $0x10] sm:$0xff]  ;;  %v781_v2 = vld [vmem:[%s5751_s6 + $0x8] sm:$0xff]  ;;  %3840 = vmatpush.msra.mxu1 %v865_v17  ;;  %3841 = vmatpush.msra.mxu3 %v865_v17 }
  0x79   : > { %825 = vmatpush.msra.mxu0 %v783_v0  ;;  %3836 = vmatpush.msra.mxu2 %v783_v0  ;;  %v780_v3 = vld [vmem:[%s5751_s6] sm:$0xff]  ;;  %v863_v20 = vld [vmem:[#allocation6 + $0x8] sm:$0xff]  ;;  %v4789_v22 = vld [vmem:[%s4696_s2 + $0x30] sm:$0xff] }
  0x7a   : > { %3842 = vmatpush.msra.mxu1 %v864_v18  ;;  %3843 = vmatpush.msra.mxu3 %v864_v18  ;;  %v4794_v23 = vld [vmem:[%s4696_s2 + $0x38] sm:$0xff]  ;;  %v4799_v24 = vld [vmem:[%s4696_s2 + $0x40] sm:$0xff]  ;;  %v4809_v27 = vld [vmem:[%s4696_s2 + $0x48] sm:$0xff] }
  0x7b   : > { %826 = vmatpush.msra.mxu0 %v782_v1  ;;  %3837 = vmatpush.msra.mxu2 %v782_v1  ;;  %v4806_v25 = vld [vmem:[%s5694_s3] ss:$0 sm:$0xff]  ;;  %v4817_v32 = vld [vmem:[%s4696_s2 + $0x50] sm:$0xff]  ;;  %v4824_v36 = vld [vmem:[%s4696_s2 + $0x58] sm:$0xff] }
  0x7c   : > { %3844 = vmatpush.msra.mxu1 %v863_v20  ;;  %3845 = vmatpush.msra.mxu3 %v863_v20  ;;  %v4831_v40 = vld [vmem:[%s4696_s2 + $0x60] sm:$0xff]  ;;  %v4838_v44 = vld [vmem:[%s4696_s2 + $0x68] sm:$0xff]  ;;  %v4845_v48 = vld [vmem:[%s4696_s2 + $0x70] sm:$0xff] }
  0x7d   : > { %827 = vmatpush.msra.mxu0 %v781_v2  ;;  %3838 = vmatpush.msra.mxu2 %v781_v2  ;;  %v4852_v52 = vld [vmem:[%s4696_s2 + $0x78] sm:$0xff] }
  0x7e   : > { %3846 = vmatpush.msra.mxu1 %v862_v21  ;;  %3847 = vmatpush.msra.mxu3 %v862_v21 }
  0x7f   : > { %828 = vmatpush.msra.mxu0 %v780_v3  ;;  %3839 = vmatpush.msra.mxu2 %v780_v3 }
  0x80   : > { %3635 = vmatmul.msk.f32.vlgmr.msra.gmra.mxu0 %vm788_vm0, %v756_v4  ;;  %3636 = vmatmul.msk.f32.vlgmr.msra.gmra.mxu2 %vm788_vm0, %v757_v5 }
  0x81   : > { %1003 = vmatpush.msrb.mxu2 %v783_v0  ;;  %906 = vmatpush.msrb.mxu0 %v865_v17 }
  0x82   : > { %1132 = vmatpush.msrb.mxu3 %v865_v17 }
  0x83   : > { %1004 = vmatpush.msrb.mxu2 %v782_v1  ;;  %907 = vmatpush.msrb.mxu0 %v864_v18 }
  0x84   : > { %1133 = vmatpush.msrb.mxu3 %v864_v18 }
  0x85   : > { %1005 = vmatpush.msrb.mxu2 %v781_v2  ;;  %908 = vmatpush.msrb.mxu0 %v863_v20 }
  0x86   : > { %1134 = vmatpush.msrb.mxu3 %v863_v20 }
  0x87   : > { %1006 = vmatpush.msrb.mxu2 %v780_v3  ;;  %909 = vmatpush.msrb.mxu0 %v862_v21 }
  0x88   : > { %3637 = vmatmul.msk.f32.gmra.mxu2 %vm788_vm0, %v4735_v6  ;;  %1135 = vmatpush.msrb.mxu3 %v862_v21 }
  0x90   : > { %3638 = vmatmul.msk.f32.gmra.mxu2 %vm788_vm0, %v4740_v7 }
  0x98   : > { %3639 = vmatmul.msk.f32.gmra.mxu2 %vm788_vm0, %v760_v8 }
  0xa0   : > { %3640 = vmatmul.msk.f32.gmra.mxu2 %vm788_vm0, %v761_v9 }
  0xa8   : > { %3641 = vmatmul.msk.f32.gmra.mxu2 %vm788_vm0, %v4749_v10 }
  0xb0   : > { %3642 = vmatmul.msk.f32.gmra.mxu2 %vm788_vm0, %v4754_v11 }
  0xb8   : > { %3651 = vmatmul.msk.f32.vlgmr.msrb.gmra.mxu2 %vm788_vm0, %v4759_v12 }
  0xc0   : > { %3652 = vmatmul.msk.f32.gmra.mxu2 %vm788_vm0, %v4764_v13 }
  0xc8   : > { %3653 = vmatmul.msk.f32.gmra.mxu2 %vm788_vm0, %v4769_v14 }
  0xd0   : > { %3654 = vmatmul.msk.f32.gmra.mxu2 %vm788_vm0, %v4774_v15 }
  0xd8   : > { %3655 = vmatmul.msk.f32.gmra.mxu2 %vm788_vm0, %v4779_v16 }
  0xe0   : > { %3656 = vmatmul.msk.f32.gmra.mxu2 %vm788_vm0, %v4784_v19 }
  0xe8   : > { %3657 = vmatmul.msk.f32.gmra.mxu2 %vm788_vm0, %v4789_v22 }
  0xf0   : > { %3658 = vmatmul.msk.f32.gmra.mxu2 %vm788_vm0, %v4794_v23 }
  0xf8   : > { %3659 = vmatmul.msk.f32.gmra.mxu2 %vm788_vm0, %v4799_v24 }
  0xfd   : > { %v830_v26 = vpop.f32.mrf.mxu0 }
  0xfe   : > { %v831_v28 = vadd.f32 %v4806_v25, %v830_v26 }
 0x100   : > { %v854_v29 = vmax.f32 %v831_v28, 0.0  ;;  %3660 = vmatmul.msk.f32.gmra.mxu2 %vm788_vm0, %v4809_v27 }
 0x102   : > { %3643 = vmatmul.msk.f32.vlgmr.msrb.gmra.mxu0 %vm788_vm0, %v854_v29 }
 0x103   : > { %v833_v30 = vpop.f32.mrf.mxu2 }
 0x104   : > { %v834_v31 = vadd.f32 %v4806_v25, %v833_v30 }
 0x106   : > { %v855_v33 = vmax.f32 %v834_v31, 0.0 }
 0x108   : > { %3661 = vmatmul.msk.f32.gmra.mxu2 %vm788_vm0, %v4817_v32 }
 0x10a   : > { %3644 = vmatmul.msk.f32.gmra.mxu0 %vm788_vm0, %v855_v33 }
 0x10b   : > { %v836_v34 = vpop.f32.mrf.mxu2 }
 0x10c   : > { %v837_v35 = vadd.f32 %v4806_v25, %v836_v34 }
 0x10e   : > { %v856_v37 = vmax.f32 %v837_v35, 0.0 }
 0x110   : > { %3645 = vmatmul.msk.f32.vlgmr.msra.gmra.mxu1 %vm788_vm0, %v856_v37  ;;  %3662 = vmatmul.msk.f32.gmra.mxu2 %vm788_vm0, %v4824_v36 }
 0x113   : > { %v839_v38 = vpop.f32.mrf.mxu2 }
 0x114   : > { %v840_v39 = vadd.f32 %v4806_v25, %v839_v38 }
 0x116   : > { %v857_v41 = vmax.f32 %v840_v39, 0.0 }
 0x118   : > { %3646 = vmatmul.msk.f32.gmra.mxu1 %vm788_vm0, %v857_v41  ;;  %3663 = vmatmul.msk.f32.gmra.mxu2 %vm788_vm0, %v4831_v40 }
 0x11b   : > { %v842_v42 = vpop.f32.mrf.mxu2 }
 0x11c   : > { %v843_v43 = vadd.f32 %v4806_v25, %v842_v42  ;;  %v4882_v42 = vld [vmem:[%s5696_s5] ss:$0 sm:$0xff] }
 0x11e   : > { %v858_v45 = vmax.f32 %v843_v43, 0.0 }
 0x120   : > { %3647 = vmatmul.msk.f32.gmra.mxu1 %vm788_vm0, %v858_v45  ;;  %3664 = vmatmul.msk.f32.gmra.mxu2 %vm788_vm0, %v4838_v44 }
 0x123   : > { %v845_v46 = vpop.f32.mrf.mxu2 }
 0x124   : > { %v846_v47 = vadd.f32 %v4806_v25, %v845_v46 }
 0x126   : > { %v859_v49 = vmax.f32 %v846_v47, 0.0 }
 0x128   : > { %3648 = vmatmul.msk.f32.vlgmr.msra.gmra.mxu3 %vm788_vm0, %v859_v49  ;;  %3665 = vmatmul.msk.f32.gmra.mxu2 %vm788_vm0, %v4845_v48 }
 0x12b   : > { %v848_v50 = vpop.f32.mrf.mxu2 }
 0x12c   : > { %v849_v51 = vadd.f32 %v4806_v25, %v848_v50 }
 0x12e   : > { %v860_v53 = vmax.f32 %v849_v51, 0.0 }
 0x130   : > { %3649 = vmatmul.msk.f32.gmra.mxu3 %vm788_vm0, %v860_v53  ;;  %3666 = vmatmul.msk.f32.gmra.mxu2 %vm788_vm0, %v4852_v52 }
 0x133   : > { %v851_v54 = vpop.f32.mrf.mxu2 }
 0x134   : > { %v852_v55 = vadd.f32 %v4806_v25, %v851_v54 }
 0x136   : > { %v861_v56 = vmax.f32 %v852_v55, 0.0 }
 0x138   : > { %3650 = vmatmul.msk.f32.gmra.mxu3 %vm788_vm0, %v861_v56 }
 0x13b   : > { %v1008_v57 = vpop.f32.mrf.mxu2 }
 0x13c   : > { %v1009_v58 = vadd.f32 %v4806_v25, %v1008_v57 }
 0x13e   : > { %v1056_v59 = vmax.f32 %v1009_v58, 0.0 }
 0x140   : > { %3667 = vmatmul.msk.f32.vlgmr.msrb.gmra.mxu3 %vm788_vm0, %v1056_v59 }
 0x143   : > { %v1011_v60 = vpop.f32.mrf.mxu2 }
 0x144   : > { %v1012_v61 = vadd.f32 %v4806_v25, %v1011_v60 }
 0x146   : > { %v1057_v62 = vmax.f32 %v1012_v61, 0.0 }
 0x148   : > { %3668 = vmatmul.msk.f32.gmra.mxu3 %vm788_vm0, %v1057_v62 }
 0x14b   : > { %v1014_v63 = vpop.f32.mrf.mxu2 }
 0x14c   : > { %v1015_v0 = vadd.f32 %v4806_v25, %v1014_v63 }
 0x14e   : > { %v1058_v1 = vmax.f32 %v1015_v0, 0.0 }
 0x150   : > { %3669 = vmatmul.msk.f32.gmra.mxu3 %vm788_vm0, %v1058_v1 }
 0x153   : > { %v1017_v2 = vpop.f32.mrf.mxu2 }
 0x154   : > { %v1018_v3 = vadd.f32 %v4806_v25, %v1017_v2 }
 0x156   : > { %v1059_v4 = vmax.f32 %v1018_v3, 0.0 }
 0x158   : > { %3670 = vmatmul.msk.f32.gmra.mxu3 %vm788_vm0, %v1059_v4 }
 0x15b   : > { %v1020_v5 = vpop.f32.mrf.mxu2 }
 0x15c   : > { %v1021_v8 = vadd.f32 %v4806_v25, %v1020_v5 }
 0x15e   : > { %v1060_v9 = vmax.f32 %v1021_v8, 0.0 }
 0x160   : > { %3671 = vmatmul.msk.f32.gmra.mxu3 %vm788_vm0, %v1060_v9 }
 0x163   : > { %v1023_v17 = vpop.f32.mrf.mxu2 }
 0x164   : > { %v1024_v18 = vadd.f32 %v4806_v25, %v1023_v17 }
 0x166   : > { %v1061_v20 = vmax.f32 %v1024_v18, 0.0 }
 0x168   : > { %3672 = vmatmul.msk.f32.gmra.mxu3 %vm788_vm0, %v1061_v20 }
 0x16b   : > { %v1026_v21 = vpop.f32.mrf.mxu2 }
 0x16c   : > { %v1027_v26 = vadd.f32 %v4806_v25, %v1026_v21 }
 0x16e   : > { %v1062_v28 = vmax.f32 %v1027_v26, 0.0 }
 0x170   : > { %3673 = vmatmul.msk.f32.gmra.mxu3 %vm788_vm0, %v1062_v28 }
 0x173   : > { %v1029_v29 = vpop.f32.mrf.mxu2 }
 0x174   : > { %v1030_v30 = vadd.f32 %v4806_v25, %v1029_v29 }
 0x176   : > { %v1063_v31 = vmax.f32 %v1030_v30, 0.0 }
 0x178   : > { %3674 = vmatmul.msk.f32.gmra.mxu3 %vm788_vm0, %v1063_v31 }
 0x17b   : > { %v1032_v33 = vpop.f32.mrf.mxu2 }
 0x17c   : > { %v1033_v34 = vadd.f32 %v4806_v25, %v1032_v33 }
 0x17e   : > { %v1064_v35 = vmax.f32 %v1033_v34, 0.0 }
 0x17f   : > { %v911_v29 = vpop.f32.mrf.mxu0 }
 0x180   : > { %3675 = vmatmul.msk.f32.gmra.mxu3 %vm788_vm0, %v1064_v35  ;;  %v4934_v33 = vadd.f32 %v4882_v42, %v911_v29 }
 0x182   : > { %v935_v35 = vmax.f32 %v4934_v33, 0.0 }
 0x183   : > { %v1035_v37 = vpop.f32.mrf.mxu2 }
 0x184   : > { %v1036_v38 = vadd.f32 %v4806_v25, %v1035_v37 }
 0x186   : > { %v1065_v39 = vmax.f32 %v1036_v38, 0.0 }
 0x188   : > { %3676 = vmatmul.msk.f32.gmra.mxu3 %vm788_vm0, %v1065_v39 }
 0x18b   : > { %v1038_v41 = vpop.f32.mrf.mxu2 }
 0x18c   : > { %v1039_v43 = vadd.f32 %v4806_v25, %v1038_v41  ;;  %v914_v41 = vpop.f32.mrf.mxu0 }
 0x18d   : > { %v917_v45 = vpop.f32.mrf.mxu1 }
 0x18e   : > { %v1066_v46 = vmax.f32 %v1039_v43, 0.0  ;;  %v4886_v47 = vadd.f32 %v4882_v42, %v917_v45 }
 0x190   : > { %v937_v49 = vmax.f32 %v4886_v47, 0.0  ;;  %3677 = vmatmul.msk.f32.gmra.mxu3 %vm788_vm0, %v1066_v46  ;;  %v4958_v46 = vadd.f32 %v4882_v42, %v914_v41 }
 0x192   : > { %3721 = vmatpush.xpose.msk.msra.mxu2 %vm788_vm0, %v937_v49 }
 0x193   : > { %v1041_v50 = vpop.f32.mrf.mxu2 }
 0x194   : > { %v1042_v51 = vadd.f32 %v4806_v25, %v1041_v50 }
 0x195   : > { %v920_v53 = vpop.f32.mrf.mxu1 }
 0x196   : > { %v1067_v54 = vmax.f32 %v1042_v51, 0.0  ;;  %v4895_v55 = vadd.f32 %v4882_v42, %v920_v53 }
 0x198   : > { %v938_v56 = vmax.f32 %v4895_v55, 0.0  ;;  %3678 = vmatmul.msk.f32.gmra.mxu3 %vm788_vm0, %v1067_v54  ;;  %v936_v54 = vmax.f32 %v4958_v46, 0.0 }
 0x19a   : > { %3724 = vmatpush.xpose.msk.msra.mxu3 %vm788_vm0, %v938_v56 }
 0x19b   : > { %v1044_v57 = vpop.f32.mrf.mxu2 }
 0x19c   : > { %v1045_v58 = vadd.f32 %v4806_v25, %v1044_v57 }
 0x19e   : > { %v1068_v59 = vmax.f32 %v1045_v58, 0.0 }
 0x1a0   : > { %3679 = vmatmul.msk.f32.gmra.mxu3 %vm788_vm0, %v1068_v59 }
 0x1a3   : > { %v1047_v60 = vpop.f32.mrf.mxu2 }
 0x1a4   : > { %v1048_v61 = vadd.f32 %v4806_v25, %v1047_v60 }
 0x1a6   : > { %v1069_v62 = vmax.f32 %v1048_v61, 0.0 }
 0x1a8   : > { %3680 = vmatmul.msk.f32.gmra.mxu3 %vm788_vm0, %v1069_v62 }
 0x1ab   : > { %v4906_v63 = vpop.f32.mrf.mxu3  ;;  %v1050_v0 = vpop.f32.mrf.mxu2 }
 0x1ac   : > { %v1051_v1 = vadd.f32 %v4806_v25, %v1050_v0 }
 0x1ae   : > { %v1070_v2 = vmax.f32 %v1051_v1, 0.0 }
 0x1b0   : > { %3681 = vmatmul.msk.f32.gmra.mxu3 %vm788_vm0, %v1070_v2 }
 0x1b3   : > { %v929_v3 = vpop.f32.mrf.mxu3  ;;  %v1053_v4 = vpop.f32.mrf.mxu2 }
 0x1b4   : > { %v4911_v5 = vadd.f32 %v4882_v42, %v929_v3  ;;  %v1054_v8 = vadd.f32 %v4806_v25, %v1053_v4 }
 0x1b6   : > { %v941_v9 = vmax.f32 %v4911_v5, 0.0  ;;  %v1071_v17 = vmax.f32 %v1054_v8, 0.0 }
 0x1b8   : > { %3682 = vmatmul.msk.f32.gmra.mxu3 %vm788_vm0, %v1071_v17  ;;  %3733 = vmatpush.xpose.msk.msrb.mxu2 %vm788_vm0, %v941_v9 }
 0x1bb   : > { %v932_v18 = vpop.f32.mrf.mxu3 }
 0x1bc   : > { %v4920_v20 = vadd.f32 %v4882_v42, %v932_v18 }
 0x1be   : > { %v942_v21 = vmax.f32 %v4920_v20, 0.0 }
 0x1c0   : > { %3736 = vmatpush.xpose.msk.msrb.mxu3 %vm788_vm0, %v942_v21 }
 0x1c3   : > { %v1137_v25 = vpop.f32.mrf.mxu3 }
 0x1c4   : > { %v4930_v30 = vadd.f32 %v4882_v42, %v1137_v25 }
 0x1c6   : > { %v1185_v34 = vmax.f32 %v4930_v30, 0.0  ;;  %v5152_v30 = vld [vmem:[%s4689_s25 + $0x8] sm:$0xff] }
 0x1cb   : > { %v1140_v26 = vpop.f32.mrf.mxu3 }
 0x1cc   : > { %v4927_v28 = vadd.f32 %v4882_v42, %v1140_v26 }
 0x1ce   : > { %v1186_v31 = vmax.f32 %v4927_v28, 0.0  ;;  %v5169_v28 = vld [vmem:[%s4689_s25 + $0x28] sm:$0xff] }
 0x1d0   : > { %3683 = vmatpush.xpose.msk.msra.mxu0 %vm788_vm0, %v1186_v31 }
 0x1d3   : > { %v1143_v37 = vpop.f32.mrf.mxu3 }
 0x1d4   : > { %3684 = vmatpush.xpose.msk.msra.mxu0 %vm788_vm0, %v1185_v34  ;;  %v4951_v43 = vadd.f32 %v4882_v42, %v1143_v37 }
 0x1d6   : > { %v1187_v50 = vmax.f32 %v4951_v43, 0.0 }
 0x1d7   : > { %3685 = vmatmul.msk.f32.vlgmr.msra.gmra.mxu0 %vm788_vm0, %v935_v35 }
 0x1db   : > { %v1146_v38 = vpop.f32.mrf.mxu3 }
 0x1dc   : > { %v4948_v39 = vadd.f32 %v4882_v42, %v1146_v38  ;;  %v5021_v38 = vadd.f32 %v4882_v42, %v4906_v63 }
 0x1de   : > { %v1188_v45 = vmax.f32 %v4948_v39, 0.0 }
 0x1e0   : > { %3686 = vmatpush.xpose.msk.msrb.mxu1 %vm788_vm0, %v1188_v45 }
 0x1e3   : > { %v1149_v51 = vpop.f32.mrf.mxu3 }
 0x1e4   : > { %v1150_v53 = vadd.f32 %v4882_v42, %v1149_v51  ;;  %3687 = vmatpush.xpose.msk.msrb.mxu1 %vm788_vm0, %v1187_v50 }
 0x1e6   : > { %v1189_v57 = vmax.f32 %v1150_v53, 0.0 }
 0x1e7   : > { %3688 = vmatmul.msk.f32.vlgmr.msrb.gmra.mxu1 %vm788_vm0, %v936_v54 }
 0x1e8   : > { %3722 = vmatmul.msk.f32.vlgmr.msra.gmra.mxu2 %vm788_vm0, %v1189_v57 }
 0x1e9   : > { %2458 = vmatpush.msra.mxu2 %v4735_v6 }
 0x1eb   : > { %v1152_v58 = vpop.f32.mrf.mxu3 }
 0x1ec   : > { %v1153_v59 = vadd.f32 %v4882_v42, %v1152_v58 }
 0x1ee   : > { %v1190_v60 = vmax.f32 %v1153_v59, 0.0 }
 0x1f0   : > { %3689 = vmatpush.xpose.msk.msrb.mxu0 %vm788_vm0, %v1190_v60  ;;  %3723 = vmatmul.msk.f32.gmra.mxu2 %vm788_vm0, %v1190_v60 }
 0x1f3   : > { %v1155_v61 = vpop.f32.mrf.mxu3 }
 0x1f4   : > { %v1156_v62 = vadd.f32 %v4882_v42, %v1155_v61  ;;  %3690 = vmatpush.xpose.msk.msrb.mxu0 %vm788_vm0, %v1189_v57  ;;  %v940_v57 = vmax.f32 %v5021_v38, 0.0 }
 0x1f6   : > { %v1191_v0 = vmax.f32 %v1156_v62, 0.0 }
 0x1f7   : > { %3691 = vmatmul.msk.f32.vlgmr.msrb.gmra.mxu0 %vm788_vm0, %v937_v49 }
 0x1f8   : > { %3725 = vmatmul.msk.f32.vlgmr.msra.gmra.mxu3 %vm788_vm0, %v1191_v0 }
 0x1f9   : > { %2487 = vmatpush.msra.mxu3 %v4740_v7  ;;  %v923_v7 = vpop.f32.mrf.mxu1 }
 0x1fa   : > { %v4999_v17 = vadd.f32 %v4882_v42, %v923_v7 }
 0x1fb   : > { %v1158_v6 = vpop.f32.mrf.mxu3 }
 0x1fc   : > { %v1159_v1 = vadd.f32 %v4882_v42, %v1158_v6  ;;  %v939_v18 = vmax.f32 %v4999_v17, 0.0 }
 0x1fe   : > { %v1192_v2 = vmax.f32 %v1159_v1, 0.0 }
 0x200   : > { %3692 = vmatpush.xpose.msk.msra.mxu1 %vm788_vm0, %v1192_v2  ;;  %3726 = vmatmul.msk.f32.gmra.mxu3 %vm788_vm0, %v1192_v2 }
 0x203   : > { %v1161_v3 = vpop.f32.mrf.mxu3 }
 0x204   : > { %3693 = vmatpush.xpose.msk.msra.mxu1 %vm788_vm0, %v1191_v0  ;;  %v4992_v4 = vadd.f32 %v4882_v42, %v1161_v3 }
 0x206   : > { %v1193_v55 = vmax.f32 %v4992_v4, 0.0 }
 0x207   : > { %3694 = vmatmul.msk.f32.vlgmr.msra.gmra.mxu1 %vm788_vm0, %v938_v56 }
 0x20b   : > { %v1164_v47 = vpop.f32.mrf.mxu3 }
 0x20c   : > { %v4989_v49 = vadd.f32 %v4882_v42, %v1164_v47 }
 0x20e   : > { %v1194_v8 = vmax.f32 %v4989_v49, 0.0 }
 0x210   : > { %3695 = vmatpush.xpose.msk.msra.mxu0 %vm788_vm0, %v1194_v8 }
 0x213   : > { %v1167_v56 = vpop.f32.mrf.mxu3 }
 0x214   : > { %3696 = vmatpush.xpose.msk.msra.mxu0 %vm788_vm0, %v1193_v55  ;;  %v5013_v29 = vadd.f32 %v4882_v42, %v1167_v56 }
 0x216   : > { %v1195_v41 = vmax.f32 %v5013_v29, 0.0 }
 0x217   : > { %3697 = vmatmul.msk.f32.vlgmr.msra.gmra.mxu0 %vm788_vm0, %v939_v18 }
 0x21b   : > { %v1170_v25 = vpop.f32.mrf.mxu3 }
 0x21c   : > { %v5010_v26 = vadd.f32 %v4882_v42, %v1170_v25 }
 0x21e   : > { %v1196_v37 = vmax.f32 %v5010_v26, 0.0 }
 0x220   : > { %3698 = vmatpush.xpose.msk.msrb.mxu1 %vm788_vm0, %v1196_v37 }
 0x223   : > { %v1173_v51 = vpop.f32.mrf.mxu3 }
 0x224   : > { %v1174_v53 = vadd.f32 %v4882_v42, %v1173_v51  ;;  %3699 = vmatpush.xpose.msk.msrb.mxu1 %vm788_vm0, %v1195_v41 }
 0x226   : > { %v1197_v58 = vmax.f32 %v1174_v53, 0.0 }
 0x227   : > { %3700 = vmatmul.msk.f32.vlgmr.msrb.gmra.mxu1 %vm788_vm0, %v940_v57 }
 0x228   : > { %3734 = vmatmul.msk.f32.vlgmr.msrb.gmra.mxu2 %vm788_vm0, %v1197_v58 }
 0x229   : > { %2574 = vmatpush.msrb.mxu2 %v4749_v10 }
 0x22b   : > { %v1176_v63 = vpop.f32.mrf.mxu3 }
 0x22c   : > { %v1177_v59 = vadd.f32 %v4882_v42, %v1176_v63 }
 0x22e   : > { %v1198_v60 = vmax.f32 %v1177_v59, 0.0 }
 0x230   : > { %3701 = vmatpush.xpose.msk.msrb.mxu0 %vm788_vm0, %v1198_v60  ;;  %3735 = vmatmul.msk.f32.gmra.mxu2 %vm788_vm0, %v1198_v60 }
 0x233   : > { %v1179_v61 = vpop.f32.mrf.mxu3 }
 0x234   : > { %v1180_v62 = vadd.f32 %v4882_v42, %v1179_v61  ;;  %3702 = vmatpush.xpose.msk.msrb.mxu0 %vm788_vm0, %v1197_v58 }
 0x236   : > { %v1199_v0 = vmax.f32 %v1180_v62, 0.0 }
 0x237   : > { %3703 = vmatmul.msk.f32.vlgmr.msrb.gmra.mxu0 %vm788_vm0, %v941_v9 }
 0x238   : > { %1643 = vmatpush.msra.mxu0 %v4764_v13  ;;  %3737 = vmatmul.msk.f32.vlgmr.msrb.gmra.mxu3 %vm788_vm0, %v1199_v0 }
 0x239   : > { %2603 = vmatpush.msrb.mxu3 %v4754_v11 }
 0x23a   : > { %1644 = vmatpush.msra.mxu0 %v4759_v12 }
 0x23b   : > { %v1182_v10 = vpop.f32.mrf.mxu3 }
 0x23c   : > { %1689 = vmatpush.msrb.mxu0 %v4784_v19  ;;  %v1183_v6 = vadd.f32 %v4882_v42, %v1182_v10 }
 0x23e   : > { %1690 = vmatpush.msrb.mxu0 %v4779_v16  ;;  %v1200_v1 = vmax.f32 %v1183_v6, 0.0 }
 0x240   : > { %3704 = vmatpush.xpose.msk.msra.mxu1 %vm788_vm0, %v1200_v1  ;;  %3738 = vmatmul.msk.f32.gmra.mxu3 %vm788_vm0, %v1200_v1 }
 0x244   : > { %3705 = vmatpush.xpose.msk.msra.mxu1 %vm788_vm0, %v1199_v0 }
 0x247   : > { %3706 = vmatmul.msk.f32.vlgmr.msra.gmra.mxu1 %vm788_vm0, %v942_v21 }
 0x248   : > { %1666 = vmatpush.msrb.mxu1 %v4774_v15 }
 0x24a   : > { %1667 = vmatpush.msrb.mxu1 %v4769_v14 }
 0x24c   : > { %1712 = vmatpush.msra.mxu1 %v4794_v23 }
 0x24e   : > { %1713 = vmatpush.msra.mxu1 %v4789_v22 }
 0x254   : > { %v1227_v11 = vpop.f32.mrf.mxu0 }
 0x255   : > { %v1434_v12 = vsel %vm1433_vm1, %v1227_v11, -inf }
 0x256   : > { %1435 = vmax.xlane.f32.xlu0 %v1434_v12 }
 0x264   : > { %v1256_v13 = vpop.f32.mrf.mxu1 }
 0x265   : > { %v1437_v16 = vsel %vm1433_vm1, %v1256_v13, -inf }
 0x266   : > { %1438 = vmax.xlane.f32.xlu1 %v1437_v16 }
 0x26b   : > { %v1873_v38 = vpop.f32.mrf.mxu2 }
 0x274   : > { %v1285_v15 = vpop.f32.mrf.mxu0 }
 0x275   : > { %v1440_v19 = vsel %vm1433_vm1, %v1285_v15, -inf }
 0x276   : > { %1441 = vmax.xlane.f32.xlu0 %v1440_v19 }
 0x284   : > { %v1314_v42 = vpop.f32.mrf.mxu1 }
 0x285   : > { %v1443_v14 = vsel %vm1433_vm1, %v1314_v42, -inf }
 0x286   : > { %1444 = vmax.xlane.f32.xlu2 %v1443_v14 }
 0x294   : > { %v1343_v23 = vpop.f32.mrf.mxu0 }
 0x295   : > { %v1446_v22 = vsel %vm1433_vm1, %v1343_v23, -inf }
 0x296   : > { %1447 = vmax.xlane.f32.xlu1 %v1446_v22 }
 0x2a4   : > { %v1372_v5 = vpop.f32.mrf.mxu1 }
 0x2a5   : > { %v1449_v9 = vsel %vm1433_vm1, %v1372_v5, -inf }
 0x2a6   : > { %1450 = vmax.xlane.f32.xlu0 %v1449_v9 }
 0x2b4   : > { %v1401_v20 = vpop.f32.mrf.mxu0 }
 0x2b5   : > { %v1452_v21 = vsel %vm1433_vm1, %v1401_v20, -inf }
 0x2b6   : > { %1453 = vmax.xlane.f32.xlu2 %v1452_v21 }
 0x2c4   : > { %v1430_v2 = vpop.f32.mrf.mxu1 }
 0x2c5   : > { %v1455_v3 = vsel %vm1433_vm1, %v1430_v2, -inf }
 0x2c6   : > { %1456 = vmax.xlane.f32.xlu1 %v1455_v3 }
 0x2c9   : > { %v1436_v47 = vpop.xlane.xlu0 %1435 }
 0x2ca   : > { %v1458_v7 = vsub.f32 %v1227_v11, %v1436_v47 }
 0x2cc   : > { %v1466_v56 = vmul.f32 1.442695, %v1458_v7 }
 0x2ce   : > { %3972 = vpow2.f32 %v1466_v56 }
 0x2d4   : > { %v5067_v25 = vpop.eup %3972 }
 0x2d5   : > { %v1482_v51 = vsel %vm1433_vm1, %v5067_v25, 0.0 }
 0x2d6   : > { %1483 = vadd.xlane.f32.xlu2 %v1482_v51 }
 0x2d9   : > { %v1439_v53 = vpop.xlane.xlu1 %1438 }
 0x2da   : > { %v1459_v58 = vsub.f32 %v1256_v13, %v1439_v53 }
 0x2dc   : > { %v1468_v63 = vmul.f32 1.442695, %v1459_v58 }
 0x2de   : > { %3974 = vpow2.f32 %v1468_v63 }
 0x2e4   : > { %v5071_v59 = vpop.eup %3974 }
 0x2e5   : > { %v1485_v60 = vsel %vm1433_vm1, %v5071_v59, 0.0 }
 0x2e6   : > { %1486 = vadd.xlane.f32.xlu1 %v1485_v60 }
 0x2e9   : > { %v1442_v61 = vpop.xlane.xlu0 %1441 }
 0x2ea   : > { %v1460_v62 = vsub.f32 %v1285_v15, %v1442_v61 }
 0x2ec   : > { %v1470_v0 = vmul.f32 1.442695, %v1460_v62 }
 0x2ee   : > { %3976 = vpow2.f32 %v1470_v0 }
 0x2f4   : > { %v5075_v10 = vpop.eup %3976 }
 0x2f5   : > { %v1488_v6 = vsel %vm1433_vm1, %v5075_v10, 0.0 }
 0x2f6   : > { %1489 = vadd.xlane.f32.xlu0 %v1488_v6 }
 0x2f9   : > { %v1445_v1 = vpop.xlane.xlu2 %1444 }
 0x2fa   : > { %v1461_v11 = vsub.f32 %v1314_v42, %v1445_v1 }
 0x2fc   : > { %v1472_v12 = vmul.f32 1.442695, %v1461_v11 }
 0x2fe   : > { %3978 = vpow2.f32 %v1472_v12 }
 0x304   : > { %v5079_v13 = vpop.eup %3978 }
 0x305   : > { %v1491_v16 = vsel %vm1433_vm1, %v5079_v13, 0.0 }
 0x306   : > { %1492 = vadd.xlane.f32.xlu0 %v1491_v16 }
 0x309   : > { %v1448_v19 = vpop.xlane.xlu1 %1447 }
 0x30a   : > { %v1462_v15 = vsub.f32 %v1343_v23, %v1448_v19 }
 0x30c   : > { %v1474_v14 = vmul.f32 1.442695, %v1462_v15 }
 0x30e   : > { %3980 = vpow2.f32 %v1474_v14 }
 0x314   : > { %v5083_v22 = vpop.eup %3980 }
 0x315   : > { %v1494_v9 = vsel %vm1433_vm1, %v5083_v22, 0.0 }
 0x316   : > { %1495 = vadd.xlane.f32.xlu2 %v1494_v9 }
 0x319   : > { %v1451_v21 = vpop.xlane.xlu0 %1450 }
 0x31a   : > { %v1463_v42 = vsub.f32 %v1372_v5, %v1451_v21 }
 0x31c   : > { %v1476_v3 = vmul.f32 1.442695, %v1463_v42 }
 0x31e   : > { %3982 = vpow2.f32 %v1476_v3 }
 0x324   : > { %v5087_v47 = vpop.eup %3982 }
 0x325   : > { %v1497_v7 = vsel %vm1433_vm1, %v5087_v47, 0.0 }
 0x326   : > { %1498 = vadd.xlane.f32.xlu2 %v1497_v7 }
 0x329   : > { %v1454_v56 = vpop.xlane.xlu2 %1453 }
 0x32a   : > { %v1464_v23 = vsub.f32 %v1401_v20, %v1454_v56 }
 0x32c   : > { %v1478_v51 = vmul.f32 1.442695, %v1464_v23 }
 0x32e   : > { %3984 = vpow2.f32 %v1478_v51 }
 0x334   : > { %v5091_v53 = vpop.eup %3984 }
 0x335   : > { %v1500_v58 = vsel %vm1433_vm1, %v5091_v53, 0.0 }
 0x336   : > { %1501 = vadd.xlane.f32.xlu1 %v1500_v58 }
 0x339   : > { %v1457_v63 = vpop.xlane.xlu1 %1456 }
 0x33a   : > { %v1465_v5 = vsub.f32 %v1430_v2, %v1457_v63 }
 0x33c   : > { %v1480_v60 = vmul.f32 1.442695, %v1465_v5 }
 0x33e   : > { %3986 = vpow2.f32 %v1480_v60 }
 0x344   : > { %v5095_v61 = vpop.eup %3986 }
 0x345   : > { %v1503_v62 = vsel %vm1433_vm1, %v5095_v61, 0.0 }
 0x346   : > { %1504 = vadd.xlane.f32.xlu0 %v1503_v62 }
 0x349   : > { %v1484_v0 = vpop.xlane.xlu2 %1483 }
 0x34a   : > { %3988 = vrcp.f32 %v1484_v0  ;;  %v1517_v11 = vand.u32 2147483648, %v1484_v0  ;;  %v1515_v16 = vand.u32 2147483647, %v1484_v0  ;;  %vm1511_vm3 = vweird.f32 %v1484_v0 }
 0x34c   : > { %v1518_v2 = vor.u32 1.1754944e-38, %v1517_v11  ;;  %vm1516_vm5 = vcmp.eq.f32.partialorder %v1515_v16, 8.507059e+37 }
 0x350   : > { %v3989_v20 = vpop.eup %3988 }
 0x351   : > { %v1507_v6 = vmul.f32 %v3989_v20, %v1484_v0  ;;  %vm1512_vm2 = vweird.f32 %v3989_v20 }
 0x352   : > { %vm1513_vm4 = vmor %vm1511_vm3, %vm1512_vm2 }
 0x353   : > { %v1508_v1 = vsub.f32 1.0, %v1507_v6 }
 0x355   : > { %v1509_v12 = vmul.f32 %v3989_v20, %v1508_v1 }
 0x357   : > { %v1510_v19 = vadd.f32 %v3989_v20, %v1509_v12 }
 0x359   : > { %v1514_v15 = vsel %vm1513_vm4, %v3989_v20, %v1510_v19  ;;  %v1487_v14 = vpop.xlane.xlu1 %1486 }
 0x35a   : > { %v1519_v9 = vsel %vm1516_vm5, %v1518_v2, %v1514_v15  ;;  %3990 = vrcp.f32 %v1487_v14  ;;  %v1532_v56 = vand.u32 2147483648, %v1487_v14  ;;  %v1530_v51 = vand.u32 2147483647, %v1487_v14 }
 0x35b   : > { %v1520_v21 = vmul.f32 %v5067_v25, %v1519_v9  ;;  %vm1526_vm7 = vweird.f32 %v1487_v14 }
 0x35c   : > { %v1533_v63 = vor.u32 1.1754944e-38, %v1532_v56  ;;  %vm1531_vm9 = vcmp.eq.f32.partialorder %v1530_v51, 8.507059e+37 }
 0x35d   : > { %3707 = vmatmul.msk.f32.vlgmr.msra.gmra.mxu0 %vm1433_vm1, %v1520_v21 }
 0x35e   : > { %1735 = vmatpush.msra.mxu0 %v4809_v27 }
 0x360   : > { %v3991_v42 = vpop.eup %3990  ;;  %1736 = vmatpush.msra.mxu0 %v4799_v24 }
 0x361   : > { %v1522_v3 = vmul.f32 %v3991_v42, %v1487_v14  ;;  %vm1527_vm6 = vweird.f32 %v3991_v42 }
 0x362   : > { %vm1528_vm8 = vmor %vm1526_vm7, %vm1527_vm6 }
 0x363   : > { %v1523_v7 = vsub.f32 1.0, %v1522_v3 }
 0x365   : > { %v1524_v23 = vmul.f32 %v3991_v42, %v1523_v7 }
 0x367   : > { %v1525_v58 = vadd.f32 %v3991_v42, %v1524_v23 }
 0x369   : > { %v1529_v5 = vsel %vm1528_vm8, %v3991_v42, %v1525_v58  ;;  %v1490_v25 = vpop.xlane.xlu0 %1489 }
 0x36a   : > { %v1534_v60 = vsel %vm1531_vm9, %v1533_v63, %v1529_v5  ;;  %3992 = vrcp.f32 %v1490_v25  ;;  %v1547_v20 = vand.u32 2147483648, %v1490_v25  ;;  %v1545_v1 = vand.u32 2147483647, %v1490_v25 }
 0x36b   : > { %v1535_v27 = vmul.f32 %v5071_v59, %v1534_v60  ;;  %vm1541_vm11 = vweird.f32 %v1490_v25 }
 0x36c   : > { %v1548_v12 = vor.u32 1.1754944e-38, %v1547_v20  ;;  %vm1546_vm13 = vcmp.eq.f32.partialorder %v1545_v1, 8.507059e+37 }
 0x36d   : > { %3708 = vmatmul.msk.f32.vlgmr.msrb.gmra.mxu1 %vm1433_vm1, %v1535_v27 }
 0x36e   : > { %1758 = vmatpush.msrb.mxu1 %v4824_v36 }
 0x370   : > { %v3993_v24 = vpop.eup %3992  ;;  %1759 = vmatpush.msrb.mxu1 %v4817_v32 }
 0x371   : > { %v1537_v62 = vmul.f32 %v3993_v24, %v1490_v25  ;;  %vm1542_vm10 = vweird.f32 %v3993_v24 }
 0x372   : > { %vm1543_vm12 = vmor %vm1541_vm11, %vm1542_vm10 }
 0x373   : > { %v1538_v0 = vsub.f32 1.0, %v1537_v62 }
 0x375   : > { %v1539_v6 = vmul.f32 %v3993_v24, %v1538_v0 }
 0x377   : > { %v1540_v11 = vadd.f32 %v3993_v24, %v1539_v6 }
 0x379   : > { %v1544_v16 = vsel %vm1543_vm12, %v3993_v24, %v1540_v11  ;;  %v1493_v59 = vpop.xlane.xlu0 %1492 }
 0x37a   : > { %v1549_v19 = vsel %vm1546_vm13, %v1548_v12, %v1544_v16  ;;  %3994 = vrcp.f32 %v1493_v59  ;;  %v1562_v14 = vand.u32 2147483648, %v1493_v59  ;;  %v1560_v21 = vand.u32 2147483647, %v1493_v59 }
 0x37b   : > { %v1550_v36 = vmul.f32 %v5075_v10, %v1549_v19  ;;  %vm1556_vm15 = vweird.f32 %v1493_v59 }
 0x37c   : > { %v1563_v3 = vor.u32 1.1754944e-38, %v1562_v14  ;;  %vm1561_vm3 = vcmp.eq.f32.partialorder %v1560_v21, 8.507059e+37 }
 0x37d   : > { %3709 = vmatmul.msk.f32.vlgmr.msrb.gmra.mxu0 %vm1433_vm1, %v1550_v36 }
 0x37e   : > { %1781 = vmatpush.msrb.mxu0 %v4838_v44 }
 0x380   : > { %v3995_v32 = vpop.eup %3994  ;;  %1782 = vmatpush.msrb.mxu0 %v4831_v40 }
 0x381   : > { %v1552_v2 = vmul.f32 %v3995_v32, %v1493_v59  ;;  %vm1557_vm14 = vweird.f32 %v3995_v32 }
 0x382   : > { %vm1558_vm2 = vmor %vm1556_vm15, %vm1557_vm14 }
 0x383   : > { %v1553_v15 = vsub.f32 1.0, %v1552_v2 }
 0x385   : > { %v1554_v9 = vmul.f32 %v3995_v32, %v1553_v15 }
 0x387   : > { %v1555_v42 = vadd.f32 %v3995_v32, %v1554_v9 }
 0x389   : > { %v1559_v7 = vsel %vm1558_vm2, %v3995_v32, %v1555_v42  ;;  %v1496_v10 = vpop.xlane.xlu2 %1495 }
 0x38a   : > { %v1564_v56 = vsel %vm1561_vm3, %v1563_v3, %v1559_v7  ;;  %3996 = vrcp.f32 %v1496_v10  ;;  %v1577_v58 = vand.u32 2147483648, %v1496_v10  ;;  %v1575_v5 = vand.u32 2147483647, %v1496_v10 }
 0x38b   : > { %v1565_v44 = vmul.f32 %v5079_v13, %v1564_v56  ;;  %vm1571_vm5 = vweird.f32 %v1496_v10 }
 0x38c   : > { %v1578_v60 = vor.u32 1.1754944e-38, %v1577_v58  ;;  %vm1576_vm7 = vcmp.eq.f32.partialorder %v1575_v5, 8.507059e+37  ;;  %v1876_v5 = vpop.f32.mrf.mxu2 }
 0x38d   : > { %3710 = vmatmul.msk.f32.vlgmr.msra.gmra.mxu1 %vm1433_vm1, %v1565_v44 }
 0x38e   : > { %1804 = vmatpush.msra.mxu1 %v4852_v52 }
 0x390   : > { %v3997_v40 = vpop.eup %3996  ;;  %1805 = vmatpush.msra.mxu1 %v4845_v48 }
 0x391   : > { %v1567_v23 = vmul.f32 %v3997_v40, %v1496_v10  ;;  %vm1572_vm4 = vweird.f32 %v3997_v40 }
 0x392   : > { %vm1573_vm6 = vmor %vm1571_vm5, %vm1572_vm4 }
 0x393   : > { %v1568_v51 = vsub.f32 1.0, %v1567_v23 }
 0x395   : > { %v1569_v63 = vmul.f32 %v3997_v40, %v1568_v51 }
 0x397   : > { %v1570_v25 = vadd.f32 %v3997_v40, %v1569_v63 }
 0x399   : > { %v1574_v27 = vsel %vm1573_vm6, %v3997_v40, %v1570_v25  ;;  %v1499_v13 = vpop.xlane.xlu2 %1498  ;;  %v5134_v40 = vld [vmem:[%s4689_s25] sm:$0xff] }
 0x39a   : > { %v1579_v24 = vsel %vm1576_vm7, %v1578_v60, %v1574_v27  ;;  %3998 = vrcp.f32 %v1499_v13  ;;  %v1592_v20 = vand.u32 2147483648, %v1499_v13  ;;  %v1590_v1 = vand.u32 2147483647, %v1499_v13 }
 0x39b   : > { %v1580_v52 = vmul.f32 %v5083_v22, %v1579_v24  ;;  %vm1586_vm9 = vweird.f32 %v1499_v13 }
 0x39c   : > { %v1593_v12 = vor.u32 1.1754944e-38, %v1592_v20  ;;  %vm1591_vm11 = vcmp.eq.f32.partialorder %v1590_v1, 8.507059e+37 }
 0x39d   : > { %3711 = vmatmul.msk.f32.vlgmr.msra.gmra.mxu0 %vm1433_vm1, %v1580_v52 }
 0x39e   : > { %3715 = vmatpush.xpose.msk.msra.mxu0 %vm788_vm0, %v935_v35 }
 0x3a0   : > { %v3999_v48 = vpop.eup %3998 }
 0x3a1   : > { %v1582_v62 = vmul.f32 %v3999_v48, %v1499_v13  ;;  %vm1587_vm8 = vweird.f32 %v3999_v48 }
 0x3a2   : > { %vm1588_vm10 = vmor %vm1586_vm9, %vm1587_vm8 }
 0x3a3   : > { %v1583_v0 = vsub.f32 1.0, %v1582_v62 }
 0x3a5   : > { %v1584_v6 = vmul.f32 %v3999_v48, %v1583_v0 }
 0x3a7   : > { %v1585_v11 = vadd.f32 %v3999_v48, %v1584_v6 }
 0x3a9   : > { %v1589_v16 = vsel %vm1588_vm10, %v3999_v48, %v1585_v11  ;;  %v1502_v22 = vpop.xlane.xlu1 %1501 }
 0x3aa   : > { %v1594_v59 = vsel %vm1591_vm11, %v1593_v12, %v1589_v16  ;;  %4000 = vrcp.f32 %v1502_v22  ;;  %v1607_v32 = vand.u32 2147483648, %v1502_v22  ;;  %v1605_v15 = vand.u32 2147483647, %v1502_v22 }
 0x3ab   : > { %v1595_v33 = vmul.f32 %v5087_v47, %v1594_v59  ;;  %vm1601_vm13 = vweird.f32 %v1502_v22 }
 0x3ac   : > { %v1608_v9 = vor.u32 1.1754944e-38, %v1607_v32  ;;  %vm1606_vm15 = vcmp.eq.f32.partialorder %v1605_v15, 8.507059e+37 }
 0x3ad   : > { %3712 = vmatmul.msk.f32.vlgmr.msrb.gmra.mxu1 %vm1433_vm1, %v1595_v33 }
 0x3ae   : > { %3718 = vmatpush.xpose.msk.msrb.mxu1 %vm788_vm0, %v936_v54 }
 0x3b0   : > { %v4001_v35 = vpop.eup %4000 }
 0x3b1   : > { %v1597_v19 = vmul.f32 %v4001_v35, %v1502_v22  ;;  %vm1602_vm12 = vweird.f32 %v4001_v35 }
 0x3b2   : > { %vm1603_vm14 = vmor %vm1601_vm13, %vm1602_vm12 }
 0x3b3   : > { %v1598_v36 = vsub.f32 1.0, %v1597_v19 }
 0x3b5   : > { %v1599_v2 = vmul.f32 %v4001_v35, %v1598_v36 }
 0x3b7   : > { %v1600_v14 = vadd.f32 %v4001_v35, %v1599_v2 }
 0x3b9   : > { %v1604_v21 = vsel %vm1603_vm14, %v4001_v35, %v1600_v14  ;;  %v1505_v47 = vpop.xlane.xlu0 %1504 }
 0x3ba   : > { %v1609_v42 = vsel %vm1606_vm15, %v1608_v9, %v1604_v21  ;;  %4002 = vrcp.f32 %v1505_v47  ;;  %v1622_v10 = vand.u32 2147483648, %v1505_v47  ;;  %v1620_v44 = vand.u32 2147483647, %v1505_v47 }
 0x3bb   : > { %v1610_v46 = vmul.f32 %v5091_v53, %v1609_v42  ;;  %vm1616_vm3 = vweird.f32 %v1505_v47 }
 0x3bc   : > { %vm1621_vm5 = vcmp.eq.f32.partialorder %v1620_v44, 8.507059e+37 }
 0x3bd   : > { %3713 = vmatmul.msk.f32.vlgmr.msrb.gmra.mxu0 %vm1433_vm1, %v1610_v46 }
 0x3be   : > { %3727 = vmatpush.xpose.msk.msrb.mxu0 %vm788_vm0, %v939_v18  ;;  %v1623_v18 = vor.u32 1.1754944e-38, %v1622_v10 }
 0x3c0   : > { %v4003_v54 = vpop.eup %4002 }
 0x3c1   : > { %v1612_v3 = vmul.f32 %v4003_v54, %v1505_v47  ;;  %vm1617_vm2 = vweird.f32 %v4003_v54 }
 0x3c2   : > { %vm1618_vm4 = vmor %vm1616_vm3, %vm1617_vm2 }
 0x3c3   : > { %v1613_v7 = vsub.f32 1.0, %v1612_v3 }
 0x3c5   : > { %v1614_v56 = vmul.f32 %v4003_v54, %v1613_v7  ;;  %3716 = vmatmul.msk.f32.vlgmr.msra.gmra.mxu0 %vm788_vm0, %v1185_v34  ;;  %v5156_v34 = vld [vmem:[%s4689_s25 + $0x20] sm:$0xff] }
 0x3c6   : > { %2400 = vmatpush.msra.mxu0 %v5134_v40 }
 0x3c7   : > { %v1615_v17 = vadd.f32 %v4003_v54, %v1614_v56 }
 0x3c9   : > { %v1619_v53 = vsel %vm1618_vm4, %v4003_v54, %v1615_v17  ;;  %v5231_v17 = vpop.f32.mrf.mxu2 }
 0x3ca   : > { %v1624_v23 = vsel %vm1621_vm5, %v1623_v18, %v1619_v53 }
 0x3cb   : > { %v1625_v51 = vmul.f32 %v5095_v61, %v1624_v23 }
 0x3cd   : > { %3714 = vmatmul.msk.f32.vlgmr.msra.gmra.mxu1 %vm1433_vm1, %v1625_v51  ;;  %3717 = vmatmul.msk.f32.gmra.mxu0 %vm788_vm0, %v1186_v31  ;;  %vm1994_vm1 = vcmask 64512  }
 0x3ce   : > { %3730 = vmatpush.xpose.msk.msra.mxu1 %vm788_vm0, %v940_v57  ;;  %v2007_v61 = vsel %vm1994_vm1, %v1873_v38, -inf  ;;  %v2010_v13 = vsel %vm1994_vm1, %v1876_v5, -inf }
 0x3d5   : > { %3719 = vmatmul.msk.f32.vlgmr.msrb.gmra.mxu1 %vm788_vm0, %v1187_v50  ;;  %3728 = vmatmul.msk.f32.vlgmr.msrb.gmra.mxu0 %vm788_vm0, %v1193_v55 }
 0x3d6   : > { %2429 = vmatpush.msrb.mxu1 %v5152_v30  ;;  %2516 = vmatpush.msrb.mxu0 %v5156_v34 }
 0x3da   : > { %v5175_v31 = vpop.f32.mrf.mxu0 }
 0x3dd   : > { %3720 = vmatmul.msk.f32.gmra.mxu1 %vm788_vm0, %v1188_v45  ;;  %3729 = vmatmul.msk.f32.gmra.mxu0 %vm788_vm0, %v1194_v8 }
 0x3e5   : > { %3731 = vmatmul.msk.f32.vlgmr.msra.gmra.mxu1 %vm788_vm0, %v1195_v41  ;;  %v5193_v41 = vpop.f32.mrf.mxu3 }
 0x3e6   : > { %2545 = vmatpush.msra.mxu1 %v5169_v28  ;;  %v2013_v0 = vsel %vm1994_vm1, %v5193_v41, -inf }
 0x3ea   : > { %v5179_v43 = vpop.f32.mrf.mxu1 }
 0x3ed   : > { %3732 = vmatmul.msk.f32.gmra.mxu1 %vm788_vm0, %v1196_v37  ;;  %v5199_v25 = vpop.f32.mrf.mxu3 }
 0x3ee   : > { %v2016_v27 = vsel %vm1994_vm1, %v5199_v25, -inf }
 0x3fa   : > { %v5177_v39 = vpop.f32.mrf.mxu0 }
 0x40a   : > { %v5183_v50 = vpop.f32.mrf.mxu1 }
 0x41a   : > { %v5181_v45 = vpop.f32.mrf.mxu0 }
 0x42a   : > { %v5187_v4 = vpop.f32.mrf.mxu1 }
 0x43a   : > { %v5185_v49 = vpop.f32.mrf.mxu0 }
 0x442   : > { %v1827_v8 = vpop.f32.mrf.mxu0 }
 0x443   : > { %v1995_v55 = vsel %vm1994_vm1, %v1827_v8, -inf }
 0x444   : > { %1996 = vmax.xlane.f32.xlu1 %v1995_v55 }
 0x44a   : > { %v5190_v26 = vpop.f32.mrf.mxu1  ;;  %v1830_v29 = vpop.f32.mrf.mxu0 }
 0x44b   : > { %v1998_v37 = vsel %vm1994_vm1, %v1830_v29, -inf }
 0x44c   : > { %1999 = vmax.xlane.f32.xlu2 %v1998_v37 }
 0x452   : > { %v1850_v57 = vpop.f32.mrf.mxu1  ;;  %v5197_v63 = vpop.f32.mrf.mxu0 }
 0x453   : > { %v2001_v58 = vsel %vm1994_vm1, %v1850_v57, -inf  ;;  %v2019_v62 = vsel %vm1994_vm1, %v5197_v63, -inf }
 0x454   : > { %2008 = vmax.xlane.f32.xlu2 %v2007_v61  ;;  %2002 = vmax.xlane.f32.xlu0 %v2001_v58 }
 0x45a   : > { %v1853_v60 = vpop.f32.mrf.mxu1  ;;  %v5205_v52 = vpop.f32.mrf.mxu0 }
 0x45b   : > { %v2004_v24 = vsel %vm1994_vm1, %v1853_v60, -inf  ;;  %v2022_v48 = vsel %vm1994_vm1, %v5205_v52, -inf }
 0x45c   : > { %2017 = vmax.xlane.f32.xlu2 %v2016_v27  ;;  %2011 = vmax.xlane.f32.xlu0 %v2010_v13  ;;  %v2031_v13 = vsel %vm1994_vm1, %v5231_v17, -inf }
 0x45d   : > { %2005 = vmax.xlane.f32.xlu1 %v2004_v24 }
 0x462   : > { %v5221_v9 = vpop.f32.mrf.mxu1 }
 0x464   : > { %2023 = vmax.xlane.f32.xlu2 %v2022_v48  ;;  %2020 = vmax.xlane.f32.xlu0 %v2019_v62 }
 0x465   : > { %2014 = vmax.xlane.f32.xlu1 %v2013_v0 }
 0x46a   : > { %v5233_v23 = vpop.f32.mrf.mxu1 }
 0x4b7   : > { %v1997_v20 = vpop.xlane.xlu1 %1996 }
 0x4b8   : > { %v2043_v6 = vsub.f32 %v1827_v8, %v1997_v20 }
 0x4ba   : > { %v2059_v1 = vmul.f32 1.442695, %v2043_v6 }
 0x4bc   : > { %4004 = vpow2.f32 %v2059_v1 }
 0x4bf   : > { %v2000_v11 = vpop.xlane.xlu2 %1999 }
 0x4c0   : > { %v2044_v12 = vsub.f32 %v1830_v29, %v2000_v11  ;;  %v2025_v29 = vsel %vm1994_vm1, %v5221_v9, -inf }
 0x4c2   : > { %v5213_v16 = vpop.eup %4004  ;;  %v2061_v22 = vmul.f32 1.442695, %v2044_v12 }
 0x4c3   : > { %v2091_v59 = vsel %vm1994_vm1, %v5213_v16, 0.0 }
 0x4c4   : > { %4006 = vpow2.f32 %v2061_v22  ;;  %2092 = vadd.xlane.f32.xlu1 %v2091_v59 }
 0x4c7   : > { %v2003_v33 = vpop.xlane.xlu0 %2002  ;;  %v2009_v35 = vpop.xlane.xlu2 %2008 }
 0x4c8   : > { %v2045_v19 = vsub.f32 %v1850_v57, %v2003_v33  ;;  %v2047_v36 = vsub.f32 %v1873_v38, %v2009_v35  ;;  %v2028_v38 = vsel %vm1994_vm1, %v5233_v23, -inf }
 0x4ca   : > { %v5217_v32 = vpop.eup %4006  ;;  %v2063_v2 = vmul.f32 1.442695, %v2045_v19  ;;  %v2067_v15 = vmul.f32 1.442695, %v2047_v36 }
 0x4cb   : > { %v2094_v14 = vsel %vm1994_vm1, %v5217_v32, 0.0 }
 0x4cc   : > { %4008 = vpow2.f32 %v2063_v2  ;;  %2095 = vadd.xlane.f32.xlu0 %v2094_v14 }
 0x4cd   : > { %4010 = vpow2.f32 %v2067_v15 }
 0x4cf   : > { %v2012_v21 = vpop.xlane.xlu0 %2011  ;;  %v2018_v44 = vpop.xlane.xlu2 %2017 }
 0x4d0   : > { %v2006_v47 = vpop.xlane.xlu1 %2005  ;;  %v2048_v3 = vsub.f32 %v1876_v5, %v2012_v21  ;;  %v2050_v51 = vsub.f32 %v5199_v25, %v2018_v44 }
 0x4d1   : > { %v2046_v42 = vsub.f32 %v1853_v60, %v2006_v47  ;;  %v5247_v60 = vpop.f32.mrf.mxu2 }
 0x4d2   : > { %v5223_v46 = vpop.eup %4008  ;;  %v2069_v18 = vmul.f32 1.442695, %v2048_v3  ;;  %v2073_v57 = vmul.f32 1.442695, %v2050_v51  ;;  %v2034_v48 = vsel %vm1994_vm1, %v5247_v60, -inf }
 0x4d3   : > { %v5225_v54 = vpop.eup %4010  ;;  %v2065_v7 = vmul.f32 1.442695, %v2046_v42  ;;  %v2097_v10 = vsel %vm1994_vm1, %v5223_v46, 0.0 }
 0x4d4   : > { %2098 = vadd.xlane.f32.xlu1 %v2097_v10  ;;  %v2103_v56 = vsel %vm1994_vm1, %v5225_v54, 0.0 }
 0x4d5   : > { %4012 = vpow2.f32 %v2065_v7  ;;  %2104 = vadd.xlane.f32.xlu0 %v2103_v56 }
 0x4d6   : > { %4014 = vpow2.f32 %v2069_v18 }
 0x4d7   : > { %v2024_v58 = vpop.xlane.xlu2 %2023  ;;  %v2021_v5 = vpop.xlane.xlu0 %2020  ;;  %4016 = vpow2.f32 %v2073_v57 }
 0x4d8   : > { %v2015_v53 = vpop.xlane.xlu1 %2014  ;;  %v2051_v27 = vsub.f32 %v5197_v63, %v2021_v5  ;;  %v5261_v63 = vpop.f32.mrf.mxu3 }
 0x4d9   : > { %v2049_v55 = vsub.f32 %v5193_v41, %v2015_v53  ;;  %v2052_v41 = vsub.f32 %v5205_v52, %v2024_v58  ;;  %v2037_v11 = vsel %vm1994_vm1, %v5261_v63, -inf }
 0x4da   : > { %v2075_v0 = vmul.f32 1.442695, %v2051_v27 }
 0x4db   : > { %v5236_v8 = vpop.eup %4012  ;;  %v2071_v61 = vmul.f32 1.442695, %v2049_v55  ;;  %v2077_v62 = vmul.f32 1.442695, %v2052_v41 }
 0x4dc   : > { %v2100_v37 = vsel %vm1994_vm1, %v5236_v8, 0.0  ;;  %2026 = vmax.xlane.f32.xlu1 %v2025_v29  ;;  %v5245_v25 = vpop.eup %4014 }
 0x4dd   : > { %2101 = vadd.xlane.f32.xlu2 %v2100_v37  ;;  %2029 = vmax.xlane.f32.xlu0 %v2028_v38  ;;  %4018 = vpow2.f32 %v2071_v61  ;;  %v2106_v24 = vsel %vm1994_vm1, %v5245_v25, 0.0  ;;  %v5257_v20 = vpop.eup %4016 }
 0x4de   : > { %4020 = vpow2.f32 %v2077_v62  ;;  %v2112_v6 = vsel %vm1994_vm1, %v5257_v20, 0.0 }
 0x4df   : > { %4022 = vpow2.f32 %v2075_v0 }
 0x4e0   : > { %v5277_v35 = vpop.f32.mrf.mxu3 }
 0x4e1   : > { %v2040_v19 = vsel %vm1994_vm1, %v5277_v35, -inf }
 0x4e3   : > { %v5259_v52 = vpop.eup %4018 }
 0x4e4   : > { %2032 = vmax.xlane.f32.xlu1 %v2031_v13  ;;  %v2109_v1 = vsel %vm1994_vm1, %v5259_v52, 0.0  ;;  %v5269_v12 = vpop.eup %4020 }
 0x4e5   : > { %2107 = vadd.xlane.f32.xlu2 %v2106_v24  ;;  %2035 = vmax.xlane.f32.xlu0 %v2034_v48  ;;  %v5271_v22 = vpop.eup %4022  ;;  %v2118_v59 = vsel %vm1994_vm1, %v5269_v12, 0.0 }
 0x4e6   : > { %v2115_v33 = vsel %vm1994_vm1, %v5271_v22, 0.0 }
 0x4ec   : > { %2113 = vadd.xlane.f32.xlu1 %v2112_v6 }
 0x4ed   : > { %2110 = vadd.xlane.f32.xlu2 %v2109_v1  ;;  %2038 = vmax.xlane.f32.xlu0 %v2037_v11 }
 0x4f4   : > { %2119 = vadd.xlane.f32.xlu1 %v2118_v59 }
 0x4f5   : > { %2116 = vadd.xlane.f32.xlu2 %v2115_v33 }
 0x4fd   : > { %2041 = vmax.xlane.f32.xlu2 %v2040_v19 }
 0x537   : > { %v2093_v36 = vpop.xlane.xlu1 %2092 }
 0x538   : > { %4024 = vrcp.f32 %v2093_v36  ;;  %v2150_v47 = vand.u32 2147483648, %v2093_v36  ;;  %v2148_v3 = vand.u32 2147483647, %v2093_v36  ;;  %vm2144_vm7 = vweird.f32 %v2093_v36 }
 0x53a   : > { %v2151_v56 = vor.u32 1.1754944e-38, %v2150_v47  ;;  %vm2149_vm9 = vcmp.eq.f32.partialorder %v2148_v3, 8.507059e+37 }
 0x53e   : > { %v4025_v2 = vpop.eup %4024 }
 0x53f   : > { %v2140_v15 = vmul.f32 %v4025_v2, %v2093_v36  ;;  %v2096_v14 = vpop.xlane.xlu0 %2095  ;;  %vm2145_vm6 = vweird.f32 %v4025_v2 }
 0x540   : > { %4026 = vrcp.f32 %v2096_v14  ;;  %vm2146_vm8 = vmor %vm2144_vm7, %vm2145_vm6  ;;  %v2165_v37 = vand.u32 2147483648, %v2096_v14  ;;  %v2163_v61 = vand.u32 2147483647, %v2096_v14  ;;  %vm2159_vm11 = vweird.f32 %v2096_v14 }
 0x541   : > { %v2141_v21 = vsub.f32 1.0, %v2140_v15 }
 0x542   : > { %v2166_v41 = vor.u32 1.1754944e-38, %v2165_v37  ;;  %vm2164_vm13 = vcmp.eq.f32.partialorder %v2163_v61, 8.507059e+37 }
 0x543   : > { %v2142_v42 = vmul.f32 %v4025_v2, %v2141_v21 }
 0x545   : > { %v2143_v7 = vadd.f32 %v4025_v2, %v2142_v42 }
 0x546   : > { %v4027_v10 = vpop.eup %4026 }
 0x547   : > { %v2147_v44 = vsel %vm2146_vm8, %v4025_v2, %v2143_v7  ;;  %v2155_v18 = vmul.f32 %v4027_v10, %v2096_v14  ;;  %v2099_v53 = vpop.xlane.xlu1 %2098  ;;  %vm2160_vm10 = vweird.f32 %v4027_v10 }
 0x548   : > { %v2152_v51 = vsel %vm2149_vm9, %v2151_v56, %v2147_v44  ;;  %4028 = vrcp.f32 %v2099_v53  ;;  %v2105_v55 = vpop.xlane.xlu0 %2104  ;;  %vm2161_vm12 = vmor %vm2159_vm11, %vm2160_vm10  ;;  %v2178_v62 = vand.u32 2147483647, %v2099_v53  ;;  %v2180_v33 = vand.u32 2147483648, %v2099_v53 }
 0x549   : > { %v2156_v29 = vsub.f32 1.0, %v2155_v18  ;;  %4030 = vrcp.f32 %v2105_v55  ;;  %v2153_v38 = vmul.f32 %v5213_v16, %v2152_v51  ;;  %v2208_v2 = vand.u32 2147483647, %v2105_v55 }
 0x54a   : > { %v2210_v47 = vand.u32 2147483648, %v2105_v55  ;;  %vm2174_vm2 = vweird.f32 %v2099_v53  ;;  %vm2204_vm4 = vweird.f32 %v2105_v55  ;;  %vm2179_vm5 = vcmp.eq.f32.partialorder %v2178_v62, 8.507059e+37 }
 0x54b   : > { %v2157_v57 = vmul.f32 %v4027_v10, %v2156_v29  ;;  %3739 = vmatmul.msk.f32.vlgmr.msra.gmra.mxu0 %vm1994_vm1, %v2153_v38  ;;  %vm2209_vm7 = vcmp.eq.f32.partialorder %v2208_v2, 8.507059e+37 }
 0x54d   : > { %v2158_v58 = vadd.f32 %v4027_v10, %v2157_v57 }
 0x54e   : > { %v4029_v5 = vpop.eup %4028 }
 0x54f   : > { %v4031_v27 = vpop.eup %4030  ;;  %v2170_v13 = vmul.f32 %v4029_v5, %v2099_v53  ;;  %v2027_v24 = vpop.xlane.xlu1 %2026  ;;  %v2162_v48 = vsel %vm2161_vm12, %v4027_v10, %v2158_v58  ;;  %vm2175_vm14 = vweird.f32 %v4029_v5 }
 0x550   : > { %v2200_v0 = vmul.f32 %v4031_v27, %v2105_v55  ;;  %v2053_v6 = vsub.f32 %v5221_v9, %v2027_v24  ;;  %v2030_v16 = vpop.xlane.xlu0 %2029  ;;  %v5284_v1 = vpop.xlane.xlu2 %2101  ;;  %v2167_v11 = vsel %vm2164_vm13, %v2166_v41, %v2162_v48  ;;  %vm2205_vm15 = vweird.f32 %v4031_v27  ;;  %vm2176_vm3 = vmor %vm2174_vm2, %vm2175_vm14 }
 0x551   : > { %v2171_v59 = vsub.f32 1.0, %v2170_v13  ;;  %v2054_v19 = vsub.f32 %v5233_v23, %v2030_v16  ;;  %4032 = vrcp.f32 %v5284_v1  ;;  %v2168_v14 = vmul.f32 %v5217_v32, %v2167_v11  ;;  %vm2206_vm6 = vmor %vm2204_vm4, %vm2205_vm15 }
 0x552   : > { %v2201_v36 = vsub.f32 1.0, %v2200_v0  ;;  %v2079_v15 = vmul.f32 1.442695, %v2053_v6  ;;  %v2181_v23 = vor.u32 1.1754944e-38, %v2180_v33  ;;  %v2211_v32 = vor.u32 1.1754944e-38, %v2210_v47 }
 0x553   : > { %v2172_v21 = vmul.f32 %v4029_v5, %v2171_v59  ;;  %v2081_v42 = vmul.f32 1.442695, %v2054_v19  ;;  %3740 = vmatmul.msk.f32.gmra.mxu0 %vm1994_vm1, %v2168_v14  ;;  %v2193_v6 = vand.u32 2147483647, %v5284_v1  ;;  %vm2189_vm9 = vweird.f32 %v5284_v1 }
 0x554   : > { %v2202_v9 = vmul.f32 %v4031_v27, %v2201_v36  ;;  %4034 = vpow2.f32 %v2079_v15 }
 0x555   : > { %v2173_v3 = vadd.f32 %v4029_v5, %v2172_v21  ;;  %4036 = vpow2.f32 %v2081_v42  ;;  %vm2194_vm11 = vcmp.eq.f32.partialorder %v2193_v6, 8.507059e+37 }
 0x556   : > { %v2203_v7 = vadd.f32 %v4031_v27, %v2202_v9 }
 0x557   : > { %v4033_v10 = vpop.eup %4032  ;;  %v2177_v56 = vsel %vm2176_vm3, %v4029_v5, %v2173_v3  ;;  %v2033_v44 = vpop.xlane.xlu1 %2032  ;;  %v5324_v3 = vld [vmem:[#allocation9 + $0x18] sm:$0xff] }
 0x558   : > { %v2182_v18 = vsel %vm2179_vm5, %v2181_v23, %v2177_v56  ;;  %v2207_v51 = vsel %vm2206_vm6, %v4031_v27, %v2203_v7  ;;  %v2185_v29 = vmul.f32 %v4033_v10, %v5284_v1  ;;  %v2055_v37 = vsub.f32 %v5231_v17, %v2033_v44  ;;  %v2036_v38 = vpop.xlane.xlu0 %2035  ;;  %v5292_v53 = vpop.xlane.xlu2 %2107  ;;  %2655 = vmatpush.msra.mxu0 %v5324_v3  ;;  %v5337_v44 = vld [vmem:[#allocation9 + $0x8] sm:$0xff] }
 0x559   : > { %v2212_v57 = vsel %vm2209_vm7, %v2211_v32, %v2207_v51  ;;  %v2056_v61 = vsub.f32 %v5247_v60, %v2036_v38  ;;  %4038 = vrcp.f32 %v5292_v53  ;;  %v2183_v24 = vmul.f32 %v5223_v46, %v2182_v18  ;;  %v5350_v38 = vld [vmem:[#allocation9] sm:$0xff] }
 0x55a   : > { %v5296_v55 = vpop.eup %4034  ;;  %v2213_v58 = vmul.f32 %v5225_v54, %v2212_v57  ;;  %v2186_v5 = vsub.f32 1.0, %v2185_v29  ;;  %v2083_v41 = vmul.f32 1.442695, %v2055_v37  ;;  %v2195_v54 = vand.u32 2147483648, %v5284_v1  ;;  %v5326_v1 = vld [vmem:[#allocation9 + $0x10] sm:$0xff] }
 0x55b   : > { %v5299_v13 = vpop.eup %4036  ;;  %v2085_v27 = vmul.f32 1.442695, %v2056_v61  ;;  %v2121_v17 = vsel %vm1994_vm1, %v5296_v55, 0.0  ;;  %3741 = vmatmul.msk.f32.vlgmr.msrb.gmra.mxu1 %vm1994_vm1, %v2183_v24  ;;  %vm2190_vm8 = vweird.f32 %v4033_v10  ;;  %v2225_v42 = vand.u32 2147483648, %v5292_v53  ;;  %2656 = vmatpush.msra.mxu0 %v5326_v1 }
 0x55c   : > { %v2187_v48 = vmul.f32 %v4033_v10, %v2186_v5  ;;  %4040 = vpow2.f32 %v2083_v41  ;;  %3743 = vmatmul.msk.f32.vlgmr.msra.gmra.mxu2 %vm1994_vm1, %v2213_v58  ;;  %2122 = vadd.xlane.f32.xlu0 %v2121_v17  ;;  %v2124_v60 = vsel %vm1994_vm1, %v5299_v13, 0.0  ;;  %v2196_v36 = vor.u32 1.1754944e-38, %v2195_v54  ;;  %vm2191_vm10 = vmor %vm2189_vm9, %vm2190_vm8 }
 0x55d   : > { %4042 = vpow2.f32 %v2085_v27  ;;  %2125 = vadd.xlane.f32.xlu1 %v2124_v60  ;;  %v2223_v32 = vand.u32 2147483647, %v5292_v53  ;;  %vm2219_vm13 = vweird.f32 %v5292_v53  ;;  %v2226_v57 = vor.u32 1.1754944e-38, %v2225_v42  ;;  %2657 = vmatpush.msra.mxu0 %v5337_v44 }
 0x55e   : > { %v2188_v46 = vadd.f32 %v4033_v10, %v2187_v48 }
 0x55f   : > { %v4039_v62 = vpop.eup %4038  ;;  %v5309_v0 = vpop.xlane.xlu1 %2113  ;;  %vm2224_vm15 = vcmp.eq.f32.partialorder %v2223_v32, 8.507059e+37  ;;  %2658 = vmatpush.msra.mxu0 %v5350_v38 }
 0x560   : > { %v2215_v16 = vmul.f32 %v4039_v62, %v5292_v53  ;;  %v2039_v11 = vpop.xlane.xlu0 %2038  ;;  %4044 = vrcp.f32 %v5309_v0  ;;  %v5314_v59 = vpop.xlane.xlu2 %2110  ;;  %v2192_v21 = vsel %vm2191_vm10, %v4033_v10, %v2188_v46  ;;  %vm2220_vm12 = vweird.f32 %v4039_v62 }
 0x561   : > { %v2057_v33 = vsub.f32 %v5261_v63, %v2039_v11  ;;  %4046 = vrcp.f32 %v5314_v59  ;;  %v2197_v9 = vsel %vm2194_vm11, %v2196_v36, %v2192_v21  ;;  %vm2221_vm14 = vmor %vm2219_vm13, %vm2220_vm12  ;;  %v2238_v41 = vand.u32 2147483647, %v5314_v59 }
 0x562   : > { %v5319_v19 = vpop.eup %4040  ;;  %v2216_v2 = vsub.f32 1.0, %v2215_v16  ;;  %v2198_v63 = vmul.f32 %v5236_v8, %v2197_v9  ;;  %v2240_v27 = vand.u32 2147483648, %v5314_v59  ;;  %vm2234_vm3 = vweird.f32 %v5314_v59 }
 0x563   : > { %v5321_v15 = vpop.eup %4042  ;;  %v2087_v14 = vmul.f32 1.442695, %v2057_v33  ;;  %v2127_v23 = vsel %vm1994_vm1, %v5319_v19, 0.0  ;;  %vm2239_vm5 = vcmp.eq.f32.partialorder %v2238_v41, 8.507059e+37  ;;  %vm2249_vm7 = vweird.f32 %v5309_v0 }
 0x564   : > { %v2217_v47 = vmul.f32 %v4039_v62, %v2216_v2  ;;  %v2130_v7 = vsel %vm1994_vm1, %v5321_v15, 0.0  ;;  %2128 = vadd.xlane.f32.xlu2 %v2127_v23  ;;  %3742 = vmatmul.msk.f32.gmra.mxu1 %vm1994_vm1, %v2198_v63  ;;  %v2241_v16 = vor.u32 1.1754944e-38, %v2240_v27  ;;  %v2253_v42 = vand.u32 2147483647, %v5309_v0  ;;  %v4073_v23 = vld [vmem:[%s4696_s2 + $0x8] sm:$0xff] }
 0x565   : > { %4048 = vpow2.f32 %v2087_v14  ;;  %2131 = vadd.xlane.f32.xlu0 %v2130_v7 }
 0x566   : > { %v5334_v10 = vpop.eup %4044  ;;  %v2218_v56 = vadd.f32 %v4039_v62, %v2217_v47  ;;  %vm2254_vm10 = vcmp.eq.f32.partialorder %v2253_v42, 8.507059e+37 }
 0x567   : > { %v4047_v18 = vpop.eup %4046  ;;  %v2245_v8 = vmul.f32 %v5334_v10, %v5309_v0  ;;  %v5342_v51 = vpop.xlane.xlu1 %2119  ;;  %vm2250_vm6 = vweird.f32 %v5334_v10 }
 0x568   : > { %v2230_v29 = vmul.f32 %v4047_v18, %v5314_v59  ;;  %4050 = vrcp.f32 %v5342_v51  ;;  %v5348_v37 = vpop.xlane.xlu2 %2116  ;;  %v2222_v5 = vsel %vm2221_vm14, %v4039_v62, %v2218_v56  ;;  %vm2235_vm2 = vweird.f32 %v4047_v18  ;;  %vm5378_vm8 = vmor %vm2249_vm7, %vm2250_vm6 }
 0x569   : > { %v2246_v61 = vsub.f32 1.0, %v2245_v8  ;;  %4052 = vrcp.f32 %v5348_v37  ;;  %v2227_v24 = vsel %vm2224_vm15, %v2226_v57, %v2222_v5  ;;  %vm2236_vm4 = vmor %vm2234_vm3, %vm2235_vm2  ;;  %v2255_v59 = vand.u32 2147483648, %v5309_v0 }
 0x56a   : > { %v2231_v58 = vsub.f32 1.0, %v2230_v29  ;;  %v2228_v60 = vmul.f32 %v5245_v25, %v2227_v24  ;;  %v2268_v7 = vand.u32 2147483647, %v5348_v37  ;;  %v2270_v56 = vand.u32 2147483648, %v5348_v37 }
 0x56b   : > { %v5355_v53 = vpop.eup %4048  ;;  %v2247_v17 = vmul.f32 %v5334_v10, %v2246_v61  ;;  %vm2264_vm11 = vweird.f32 %v5348_v37  ;;  %vm2279_vm15 = vweird.f32 %v5342_v51  ;;  %v2283_v41 = vand.u32 2147483647, %v5342_v51 }
 0x56c   : > { %v2232_v48 = vmul.f32 %v4047_v18, %v2231_v58  ;;  %v2133_v54 = vsel %vm1994_vm1, %v5355_v53, 0.0  ;;  %3744 = vmatmul.msk.f32.gmra.mxu2 %vm1994_vm1, %v2228_v60  ;;  %v2271_v29 = vor.u32 1.1754944e-38, %v2270_v56  ;;  %vm2269_vm13 = vcmp.eq.f32.partialorder %v2268_v7, 8.507059e+37  ;;  %v4072_v60 = vld [vmem:[%s4696_s2] sm:$0xff] }
 0x56d   : > { %2134 = vadd.xlane.f32.xlu1 %v2133_v54  ;;  %v2248_v25 = vadd.f32 %v5334_v10, %v2247_v17  ;;  %vm2284_vm3 = vcmp.eq.f32.partialorder %v2283_v41, 8.507059e+37 }
 0x56e   : > { %v5364_v46 = vpop.eup %4050  ;;  %v2233_v62 = vadd.f32 %v4047_v18, %v2232_v48 }
 0x56f   : > { %v4053_v6 = vpop.eup %4052  ;;  %v2275_v11 = vmul.f32 %v5364_v46, %v5342_v51  ;;  %vm2280_vm14 = vweird.f32 %v5364_v46 }
 0x570   : > { %v2237_v33 = vsel %vm2236_vm4, %v4047_v18, %v2233_v62  ;;  %v2260_v36 = vmul.f32 %v4053_v6, %v5348_v37  ;;  %v2042_v2 = vpop.xlane.xlu2 %2041  ;;  %vm2265_vm9 = vweird.f32 %v4053_v6  ;;  %vm2281_vm2 = vmor %vm2279_vm15, %vm2280_vm14 }
 0x571   : > { %v2242_v14 = vsel %vm2239_vm5, %v2241_v16, %v2237_v33  ;;  %v2276_v21 = vsub.f32 1.0, %v2275_v11  ;;  %v2058_v47 = vsub.f32 %v5277_v35, %v2042_v2  ;;  %v2252_v35 = vsel %vm5378_vm8, %v5334_v10, %v2248_v25  ;;  %vm2266_vm12 = vmor %vm2264_vm11, %vm2265_vm9 }
 0x572   : > { %v2261_v9 = vsub.f32 1.0, %v2260_v36  ;;  %v2243_v63 = vmul.f32 %v5259_v52, %v2242_v14  ;;  %v2256_v52 = vor.u32 1.1754944e-38, %v2255_v59  ;;  %v2285_v10 = vand.u32 2147483648, %v5342_v51  ;;  %v2611_v51 = vld [vmem:[#allocation7] sm:$0xff] }
 0x573   : > { %v2089_v32 = vmul.f32 1.442695, %v2058_v47  ;;  %v2277_v18 = vmul.f32 %v5364_v46, %v2276_v21 }
 0x574   : > { %v2262_v8 = vmul.f32 %v4053_v6, %v2261_v9  ;;  %3745 = vmatmul.msk.f32.vlgmr.msra.gmra.mxu3 %vm1994_vm1, %v2243_v63  ;;  %v2257_v57 = vsel %vm2254_vm10, %v2256_v52, %v2252_v35  ;;  %v2286_v24 = vor.u32 1.1754944e-38, %v2285_v10 }
 0x575   : > { %4054 = vpow2.f32 %v2089_v32  ;;  %2942 = vmatpush.msra.mxu3 %v5324_v3  ;;  %v2278_v58 = vadd.f32 %v5364_v46, %v2277_v18  ;;  %v2258_v3 = vmul.f32 %v5257_v20, %v2257_v57 }
 0x576   : > { %v2263_v0 = vadd.f32 %v4053_v6, %v2262_v8 }
 0x577   : > { %2943 = vmatpush.msra.mxu3 %v5326_v1  ;;  %v2282_v27 = vsel %vm2281_vm2, %v5364_v46, %v2278_v58 }
 0x578   : > { %v2267_v61 = vsel %vm2266_vm12, %v4053_v6, %v2263_v0  ;;  %v2287_v20 = vsel %vm2284_vm3, %v2286_v24, %v2282_v27 }
 0x579   : > { %v2272_v5 = vsel %vm2269_vm13, %v2271_v29, %v2267_v61  ;;  %2944 = vmatpush.msra.mxu3 %v5337_v44 }
 0x57a   : > { %v2273_v37 = vmul.f32 %v5271_v22, %v2272_v5  ;;  %v2288_v22 = vmul.f32 %v5269_v12, %v2287_v20 }
 0x57b   : > { %v5400_v1 = vpop.eup %4054  ;;  %2945 = vmatpush.msra.mxu3 %v5350_v38 }
 0x57c   : > { %3746 = vmatmul.msk.f32.gmra.mxu3 %vm1994_vm1, %v2258_v3  ;;  %3747 = vmatmul.msk.f32.vlgmr.msrb.gmra.mxu0 %vm1994_vm1, %v2273_v37  ;;  %v2136_v44 = vsel %vm1994_vm1, %v5400_v1, 0.0  ;;  %v4074_v3 = vld [vmem:[%s4696_s2 + $0x10] sm:$0xff] }
 0x57d   : > { %2137 = vadd.xlane.f32.xlu2 %v2136_v44 }
 0x584   : > { %3748 = vmatmul.msk.f32.gmra.mxu0 %vm1994_vm1, %v2288_v22 }
 0x58c   : > { %3755 = vmatmul.msk.f32.vlgmr.msra.gmra.mxu0 %vm788_vm0, %v5175_v31  ;;  %v2614_v31 = vld [vmem:[#allocation7 + $0x18] sm:$0xff] }
 0x58d   : > { %3007 = vmatpush.msrb.mxu0 %v2614_v31  ;;  %2696 = vmatpush.msrb.mxu1 %v2614_v31 }
 0x594   : > { %3756 = vmatmul.msk.f32.gmra.mxu0 %vm788_vm0, %v5179_v43 }
 0x59c   : > { %3757 = vmatmul.msk.f32.gmra.mxu0 %vm788_vm0, %v5177_v39 }
 0x5a4   : > { %3758 = vmatmul.msk.f32.gmra.mxu0 %vm788_vm0, %v5183_v50  ;;  %v2613_v50 = vld [vmem:[#allocation7 + $0x10] sm:$0xff] }
 0x5a5   : > { %3008 = vmatpush.msrb.mxu0 %v2613_v50  ;;  %2697 = vmatpush.msrb.mxu1 %v2613_v50 }
 0x5ac   : > { %3759 = vmatmul.msk.f32.gmra.mxu0 %vm788_vm0, %v5181_v45  ;;  %v2612_v45 = vld [vmem:[#allocation7 + $0x8] sm:$0xff] }
 0x5ad   : > { %2698 = vmatpush.msrb.mxu1 %v2612_v45  ;;  %3009 = vmatpush.msrb.mxu0 %v2612_v45 }
 0x5af   : > { %2699 = vmatpush.msrb.mxu1 %v2611_v51  ;;  %3010 = vmatpush.msrb.mxu0 %v2611_v51 }
 0x5b4   : > { %3760 = vmatmul.msk.f32.gmra.mxu0 %vm788_vm0, %v5187_v4 }
 0x5bc   : > { %3761 = vmatmul.msk.f32.gmra.mxu0 %vm788_vm0, %v5185_v49 }
 0x5c4   : > { %3762 = vmatmul.msk.f32.gmra.mxu0 %vm788_vm0, %v5190_v26 }
 0x5cc   : > { %3795 = vmatmul.msk.f32.vlgmr.msrb.gmra.mxu0 %vm788_vm0, %v4072_v60 }
 0x5cf   : > { %v2123_v43 = vpop.xlane.xlu0 %2122 }
 0x5d0   : > { %4056 = vrcp.f32 %v2123_v43  ;;  %v2126_v39 = vpop.xlane.xlu1 %2125  ;;  %v2300_v54 = vand.u32 2147483648, %v2123_v43  ;;  %v2298_v6 = vand.u32 2147483647, %v2123_v43  ;;  %vm2294_vm5 = vweird.f32 %v2123_v43 }
 0x5d1   : > { %4058 = vrcp.f32 %v2126_v39  ;;  %v2315_v14 = vand.u32 2147483648, %v2126_v39  ;;  %vm2309_vm9 = vweird.f32 %v2126_v39  ;;  %v2313_v63 = vand.u32 2147483647, %v2126_v39 }
 0x5d2   : > { %v2301_v25 = vor.u32 1.1754944e-38, %v2300_v54  ;;  %vm2299_vm7 = vcmp.eq.f32.partialorder %v2298_v6, 8.507059e+37 }
 0x5d3   : > { %v2316_v18 = vor.u32 1.1754944e-38, %v2315_v14  ;;  %vm2314_vm11 = vcmp.eq.f32.partialorder %v2313_v63, 8.507059e+37  ;;  %v4080_v14 = vld [vmem:[%s4689_s25 + $0x18] sm:$0xff] }
 0x5d4   : > { %3796 = vmatmul.msk.f32.gmra.mxu0 %vm788_vm0, %v4073_v23  ;;  %v4083_v23 = vld [vmem:[%s4696_s2 + $0x48] sm:$0xff] }
 0x5d6   : > { %v4057_v12 = vpop.eup %4056 }
 0x5d7   : > { %v4059_v4 = vpop.eup %4058  ;;  %v2290_v49 = vmul.f32 %v4057_v12, %v2123_v43  ;;  %v2129_v48 = vpop.xlane.xlu2 %2128  ;;  %vm2295_vm4 = vweird.f32 %v4057_v12 }
 0x5d8   : > { %v2305_v38 = vmul.f32 %v4059_v4, %v2126_v39  ;;  %v5426_v17 = vpop.xlane.xlu0 %2131  ;;  %vm2296_vm6 = vmor %vm2294_vm5, %vm2295_vm4  ;;  %vm2310_vm8 = vweird.f32 %v4059_v4  ;;  %v2328_v35 = vand.u32 2147483647, %v2129_v48  ;;  %v2330_v52 = vand.u32 2147483648, %v2129_v48 }
 0x5d9   : > { %v2291_v26 = vsub.f32 1.0, %v2290_v49  ;;  %4060 = vrcp.f32 %v5426_v17  ;;  %vm2311_vm10 = vmor %vm2309_vm9, %vm2310_vm8  ;;  %vm2324_vm13 = vweird.f32 %v2129_v48  ;;  %v2345_v44 = vand.u32 2147483648, %v5426_v17 }
 0x5da   : > { %v2306_v46 = vsub.f32 1.0, %v2305_v38  ;;  %4062 = vrcp.f32 %v2129_v48  ;;  %v2331_v58 = vor.u32 1.1754944e-38, %v2330_v52  ;;  %vm2329_vm2 = vcmp.eq.f32.partialorder %v2328_v35, 8.507059e+37  ;;  %v4075_v38 = vld [vmem:[%s4696_s2 + $0x18] sm:$0xff] }
 0x5db   : > { %v2292_v62 = vmul.f32 %v4057_v12, %v2291_v26  ;;  %vm2339_vm3 = vweird.f32 %v5426_v17  ;;  %v2343_v20 = vand.u32 2147483647, %v5426_v17  ;;  %v2346_v45 = vor.u32 1.1754944e-38, %v2345_v44  ;;  %v2746_v44 = vld [vmem:[#allocation10 + $0x8] sm:$0xff] }
 0x5dc   : > { %v2307_v16 = vmul.f32 %v4059_v4, %v2306_v46  ;;  %3797 = vmatmul.msk.f32.gmra.mxu0 %vm788_vm0, %v4074_v3  ;;  %v4076_v46 = vld [vmem:[%s4696_s2 + $0x20] sm:$0xff]  ;;  %v4090_v3 = vld [vmem:[%s4696_s2 + $0x70] sm:$0xff] }
 0x5dd   : > { %v2293_v11 = vadd.f32 %v4057_v12, %v2292_v62 }
 0x5de   : > { %v2308_v36 = vadd.f32 %v4059_v4, %v2307_v16 }
 0x5df   : > { %v2297_v33 = vsel %vm2296_vm6, %v4057_v12, %v2293_v11  ;;  %v5431_v2 = vpop.eup %4060 }
 0x5e0   : > { %v2302_v59 = vsel %vm2299_vm7, %v2301_v25, %v2297_v33  ;;  %v4063_v21 = vpop.eup %4062  ;;  %v2335_v47 = vmul.f32 %v5431_v2, %v5426_v17  ;;  %v2135_v42 = vpop.xlane.xlu1 %2134  ;;  %v2312_v32 = vsel %vm2311_vm10, %v4059_v4, %v2308_v36  ;;  %vm2340_vm15 = vweird.f32 %v5431_v2  ;;  %v4077_v33 = vld [vmem:[%s4696_s2 + $0x28] sm:$0xff] }
 0x5e1   : > { %v2303_v9 = vmul.f32 %v5296_v55, %v2302_v59  ;;  %v2320_v7 = vmul.f32 %v4063_v21, %v2129_v48  ;;  %4064 = vrcp.f32 %v2135_v42  ;;  %vm2325_vm12 = vweird.f32 %v4063_v21  ;;  %vm5450_vm4 = vmor %vm2339_vm3, %vm2340_vm15  ;;  %v4079_v59 = vld [vmem:[%s4696_s2 + $0x30] sm:$0xff] }
 0x5e2   : > { %v2336_v56 = vsub.f32 1.0, %v2335_v47  ;;  %v2317_v29 = vsel %vm2314_vm11, %v2316_v18, %v2312_v32  ;;  %vm2326_vm14 = vmor %vm2324_vm13, %vm2325_vm12  ;;  %v2360_v22 = vand.u32 2147483648, %v2135_v42  ;;  %v2358_v39 = vand.u32 2147483647, %v2135_v42  ;;  %v4081_v47 = vld [vmem:[%s4696_s2 + $0x38] sm:$0xff]  ;;  %v4085_v32 = vld [vmem:[%s4696_s2 + $0x50] sm:$0xff]  ;;  %v2460_v18 = vpop.f32.mrf.mxu2 }
 0x5e3   : > { %3749 = vmatmul.msk.f32.vlgmr.msra.gmra.mxu1 %vm1994_vm1, %v2303_v9  ;;  %v2321_v8 = vsub.f32 1.0, %v2320_v7  ;;  %v2318_v5 = vmul.f32 %v5299_v13, %v2317_v29  ;;  %vm2354_vm6 = vweird.f32 %v2135_v42  ;;  %vm2344_vm7 = vcmp.eq.f32.partialorder %v2343_v20, 8.507059e+37  ;;  %v4082_v9 = vld [vmem:[%s4696_s2 + $0x40] sm:$0xff]  ;;  %v4084_v7 = vld [vmem:[%s4689_s25 + $0x30] sm:$0xff] }
 0x5e4   : > { %v2337_v0 = vmul.f32 %v5431_v2, %v2336_v56  ;;  %vm2359_vm9 = vcmp.eq.f32.partialorder %v2358_v39, 8.507059e+37  ;;  %3798 = vmatmul.msk.f32.gmra.mxu0 %vm788_vm0, %v4075_v38  ;;  %v4088_v29 = vld [vmem:[%s4696_s2 + $0x60] sm:$0xff]  ;;  %vm3313_vm15 = vcmask 1043459   ;;  %vm3317_vm3 = vcmask 1045509  }
 0x5e5   : > { %v2322_v55 = vmul.f32 %v4063_v21, %v2321_v8  ;;  %v4087_v8 = vld [vmem:[%s4696_s2 + $0x58] sm:$0xff] }
 0x5e6   : > { %v2338_v37 = vadd.f32 %v5431_v2, %v2337_v0  ;;  %v2748_v0 = vld [vmem:[#allocation10 + $0x18] sm:$0xff] }
 0x5e7   : > { %v4065_v57 = vpop.eup %4064  ;;  %v2323_v61 = vadd.f32 %v4063_v21, %v2322_v55  ;;  %3152 = vmatpush.msra.mxu1 %v2748_v0  ;;  %2789 = vmatpush.msra.mxu2 %v2748_v0 }
 0x5e8   : > { %v2350_v10 = vmul.f32 %v4065_v57, %v2135_v42  ;;  %vm2355_vm5 = vweird.f32 %v4065_v57  ;;  %v2342_v50 = vsel %vm5450_vm4, %v5431_v2, %v2338_v37  ;;  %v2402_v2 = vpop.f32.mrf.mxu0  ;;  %v2431_v42 = vpop.f32.mrf.mxu1  ;;  %vm3319_vm4 = vcmask 1046534  }
 0x5e9   : > { %v2327_v41 = vsel %vm2326_vm14, %v4063_v21, %v2323_v61  ;;  %vm2356_vm8 = vmor %vm2354_vm6, %vm2355_vm5  ;;  %v2347_v51 = vsel %vm2344_vm7, %v2346_v45, %v2342_v50  ;;  %v4089_v61 = vld [vmem:[%s4696_s2 + $0x68] sm:$0xff]  ;;  %vm3311_vm14 = vcmask 1042434   ;;  %vm3321_vm5 = vcmask 1047559  }
 0x5ea   : > { %v2332_v27 = vsel %vm2329_vm2, %v2331_v58, %v2327_v41  ;;  %v2351_v24 = vsub.f32 1.0, %v2350_v10  ;;  %v2348_v48 = vmul.f32 %v5321_v15, %v2347_v51  ;;  %v4091_v41 = vld [vmem:[%s4696_s2 + $0x78] sm:$0xff]  ;;  %vm3315_vm2 = vcmask 1044484  }
 0x5eb   : > { %3750 = vmatmul.msk.f32.gmra.mxu1 %vm1994_vm1, %v2318_v5  ;;  %v2333_v13 = vmul.f32 %v5319_v19, %v2332_v27  ;;  %v2361_v19 = vor.u32 1.1754944e-38, %v2360_v22  ;;  %v2747_v5 = vld [vmem:[#allocation10 + $0x10] sm:$0xff]  ;;  %v2745_v27 = vld [vmem:[#allocation10] sm:$0xff]  ;;  %vm3451_vm6 = vcmask 39936  }
 0x5ec   : > { %v2352_v43 = vmul.f32 %v4065_v57, %v2351_v24  ;;  %3799 = vmatmul.msk.f32.gmra.mxu0 %vm788_vm0, %v4076_v46  ;;  %3153 = vmatpush.msra.mxu1 %v2747_v5 }
 0x5ed   : > { %3751 = vmatmul.msk.f32.vlgmr.msrb.gmra.mxu2 %vm1994_vm1, %v2333_v13 }
 0x5ee   : > { %v2353_v12 = vadd.f32 %v4065_v57, %v2352_v43  ;;  %2790 = vmatpush.msra.mxu2 %v2747_v5  ;;  %3154 = vmatpush.msra.mxu1 %v2746_v44  ;;  %v5523_v43 = vld [vmem:[%s5699_s8] ss:$0 sm:$0xff] }
 0x5ef   : > { %v2463_v35 = vpop.f32.mrf.mxu2 }
 0x5f0   : > { %v2138_v4 = vpop.xlane.xlu2 %2137  ;;  %v2357_v49 = vsel %vm2356_vm8, %v4065_v57, %v2353_v12  ;;  %v2405_v21 = vpop.f32.mrf.mxu0  ;;  %2791 = vmatpush.msra.mxu2 %v2746_v44  ;;  %3155 = vmatpush.msra.mxu1 %v2745_v27 }
 0x5f1   : > { %4066 = vrcp.f32 %v2138_v4  ;;  %v2362_v26 = vsel %vm2359_vm9, %v2361_v19, %v2357_v49  ;;  %v2375_v6 = vand.u32 2147483648, %v2138_v4  ;;  %vm2369_vm11 = vweird.f32 %v2138_v4 }
 0x5f2   : > { %v2363_v17 = vmul.f32 %v5355_v53, %v2362_v26  ;;  %2792 = vmatpush.msra.mxu2 %v2745_v27 }
 0x5f3   : > { %3763 = vmatmul.msk.f32.vlgmr.msrb.gmra.mxu1 %vm788_vm0, %v5134_v40  ;;  %v2373_v40 = vand.u32 2147483647, %v2138_v4  ;;  %v2376_v16 = vor.u32 1.1754944e-38, %v2375_v6 }
 0x5f4   : > { %3753 = vmatmul.msk.f32.vlgmr.msrb.gmra.mxu3 %vm1994_vm1, %v2363_v17  ;;  %3800 = vmatmul.msk.f32.gmra.mxu0 %vm788_vm0, %v4077_v33 }
 0x5f5   : > { %3752 = vmatmul.msk.f32.gmra.mxu2 %vm1994_vm1, %v2348_v48  ;;  %vm2374_vm13 = vcmp.eq.f32.partialorder %v2373_v40, 8.507059e+37 }
 0x5f7   : > { %v4067_v60 = vpop.eup %4066  ;;  %v2489_v55 = vpop.f32.mrf.mxu3 }
 0x5f8   : > { %v2365_v54 = vmul.f32 %v4067_v60, %v2138_v4  ;;  %vm2370_vm10 = vweird.f32 %v4067_v60 }
 0x5f9   : > { %vm2371_vm12 = vmor %vm2369_vm11, %vm2370_vm10 }
 0x5fa   : > { %v2366_v62 = vsub.f32 1.0, %v2365_v54 }
 0x5fb   : > { %3764 = vmatmul.msk.f32.gmra.mxu1 %vm788_vm0, %v5152_v30  ;;  %v4078_v30 = vld [vmem:[%s4689_s25 + $0x10] sm:$0xff] }
 0x5fc   : > { %v2367_v53 = vmul.f32 %v4067_v60, %v2366_v62  ;;  %3801 = vmatmul.msk.f32.gmra.mxu0 %vm788_vm0, %v4079_v59 }
 0x5fe   : > { %v2368_v15 = vadd.f32 %v4067_v60, %v2367_v53 }
 0x5ff   : > { %v2492_v58 = vpop.f32.mrf.mxu3 }
 0x600   : > { %v2372_v11 = vsel %vm2371_vm12, %v4067_v60, %v2368_v15 }
 0x601   : > { %v2377_v25 = vsel %vm2374_vm13, %v2376_v16, %v2372_v11 }
 0x602   : > { %v2378_v36 = vmul.f32 %v5400_v1, %v2377_v25  ;;  %v2518_v1 = vpop.f32.mrf.mxu0 }
 0x603   : > { %3765 = vmatmul.msk.f32.gmra.mxu1 %vm788_vm0, %v4078_v30 }
 0x604   : > { %3754 = vmatmul.msk.f32.gmra.mxu3 %vm1994_vm1, %v2378_v36  ;;  %3802 = vmatmul.msk.f32.gmra.mxu0 %vm788_vm0, %v4081_v47  ;;  %vm3309_vm1 = vcmask 1041409  }
 0x60a   : > { %v2521_v63 = vpop.f32.mrf.mxu0 }
 0x60b   : > { %3766 = vmatmul.msk.f32.gmra.mxu1 %vm788_vm0, %v4080_v14 }
 0x60c   : > { %3779 = vmatmul.msk.f32.vlgmr.msra.gmra.mxu3 %vm788_vm0, %v2402_v2  ;;  %3803 = vmatmul.msk.f32.gmra.mxu0 %vm788_vm0, %v4082_v9 }
 0x612   : > { %v2660_v56 = vpop.f32.mrf.mxu0 }
 0x613   : > { %3767 = vmatmul.msk.f32.gmra.mxu1 %vm788_vm0, %v5156_v34  ;;  %v2434_v34 = vpop.f32.mrf.mxu1 }
 0x614   : > { %3780 = vmatmul.msk.f32.gmra.mxu3 %vm788_vm0, %v2405_v21  ;;  %3804 = vmatmul.msk.f32.gmra.mxu0 %vm788_vm0, %v4083_v23 }
 0x61a   : > { %v2663_v52 = vpop.f32.mrf.mxu0 }
 0x61b   : > { %3768 = vmatmul.msk.f32.gmra.mxu1 %vm788_vm0, %v5169_v28  ;;  %v4086_v28 = vld [vmem:[%s4689_s25 + $0x38] sm:$0xff]  ;;  %s5758_s25 = sld [smem:[#allocation37_spill]] }
 0x61c   : > { %3781 = vmatmul.msk.f32.gmra.mxu3 %vm788_vm0, %v2431_v42  ;;  %3805 = vmatmul.msk.f32.gmra.mxu0 %vm788_vm0, %v4085_v32 }
 0x621   : > { %s755_s23 = scalar_lea.vmem %s5758_s25, %s3634_s18 }
 0x622   : > { %v2666_v57 = vpop.f32.mrf.mxu0 }
 0x623   : > { %3769 = vmatmul.msk.f32.gmra.mxu1 %vm788_vm0, %v4084_v7 }
 0x624   : > { %3782 = vmatmul.msk.f32.gmra.mxu3 %vm788_vm0, %v2434_v34  ;;  %3806 = vmatmul.msk.f32.gmra.mxu0 %vm788_vm0, %v4087_v8 }
 0x62a   : > { %v2669_v10 = vpop.f32.mrf.mxu0 }
 0x62b   : > { %3770 = vmatmul.msk.f32.gmra.mxu1 %vm788_vm0, %v4086_v28 }
 0x62c   : > { %3783 = vmatmul.msk.f32.gmra.mxu3 %vm788_vm0, %v2460_v18  ;;  %3807 = vmatmul.msk.f32.gmra.mxu0 %vm788_vm0, %v4088_v29 }
 0x632   : > { %v2672_v37 = vpop.f32.mrf.mxu0 }
 0x634   : > { %3784 = vmatmul.msk.f32.gmra.mxu3 %vm788_vm0, %v2463_v35  ;;  %3808 = vmatmul.msk.f32.gmra.mxu0 %vm788_vm0, %v4089_v61 }
 0x63a   : > { %v2675_v24 = vpop.f32.mrf.mxu0 }
 0x63c   : > { %3785 = vmatmul.msk.f32.gmra.mxu3 %vm788_vm0, %v2489_v55  ;;  %3809 = vmatmul.msk.f32.gmra.mxu0 %vm788_vm0, %v4090_v3 }
 0x642   : > { %v2678_v13 = vpop.f32.mrf.mxu0 }
 0x644   : > { %3786 = vmatmul.msk.f32.gmra.mxu3 %vm788_vm0, %v2492_v58  ;;  %3810 = vmatmul.msk.f32.gmra.mxu0 %vm788_vm0, %v4091_v41 }
 0x64a   : > { %v5518_v31 = vpop.f32.mrf.mxu0 }
 0x64c   : > { %3787 = vmatmul.msk.f32.gmra.mxu3 %vm788_vm0, %v2518_v1 }
 0x652   : > { %v3012_v4 = vpop.f32.mrf.mxu0 }
 0x654   : > { %3788 = vmatmul.msk.f32.gmra.mxu3 %vm788_vm0, %v2521_v63 }
 0x65a   : > { %v3015_v46 = vpop.f32.mrf.mxu0 }
 0x660   : > { %v2547_v20 = vpop.f32.mrf.mxu1 }
 0x661   : > { %3789 = vmatmul.msk.f32.gmra.mxu3 %vm788_vm0, %v2547_v20 }
 0x662   : > { %v3018_v11 = vpop.f32.mrf.mxu0 }
 0x668   : > { %v2550_v22 = vpop.f32.mrf.mxu1 }
 0x669   : > { %3790 = vmatmul.msk.f32.gmra.mxu3 %vm788_vm0, %v2550_v22 }
 0x66a   : > { %v3021_v1 = vpop.f32.mrf.mxu0 }
 0x670   : > { %v2701_v39 = vpop.f32.mrf.mxu1  ;;  %v2576_v50 = vpop.f32.mrf.mxu2 }
 0x671   : > { %v2702_v45 = vadd.f32 %v2701_v39, %v2660_v56  ;;  %3791 = vmatmul.msk.f32.gmra.mxu3 %vm788_vm0, %v2576_v50 }
 0x672   : > { %v3024_v28 = vpop.f32.mrf.mxu0 }
 0x673   : > { %v2729_v12 = vadd.f32 %v5523_v43, %v2702_v45 }
 0x675   : > { %v2737_v19 = vmax.f32 %v2729_v12, 0.0 }
 0x677   : > { %3771 = vmatmul.msk.f32.vlgmr.msra.gmra.mxu2 %vm788_vm0, %v2737_v19  ;;  %v2605_v48 = vpop.f32.mrf.mxu3 }
 0x678   : > { %v2704_v49 = vpop.f32.mrf.mxu1  ;;  %v2579_v51 = vpop.f32.mrf.mxu2 }
 0x679   : > { %v2705_v38 = vadd.f32 %v2704_v49, %v2663_v52  ;;  %3792 = vmatmul.msk.f32.gmra.mxu3 %vm788_vm0, %v2579_v51 }
 0x67a   : > { %v3027_v3 = vpop.f32.mrf.mxu0 }
 0x67b   : > { %v2730_v26 = vadd.f32 %v5523_v43, %v2705_v38 }
 0x67d   : > { %v2738_v17 = vmax.f32 %v2730_v26, 0.0 }
 0x67f   : > { %3772 = vmatmul.msk.f32.gmra.mxu2 %vm788_vm0, %v2738_v17 }
 0x680   : > { %v2707_v60 = vpop.f32.mrf.mxu1 }
 0x681   : > { %v2708_v54 = vadd.f32 %v2707_v60, %v2666_v57  ;;  %3793 = vmatmul.msk.f32.gmra.mxu3 %vm788_vm0, %v2605_v48 }
 0x682   : > { %v3030_v22 = vpop.f32.mrf.mxu0 }
 0x683   : > { %v2731_v62 = vadd.f32 %v5523_v43, %v2708_v54 }
 0x685   : > { %v2739_v6 = vmax.f32 %v2731_v62, 0.0 }
 0x687   : > { %v2608_v53 = vpop.f32.mrf.mxu3  ;;  %3773 = vmatmul.msk.f32.gmra.mxu2 %vm788_vm0, %v2739_v6 }
 0x688   : > { %v2710_v40 = vpop.f32.mrf.mxu1 }
 0x689   : > { %v2711_v15 = vadd.f32 %v2710_v40, %v2669_v10  ;;  %3794 = vmatmul.msk.f32.gmra.mxu3 %vm788_vm0, %v2608_v53 }
 0x68a   : > { %v3033_v19 = vpop.f32.mrf.mxu0 }
 0x68b   : > { %v2732_v16 = vadd.f32 %v5523_v43, %v2711_v15 }
 0x68d   : > { %v2740_v25 = vmax.f32 %v2732_v16, 0.0 }
 0x68f   : > { %v2947_v33 = vpop.f32.mrf.mxu3  ;;  %3774 = vmatmul.msk.f32.gmra.mxu2 %vm788_vm0, %v2740_v25 }
 0x690   : > { %v3013_v36 = vadd.f32 %v3012_v4, %v2947_v33  ;;  %v2713_v2 = vpop.f32.mrf.mxu1 }
 0x691   : > { %v2714_v30 = vadd.f32 %v2713_v2, %v2672_v37 }
 0x692   : > { %v3060_v59 = vadd.f32 %v5523_v43, %v3013_v36  ;;  %v3036_v17 = vpop.f32.mrf.mxu0 }
 0x693   : > { %v2733_v14 = vadd.f32 %v5523_v43, %v2714_v30 }
 0x694   : > { %v3076_v21 = vmax.f32 %v3060_v59, 0.0 }
 0x695   : > { %v2741_v47 = vmax.f32 %v2733_v14, 0.0 }
 0x696   : > { %3811 = vmatmul.msk.f32.vlgmr.msra.gmra.mxu1 %vm788_vm0, %v3076_v21 }
 0x697   : > { %v2950_v42 = vpop.f32.mrf.mxu3  ;;  %3775 = vmatmul.msk.f32.gmra.mxu2 %vm788_vm0, %v2741_v47 }
 0x698   : > { %v3016_v9 = vadd.f32 %v3015_v46, %v2950_v42  ;;  %v2716_v63 = vpop.f32.mrf.mxu1 }
 0x699   : > { %v2717_v23 = vadd.f32 %v2716_v63, %v2675_v24 }
 0x69a   : > { %v3061_v34 = vadd.f32 %v5523_v43, %v3016_v9  ;;  %v3039_v6 = vpop.f32.mrf.mxu0 }
 0x69b   : > { %v2734_v7 = vadd.f32 %v5523_v43, %v2717_v23 }
 0x69c   : > { %v3077_v56 = vmax.f32 %v3061_v34, 0.0 }
 0x69d   : > { %v2742_v32 = vmax.f32 %v2734_v7, 0.0 }
 0x69e   : > { %3812 = vmatmul.msk.f32.gmra.mxu1 %vm788_vm0, %v3077_v56 }
 0x69f   : > { %v2953_v18 = vpop.f32.mrf.mxu3  ;;  %3776 = vmatmul.msk.f32.gmra.mxu2 %vm788_vm0, %v2742_v32 }
 0x6a0   : > { %v3019_v8 = vadd.f32 %v3018_v11, %v2953_v18  ;;  %v2719_v35 = vpop.f32.mrf.mxu1 }
 0x6a1   : > { %v2720_v52 = vadd.f32 %v2719_v35, %v2678_v13 }
 0x6a2   : > { %v3062_v0 = vadd.f32 %v5523_v43, %v3019_v8  ;;  %v3042_v11 = vpop.f32.mrf.mxu0 }
 0x6a3   : > { %v2735_v55 = vadd.f32 %v5523_v43, %v2720_v52 }
 0x6a4   : > { %v3078_v29 = vmax.f32 %v3062_v0, 0.0 }
 0x6a5   : > { %v2743_v57 = vmax.f32 %v2735_v55, 0.0 }
 0x6a6   : > { %3813 = vmatmul.msk.f32.gmra.mxu1 %vm788_vm0, %v3078_v29 }
 0x6a7   : > { %v2956_v61 = vpop.f32.mrf.mxu3  ;;  %3777 = vmatmul.msk.f32.gmra.mxu2 %vm788_vm0, %v2743_v57 }
 0x6a8   : > { %v3022_v58 = vadd.f32 %v3021_v1, %v2956_v61  ;;  %v2722_v10 = vpop.f32.mrf.mxu1 }
 0x6a9   : > { %v2723_v5 = vadd.f32 %v2722_v10, %v5518_v31 }
 0x6aa   : > { %v3063_v37 = vadd.f32 %v5523_v43, %v3022_v58  ;;  %v3045_v36 = vpop.f32.mrf.mxu0 }
 0x6ab   : > { %v2736_v41 = vadd.f32 %v5523_v43, %v2723_v5 }
 0x6ac   : > { %v3079_v44 = vmax.f32 %v3063_v37, 0.0  ;;  %v5581_v37 = vld [vmem:[%s5701_s10] ss:$0 sm:$0xff] }
 0x6ad   : > { %v2744_v27 = vmax.f32 %v2736_v41, 0.0 }
 0x6ae   : > { %3814 = vmatmul.msk.f32.gmra.mxu1 %vm788_vm0, %v3079_v44 }
 0x6af   : > { %v2959_v24 = vpop.f32.mrf.mxu3  ;;  %3778 = vmatmul.msk.f32.gmra.mxu2 %vm788_vm0, %v2744_v27 }
 0x6b0   : > { %v3025_v20 = vadd.f32 %v3024_v28, %v2959_v24 }
 0x6b2   : > { %v3064_v13 = vadd.f32 %v5523_v43, %v3025_v20  ;;  %v3048_v1 = vpop.f32.mrf.mxu0 }
 0x6b4   : > { %v3080_v39 = vmax.f32 %v3064_v13, 0.0 }
 0x6b6   : > { %3815 = vmatmul.msk.f32.gmra.mxu1 %vm788_vm0, %v3080_v39 }
 0x6b7   : > { %v2962_v31 = vpop.f32.mrf.mxu3 }
 0x6b8   : > { %v3028_v50 = vadd.f32 %v3027_v3, %v2962_v31 }
 0x6ba   : > { %v3065_v45 = vadd.f32 %v5523_v43, %v3028_v50  ;;  %v3051_v34 = vpop.f32.mrf.mxu0 }
 0x6bc   : > { %v3081_v12 = vmax.f32 %v3065_v45, 0.0 }
 0x6be   : > { %3816 = vmatmul.msk.f32.gmra.mxu1 %vm788_vm0, %v3081_v12 }
 0x6bf   : > { %v2965_v4 = vpop.f32.mrf.mxu3 }
 0x6c0   : > { %v3031_v49 = vadd.f32 %v3030_v22, %v2965_v4 }
 0x6c2   : > { %v3066_v51 = vadd.f32 %v5523_v43, %v3031_v49  ;;  %v3054_v8 = vpop.f32.mrf.mxu0 }
 0x6c4   : > { %v3082_v38 = vmax.f32 %v3066_v51, 0.0 }
 0x6c6   : > { %3817 = vmatmul.msk.f32.gmra.mxu1 %vm788_vm0, %v3082_v38 }
 0x6c7   : > { %v2968_v26 = vpop.f32.mrf.mxu3 }
 0x6c8   : > { %v3034_v48 = vadd.f32 %v3033_v19, %v2968_v26 }
 0x6ca   : > { %v3067_v60 = vadd.f32 %v5523_v43, %v3034_v48  ;;  %v3057_v57 = vpop.f32.mrf.mxu0 }
 0x6cc   : > { %v3083_v54 = vmax.f32 %v3067_v60, 0.0 }
 0x6ce   : > { %3818 = vmatmul.msk.f32.gmra.mxu1 %vm788_vm0, %v3083_v54 }
 0x6cf   : > { %v2971_v46 = vpop.f32.mrf.mxu3 }
 0x6d0   : > { %v3037_v62 = vadd.f32 %v3036_v17, %v2971_v46 }
 0x6d2   : > { %v3068_v53 = vadd.f32 %v5523_v43, %v3037_v62 }
 0x6d4   : > { %v3084_v40 = vmax.f32 %v3068_v53, 0.0 }
 0x6d6   : > { %3819 = vmatmul.msk.f32.gmra.mxu1 %vm788_vm0, %v3084_v40 }
 0x6d7   : > { %v2974_v15 = vpop.f32.mrf.mxu3 }
 0x6d8   : > { %v3040_v16 = vadd.f32 %v3039_v6, %v2974_v15 }
 0x6da   : > { %v3069_v25 = vadd.f32 %v5523_v43, %v3040_v16 }
 0x6dc   : > { %v3085_v33 = vmax.f32 %v3069_v25, 0.0 }
 0x6de   : > { %3820 = vmatmul.msk.f32.gmra.mxu1 %vm788_vm0, %v3085_v33 }
 0x6e4   : > { %v2977_v2 = vpop.f32.mrf.mxu3 }
 0x6e5   : > { %v3043_v30 = vadd.f32 %v3042_v11, %v2977_v2 }
 0x6e7   : > { %v3070_v59 = vadd.f32 %v5523_v43, %v3043_v30 }
 0x6e9   : > { %v3086_v14 = vmax.f32 %v3070_v59, 0.0 }
 0x6eb   : > { %3821 = vmatmul.msk.f32.gmra.mxu1 %vm788_vm0, %v3086_v14 }
 0x6ec   : > { %v2980_v21 = vpop.f32.mrf.mxu3 }
 0x6ed   : > { %v3046_v47 = vadd.f32 %v3045_v36, %v2980_v21 }
 0x6ef   : > { %v3071_v42 = vadd.f32 %v5523_v43, %v3046_v47 }
 0x6f1   : > { %v3087_v9 = vmax.f32 %v3071_v42, 0.0 }
 0x6f3   : > { %3822 = vmatmul.msk.f32.gmra.mxu1 %vm788_vm0, %v3087_v9 }
 0x6f4   : > { %v2983_v63 = vpop.f32.mrf.mxu3 }
 0x6f5   : > { %v3049_v23 = vadd.f32 %v3048_v1, %v2983_v63 }
 0x6f7   : > { %v3072_v7 = vadd.f32 %v5523_v43, %v3049_v23 }
 0x6f9   : > { %v3088_v56 = vmax.f32 %v3072_v7, 0.0 }
 0x6fa   : > { %v2794_v21 = vpop.f32.mrf.mxu2 }
 0x6fb   : > { %3823 = vmatmul.msk.f32.gmra.mxu1 %vm788_vm0, %v3088_v56 }
 0x6fc   : > { %v2986_v32 = vpop.f32.mrf.mxu3 }
 0x6fd   : > { %v3052_v18 = vadd.f32 %v3051_v34, %v2986_v32 }
 0x6ff   : > { %v3073_v28 = vadd.f32 %v5523_v43, %v3052_v18 }
 0x701   : > { %v3089_v35 = vmax.f32 %v3073_v28, 0.0 }
 0x702   : > { %v2797_v7 = vpop.f32.mrf.mxu2 }
 0x703   : > { %3824 = vmatmul.msk.f32.gmra.mxu1 %vm788_vm0, %v3089_v35 }
 0x704   : > { %v2989_v52 = vpop.f32.mrf.mxu3 }
 0x705   : > { %v3055_v0 = vadd.f32 %v3054_v8, %v2989_v52 }
 0x707   : > { %v3074_v55 = vadd.f32 %v5523_v43, %v3055_v0  ;;  %v3300_v0 = vld [vmem:[#allocation13 + $0x18] sm:$0xff] }
 0x708   : > { %3337 = vmatpush.msrb.mxu2 %v3300_v0 }
 0x709   : > { %v3090_v29 = vmax.f32 %v3074_v55, 0.0 }
 0x70b   : > { %3825 = vmatmul.msk.f32.gmra.mxu1 %vm788_vm0, %v3090_v29 }
 0x70c   : > { %v2992_v61 = vpop.f32.mrf.mxu3 }
 0x70d   : > { %v3058_v58 = vadd.f32 %v3057_v57, %v2992_v61 }
 0x70f   : > { %v3075_v10 = vadd.f32 %v5523_v43, %v3058_v58  ;;  %v2800_v58 = vpop.f32.mrf.mxu2 }
 0x711   : > { %v3091_v5 = vmax.f32 %v3075_v10, 0.0 }
 0x713   : > { %v3157_v3 = vpop.f32.mrf.mxu1  ;;  %3826 = vmatmul.msk.f32.gmra.mxu1 %vm788_vm0, %v3091_v5 }
 0x714   : > { %v3158_v41 = vadd.f32 %v5581_v37, %v3157_v3 }
 0x716   : > { %v3205_v27 = vmax.f32 %v3158_v41, 0.0 }
 0x718   : > { %v3221_v13 = vsel %vm788_vm0, %v3205_v27, 0.0 }
 0x71b   : > { %v3160_v44 = vpop.f32.mrf.mxu1 }
 0x71c   : > { %v3161_v24 = vadd.f32 %v5581_v37, %v3160_v44 }
 0x71e   : > { %v3206_v20 = vmax.f32 %v3161_v24, 0.0  ;;  %v2803_v24 = vpop.f32.mrf.mxu2 }
 0x720   : > { %v3222_v43 = vsel %vm788_vm0, %v3206_v20, 0.0 }
 0x721   : > { %v3223_v22 = vadd.f32 %v3222_v43, %v3221_v13  ;;  %v3299_v43 = vld [vmem:[#allocation13 + $0x10] sm:$0xff] }
 0x722   : > { %3338 = vmatpush.msrb.mxu2 %v3299_v43 }
 0x723   : > { %v3163_v39 = vpop.f32.mrf.mxu1  ;;  %v3224_v50 = vrot.slane %v3223_v22, 4 }
 0x724   : > { %v3164_v31 = vadd.f32 %v5581_v37, %v3163_v39 }
 0x725   : > { %v3225_v4 = vadd.f32 %v3224_v50, %v3223_v22 }
 0x726   : > { %v3207_v12 = vmax.f32 %v3164_v31, 0.0  ;;  %v2806_v39 = vpop.f32.mrf.mxu2 }
 0x727   : > { %v3226_v26 = vrot.slane %v3225_v4, 2 }
 0x728   : > { %v3230_v51 = vsel %vm788_vm0, %v3207_v12, 0.0 }
 0x729   : > { %v3227_v54 = vadd.f32 %v3226_v26, %v3225_v4 }
 0x72b   : > { %v3166_v45 = vpop.f32.mrf.mxu1  ;;  %v3228_v53 = vrot.slane %v3227_v54, 1 }
 0x72c   : > { %v3167_v19 = vadd.f32 %v5581_v37, %v3166_v45  ;;  %v3298_v45 = vld [vmem:[#allocation13 + $0x8] sm:$0xff] }
 0x72d   : > { %v3229_v33 = vadd.f32 %v3228_v53, %v3227_v54  ;;  %3339 = vmatpush.msrb.mxu2 %v3298_v45 }
 0x72e   : > { %v3208_v49 = vmax.f32 %v3167_v19, 0.0  ;;  %v2809_v50 = vpop.f32.mrf.mxu2 }
 0x730   : > { %v3231_v38 = vsel %vm788_vm0, %v3208_v49, 0.0 }
 0x731   : > { %v3232_v17 = vadd.f32 %v3231_v38, %v3230_v51 }
 0x733   : > { %v3233_v48 = vrot.slane %v3232_v17, 4  ;;  %v3169_v60 = vpop.f32.mrf.mxu1 }
 0x734   : > { %v3170_v6 = vadd.f32 %v5581_v37, %v3169_v60  ;;  %v2798_v60 = vadd.f32 %v5581_v37, %v2797_v7  ;;  %v2810_v7 = vadd.f32 %v5581_v37, %v2809_v50 }
 0x735   : > { %v3234_v46 = vadd.f32 %v3233_v48, %v3232_v17 }
 0x736   : > { %v3209_v11 = vmax.f32 %v3170_v6, 0.0  ;;  %v2812_v49 = vpop.f32.mrf.mxu2 }
 0x737   : > { %v3235_v62 = vrot.slane %v3234_v46, 2 }
 0x738   : > { %v3239_v59 = vsel %vm788_vm0, %v3209_v11, 0.0 }
 0x739   : > { %v3236_v40 = vadd.f32 %v3235_v62, %v3234_v46 }
 0x73b   : > { %v3237_v15 = vrot.slane %v3236_v40, 1  ;;  %v3172_v16 = vpop.f32.mrf.mxu1 }
 0x73c   : > { %v3173_v25 = vadd.f32 %v5581_v37, %v3172_v16  ;;  %v2795_v16 = vadd.f32 %v5581_v37, %v2794_v21  ;;  %v3295_v21 = vld [vmem:[#allocation12 + $0x10] sm:$0xff] }
 0x73d   : > { %v3238_v36 = vadd.f32 %v3237_v15, %v3236_v40  ;;  %v3297_v15 = vld [vmem:[#allocation13] sm:$0xff] }
 0x73e   : > { %v3210_v2 = vmax.f32 %v3173_v25, 0.0  ;;  %3340 = vmatpush.msrb.mxu2 %v3297_v15 }
 0x73f   : > { %v3310_v30 = vsel %vm3309_vm1, %v3238_v36, %v3229_v33  ;;  %v2819_v33 = vmax.f32 %v2798_v60, 0.0  ;;  %v2801_v36 = vadd.f32 %v5581_v37, %v2800_v58 }
 0x740   : > { %v3240_v14 = vsel %vm788_vm0, %v3210_v2, 0.0  ;;  %v2804_v2 = vadd.f32 %v5581_v37, %v2803_v24 }
 0x741   : > { %v3241_v47 = vadd.f32 %v3240_v14, %v3239_v59  ;;  %v2807_v59 = vadd.f32 %v5581_v37, %v2806_v39 }
 0x743   : > { %v3242_v1 = vrot.slane %v3241_v47, 4  ;;  %v3175_v42 = vpop.f32.mrf.mxu1  ;;  %v2822_v0 = vmax.f32 %v2807_v59, 0.0 }
 0x744   : > { %v3176_v23 = vadd.f32 %v5581_v37, %v3175_v42  ;;  %v3296_v42 = vld [vmem:[#allocation12 + $0x18] sm:$0xff] }
 0x745   : > { %v3243_v9 = vadd.f32 %v3242_v1, %v3241_v47  ;;  %3374 = vmatpush.msra.mxu2 %v3296_v42  ;;  %v2854_v24 = vsel %vm788_vm0, %v2822_v0, 0.0 }
 0x746   : > { %v3211_v18 = vmax.f32 %v3176_v23, 0.0 }
 0x747   : > { %v3244_v63 = vrot.slane %v3243_v9, 2  ;;  %3375 = vmatpush.msra.mxu2 %v3295_v21 }
 0x748   : > { %v3248_v55 = vsel %vm788_vm0, %v3211_v18, 0.0  ;;  %v2820_v18 = vmax.f32 %v2801_v36, 0.0 }
 0x749   : > { %v3245_v34 = vadd.f32 %v3244_v63, %v3243_v9  ;;  %v2815_v9 = vpop.f32.mrf.mxu2 }
 0x74b   : > { %v3246_v56 = vrot.slane %v3245_v34, 1  ;;  %v3178_v32 = vpop.f32.mrf.mxu1 }
 0x74c   : > { %v3179_v28 = vadd.f32 %v5581_v37, %v3178_v32  ;;  %v3294_v32 = vld [vmem:[#allocation12 + $0x8] sm:$0xff] }
 0x74d   : > { %v3247_v8 = vadd.f32 %v3246_v56, %v3245_v34  ;;  %v2818_v34 = vmax.f32 %v2795_v16, 0.0  ;;  %3376 = vmatpush.msra.mxu2 %v3294_v32 }
 0x74e   : > { %v3212_v35 = vmax.f32 %v3179_v28, 0.0  ;;  %v2821_v28 = vmax.f32 %v2804_v2, 0.0 }
 0x74f   : > { %v3312_v52 = vsel %vm3311_vm14, %v3247_v8, %v3310_v30  ;;  %v2813_v8 = vadd.f32 %v5581_v37, %v2812_v49  ;;  %v2826_v58 = vsel %vm788_vm0, %v2818_v34, 0.0  ;;  %v2855_v49 = vrot.slane %v2854_v24, 4 }
 0x750   : > { %v3249_v29 = vsel %vm788_vm0, %v3212_v35, 0.0  ;;  %v2827_v39 = vrot.slane %v2826_v58, 4 }
 0x751   : > { %v3250_v57 = vadd.f32 %v3249_v29, %v3248_v55  ;;  %v2816_v55 = vadd.f32 %v5581_v37, %v2815_v9 }
 0x753   : > { %v3251_v61 = vrot.slane %v3250_v57, 4  ;;  %v3181_v5 = vpop.f32.mrf.mxu1 }
 0x754   : > { %v3182_v51 = vadd.f32 %v5581_v37, %v3181_v5 }
 0x755   : > { %v3252_v10 = vadd.f32 %v3251_v61, %v3250_v57  ;;  %v3293_v57 = vld [vmem:[#allocation12] sm:$0xff] }
 0x756   : > { %v3213_v54 = vmax.f32 %v3182_v51, 0.0  ;;  %3377 = vmatpush.msra.mxu2 %v3293_v57 }
 0x757   : > { %v3253_v3 = vrot.slane %v3252_v10, 2 }
 0x758   : > { %v3257_v30 = vsel %vm788_vm0, %v3213_v54, 0.0  ;;  %v2828_v54 = vadd.f32 %v2827_v39, %v2826_v58 }
 0x759   : > { %v3254_v41 = vadd.f32 %v3253_v3, %v3252_v10  ;;  %v2823_v10 = vmax.f32 %v2810_v7, 0.0 }
 0x75b   : > { %v3255_v44 = vrot.slane %v3254_v41, 1  ;;  %v3184_v13 = vpop.f32.mrf.mxu1  ;;  %v2861_v45 = vsel %vm788_vm0, %v2823_v10, 0.0 }
 0x75c   : > { %v3185_v19 = vadd.f32 %v5581_v37, %v3184_v13  ;;  %v2825_v13 = vmax.f32 %v2816_v55, 0.0 }
 0x75d   : > { %v3256_v27 = vadd.f32 %v3255_v44, %v3254_v41  ;;  %v2840_v41 = vsel %vm788_vm0, %v2820_v18, 0.0  ;;  %v2847_v44 = vsel %vm788_vm0, %v2821_v28, 0.0 }
 0x75e   : > { %v3214_v26 = vmax.f32 %v3185_v19, 0.0  ;;  %v2841_v50 = vrot.slane %v2840_v41, 4 }
 0x75f   : > { %v5602_v20 = vsel %vm3313_vm15, %v3256_v27, %v3312_v52  ;;  %v2833_v52 = vsel %vm788_vm0, %v2819_v33, 0.0  ;;  %v2824_v27 = vmax.f32 %v2813_v8, 0.0  ;;  %v2856_v33 = vadd.f32 %v2855_v49, %v2854_v24 }
 0x760   : > { %v3258_v53 = vsel %vm788_vm0, %v3214_v26, 0.0  ;;  %v2834_v3 = vrot.slane %v2833_v52, 4  ;;  %v2875_v26 = vsel %vm788_vm0, %v2825_v13, 0.0 }
 0x761   : > { %v3259_v14 = vadd.f32 %v3258_v53, %v3257_v30  ;;  %v2868_v51 = vsel %vm788_vm0, %v2824_v27, 0.0  ;;  %v2857_v7 = vrot.slane %v2856_v33, 2 }
 0x762   : > { %v2835_v19 = vadd.f32 %v2834_v3, %v2833_v52  ;;  %v2869_v53 = vrot.slane %v2868_v51, 4 }
 0x763   : > { %v3260_v29 = vrot.slane %v3259_v14, 4  ;;  %v2858_v58 = vadd.f32 %v2857_v7, %v2856_v33  ;;  %v3391_v33 = vld [vmem:[#allocation15 + $0x18] sm:$0xff] }
 0x764   : > { %v2836_v16 = vrot.slane %v2835_v19, 2  ;;  %v2870_v42 = vadd.f32 %v2869_v53, %v2868_v51 }
 0x765   : > { %v3261_v43 = vadd.f32 %v3260_v29, %v3259_v14 }
 0x766   : > { %v2837_v34 = vadd.f32 %v2836_v16, %v2835_v19  ;;  %v2871_v52 = vrot.slane %v2870_v42, 2 }
 0x768   : > { %v3187_v22 = vpop.f32.mrf.mxu1  ;;  %v2872_v24 = vadd.f32 %v2871_v52, %v2870_v42 }
 0x769   : > { %v3188_v38 = vadd.f32 %v5581_v37, %v3187_v22 }
 0x76a   : > { %v2873_v51 = vrot.slane %v2872_v24, 1 }
 0x76b   : > { %v3215_v62 = vmax.f32 %v3188_v38, 0.0 }
 0x76d   : > { %v3266_v47 = vsel %vm788_vm0, %v3215_v62, 0.0 }
 0x770   : > { %v3190_v31 = vpop.f32.mrf.mxu1 }
 0x771   : > { %v3191_v4 = vadd.f32 %v5581_v37, %v3190_v31 }
 0x773   : > { %v3216_v48 = vmax.f32 %v3191_v4, 0.0  ;;  %v2848_v4 = vrot.slane %v2847_v44, 4 }
 0x775   : > { %v3267_v11 = vsel %vm788_vm0, %v3216_v48, 0.0 }
 0x776   : > { %v3268_v63 = vadd.f32 %v3267_v11, %v3266_v47  ;;  %v2849_v11 = vadd.f32 %v2848_v4, %v2847_v44 }
 0x778   : > { %v3193_v12 = vpop.f32.mrf.mxu1  ;;  %v3269_v61 = vrot.slane %v3268_v63, 4  ;;  %v2850_v9 = vrot.slane %v2849_v11, 2 }
 0x779   : > { %v3194_v17 = vadd.f32 %v5581_v37, %v3193_v12 }
 0x77a   : > { %v3270_v31 = vadd.f32 %v3269_v61, %v3268_v63  ;;  %v2851_v55 = vadd.f32 %v2850_v9, %v2849_v11  ;;  %v2838_v61 = vrot.slane %v2837_v34, 1  ;;  %v3422_v9 = vld [vmem:[%s5707_s16 + $0x10] sm:$0xff] }
 0x77b   : > { %v3217_v40 = vmax.f32 %v3194_v17, 0.0  ;;  %v3262_v17 = vrot.slane %v3261_v43, 2 }
 0x77c   : > { %v3271_v62 = vrot.slane %v3270_v31, 2 }
 0x77d   : > { %v3275_v23 = vsel %vm788_vm0, %v3217_v40, 0.0  ;;  %v3263_v36 = vadd.f32 %v3262_v17, %v3261_v43  ;;  %v2852_v43 = vrot.slane %v2851_v55, 1 }
 0x77e   : > { %v3272_v14 = vadd.f32 %v3271_v62, %v3270_v31  ;;  %v2839_v31 = vadd.f32 %v2838_v61, %v2837_v34  ;;  %v3970_v34 = vld [vmem:[%s5756_s30] ss:$0 sm:$0xff] }
 0x77f   : > { %v2853_v17 = vadd.f32 %v2852_v43, %v2851_v55 }
 0x780   : > { %v3196_v46 = vpop.f32.mrf.mxu1  ;;  %v3273_v18 = vrot.slane %v3272_v14, 1 }
 0x781   : > { %v3197_v6 = vadd.f32 %v5581_v37, %v3196_v46  ;;  %v2862_v46 = vrot.slane %v2861_v45, 4 }
 0x782   : > { %v3274_v3 = vadd.f32 %v3273_v18, %v3272_v14  ;;  %v3971_v18 = vld [vmem:[%s5757_s15] ss:$0 sm:$0xff] }
 0x783   : > { %v3218_v25 = vmax.f32 %v3197_v6, 0.0  ;;  %v2842_v6 = vadd.f32 %v2841_v50, %v2840_v41  ;;  %v2863_v59 = vadd.f32 %v2862_v46, %v2861_v45  ;;  %v2859_v50 = vrot.slane %v2858_v58, 1 }
 0x785   : > { %v3276_v1 = vsel %vm788_vm0, %v3218_v25, 0.0  ;;  %v2876_v25 = vrot.slane %v2875_v26, 4  ;;  %v2864_v32 = vrot.slane %v2863_v59, 2 }
 0x786   : > { %v3277_v56 = vadd.f32 %v3276_v1, %v3275_v23  ;;  %v2843_v1 = vrot.slane %v2842_v6, 2 }
 0x787   : > { %v2877_v63 = vadd.f32 %v2876_v25, %v2875_v26 }
 0x788   : > { %v3199_v35 = vpop.f32.mrf.mxu1  ;;  %v3278_v5 = vrot.slane %v3277_v56, 4 }
 0x789   : > { %v3200_v22 = vadd.f32 %v5581_v37, %v3199_v35  ;;  %v2844_v35 = vadd.f32 %v2843_v1, %v2842_v6  ;;  %v2878_v29 = vrot.slane %v2877_v63, 2  ;;  %v2874_v6 = vadd.f32 %v2873_v51, %v2872_v24 }
 0x78a   : > { %v3279_v12 = vadd.f32 %v3278_v5, %v3277_v56  ;;  %v3264_v56 = vrot.slane %v3263_v36, 1  ;;  %v2865_v5 = vadd.f32 %v2864_v32, %v2863_v59  ;;  %v3423_v59 = vld [vmem:[%s5707_s16 + $0x18] sm:$0xff] }
 0x78b   : > { %v3219_v48 = vmax.f32 %v3200_v22, 0.0  ;;  %v2845_v27 = vrot.slane %v2844_v35, 1  ;;  %v2879_v22 = vadd.f32 %v2878_v29, %v2877_v63  ;;  %v3421_v63 = vld [vmem:[%s5707_s16 + $0x8] sm:$0xff] }
 0x78c   : > { %v3280_v40 = vrot.slane %v3279_v12, 2  ;;  %v3265_v10 = vadd.f32 %v3264_v56, %v3263_v36  ;;  %v3390_v36 = vld [vmem:[#allocation15 + $0x10] sm:$0xff] }
 0x78d   : > { %v3284_v2 = vsel %vm788_vm0, %v3219_v48, 0.0  ;;  %v2846_v49 = vadd.f32 %v2845_v27, %v2844_v35  ;;  %v2880_v48 = vrot.slane %v2879_v22, 1 }
 0x78e   : > { %v3281_v21 = vadd.f32 %v3280_v40, %v3279_v12  ;;  %v3316_v45 = vsel %vm3315_vm2, %v3265_v10, %v5602_v20  ;;  %v2866_v12 = vrot.slane %v2865_v5, 1 }
 0x78f   : > { %v3318_v4 = vsel %vm3317_vm3, %v3274_v3, %v3316_v45  ;;  %v2881_v40 = vadd.f32 %v2880_v48, %v2879_v22 }
 0x790   : > { %v3202_v38 = vpop.f32.mrf.mxu1  ;;  %v3282_v0 = vrot.slane %v3281_v21, 1  ;;  %v2867_v46 = vadd.f32 %v2866_v12, %v2865_v5 }
 0x791   : > { %v3203_v60 = vadd.f32 %v5581_v37, %v3202_v38  ;;  %v2829_v37 = vrot.slane %v2828_v54, 2 }
 0x792   : > { %v3283_v13 = vadd.f32 %v3282_v0, %v3281_v21 }
 0x793   : > { %v3220_v15 = vmax.f32 %v3203_v60, 0.0  ;;  %v2830_v8 = vadd.f32 %v2829_v37, %v2828_v54  ;;  %v2860_v54 = vadd.f32 %v2859_v50, %v2858_v58 }
 0x794   : > { %v3320_v38 = vsel %vm3319_vm4, %v3283_v13, %v3318_v4 }
 0x795   : > { %v3285_v30 = vsel %vm788_vm0, %v3220_v15, 0.0  ;;  %v2831_v44 = vrot.slane %v2830_v8, 1 }
 0x796   : > { %v3286_v47 = vadd.f32 %v3285_v30, %v3284_v2  ;;  %v3389_v2 = vld [vmem:[#allocation15 + $0x8] sm:$0xff]  ;;  %v3388_v30 = vld [vmem:[#allocation15] sm:$0xff] }
 0x797   : > { %v2832_v26 = vadd.f32 %v2831_v44, %v2830_v8 }
 0x798   : > { %v3287_v23 = vrot.slane %v3286_v47, 4 }
 0x799   : > { %v3353_v20 = vsel %vm3309_vm1, %v2839_v31, %v2832_v26 }
 0x79a   : > { %v3288_v28 = vadd.f32 %v3287_v23, %v3286_v47  ;;  %v3354_v62 = vsel %vm3311_vm14, %v2846_v49, %v3353_v20  ;;  %v3969_v47 = vld [vmem:[%s5704_s13] ss:$0 sm:$0xff] }
 0x79b   : > { %v3355_v53 = vsel %vm3313_vm15, %v2853_v17, %v3354_v62  ;;  %v3420_v23 = vld [vmem:[%s5707_s16] sm:$0xff] }
 0x79c   : > { %v3289_v57 = vrot.slane %v3288_v28, 2  ;;  %v3356_v15 = vsel %vm3315_vm2, %v2860_v54, %v3355_v53 }
 0x79d   : > { %v3357_v16 = vsel %vm3317_vm3, %v2867_v46, %v3356_v15 }
 0x79e   : > { %v3290_v41 = vadd.f32 %v3289_v57, %v3288_v28  ;;  %v3358_v11 = vsel %vm3319_vm4, %v2874_v6, %v3357_v16 }
 0x79f   : > { %v3359_v25 = vsel %vm3321_vm5, %v2881_v40, %v3358_v11 }
 0x7a0   : > { %v3291_v39 = vrot.slane %v3290_v41, 1 }
 0x7a2   : > { %v3292_v19 = vadd.f32 %v3291_v39, %v3290_v41 }
 0x7a4   : > { %v3322_v60 = vsel %vm3321_vm5, %v3292_v19, %v3320_v38 }
 0x7a5   : > { %3827 = vmatmul.msk.f32.vlgmr.msrb.gmra.mxu2 %vm788_vm0, %v3322_v60 }
 0x7a6   : > { %3411 = vmatpush.msrb.mxu2 %v3391_v33 }
 0x7a8   : > { %3412 = vmatpush.msrb.mxu2 %v3390_v36 }
 0x7aa   : > { %3413 = vmatpush.msrb.mxu2 %v3389_v2 }
 0x7ac   : > { %3414 = vmatpush.msrb.mxu2 %v3388_v30 }
 0x7ad   : > { %3828 = vmatmul.msk.f32.vlgmr.msra.gmra.mxu2 %vm788_vm0, %v3359_v25 }
 0x7ae   : > { %3443 = vmatpush.msra.mxu2 %v3423_v59 }
 0x7b0   : > { %3444 = vmatpush.msra.mxu2 %v3422_v9 }
 0x7b2   : > { %3445 = vmatpush.msra.mxu2 %v3421_v63 }
 0x7b4   : > { %3446 = vmatpush.msra.mxu2 %v3420_v23 }
 0x828   : > { %v3342_v14 = vpop.f32.mrf.mxu2 }
 0x830   : > { %v3379_v37 = vpop.f32.mrf.mxu2 }
 0x831   : > { %v3380_v1 = vadd.f32 %v3379_v37, %v3342_v14 }
 0x833   : > { %v3386_v42 = vadd.f32 %v3969_v47, %v3380_v1 }
 0x835   : > { %v3387_v21 = vmax.f32 %v3386_v42, 0.0 }
 0x837   : > { %3829 = vmatmul.msk.f32.vlgmr.msrb.gmra.mxu2 %vm788_vm0, %v3387_v21 }
 0x8ba   : > { %v3416_v7 = vpop.f32.mrf.mxu2 }
 0x8bb   : > { %v3417_v56 = vadd.f32 %v3970_v34, %v3416_v7 }
 0x8bd   : > { %v3419_v32 = vmax.f32 %v3417_v56, 0.0 }
 0x8bf   : > { %3830 = vmatmul.msk.f32.vlgmr.msra.gmra.mxu2 %vm788_vm0, %v3419_v32 }
 0x942   : > { %v3448_v28 = vpop.f32.mrf.mxu2 }
 0x943   : > { %v3449_v8 = vadd.f32 %v3971_v18, %v3448_v28 }
 0x945   : > { %3452 = vst.msk [vmem:[%s755_s23] sm:$0xff] %vm3451_vm6, %v3449_v8 }
 0x946 PF: > { %s5759_s30 = sld [smem:[#allocation23_spill]]  ;;  %s5762_s27 = smov %s4408_s28 }
 0x947   : > { %s5760_s22 = sld [smem:[#allocation22_spill]] }
 0x948   : > { %s5761_s29 = sld [smem:[#allocation24_spill]] }
 0x94c   : > { %p34_p3 = scmp.ge.s32.totalorder %s5759_s30, 4  }
 0x94d   : > { %s5763_s28 = smov %s5760_s22 }
 0x94e   :  { %36 = sbr.rel (!%p34_p3) target bundleno = 22 (0x16), region = 173 }
 0x953   :  { %3472 = vsyncpa [#allocation3], 1 }
 0x954   :  { %3474 = vsyncpa [#allocation3 + $0x1], 1 }
 0x955   :  { %3475 = vsyncpa [#allocation5], 1 }
 0x956   :  { %3477 = vsyncpa [#allocation5 + $0x1], 1 }
 0x957   :  { %3478 = vsyncpa [#allocation8], 1 }
 0x958   :  { %3479 = vsyncpa [#allocation11], 1 }
 0x959   :  { %3480 = vsyncpa [#allocation14], 1 }

</bundles_post_ra>
